<compile_context>
chip_gen: v7x
topology: tpu7x:2x2x1
jax: 0.10.0
libtpu: 0.0.40
codegen_flags: <defaults>
</compile_context>

<pallas_src>
import math
import functools

import jax
import jax.numpy as jnp
from jax.experimental import pallas as pl
from jax.experimental.pallas import tpu as pltpu


def _round_up(x, m):
    return ((x + m - 1) // m) * m


# ----------------------------------------------------------------------------
# Pallas kernel: (tm, K) x (K, tn) matmul + bias + optional Mish.
# Full-K block (no reduction grid axis), bf16 inputs, f32 MXU accumulation,
# f32 epilogue, lane-dense (tn = 128) output stores.
# ----------------------------------------------------------------------------
def _mm_bias_act_kernel(a_ref, w_ref, b_ref, o_ref, *, apply_mish):
    r = jnp.dot(a_ref[...], w_ref[...], preferred_element_type=jnp.float32)
    r = r + b_ref[...]                                   # (tm, tn) + (1, tn)
    if apply_mish:
        # numerically stable softplus, then Mish = x * tanh(softplus(x))
        sp = jnp.maximum(r, 0.0) + jnp.log1p(jnp.exp(-jnp.abs(r)))
        r = r * jnp.tanh(sp)
    o_ref[...] = r


def matmul_bias(a, w_p, b_p, n_out, *, mish, tm_max=512, tn=128):
    """out = a @ w + b (optionally Mish), returned as (M, n_out) f32.

    a:   (M, K)  any float dtype (cast to bf16 here).
    w_p: (Kp, Np) bf16, pre-padded at init (K -> Kp, N -> Np multiples of 128).
    b_p: (1, Np)  f32, pre-padded at init.
    """
    M, K = a.shape
    Kp, Np = w_p.shape

    tm = tm_max if M >= tm_max else max(8, _round_up(M, 8))
    Mp = _round_up(M, tm)

    a = a.astype(jnp.bfloat16)
    if (Mp, Kp) != (M, K):
        a = jnp.pad(a, ((0, Mp - M), (0, Kp - K)))       # zero K-pad is benign

    out = pl.pallas_call(
        functools.partial(_mm_bias_act_kernel, apply_mish=mish),
        out_shape=jax.ShapeDtypeStruct((Mp, Np), jnp.float32),
        grid_spec=pltpu.PrefetchScalarGridSpec(
            num_scalar_prefetch=0,
            grid=(Mp // tm, Np // tn),
            in_specs=[
                pl.BlockSpec((tm, Kp), lambda i, j: (i, 0)),
                pl.BlockSpec((Kp, tn), lambda i, j: (0, j)),
                pl.BlockSpec((1, tn), lambda i, j: (0, j)),
            ],
            out_specs=pl.BlockSpec((tm, tn), lambda i, j: (i, j)),
        ),
        compiler_params=pltpu.CompilerParams(
            dimension_semantics=("parallel", "parallel"),
            vmem_limit_bytes=32 * 1024 * 1024),
    )(a, w_p, b_p)
    return out[:M, :n_out]


# ----------------------------------------------------------------------------
# Layer helpers (NHWC glue around the Pallas matmul)
# ----------------------------------------------------------------------------
def conv2d_nhwc(x, w_p, b_p, *, oc, k, pad, mish):
    """Conv2d(kernel=k, stride=1, padding=pad).  x: (B, H, W, C) -> (B, Ho, Wo, oc)."""
    B, H, W, C = x.shape
    if pad:
        x = jnp.pad(x, ((0, 0), (pad, pad), (pad, pad), (0, 0)))
        H += 2 * pad
        W += 2 * pad
    Ho, Wo = H - k + 1, W - k + 1
    # im2col in NHWC; column order (di, dj, c) matches the pre-transposed weight.
    # TODO(synk): fuse patch extraction into the kernel (k shifted dots) to drop
    #             the k*k-inflated im2col HBM traffic for larger problem sizes.
    patches = [x[:, di:di + Ho, dj:dj + Wo, :] for di in range(k) for dj in range(k)]
    pm = jnp.concatenate(patches, axis=-1).reshape(B * Ho * Wo, k * k * C)
    out = matmul_bias(pm, w_p, b_p, oc, mish=mish)
    return out.reshape(B, Ho, Wo, oc)


def conv_transpose2x2_nhwc(x, w_p, b_p, *, oc, crop, mish):
    """ConvTranspose2d(kernel=2, stride=2, padding=crop).  x: (B, H, W, C)."""
    B, H, W, C = x.shape
    out = matmul_bias(x.reshape(B * H * W, C), w_p, b_p, oc * 4, mish=mish)
    out = out.reshape(B, H, W, oc, 2, 2)                 # columns = (oc, di, dj)
    out = out.transpose(0, 1, 4, 2, 5, 3).reshape(B, 2 * H, 2 * W, oc)
    if crop:                                             # ConvTranspose "padding"
        out = out[:, crop:-crop, crop:-crop, :]
    return out


def batchnorm_nhwc(x, g, b, eps=1e-5):
    # training-mode BatchNorm2d forward (batch statistics, biased variance)
    mean = jnp.mean(x, axis=(0, 1, 2), keepdims=True)
    var = jnp.mean(jnp.square(x - mean), axis=(0, 1, 2), keepdims=True)
    return (x - mean) * jax.lax.rsqrt(var + eps) * g + b


# ----------------------------------------------------------------------------
# Parameter initialization: PyTorch-style uniform fan-in bounds, then weights
# are pre-transposed / pre-padded ONCE into the matmul layout (bf16) and the
# biases into (1, Np) f32 rows.
# ----------------------------------------------------------------------------
def _uniform(key, shape, bound):
    return jax.random.uniform(key, shape, jnp.float32, -bound, bound)


def conv_params(key, ic, oc, k, *, align=128):
    k1, k2 = jax.random.split(key)
    bound = 1.0 / math.sqrt(ic * k * k)
    w = _uniform(k1, (oc, ic, k, k), bound)              # PyTorch layout
    b = _uniform(k2, (oc,), bound)
    wm = w.transpose(2, 3, 1, 0).reshape(k * k * ic, oc)  # rows = (di, dj, c)
    K, N = wm.shape
    Kp, Np = _round_up(K, align), _round_up(N, align)
    wm = jnp.pad(wm, ((0, Kp - K), (0, Np - N))).astype(jnp.bfloat16)
    bm = jnp.pad(b.reshape(1, N), ((0, 0), (0, Np - N)))
    return {"w": wm, "b": bm}


def convT_params(key, ic, oc, *, align=128):
    k1, k2 = jax.random.split(key)
    bound = 1.0 / math.sqrt(oc * 2 * 2)
    w = _uniform(k1, (ic, oc, 2, 2), bound)              # PyTorch layout
    b = _uniform(k2, (oc,), bound)
    wm = w.reshape(ic, oc * 4)                           # cols = (oc, di, dj)
    bm = jnp.repeat(b, 4)
    K, N = wm.shape
    Kp, Np = _round_up(K, align), _round_up(N, align)
    wm = jnp.pad(wm, ((0, Kp - K), (0, Np - N))).astype(jnp.bfloat16)
    bm = jnp.pad(bm.reshape(1, N), ((0, 0), (0, Np - N)))
    return {"w": wm, "b": bm}


def bn_params(c):
    return {"g": jnp.ones((c,), jnp.float32), "b": jnp.zeros((c,), jnp.float32)}


def init_decoder_params(key, CH=1, latent=128):
    c2, c3, c4 = int(latent / 2), int(latent / 3), int(latent / 4)
    ks = iter(jax.random.split(key, 8))
    return {
        "l1_conv": conv_params(next(ks), latent, latent, 2),
        "l1_bn1": bn_params(latent),
        "l1_convT": convT_params(next(ks), latent, c2),
        "l1_bn2": bn_params(c2),
        "l2_conv": conv_params(next(ks), c2, c2, 2),
        "l2_bn1": bn_params(c2),
        "l2_convT": convT_params(next(ks), c2, c3),
        "l2_bn2": bn_params(c3),
        "l3_conv": conv_params(next(ks), c3, c3, 2),
        "l3_bn1": bn_params(c3),
        "l3_convT": convT_params(next(ks), c3, c4),
        "l3_bn2": bn_params(c4),
        "l3_out": conv_params(next(ks), c4, CH, 3),
    }


# ----------------------------------------------------------------------------
# Forward pass (channel widths are baked in statically via closure so the
# params pytree contains only arrays under jit).
# ----------------------------------------------------------------------------
def make_decoder_forward(CH=1, latent=128):
    c2, c3, c4 = int(latent / 2), int(latent / 3), int(latent / 4)

    def forward(P, x):
        y = x.transpose(0, 2, 3, 1)                      # NCHW -> NHWC once

        # layer1: Conv(k2,p2) -> Mish -> BN -> ConvT(k2,s2,p1) -> Mish -> BN
        y = conv2d_nhwc(y, P["l1_conv"]["w"], P["l1_conv"]["b"],
                        oc=latent, k=2, pad=2, mish=True)
        y = batchnorm_nhwc(y, P["l1_bn1"]["g"], P["l1_bn1"]["b"])
        y = conv_transpose2x2_nhwc(y, P["l1_convT"]["w"], P["l1_convT"]["b"],
                                   oc=c2, crop=1, mish=True)
        y = batchnorm_nhwc(y, P["l1_bn2"]["g"], P["l1_bn2"]["b"])

        # layer2: Conv(k2) -> Mish -> BN -> ConvT(k2,s2) -> Mish -> BN
        y = conv2d_nhwc(y, P["l2_conv"]["w"], P["l2_conv"]["b"],
                        oc=c2, k=2, pad=0, mish=True)
        y = batchnorm_nhwc(y, P["l2_bn1"]["g"], P["l2_bn1"]["b"])
        y = conv_transpose2x2_nhwc(y, P["l2_convT"]["w"], P["l2_convT"]["b"],
                                   oc=c3, crop=0, mish=True)
        y = batchnorm_nhwc(y, P["l2_bn2"]["g"], P["l2_bn2"]["b"])

        # layer3: Conv(k2) -> Mish -> BN -> ConvT(k2,s2) -> Mish -> BN -> Conv(k3)
        y = conv2d_nhwc(y, P["l3_conv"]["w"], P["l3_conv"]["b"],
                        oc=c3, k=2, pad=0, mish=True)
        y = batchnorm_nhwc(y, P["l3_bn1"]["g"], P["l3_bn1"]["b"])
        y = conv_transpose2x2_nhwc(y, P["l3_convT"]["w"], P["l3_convT"]["b"],
                                   oc=c4, crop=0, mish=True)
        y = batchnorm_nhwc(y, P["l3_bn2"]["g"], P["l3_bn2"]["b"])
        y = conv2d_nhwc(y, P["l3_out"]["w"], P["l3_out"]["b"],
                        oc=CH, k=3, pad=0, mish=False)    # final conv, no act

        return y.transpose(0, 3, 1, 2)                   # NHWC -> NCHW once

    return forward


# ----------------------------------------------------------------------------
if __name__ == "__main__":
    key = jax.random.PRNGKey(0)
    k_p, k_x = jax.random.split(key)

    CH, latent = 1, 128
    B, H, W = 2, 4, 4
    x = jax.random.normal(k_x, (B, latent, H, W), dtype=jnp.float32)

    params = init_decoder_params(k_p, CH=CH, latent=latent)
    fwd = jax.jit(make_decoder_forward(CH=CH, latent=latent))

    out = jax.block_until_ready(fwd(params, x))

    # spatial trace: H -> H+3 -> 2H+4 -> 2H+3 -> 4H+6 -> 4H+5 -> 8H+10 -> 8H+8
    assert out.shape == (B, CH, 8 * H + 8, 8 * W + 8), out.shape
    assert out.dtype == jnp.float32
    assert bool(jnp.all(jnp.isfinite(out)))
    print("KERNEL_OK")
</pallas_src>

<mosaic_0001>
module attributes {stable_mosaic.version = 11 : i64} {
  func.func @_mm_bias_act_kernel(%arg0: i32, %arg1: i32, %arg2: memref<104x512xbf16, #tpu.memory_space<vmem>>, %arg3: memref<512x128xbf16, #tpu.memory_space<vmem>>, %arg4: memref<1x128xf32, #tpu.memory_space<vmem>>, %arg5: memref<104x128xf32, #tpu.memory_space<vmem>>) attributes {dimension_semantics = [#tpu.dimension_semantics<parallel>, #tpu.dimension_semantics<parallel>], iteration_bounds = array<i64: 1, 1>, scalar_prefetch = 0 : i64, scratch_operands = 0 : i64, tpu.core_type = #tpu.core_type<tc>, window_params = [{transform_indices = @transform_0, window_bounds = array<i64: 104, 512>}, {transform_indices = @transform_1, window_bounds = array<i64: 512, 128>}, {transform_indices = @transform_2, window_bounds = array<i64: 1, 128>}, {transform_indices = @transform_3, window_bounds = array<i64: 104, 128>}]} {
    %c0 = arith.constant 0 : index
    %c0_0 = arith.constant 0 : index
    %0 = vector.load %arg2[%c0, %c0_0] : memref<104x512xbf16, #tpu.memory_space<vmem>>, vector<104x512xbf16>
    %c0_1 = arith.constant 0 : index
    %c0_2 = arith.constant 0 : index
    %1 = vector.load %arg3[%c0_1, %c0_2] : memref<512x128xbf16, #tpu.memory_space<vmem>>, vector<512x128xbf16>
    %cst = arith.constant dense<0.000000e+00> : vector<104x128xf32>
    %2 = tpu.matmul %0, %1, %cst {dimension_numbers = #tpu.dot_dimension_numbers<[1], [0], [0], [1], [0, 0, 1, 1], [], []>} : vector<104x512xbf16>, vector<512x128xbf16>, vector<104x128xf32> -> vector<104x128xf32>
    %c0_3 = arith.constant 0 : index
    %c0_4 = arith.constant 0 : index
    %3 = vector.load %arg4[%c0_3, %c0_4] : memref<1x128xf32, #tpu.memory_space<vmem>>, vector<1x128xf32>
    %4 = vector.broadcast %3 : vector<1x128xf32> to vector<104x128xf32>
    %5 = arith.addf %2, %4 : vector<104x128xf32>
    %cst_5 = arith.constant 0.000000e+00 : f32
    %6 = vector.broadcast %cst_5 : f32 to vector<104x128xf32>
    %7 = arith.maximumf %5, %6 : vector<104x128xf32>
    %8 = math.absf %5 : vector<104x128xf32>
    %cst_6 = arith.constant 0.000000e+00 : f32
    %9 = vector.broadcast %cst_6 : f32 to vector<104x128xf32>
    %10 = arith.subf %9, %8 : vector<104x128xf32>
    %11 = math.exp %10 : vector<104x128xf32>
    %12 = math.log1p %11 : vector<104x128xf32>
    %13 = arith.addf %7, %12 : vector<104x128xf32>
    %14 = math.tanh %13 : vector<104x128xf32>
    %15 = arith.mulf %5, %14 : vector<104x128xf32>
    %c0_7 = arith.constant 0 : index
    %c0_8 = arith.constant 0 : index
    %16 = vector.load %arg5[%c0_7, %c0_8] : memref<104x128xf32, #tpu.memory_space<vmem>>, vector<104x128xf32>
    tpu.vector_store %arg5[%c0_7, %c0_8], %15 {strides = array<i32>} : memref<104x128xf32, #tpu.memory_space<vmem>>, vector<104x128xf32>,
    return
  }
  func.func @transform_0(%arg0: i32, %arg1: i32) -> (i32, i32) {
    %c0_i32 = arith.constant 0 : i32
    %c0_i32_0 = arith.constant 0 : i32
    return %arg0, %c0_i32 : i32, i32
  }
  func.func @transform_1(%arg0: i32, %arg1: i32) -> (i32, i32) {
    %c0_i32 = arith.constant 0 : i32
    %c0_i32_0 = arith.constant 0 : i32
    return %c0_i32, %arg1 : i32, i32
  }
  func.func @transform_2(%arg0: i32, %arg1: i32) -> (i32, i32) {
    %c0_i32 = arith.constant 0 : i32
    %c0_i32_0 = arith.constant 0 : i32
    return %c0_i32, %arg1 : i32, i32
  }
  func.func @transform_3(%arg0: i32, %arg1: i32) -> (i32, i32) {
    %c0_i32 = arith.constant 0 : i32
    return %arg0, %arg1 : i32, i32
  }
}

module attributes {stable_mosaic.version = 11 : i64} {
  func.func @_mm_bias_act_kernel(%arg0: i32, %arg1: i32, %arg2: memref<104x128xbf16, #tpu.memory_space<vmem>>, %arg3: memref<128x128xbf16, #tpu.memory_space<vmem>>, %arg4: memref<1x128xf32, #tpu.memory_space<vmem>>, %arg5: memref<104x128xf32, #tpu.memory_space<vmem>>) attributes {dimension_semantics = [#tpu.dimension_semantics<parallel>, #tpu.dimension_semantics<parallel>], iteration_bounds = array<i64: 1, 2>, scalar_prefetch = 0 : i64, scratch_operands = 0 : i64, tpu.core_type = #tpu.core_type<tc>, window_params = [{transform_indices = @transform_0, window_bounds = array<i64: 104, 128>}, {transform_indices = @transform_1, window_bounds = array<i64: 128, 128>}, {transform_indices = @transform_2, window_bounds = array<i64: 1, 128>}, {transform_indices = @transform_3, window_bounds = array<i64: 104, 128>}]} {
    %c0 = arith.constant 0 : index
    %c0_0 = arith.constant 0 : index
    %0 = vector.load %arg2[%c0, %c0_0] : memref<104x128xbf16, #tpu.memory_space<vmem>>, vector<104x128xbf16>
    %c0_1 = arith.constant 0 : index
    %c0_2 = arith.constant 0 : index
    %1 = vector.load %arg3[%c0_1, %c0_2] : memref<128x128xbf16, #tpu.memory_space<vmem>>, vector<128x128xbf16>
    %cst = arith.constant dense<0.000000e+00> : vector<104x128xf32>
    %2 = tpu.matmul %0, %1, %cst {dimension_numbers = #tpu.dot_dimension_numbers<[1], [0], [0], [1], [0, 0, 1, 1], [], []>} : vector<104x128xbf16>, vector<128x128xbf16>, vector<104x128xf32> -> vector<104x128xf32>
    %c0_3 = arith.constant 0 : index
    %c0_4 = arith.constant 0 : index
    %3 = vector.load %arg4[%c0_3, %c0_4] : memref<1x128xf32, #tpu.memory_space<vmem>>, vector<1x128xf32>
    %4 = vector.broadcast %3 : vector<1x128xf32> to vector<104x128xf32>
    %5 = arith.addf %2, %4 : vector<104x128xf32>
    %cst_5 = arith.constant 0.000000e+00 : f32
    %6 = vector.broadcast %cst_5 : f32 to vector<104x128xf32>
    %7 = arith.maximumf %5, %6 : vector<104x128xf32>
    %8 = math.absf %5 : vector<104x128xf32>
    %cst_6 = arith.constant 0.000000e+00 : f32
    %9 = vector.broadcast %cst_6 : f32 to vector<104x128xf32>
    %10 = arith.subf %9, %8 : vector<104x128xf32>
    %11 = math.exp %10 : vector<104x128xf32>
    %12 = math.log1p %11 : vector<104x128xf32>
    %13 = arith.addf %7, %12 : vector<104x128xf32>
    %14 = math.tanh %13 : vector<104x128xf32>
    %15 = arith.mulf %5, %14 : vector<104x128xf32>
    %c0_7 = arith.constant 0 : index
    %c0_8 = arith.constant 0 : index
    %16 = vector.load %arg5[%c0_7, %c0_8] : memref<104x128xf32, #tpu.memory_space<vmem>>, vector<104x128xf32>
    tpu.vector_store %arg5[%c0_7, %c0_8], %15 {strides = array<i32>} : memref<104x128xf32, #tpu.memory_space<vmem>>, vector<104x128xf32>,
    return
  }
  func.func @transform_0(%arg0: i32, %arg1: i32) -> (i32, i32) {
    %c0_i32 = arith.constant 0 : i32
    %c0_i32_0 = arith.constant 0 : i32
    return %arg0, %c0_i32 : i32, i32
  }
  func.func @transform_1(%arg0: i32, %arg1: i32) -> (i32, i32) {
    %c0_i32 = arith.constant 0 : i32
    %c0_i32_0 = arith.constant 0 : i32
    return %c0_i32, %arg1 : i32, i32
  }
  func.func @transform_2(%arg0: i32, %arg1: i32) -> (i32, i32) {
    %c0_i32 = arith.constant 0 : i32
    %c0_i32_0 = arith.constant 0 : i32
    return %c0_i32, %arg1 : i32, i32
  }
  func.func @transform_3(%arg0: i32, %arg1: i32) -> (i32, i32) {
    %c0_i32 = arith.constant 0 : i32
    return %arg0, %arg1 : i32, i32
  }
}

module attributes {stable_mosaic.version = 11 : i64} {
  func.func @_mm_bias_act_kernel(%arg0: i32, %arg1: i32, %arg2: memref<248x256xbf16, #tpu.memory_space<vmem>>, %arg3: memref<256x128xbf16, #tpu.memory_space<vmem>>, %arg4: memref<1x128xf32, #tpu.memory_space<vmem>>, %arg5: memref<248x128xf32, #tpu.memory_space<vmem>>) attributes {dimension_semantics = [#tpu.dimension_semantics<parallel>, #tpu.dimension_semantics<parallel>], iteration_bounds = array<i64: 1, 1>, scalar_prefetch = 0 : i64, scratch_operands = 0 : i64, tpu.core_type = #tpu.core_type<tc>, window_params = [{transform_indices = @transform_0, window_bounds = array<i64: 248, 256>}, {transform_indices = @transform_1, window_bounds = array<i64: 256, 128>}, {transform_indices = @transform_2, window_bounds = array<i64: 1, 128>}, {transform_indices = @transform_3, window_bounds = array<i64: 248, 128>}]} {
    %c0 = arith.constant 0 : index
    %c0_0 = arith.constant 0 : index
    %0 = vector.load %arg2[%c0, %c0_0] : memref<248x256xbf16, #tpu.memory_space<vmem>>, vector<248x256xbf16>
    %c0_1 = arith.constant 0 : index
    %c0_2 = arith.constant 0 : index
    %1 = vector.load %arg3[%c0_1, %c0_2] : memref<256x128xbf16, #tpu.memory_space<vmem>>, vector<256x128xbf16>
    %cst = arith.constant dense<0.000000e+00> : vector<248x128xf32>
    %2 = tpu.matmul %0, %1, %cst {dimension_numbers = #tpu.dot_dimension_numbers<[1], [0], [0], [1], [0, 0, 1, 1], [], []>} : vector<248x256xbf16>, vector<256x128xbf16>, vector<248x128xf32> -> vector<248x128xf32>
    %c0_3 = arith.constant 0 : index
    %c0_4 = arith.constant 0 : index
    %3 = vector.load %arg4[%c0_3, %c0_4] : memref<1x128xf32, #tpu.memory_space<vmem>>, vector<1x128xf32>
    %4 = vector.broadcast %3 : vector<1x128xf32> to vector<248x128xf32>
    %5 = arith.addf %2, %4 : vector<248x128xf32>
    %cst_5 = arith.constant 0.000000e+00 : f32
    %6 = vector.broadcast %cst_5 : f32 to vector<248x128xf32>
    %7 = arith.maximumf %5, %6 : vector<248x128xf32>
    %8 = math.absf %5 : vector<248x128xf32>
    %cst_6 = arith.constant 0.000000e+00 : f32
    %9 = vector.broadcast %cst_6 : f32 to vector<248x128xf32>
    %10 = arith.subf %9, %8 : vector<248x128xf32>
    %11 = math.exp %10 : vector<248x128xf32>
    %12 = math.log1p %11 : vector<248x128xf32>
    %13 = arith.addf %7, %12 : vector<248x128xf32>
    %14 = math.tanh %13 : vector<248x128xf32>
    %15 = arith.mulf %5, %14 : vector<248x128xf32>
    %c0_7 = arith.constant 0 : index
    %c0_8 = arith.constant 0 : index
    %16 = vector.load %arg5[%c0_7, %c0_8] : memref<248x128xf32, #tpu.memory_space<vmem>>, vector<248x128xf32>
    tpu.vector_store %arg5[%c0_7, %c0_8], %15 {strides = array<i32>} : memref<248x128xf32, #tpu.memory_space<vmem>>, vector<248x128xf32>,
    return
  }
  func.func @transform_0(%arg0: i32, %arg1: i32) -> (i32, i32) {
    %c0_i32 = arith.constant 0 : i32
    %c0_i32_0 = arith.constant 0 : i32
    return %arg0, %c0_i32 : i32, i32
  }
  func.func @transform_1(%arg0: i32, %arg1: i32) -> (i32, i32) {
    %c0_i32 = arith.constant 0 : i32
    %c0_i32_0 = arith.constant 0 : i32
    return %c0_i32, %arg1 : i32, i32
  }
  func.func @transform_2(%arg0: i32, %arg1: i32) -> (i32, i32) {
    %c0_i32 = arith.constant 0 : i32
    %c0_i32_0 = arith.constant 0 : i32
    return %c0_i32, %arg1 : i32, i32
  }
  func.func @transform_3(%arg0: i32, %arg1: i32) -> (i32, i32) {
    %c0_i32 = arith.constant 0 : i32
    return %arg0, %arg1 : i32, i32
  }
}

module attributes {stable_mosaic.version = 11 : i64} {
  func.func @_mm_bias_act_kernel(%arg0: i32, %arg1: i32, %arg2: memref<248x128xbf16, #tpu.memory_space<vmem>>, %arg3: memref<128x128xbf16, #tpu.memory_space<vmem>>, %arg4: memref<1x128xf32, #tpu.memory_space<vmem>>, %arg5: memref<248x128xf32, #tpu.memory_space<vmem>>) attributes {dimension_semantics = [#tpu.dimension_semantics<parallel>, #tpu.dimension_semantics<parallel>], iteration_bounds = array<i64: 1, 2>, scalar_prefetch = 0 : i64, scratch_operands = 0 : i64, tpu.core_type = #tpu.core_type<tc>, window_params = [{transform_indices = @transform_0, window_bounds = array<i64: 248, 128>}, {transform_indices = @transform_1, window_bounds = array<i64: 128, 128>}, {transform_indices = @transform_2, window_bounds = array<i64: 1, 128>}, {transform_indices = @transform_3, window_bounds = array<i64: 248, 128>}]} {
    %c0 = arith.constant 0 : index
    %c0_0 = arith.constant 0 : index
    %0 = vector.load %arg2[%c0, %c0_0] : memref<248x128xbf16, #tpu.memory_space<vmem>>, vector<248x128xbf16>
    %c0_1 = arith.constant 0 : index
    %c0_2 = arith.constant 0 : index
    %1 = vector.load %arg3[%c0_1, %c0_2] : memref<128x128xbf16, #tpu.memory_space<vmem>>, vector<128x128xbf16>
    %cst = arith.constant dense<0.000000e+00> : vector<248x128xf32>
    %2 = tpu.matmul %0, %1, %cst {dimension_numbers = #tpu.dot_dimension_numbers<[1], [0], [0], [1], [0, 0, 1, 1], [], []>} : vector<248x128xbf16>, vector<128x128xbf16>, vector<248x128xf32> -> vector<248x128xf32>
    %c0_3 = arith.constant 0 : index
    %c0_4 = arith.constant 0 : index
    %3 = vector.load %arg4[%c0_3, %c0_4] : memref<1x128xf32, #tpu.memory_space<vmem>>, vector<1x128xf32>
    %4 = vector.broadcast %3 : vector<1x128xf32> to vector<248x128xf32>
    %5 = arith.addf %2, %4 : vector<248x128xf32>
    %cst_5 = arith.constant 0.000000e+00 : f32
    %6 = vector.broadcast %cst_5 : f32 to vector<248x128xf32>
    %7 = arith.maximumf %5, %6 : vector<248x128xf32>
    %8 = math.absf %5 : vector<248x128xf32>
    %cst_6 = arith.constant 0.000000e+00 : f32
    %9 = vector.broadcast %cst_6 : f32 to vector<248x128xf32>
    %10 = arith.subf %9, %8 : vector<248x128xf32>
    %11 = math.exp %10 : vector<248x128xf32>
    %12 = math.log1p %11 : vector<248x128xf32>
    %13 = arith.addf %7, %12 : vector<248x128xf32>
    %14 = math.tanh %13 : vector<248x128xf32>
    %15 = arith.mulf %5, %14 : vector<248x128xf32>
    %c0_7 = arith.constant 0 : index
    %c0_8 = arith.constant 0 : index
    %16 = vector.load %arg5[%c0_7, %c0_8] : memref<248x128xf32, #tpu.memory_space<vmem>>, vector<248x128xf32>
    tpu.vector_store %arg5[%c0_7, %c0_8], %15 {strides = array<i32>} : memref<248x128xf32, #tpu.memory_space<vmem>>, vector<248x128xf32>,
    return
  }
  func.func @transform_0(%arg0: i32, %arg1: i32) -> (i32, i32) {
    %c0_i32 = arith.constant 0 : i32
    %c0_i32_0 = arith.constant 0 : i32
    return %arg0, %c0_i32 : i32, i32
  }
  func.func @transform_1(%arg0: i32, %arg1: i32) -> (i32, i32) {
    %c0_i32 = arith.constant 0 : i32
    %c0_i32_0 = arith.constant 0 : i32
    return %c0_i32, %arg1 : i32, i32
  }
  func.func @transform_2(%arg0: i32, %arg1: i32) -> (i32, i32) {
    %c0_i32 = arith.constant 0 : i32
    %c0_i32_0 = arith.constant 0 : i32
    return %c0_i32, %arg1 : i32, i32
  }
  func.func @transform_3(%arg0: i32, %arg1: i32) -> (i32, i32) {
    %c0_i32 = arith.constant 0 : i32
    return %arg0, %arg1 : i32, i32
  }
}

module attributes {stable_mosaic.version = 11 : i64} {
  func.func @_mm_bias_act_kernel(%arg0: i32, %arg1: i32, %arg2: memref<512x256xbf16, #tpu.memory_space<vmem>>, %arg3: memref<256x128xbf16, #tpu.memory_space<vmem>>, %arg4: memref<1x128xf32, #tpu.memory_space<vmem>>, %arg5: memref<512x128xf32, #tpu.memory_space<vmem>>) attributes {dimension_semantics = [#tpu.dimension_semantics<parallel>, #tpu.dimension_semantics<parallel>], iteration_bounds = array<i64: 2, 1>, scalar_prefetch = 0 : i64, scratch_operands = 0 : i64, tpu.core_type = #tpu.core_type<tc>, window_params = [{transform_indices = @transform_0, window_bounds = array<i64: 512, 256>}, {transform_indices = @transform_1, window_bounds = array<i64: 256, 128>}, {transform_indices = @transform_2, window_bounds = array<i64: 1, 128>}, {transform_indices = @transform_3, window_bounds = array<i64: 512, 128>}]} {
    %c0 = arith.constant 0 : index
    %c0_0 = arith.constant 0 : index
    %0 = vector.load %arg2[%c0, %c0_0] : memref<512x256xbf16, #tpu.memory_space<vmem>>, vector<512x256xbf16>
    %c0_1 = arith.constant 0 : index
    %c0_2 = arith.constant 0 : index
    %1 = vector.load %arg3[%c0_1, %c0_2] : memref<256x128xbf16, #tpu.memory_space<vmem>>, vector<256x128xbf16>
    %cst = arith.constant dense<0.000000e+00> : vector<512x128xf32>
    %2 = tpu.matmul %0, %1, %cst {dimension_numbers = #tpu.dot_dimension_numbers<[1], [0], [0], [1], [0, 0, 1, 1], [], []>} : vector<512x256xbf16>, vector<256x128xbf16>, vector<512x128xf32> -> vector<512x128xf32>
    %c0_3 = arith.constant 0 : index
    %c0_4 = arith.constant 0 : index
    %3 = vector.load %arg4[%c0_3, %c0_4] : memref<1x128xf32, #tpu.memory_space<vmem>>, vector<1x128xf32>
    %4 = vector.broadcast %3 : vector<1x128xf32> to vector<512x128xf32>
    %5 = arith.addf %2, %4 : vector<512x128xf32>
    %cst_5 = arith.constant 0.000000e+00 : f32
    %6 = vector.broadcast %cst_5 : f32 to vector<512x128xf32>
    %7 = arith.maximumf %5, %6 : vector<512x128xf32>
    %8 = math.absf %5 : vector<512x128xf32>
    %cst_6 = arith.constant 0.000000e+00 : f32
    %9 = vector.broadcast %cst_6 : f32 to vector<512x128xf32>
    %10 = arith.subf %9, %8 : vector<512x128xf32>
    %11 = math.exp %10 : vector<512x128xf32>
    %12 = math.log1p %11 : vector<512x128xf32>
    %13 = arith.addf %7, %12 : vector<512x128xf32>
    %14 = math.tanh %13 : vector<512x128xf32>
    %15 = arith.mulf %5, %14 : vector<512x128xf32>
    %c0_7 = arith.constant 0 : index
    %c0_8 = arith.constant 0 : index
    %16 = vector.load %arg5[%c0_7, %c0_8] : memref<512x128xf32, #tpu.memory_space<vmem>>, vector<512x128xf32>
    tpu.vector_store %arg5[%c0_7, %c0_8], %15 {strides = array<i32>} : memref<512x128xf32, #tpu.memory_space<vmem>>, vector<512x128xf32>,
    return
  }
  func.func @transform_0(%arg0: i32, %arg1: i32) -> (i32, i32) {
    %c0_i32 = arith.constant 0 : i32
    %c0_i32_0 = arith.constant 0 : i32
    return %arg0, %c0_i32 : i32, i32
  }
  func.func @transform_1(%arg0: i32, %arg1: i32) -> (i32, i32) {
    %c0_i32 = arith.constant 0 : i32
    %c0_i32_0 = arith.constant 0 : i32
    return %c0_i32, %arg1 : i32, i32
  }
  func.func @transform_2(%arg0: i32, %arg1: i32) -> (i32, i32) {
    %c0_i32 = arith.constant 0 : i32
    %c0_i32_0 = arith.constant 0 : i32
    return %c0_i32, %arg1 : i32, i32
  }
  func.func @transform_3(%arg0: i32, %arg1: i32) -> (i32, i32) {
    %c0_i32 = arith.constant 0 : i32
    return %arg0, %arg1 : i32, i32
  }
}

module attributes {stable_mosaic.version = 11 : i64} {
  func.func @_mm_bias_act_kernel(%arg0: i32, %arg1: i32, %arg2: memref<512x128xbf16, #tpu.memory_space<vmem>>, %arg3: memref<128x128xbf16, #tpu.memory_space<vmem>>, %arg4: memref<1x128xf32, #tpu.memory_space<vmem>>, %arg5: memref<512x128xf32, #tpu.memory_space<vmem>>) attributes {dimension_semantics = [#tpu.dimension_semantics<parallel>, #tpu.dimension_semantics<parallel>], iteration_bounds = array<i64: 2, 1>, scalar_prefetch = 0 : i64, scratch_operands = 0 : i64, tpu.core_type = #tpu.core_type<tc>, window_params = [{transform_indices = @transform_0, window_bounds = array<i64: 512, 128>}, {transform_indices = @transform_1, window_bounds = array<i64: 128, 128>}, {transform_indices = @transform_2, window_bounds = array<i64: 1, 128>}, {transform_indices = @transform_3, window_bounds = array<i64: 512, 128>}]} {
    %c0 = arith.constant 0 : index
    %c0_0 = arith.constant 0 : index
    %0 = vector.load %arg2[%c0, %c0_0] : memref<512x128xbf16, #tpu.memory_space<vmem>>, vector<512x128xbf16>
    %c0_1 = arith.constant 0 : index
    %c0_2 = arith.constant 0 : index
    %1 = vector.load %arg3[%c0_1, %c0_2] : memref<128x128xbf16, #tpu.memory_space<vmem>>, vector<128x128xbf16>
    %cst = arith.constant dense<0.000000e+00> : vector<512x128xf32>
    %2 = tpu.matmul %0, %1, %cst {dimension_numbers = #tpu.dot_dimension_numbers<[1], [0], [0], [1], [0, 0, 1, 1], [], []>} : vector<512x128xbf16>, vector<128x128xbf16>, vector<512x128xf32> -> vector<512x128xf32>
    %c0_3 = arith.constant 0 : index
    %c0_4 = arith.constant 0 : index
    %3 = vector.load %arg4[%c0_3, %c0_4] : memref<1x128xf32, #tpu.memory_space<vmem>>, vector<1x128xf32>
    %4 = vector.broadcast %3 : vector<1x128xf32> to vector<512x128xf32>
    %5 = arith.addf %2, %4 : vector<512x128xf32>
    %cst_5 = arith.constant 0.000000e+00 : f32
    %6 = vector.broadcast %cst_5 : f32 to vector<512x128xf32>
    %7 = arith.maximumf %5, %6 : vector<512x128xf32>
    %8 = math.absf %5 : vector<512x128xf32>
    %cst_6 = arith.constant 0.000000e+00 : f32
    %9 = vector.broadcast %cst_6 : f32 to vector<512x128xf32>
    %10 = arith.subf %9, %8 : vector<512x128xf32>
    %11 = math.exp %10 : vector<512x128xf32>
    %12 = math.log1p %11 : vector<512x128xf32>
    %13 = arith.addf %7, %12 : vector<512x128xf32>
    %14 = math.tanh %13 : vector<512x128xf32>
    %15 = arith.mulf %5, %14 : vector<512x128xf32>
    %c0_7 = arith.constant 0 : index
    %c0_8 = arith.constant 0 : index
    %16 = vector.load %arg5[%c0_7, %c0_8] : memref<512x128xf32, #tpu.memory_space<vmem>>, vector<512x128xf32>
    tpu.vector_store %arg5[%c0_7, %c0_8], %15 {strides = array<i32>} : memref<512x128xf32, #tpu.memory_space<vmem>>, vector<512x128xf32>,
    return
  }
  func.func @transform_0(%arg0: i32, %arg1: i32) -> (i32, i32) {
    %c0_i32 = arith.constant 0 : i32
    %c0_i32_0 = arith.constant 0 : i32
    return %arg0, %c0_i32 : i32, i32
  }
  func.func @transform_1(%arg0: i32, %arg1: i32) -> (i32, i32) {
    %c0_i32 = arith.constant 0 : i32
    %c0_i32_0 = arith.constant 0 : i32
    return %c0_i32, %arg1 : i32, i32
  }
  func.func @transform_2(%arg0: i32, %arg1: i32) -> (i32, i32) {
    %c0_i32 = arith.constant 0 : i32
    %c0_i32_0 = arith.constant 0 : i32
    return %c0_i32, %arg1 : i32, i32
  }
  func.func @transform_3(%arg0: i32, %arg1: i32) -> (i32, i32) {
    %c0_i32 = arith.constant 0 : i32
    return %arg0, %arg1 : i32, i32
  }
}

module attributes {stable_mosaic.version = 11 : i64} {
  func.func @_mm_bias_act_kernel(%arg0: i32, %arg1: i32, %arg2: memref<512x384xbf16, #tpu.memory_space<vmem>>, %arg3: memref<384x128xbf16, #tpu.memory_space<vmem>>, %arg4: memref<1x128xf32, #tpu.memory_space<vmem>>, %arg5: memref<512x128xf32, #tpu.memory_space<vmem>>) attributes {dimension_semantics = [#tpu.dimension_semantics<parallel>, #tpu.dimension_semantics<parallel>], iteration_bounds = array<i64: 7, 1>, scalar_prefetch = 0 : i64, scratch_operands = 0 : i64, tpu.core_type = #tpu.core_type<tc>, window_params = [{transform_indices = @transform_0, window_bounds = array<i64: 512, 384>}, {transform_indices = @transform_1, window_bounds = array<i64: 384, 128>}, {transform_indices = @transform_2, window_bounds = array<i64: 1, 128>}, {transform_indices = @transform_3, window_bounds = array<i64: 512, 128>}]} {
    %c0 = arith.constant 0 : index
    %c0_0 = arith.constant 0 : index
    %0 = vector.load %arg2[%c0, %c0_0] : memref<512x384xbf16, #tpu.memory_space<vmem>>, vector<512x384xbf16>
    %c0_1 = arith.constant 0 : index
    %c0_2 = arith.constant 0 : index
    %1 = vector.load %arg3[%c0_1, %c0_2] : memref<384x128xbf16, #tpu.memory_space<vmem>>, vector<384x128xbf16>
    %cst = arith.constant dense<0.000000e+00> : vector<512x128xf32>
    %2 = tpu.matmul %0, %1, %cst {dimension_numbers = #tpu.dot_dimension_numbers<[1], [0], [0], [1], [0, 0, 1, 1], [], []>} : vector<512x384xbf16>, vector<384x128xbf16>, vector<512x128xf32> -> vector<512x128xf32>
    %c0_3 = arith.constant 0 : index
    %c0_4 = arith.constant 0 : index
    %3 = vector.load %arg4[%c0_3, %c0_4] : memref<1x128xf32, #tpu.memory_space<vmem>>, vector<1x128xf32>
    %4 = vector.broadcast %3 : vector<1x128xf32> to vector<512x128xf32>
    %5 = arith.addf %2, %4 : vector<512x128xf32>
    %c0_5 = arith.constant 0 : index
    %c0_6 = arith.constant 0 : index
    %6 = vector.load %arg5[%c0_5, %c0_6] : memref<512x128xf32, #tpu.memory_space<vmem>>, vector<512x128xf32>
    tpu.vector_store %arg5[%c0_5, %c0_6], %5 {strides = array<i32>} : memref<512x128xf32, #tpu.memory_space<vmem>>, vector<512x128xf32>,
    return
  }
  func.func @transform_0(%arg0: i32, %arg1: i32) -> (i32, i32) {
    %c0_i32 = arith.constant 0 : i32
    %c0_i32_0 = arith.constant 0 : i32
    return %arg0, %c0_i32 : i32, i32
  }
  func.func @transform_1(%arg0: i32, %arg1: i32) -> (i32, i32) {
    %c0_i32 = arith.constant 0 : i32
    %c0_i32_0 = arith.constant 0 : i32
    return %c0_i32, %arg1 : i32, i32
  }
  func.func @transform_2(%arg0: i32, %arg1: i32) -> (i32, i32) {
    %c0_i32 = arith.constant 0 : i32
    %c0_i32_0 = arith.constant 0 : i32
    return %c0_i32, %arg1 : i32, i32
  }
  func.func @transform_3(%arg0: i32, %arg1: i32) -> (i32, i32) {
    %c0_i32 = arith.constant 0 : i32
    return %arg0, %arg1 : i32, i32
  }
}

</mosaic_0001>

<bundles_post_ra>
// kernel: forward.8
= control target key start
LH: loop header
LB: loop body
LE: loop exit
PB: predicated region body
PF: predicated region fallthrough
CT: control target
= control target key end

     0   :  { %8 = vsyncpa [#allocation3], 0  ;;  %s1712_s0 = inlined_call_operand.vmem [shape: bf16[104,128], index: 0, kind: input, shape index: {}]   ;;  %s1713_s1 = inlined_call_operand.hbm [shape: bf16[128,256], index: 1, kind: input, shape index: {}]   ;;  %s1714_s2 = inlined_call_operand.hbm [shape: f32[1,256], index: 2, kind: input, shape index: {}]   ;;  %s1715_s3 = inlined_call_operand.vmem [shape: f32[104,256], index: 3, kind: output, shape index: {}]  }
   0x1   :  { %10 = vsyncpa [#allocation3 + $0x1], 0 }
   0x2   :  { %11 = vsyncpa [#allocation5], 0 }
   0x3   :  { %13 = vsyncpa [#allocation5 + $0x1], 0  ;;  %s1307_s12 = smov 0   ;;  %s1309_s13 = smov 0  }
   0x4   :  { %s1311_s14 = smov 0   ;;  %s1313_s15 = smov 0  }
   0x5   :  { %s1315_s16 = smov 0   ;;  %s1317_s17 = smov 0  }
   0x6 LB: > { %s901_s18 = sadd.s32 4294967295, %s1278_s17   ;;  %s28_s19 = sadd.s32 1, %s1274_s16  ;;  %s1278_s17 = sphi %s1317_s17, %s19_s17   ;;  %s1274_s16 = sphi %s1315_s16, %s1744_s16   ;;  %s1270_s15 = sphi %s1313_s15, %s1743_s15   ;;  %s1266_s14 = sphi %s1311_s14, %s1742_s14   ;;  %s1262_s13 = sphi %s1309_s13, %s1741_s13   ;;  %s1258_s12 = sphi %s1307_s12, %s1740_s12  }
   0x7   : > { %p29_p0 = scmp.ge.s32.totalorder %s28_s19, 2  ;;  %s64_s20 = sadd.s32 1, %s1266_s14 }
   0x8   : > { %p71_p1 = scmp.ne.s32.totalorder %s1266_s14, %s1262_s13  ;;  %p72_p2 = scmp.eq.s32.totalorder %s1278_s17, 0 }
   0x9   : > { %s1746_s19 = smov (%p29_p0, %s28_s19), 0  ;;  %p77_p4 = scmp.ne.s32.totalorder %s1262_s13, %s1258_s12 }
   0xa   : > { %p1343_p3 = por %p72_p2, %p71_p1  ;;  %s61_s22 = ssub.s32 %s1274_s16, %s1746_s19 }
   0xb   : > { %p78_p5 = scmp.eq.s32.totalorder %s901_s18, 0  ;;  %p62_p6 = scmp.eq.s32.totalorder %s61_s22, 0 }
   0xc   : > { %p129_p7 = scmp.eq.s32.totalorder %s901_s18, 1  ;;  %p1017_p10 = scmp.lt.s32.totalorder %s1278_s17, 2 }
   0xd   : > { %p1350_p8 = por %p78_p5, %p77_p4  ;;  %s1363_s26 = sand.u32 1, %s1266_s14  }
   0xe   : > { %s1355_s24 = scalar_select %p62_p6, %s1266_s14, %s64_s20  }
   0xf   : > { %s1718_s23 = scalar_select %p1350_p8, 1, 0 }
  0x10   : > { %p1357_p9 = por %p129_p7, %p71_p1  ;;  %s907_s27 = sshll.u32 %s1274_s16, 6 }
  0x11   : > { %s906_s28 = sshll.u32 %s1363_s26, 6  ;;  %s1370_s4 = scalar_lea.hbm %s1713_s1, %s907_s27 }
  0x12   : > { %s1719_s25 = scalar_select %p1357_p9, 1, 0 }
  0x13   : > { %s168_s5 = scalar_lea.vmem [#allocation2], %s906_s28  ;;  %p1374_p11 = pnand %p1017_p10, %p1343_p3 }
  0x14   : > { %s174_s6 = sshll.u32 %s168_s5, 4  ;;  %s165_s8 = scalar_lea.sflag [#allocation3], %s1363_s26  ;;  %s1378_s6 = int_to_ptr.vmem [resolvable:$true] %s174_s6 }
  0x15   : > { %s1164_s9 = scalar_lea.hbm %s1370_s4, 1024  ;;  %p1166_p0 = pneg %p1374_p11 }
  0x16   : > { %p1165_p13 = scmp.ne.s32.totalorder %s1370_s4, %s1164_s9  ;;  %s1169_s12 = scalar_lea.hbm %s1713_s1, 2048 }
  0x17   : > { %p1170_p3 = scmp.lt.u32.totalorder %s1370_s4, %s1713_s1  ;;  %p1171_p4 = scmp.lt.u32.totalorder %s1169_s12, %s1164_s9 }
  0x18   : > { %p1167_p1 = pnand %p1166_p0, %p1165_p13  ;;  %p1173_p6 = scmp.lt.u32.totalorder %s1164_s9, %s1370_s4 }
  0x19   : > { %p1172_p5 = por %p1171_p4, %p1170_p3 }
  0x1a   : > { %p1168_p2 = pneg %p1167_p1 }
  0x1b   : > { %p1174_p7 = por %p1173_p6, %p1172_p5 }
  0x1d   : > { %p1175_p10 = pnand %p1174_p7, %p1168_p2 }
  0x1f   : > { %1178 = shalt.err (!%p1175_p10)
}
  0x20   : > { %s1179_s21 = scalar_lea.vmem %s1378_s6, 1024  ;;  %s1280_s22 = smov [#allocation2]  }
  0x21   : > { %p1180_p13 = scmp.ne.s32.totalorder %s1378_s6, %s1179_s21  ;;  %s1184_s27 = sshll.u32 %s1280_s22, 4  ;;  %s1185_s27 = int_to_ptr.vmem [resolvable:$false] %s1184_s27 }
  0x22   : > { %s1186_s28 = scalar_lea.vmem %s1185_s27, 2048  ;;  %p1187_p9 = scmp.lt.s32.totalorder %s1378_s6, %s1185_s27 }
  0x23   : > { %p1182_p1 = pnand %p1180_p13, %p1166_p0  ;;  %p1188_p3 = scmp.lt.s32.totalorder %s1186_s28, %s1179_s21 }
  0x25   : > { %p1183_p12 = pneg %p1182_p1  ;;  %p1189_p4 = por %p1188_p3, %p1187_p9 }
  0x27   : > { %p1190_p5 = pnand %p1189_p4, %p1183_p12 }
  0x29   : > { %1193 = shalt.err (!%p1190_p5)
}
  0x2a   : > { %s1281_s29 = smov 128   ;;  %s1282_s30 = smov 64  }
  0x2b   : > { %s1283_s5 = smov 4   ;;  %p199_p2 = scmp.lt.s32.totalorder %s1278_s17, 3 }
  0x2c   : > { %1013 = dma.hbm_to_vmem [thread:$0]  (!%p1374_p11), %s1370_s4, 1024, %s1378_s6, %s165_s8, %s1281_s29, %s1282_s30, %s1283_s5  }
  0x2d   : > { %s908_s9 = sshll.u32 %s1274_s16, 4  ;;  %p1721_p9 = scmp.ge.s32.totalorder %s1278_s17, 1 }
  0x2e   : > { %s1420_s18 = scalar_lea.hbm %s1714_s2, %s908_s9  ;;  %s187_s20 = scalar_lea.vmem [#allocation4], %s1363_s26 }
  0x2f   : > { %p1413_p12 = pnand %p1721_p9, %p199_p2  ;;  %s194_s21 = sshll.u32 %s187_s20, 4  ;;  %s195_s21 = int_to_ptr.vmem [resolvable:$true] %s194_s21 }
  0x30   : > { %s185_s4 = scalar_lea.sflag [#allocation5], %s1363_s26  ;;  %s1194_s6 = scalar_lea.hbm %s1420_s18, 16 }
  0x31   : > { %s1722_s10 = scalar_select %p1413_p12, 1, 0 }
  0x32   : > { %p1195_p6 = scmp.ne.s32.totalorder %s1420_s18, %s1194_s6  ;;  %s1199_s27 = scalar_lea.hbm %s1714_s2, 32 }
  0x33   : > { %p1200_p13 = scmp.lt.u32.totalorder %s1420_s18, %s1714_s2  ;;  %p1201_p1 = scmp.lt.u32.totalorder %s1199_s27, %s1194_s6 }
  0x34   : > { %p1197_p7 = pnand %p1195_p6, %p1166_p0  ;;  %p1203_p4 = scmp.lt.u32.totalorder %s1194_s6, %s1420_s18 }
  0x35   : > { %p1202_p3 = por %p1201_p1, %p1200_p13 }
  0x36   : > { %p1198_p10 = pneg %p1197_p7 }
  0x37   : > { %p1204_p5 = por %p1203_p4, %p1202_p3 }
  0x39   : > { %p1205_p2 = pnand %p1204_p5, %p1198_p10 }
  0x3b   : > { %1208 = shalt.err (!%p1205_p2)
}
  0x3c   : > { %s1209_s26 = scalar_lea.vmem %s195_s21, 16  ;;  %s1284_s30 = smov [#allocation4]  }
  0x3d   : > { %p1210_p9 = scmp.ne.s32.totalorder %s195_s21, %s1209_s26  ;;  %s1214_s5 = sshll.u32 %s1284_s30, 4  ;;  %s1215_s5 = int_to_ptr.vmem [resolvable:$false] %s1214_s5 }
  0x3e   : > { %s1216_s9 = scalar_lea.vmem %s1215_s5, 32  ;;  %p1217_p8 = scmp.lt.s32.totalorder %s195_s21, %s1215_s5 }
  0x3f   : > { %p1212_p6 = pnand %p1210_p9, %p1166_p0  ;;  %p1218_p12 = scmp.lt.s32.totalorder %s1216_s9, %s1209_s26 }
  0x41   : > { %p1213_p7 = pneg %p1212_p6  ;;  %p1219_p1 = por %p1218_p12, %p1217_p8 }
  0x43   : > { %p1220_p13 = pnand %p1219_p1, %p1213_p7 }
  0x45   : > { %1223 = shalt.err (!%p1220_p13)
}
  0x46   : > { %1016 = dma.hbm_to_vmem [thread:$0]  (!%p1374_p11), %s1420_s18, 16, %s195_s21, %s185_s4  }
  0x47   : > { %p1723_p10 = scmp.ne.s32.totalorder %s1722_s10, 0 }
  0x48   : > { %s1446_s11 = sand.u32 (!%p1723_p10), 1, %s1262_s13   ;;  %p1724_p8 = scmp.ne.s32.totalorder (!%p1723_p10), %s1718_s23, 0 }
  0x49   : > { %203 = sbr.rel (%p1723_p10) target bundleno = 432 (0x1b0), region = 32  ;;  %s910_s12 = sshll.u32 (!%p1723_p10), %s1446_s11, 6 }
  0x4a   : > { %s206_s20 = scalar_lea.sflag (!%p1723_p10), [#allocation3], %s1446_s11  ;;  %s1450_s6 = scalar_lea.vmem (!%p1723_p10), [#allocation2], %s910_s12 }
  0x50   : > { %1249 = dma.done.wait (%p1724_p8), %s206_s20, 1024  }
  0x51   : > { %1251 = vsyncadd (%p1724_p8), %s206_s20, 4294966272  ;;  %s215_s7 = scalar_lea.sflag [#allocation5], %s1446_s11  ;;  %s217_s10 = scalar_lea.vmem [#allocation4], %s1446_s11 }
  0x52   : > { %1253 = dma.done.wait (%p1724_p8), %s215_s7, 16  }
  0x53   : > { %1255 = vsyncadd (%p1724_p8), %s215_s7, 4294967280  ;;  %v1285_v0 = vmov 0.0   ;;  %vm1286_vm0 = vmmov 0   ;;  %v1071_v1 = vld [vmem:[%s1450_s6] sm:$0xff]   ;;  %v1072_v2 = vld [vmem:[%s1450_s6 + $0x8] sm:$0xff]   ;;  %s1005_s20 = smul.u32 104, %s1446_s11 }
  0x54   : > { %945 = vmatprep.subr.bf16.mxu0 %v1285_v0  ;;  %989 = vmatprep.subr.bf16.mxu1 %v1285_v0  ;;  %v1073_v3 = vld [vmem:[%s1450_s6 + $0x10] sm:$0xff]   ;;  %v1074_v4 = vld [vmem:[%s1450_s6 + $0x18] sm:$0xff]   ;;  %v1075_v5 = vld [vmem:[%s1450_s6 + $0x20] sm:$0xff]   ;;  %p1739_p11 = scmp.ne.s32.totalorder %s1719_s25, 0 }
  0x55   : > { %961 = vmatprep.mubr.msk.bf16.mxu0 %vm1286_vm0, %v1285_v0  ;;  %977 = vmatprep.mubr.msk.bf16.mxu1 %vm1286_vm0, %v1285_v0  ;;  %v1076_v6 = vld [vmem:[%s1450_s6 + $0x28] sm:$0xff]   ;;  %v1077_v7 = vld [vmem:[%s1450_s6 + $0x30] sm:$0xff]   ;;  %v1078_v8 = vld [vmem:[%s1450_s6 + $0x38] sm:$0xff]   ;;  %s1644_s11 = scalar_lea.vmem [#allocation6], %s1005_s20  ;;  %s927_s6 = sshll.u32 (%p1739_p11), %s1270_s15, 3 }
  0x56   : > { %946 = vmatpush3.bf16.msra.mxu0 %v1071_v1  ;;  %997 = vmatpush3.bf16.msra.mxu1 %v1071_v1  ;;  %v1079_v9 = vld [vmem:[%s1712_s0] sm:$0xff]   ;;  %v1081_v11 = vld [vmem:[%s1712_s0 + $0x8] sm:$0xff]   ;;  %v1083_v13 = vld [vmem:[%s1712_s0 + $0x10] sm:$0xff]   ;;  %s713_s23 = scalar_lea.vmem (%p1739_p11), %s1715_s3, %s927_s6 }
  0x57   : > { %947 = vmatprep.subr.bf16.mxu0 %v1285_v0  ;;  %990 = vmatprep.subr.bf16.mxu1 %v1285_v0  ;;  %v1080_v10 = vld [vmem:[%s1712_s0 + $0x20] sm:$0xff]   ;;  %v1082_v12 = vld [vmem:[%s1712_s0 + $0x28] sm:$0xff]   ;;  %v1084_v14 = vld [vmem:[%s1712_s0 + $0x30] ss:$0 sps:$4 sm:$0xff]  }
  0x58   : > { %v1085_v15 = vld [vmem:[%s1712_s0 + $0x18] sm:$0xff]   ;;  %v1500_v16 = vld [vmem:[%s217_s10] ss:$0 sm:$0xff] }
  0x5a   : > { %948 = vmatpush3.bf16.msra.mxu0 %v1072_v2  ;;  %998 = vmatpush3.bf16.msra.mxu1 %v1072_v2 }
  0x5b   : > { %949 = vmatprep.subr.bf16.mxu0 %v1285_v0  ;;  %991 = vmatprep.subr.bf16.mxu1 %v1285_v0 }
  0x5e   : > { %950 = vmatpush3.bf16.msra.mxu0 %v1073_v3  ;;  %999 = vmatpush3.bf16.msra.mxu1 %v1073_v3 }
  0x5f   : > { %951 = vmatprep.subr.bf16.mxu0 %v1285_v0  ;;  %992 = vmatprep.subr.bf16.mxu1 %v1285_v0 }
  0x62   : > { %952 = vmatpush3.bf16.msra.mxu0 %v1074_v4  ;;  %1000 = vmatpush3.bf16.msra.mxu1 %v1074_v4 }
  0x63   : > { %953 = vmatprep.subr.bf16.mxu0 %v1285_v0  ;;  %993 = vmatprep.subr.bf16.mxu1 %v1285_v0 }
  0x66   : > { %954 = vmatpush3.bf16.msra.mxu0 %v1075_v5  ;;  %1001 = vmatpush3.bf16.msra.mxu1 %v1075_v5 }
  0x67   : > { %955 = vmatprep.subr.bf16.mxu0 %v1285_v0  ;;  %994 = vmatprep.subr.bf16.mxu1 %v1285_v0 }
  0x6a   : > { %956 = vmatpush3.bf16.msra.mxu0 %v1076_v6  ;;  %1002 = vmatpush3.bf16.msra.mxu1 %v1076_v6 }
  0x6b   : > { %957 = vmatprep.subr.bf16.mxu0 %v1285_v0  ;;  %995 = vmatprep.subr.bf16.mxu1 %v1285_v0 }
  0x6e   : > { %958 = vmatpush3.bf16.msra.mxu0 %v1077_v7  ;;  %1003 = vmatpush3.bf16.msra.mxu1 %v1077_v7 }
  0x6f   : > { %959 = vmatprep.subr.bf16.mxu0 %v1285_v0  ;;  %996 = vmatprep.subr.bf16.mxu1 %v1285_v0 }
  0x72   : > { %960 = vmatpush3.bf16.msra.mxu0 %v1078_v8  ;;  %1004 = vmatpush3.bf16.msra.mxu1 %v1078_v8 }
  0x75   : > { %962 = vmatmul.mubr.bf16.vlgmr.msra.gmra.mrb[0].mxu0 %v1079_v9  ;;  %978 = vmatmul.mubr.bf16.vlgmr.msra.gmra.mrb[0].mxu1 %v1080_v10 }
  0x76   : > { %965 = vmatprep.mubr.msk.bf16.mxu0 %vm1286_vm0, %v1285_v0  ;;  %981 = vmatprep.mubr.msk.bf16.mxu1 %vm1286_vm0, %v1285_v0 }
  0x7d   : > { %966 = vmatmul.mubr.bf16.gmra.mrb[4].mxu0 %v1081_v11  ;;  %982 = vmatmul.mubr.bf16.gmra.mrb[4].mxu1 %v1082_v12 }
  0x7e   : > { %969 = vmatprep.mubr.msk.bf16.mxu0 %vm1286_vm0, %v1285_v0  ;;  %985 = vmatprep.mubr.msk.bf16.mxu1 %vm1286_vm0, %v1285_v0 }
  0x85   : > { %970 = vmatmul.mubr.bf16.gmra.mrb[8].mxu0 %v1083_v13  ;;  %986 = vmatmul.mubr.bf16.gmra.mrb[8].mxu1 %v1084_v14 }
  0x86   : > { %973 = vmatprep.mubr.msk.bf16.mxu0 %vm1286_vm0, %v1285_v0 }
  0x8d   : > { %974 = vmatmul.mubr.bf16.gmra.mrb[12].mxu0 %v1085_v15 }
 0x148   : > { %v414_v17 = vpop.f32.mrb[0].mxu0  ;;  %v446_v18 = vpop.f32.mrb[0].mxu1 }
 0x149   : > { %v1503_v19 = vadd.f32 %v1500_v16, %v414_v17  ;;  %v1506_v20 = vadd.f32 %v1500_v16, %v446_v18  ;;  %v963_v21 = vpop.f32.mrb[1].mxu0  ;;  %v979_v22 = vpop.f32.mrb[1].mxu1 }
 0x14a   : > { %v417_v23 = vpop.f32.mrb[2].mxu0  ;;  %v449_v24 = vpop.f32.mrb[2].mxu1 }
 0x14b   : > { %v481_v25 = vand.u32 2147483647, %v1503_v19  ;;  %v489_v26 = vand.u32 2147483647, %v1506_v20  ;;  %v1511_v27 = vadd.f32 %v1500_v16, %v417_v23  ;;  %v1514_v28 = vadd.f32 %v1500_v16, %v449_v24  ;;  %v964_v29 = vpop.f32.mrb[3].mxu0  ;;  %v980_v30 = vpop.f32.mrb[3].mxu1 }
 0x14c   : > { %v468_v9 = vmax.f32 %v1503_v19, 0.0  ;;  %v476_v10 = vmax.f32 %v1506_v20, 0.0 }
 0x14d   : > { %v494_v31 = vsub.f32 0.0, %v481_v25  ;;  %v502_v32 = vsub.f32 0.0, %v489_v26  ;;  %v482_v33 = vand.u32 2147483647, %v1511_v27  ;;  %v490_v34 = vand.u32 2147483647, %v1514_v28 }
 0x14e   : > { %v469_v11 = vmax.f32 %v1511_v27, 0.0  ;;  %v477_v15 = vmax.f32 %v1514_v28, 0.0 }
 0x14f   : > { %v507_v35 = vmul.f32 1.442695, %v494_v31  ;;  %v523_v36 = vmul.f32 1.442695, %v502_v32  ;;  %v495_v37 = vsub.f32 0.0, %v482_v33  ;;  %v503_v38 = vsub.f32 0.0, %v490_v34 }
 0x150   : > { %v422_v39 = vpop.f32.mrb[4].mxu0  ;;  %v454_v40 = vpop.f32.mrb[4].mxu1 }
 0x151   : > { %1086 = vpow2.f32 %v507_v35  ;;  %v1519_v41 = vadd.f32 %v1500_v16, %v422_v39  ;;  %v1522_v42 = vadd.f32 %v1500_v16, %v454_v40  ;;  %v967_v43 = vpop.f32.mrb[5].mxu0  ;;  %v983_v44 = vpop.f32.mrb[5].mxu1  ;;  %v509_v45 = vmul.f32 1.442695, %v495_v37 }
 0x152   : > { %1088 = vpow2.f32 %v523_v36  ;;  %v525_v46 = vmul.f32 1.442695, %v503_v38  ;;  %v425_v47 = vpop.f32.mrb[6].mxu0  ;;  %v457_v48 = vpop.f32.mrb[6].mxu1 }
 0x153   : > { %v483_v49 = vand.u32 2147483647, %v1519_v41  ;;  %v491_v50 = vand.u32 2147483647, %v1522_v42  ;;  %1090 = vpow2.f32 %v509_v45  ;;  %v1527_v51 = vadd.f32 %v1500_v16, %v425_v47  ;;  %v968_v53 = vpop.f32.mrb[7].mxu0  ;;  %v984_v54 = vpop.f32.mrb[7].mxu1 }
 0x154   : > { %v1530_v52 = vadd.f32 %v1500_v16, %v457_v48  ;;  %1092 = vpow2.f32 %v525_v46  ;;  %v470_v26 = vmax.f32 %v1519_v41, 0.0  ;;  %v478_v37 = vmax.f32 %v1522_v42, 0.0 }
 0x155   : > { %v496_v55 = vsub.f32 0.0, %v483_v49  ;;  %v504_v56 = vsub.f32 0.0, %v491_v50  ;;  %v484_v57 = vand.u32 2147483647, %v1527_v51  ;;  %v471_v46 = vmax.f32 %v1527_v51, 0.0 }
 0x156   : > { %v492_v58 = vand.u32 2147483647, %v1530_v52 }
 0x157   : > { %v511_v59 = vmul.f32 1.442695, %v496_v55  ;;  %v527_v60 = vmul.f32 1.442695, %v504_v56  ;;  %v497_v61 = vsub.f32 0.0, %v484_v57  ;;  %v479_v55 = vmax.f32 %v1530_v52, 0.0 }
 0x158   : > { %v505_v62 = vsub.f32 0.0, %v492_v58  ;;  %v430_v63 = vpop.f32.mrb[8].mxu0  ;;  %v462_v0 = vpop.f32.mrb[8].mxu1 }
 0x159   : > { %1094 = vpow2.f32 %v511_v59  ;;  %v1535_v1 = vadd.f32 %v1500_v16, %v430_v63  ;;  %v971_v2 = vpop.f32.mrb[9].mxu0  ;;  %v987_v3 = vpop.f32.mrb[9].mxu1  ;;  %v513_v4 = vmul.f32 1.442695, %v497_v61  ;;  %v1546_v29 = vadd.f32 %v1500_v16, %v462_v0 }
 0x15a   : > { %1096 = vpow2.f32 %v527_v60  ;;  %v529_v5 = vmul.f32 1.442695, %v505_v62  ;;  %v1537_v6 = vpop.f32.mrb[10].mxu0  ;;  %v465_v7 = vpop.f32.mrb[10].mxu1 }
 0x15b   : > { %v1087_v8 = vpop.eup %1086  ;;  %1098 = vpow2.f32 %v513_v4  ;;  %v972_v17 = vpop.f32.mrb[11].mxu0  ;;  %v485_v23 = vand.u32 2147483647, %v1535_v1  ;;  %v493_v47 = vand.u32 2147483647, %v1546_v29 }
 0x15c   : > { %v1089_v12 = vpop.eup %1088  ;;  %v533_v13 = vadd.f32 1.0, %v1087_v8  ;;  %v536_v14 = vmul.f32 -0.5, %v1087_v8  ;;  %v988_v18 = vpop.f32.mrb[11].mxu1  ;;  %1100 = vpow2.f32 %v529_v5  ;;  %v539_v25 = vand.u32 2147483647, %v1087_v8 }
 0x15d   : > { %v605_v21 = vadd.f32 1.0, %v1089_v12  ;;  %v608_v22 = vmul.f32 -0.5, %v1089_v12  ;;  %v1091_v24 = vpop.eup %1090  ;;  %v611_v32 = vand.u32 2147483647, %v1089_v12  ;;  %v498_v43 = vsub.f32 0.0, %v485_v23 }
 0x15e   : > { %1102 = vlog2.f32 %v533_v13  ;;  %v1093_v30 = vpop.eup %1092  ;;  %v537_v31 = vadd.f32 1.0, %v536_v14  ;;  %v542_v33 = vadd.f32 1.0, %v1091_v24  ;;  %v545_v35 = vmul.f32 -0.5, %v1091_v24 }
 0x15f   : > { %1104 = vlog2.f32 %v605_v21  ;;  %v609_v34 = vadd.f32 1.0, %v608_v22  ;;  %v614_v36 = vadd.f32 1.0, %v1093_v30  ;;  %v548_v39 = vand.u32 2147483647, %v1091_v24 }
 0x160   : > { %v1549_v38 = vpop.f32.mrb[12].mxu0  ;;  %1106 = vlog2.f32 %v542_v33  ;;  %v617_v40 = vmul.f32 -0.5, %v1093_v30  ;;  %v620_v45 = vand.u32 2147483647, %v1093_v30  ;;  %v538_v50 = vmul.f32 %v1087_v8, %v537_v31 }
 0x161   : > { %v975_v44 = vpop.f32.mrb[13].mxu0  ;;  %1108 = vlog2.f32 %v614_v36  ;;  %vm1555_vm1 = vcmp.lt.f32.partialorder %v539_v25, 0.0004427343  ;;  %vm1559_vm2 = vcmp.lt.f32.partialorder %v611_v32, 0.0004427343  ;;  %v610_v58 = vmul.f32 %v1089_v12, %v609_v34 }
 0x162   : > { %v1553_v48 = vpop.f32.mrb[14].mxu0  ;;  %v546_v59 = vadd.f32 1.0, %v545_v35  ;;  %vm1564_vm3 = vcmp.lt.f32.partialorder %v548_v39, 0.0004427343  ;;  %v618_v63 = vadd.f32 1.0, %v617_v40  ;;  %v506_v8 = vsub.f32 0.0, %v493_v47 }
 0x163   : > { %v1095_v49 = vpop.eup %1094  ;;  %v976_v56 = vpop.f32.mrb[15].mxu0  ;;  %v515_v3 = vmul.f32 1.442695, %v498_v43  ;;  %vm1570_vm4 = vcmp.lt.f32.partialorder %v620_v45, 0.0004427343  ;;  %v1580_v25 = vadd.f32 %v1500_v16, %v1537_v6 }
 0x164   : > { %v1097_v57 = vpop.eup %1096  ;;  %v551_v60 = vadd.f32 1.0, %v1095_v49  ;;  %v554_v61 = vmul.f32 -0.5, %v1095_v49  ;;  %v557_v7 = vand.u32 2147483647, %v1095_v49  ;;  %v547_v21 = vmul.f32 %v1091_v24, %v546_v59 }
 0x165   : > { %v623_v0 = vadd.f32 1.0, %v1097_v57  ;;  %v626_v2 = vmul.f32 -0.5, %v1097_v57  ;;  %v1568_v4 = vpop.eup %1098  ;;  %v629_v14 = vand.u32 2147483647, %v1097_v57  ;;  %v619_v33 = vmul.f32 %v1093_v30, %v618_v63 }
 0x166   : > { %1110 = vlog2.f32 %v551_v60  ;;  %v1574_v12 = vpop.eup %1100  ;;  %v555_v13 = vadd.f32 1.0, %v554_v61  ;;  %v560_v17 = vadd.f32 1.0, %v1568_v4  ;;  %v563_v34 = vmul.f32 -0.5, %v1568_v4 }
 0x167   : > { %1112 = vlog2.f32 %v623_v0  ;;  %v627_v22 = vadd.f32 1.0, %v626_v2  ;;  %v632_v23 = vadd.f32 1.0, %v1574_v12  ;;  %vm1583_vm5 = vcmp.lt.f32.partialorder %v557_v7, 0.0004427343 }
 0x168   : > { %v1103_v18 = vpop.eup %1102  ;;  %1114 = vlog2.f32 %v560_v17  ;;  %v566_v24 = vand.u32 2147483647, %v1568_v4  ;;  %v531_v39 = vmul.f32 1.442695, %v506_v8  ;;  %v556_v43 = vmul.f32 %v1095_v49, %v555_v13 }
 0x169   : > { %v1105_v31 = vpop.eup %1104  ;;  %v535_v32 = vmul.f32 0.6931472, %v1103_v18  ;;  %1116 = vlog2.f32 %v632_v23  ;;  %vm1590_vm6 = vcmp.lt.f32.partialorder %v629_v14, 0.0004427343  ;;  %v628_v59 = vmul.f32 %v1097_v57, %v627_v22 }
 0x16a   : > { %v607_v35 = vmul.f32 0.6931472, %v1105_v31  ;;  %v1107_v40 = vpop.eup %1106  ;;  %1118 = vpow2.f32 %v515_v3  ;;  %v635_v49 = vmul.f32 -0.5, %v1574_v12  ;;  %vm1603_vm7 = vcmp.lt.f32.partialorder %v566_v24, 0.0004427343 }
 0x16b   : > { %v541_v6 = vsel %vm1555_vm1, %v538_v50, %v535_v32  ;;  %v1109_v30 = vpop.eup %1108  ;;  %v544_v56 = vmul.f32 0.6931472, %v1107_v40  ;;  %v564_v50 = vadd.f32 1.0, %v563_v34  ;;  %v1614_v57 = vadd.f32 %v1500_v16, %v1549_v38 }
 0x16c   : > { %v650_v45 = vadd.f32 %v541_v6, %v468_v9  ;;  %v613_v47 = vsel %vm1559_vm2, %v610_v58, %v607_v35  ;;  %v616_v53 = vmul.f32 0.6931472, %v1109_v30  ;;  %v486_v9 = vand.u32 2147483647, %v1580_v25 }
 0x16d   : > { %v658_v60 = vadd.f32 %v613_v47, %v476_v10  ;;  %v550_v61 = vsel %vm1564_vm3, %v547_v21, %v544_v56  ;;  %v1620_v2 = vadd.f32 %v1500_v16, %v1553_v48  ;;  %v636_v5 = vadd.f32 1.0, %v635_v49 }
 0x16e   : > { %1120 = vtanh.f32 %v650_v45  ;;  %v651_v54 = vadd.f32 %v550_v61, %v469_v11  ;;  %v622_v10 = vsel %vm1570_vm4, %v619_v33, %v616_v53  ;;  %v499_v0 = vsub.f32 0.0, %v486_v9 }
 0x16f   : > { %1122 = vtanh.f32 %v658_v60  ;;  %v659_v62 = vadd.f32 %v622_v10, %v477_v15  ;;  %v487_v7 = vand.u32 2147483647, %v1614_v57  ;;  %v638_v8 = vand.u32 2147483647, %v1574_v12 }
 0x170   : > { %v1111_v58 = vpop.eup %1110  ;;  %1124 = vpow2.f32 %v531_v39  ;;  %v517_v13 = vmul.f32 1.442695, %v499_v0  ;;  %v565_v17 = vmul.f32 %v1568_v4, %v564_v50  ;;  %v488_v48 = vand.u32 2147483647, %v1620_v2 }
 0x171   : > { %v1113_v3 = vpop.eup %1112  ;;  %1126 = vtanh.f32 %v651_v54  ;;  %v553_v11 = vmul.f32 0.6931472, %v1111_v58  ;;  %v500_v16 = vsub.f32 0.0, %v487_v7  ;;  %v637_v4 = vmul.f32 %v1574_v12, %v636_v5 }
 0x172   : > { %1128 = vtanh.f32 %v659_v62  ;;  %v625_v38 = vmul.f32 0.6931472, %v1113_v3  ;;  %v1115_v14 = vpop.eup %1114  ;;  %v501_v34 = vsub.f32 0.0, %v488_v48  ;;  %vm639_vm8 = vcmp.lt.f32.partialorder %v638_v8, 0.0004427343 }
 0x173   : > { %v559_v15 = vsel %vm1583_vm5, %v556_v43, %v553_v11  ;;  %v1117_v18 = vpop.eup %1116  ;;  %v562_v23 = vmul.f32 0.6931472, %v1115_v14  ;;  %1130 = vpow2.f32 %v517_v13  ;;  %v519_v39 = vmul.f32 1.442695, %v500_v16 }
 0x174   : > { %v652_v21 = vadd.f32 %v559_v15, %v470_v26  ;;  %v631_v22 = vsel %vm1590_vm6, %v628_v59, %v625_v38  ;;  %v1119_v31 = vpop.eup %1118  ;;  %v634_v33 = vmul.f32 0.6931472, %v1117_v18  ;;  %v521_v6 = vmul.f32 1.442695, %v501_v34 }
 0x175   : > { %v660_v32 = vadd.f32 %v631_v22, %v478_v37  ;;  %v568_v35 = vsel %vm1603_vm7, %v565_v17, %v562_v23  ;;  %v569_v36 = vadd.f32 1.0, %v1119_v31  ;;  %v575_v50 = vand.u32 2147483647, %v1119_v31 }
 0x176   : > { %1132 = vtanh.f32 %v652_v21  ;;  %v653_v26 = vadd.f32 %v568_v35, %v471_v46  ;;  %v640_v24 = vsel %vm639_vm8, %v637_v4, %v634_v33  ;;  %v572_v46 = vmul.f32 -0.5, %v1119_v31 }
 0x177   : > { %1134 = vtanh.f32 %v660_v32  ;;  %v661_v37 = vadd.f32 %v640_v24, %v479_v55  ;;  %vm576_vm9 = vcmp.lt.f32.partialorder %v575_v50, 0.0004427343  ;;  %v473_v33 = vmax.f32 %v1580_v25, 0.0 }
 0x178   : > { %v1121_v40 = vpop.eup %1120  ;;  %1136 = vlog2.f32 %v569_v36  ;;  %v573_v59 = vadd.f32 1.0, %v572_v46 }
 0x179   : > { %v1123_v12 = vpop.eup %1122  ;;  %v676_v43 = vmul.f32 %v1121_v40, %v1503_v19  ;;  %1138 = vtanh.f32 %v653_v26 }
 0x17a   : > { %v1125_v44 = vpop.eup %1124  ;;  %v684_v30 = vmul.f32 %v1123_v12, %v1506_v20  ;;  %1140 = vtanh.f32 %v661_v37  ;;  %v574_v58 = vmul.f32 %v1119_v31, %v573_v59 }
 0x17b   : > { %v1127_v45 = vpop.eup %1126  ;;  %689 = vst [vmem:[%s1644_s11] sm:$0xff] %v676_v43  ;;  %v641_v55 = vadd.f32 1.0, %v1125_v44  ;;  %1142 = vpow2.f32 %v519_v39  ;;  %v644_v49 = vmul.f32 -0.5, %v1125_v44 }
 0x17c   : > { %v1129_v47 = vpop.eup %1128  ;;  %697 = vst [vmem:[%s1644_s11 + $0x40] sm:$0xff] %v684_v30  ;;  %v677_v19 = vmul.f32 %v1127_v45, %v1511_v27  ;;  %1144 = vpow2.f32 %v521_v6  ;;  %v474_v30 = vmax.f32 %v1614_v57, 0.0 }
 0x17d   : > { %v685_v56 = vmul.f32 %v1129_v47, %v1514_v28  ;;  %1146 = vlog2.f32 %v641_v55  ;;  %v1131_v20 = vpop.eup %1130  ;;  %v472_v28 = vmax.f32 %v1535_v1, 0.0  ;;  %v645_v3 = vadd.f32 1.0, %v644_v49 }
 0x17e   : > { %690 = vst [vmem:[%s1644_s11 + $0x8] sm:$0xff] %v677_v19  ;;  %v578_v60 = vadd.f32 1.0, %v1131_v20  ;;  %v581_v11 = vmul.f32 -0.5, %v1131_v20  ;;  %v584_v18 = vand.u32 2147483647, %v1131_v20  ;;  %v475_v47 = vmax.f32 %v1620_v2, 0.0 }
 0x17f   : > { %698 = vst [vmem:[%s1644_s11 + $0x48] sm:$0xff] %v685_v56  ;;  %v646_v16 = vmul.f32 %v1125_v44, %v645_v3 }
 0x180   : > { %v1133_v53 = vpop.eup %1132  ;;  %1148 = vlog2.f32 %v578_v60  ;;  %v582_v48 = vadd.f32 1.0, %v581_v11  ;;  %vm585_vm11 = vcmp.lt.f32.partialorder %v584_v18, 0.0004427343 }
 0x181   : > { %v1135_v61 = vpop.eup %1134  ;;  %v678_v63 = vmul.f32 %v1133_v53, %v1519_v41 }
 0x182   : > { %v1137_v9 = vpop.eup %1136  ;;  %v686_v27 = vmul.f32 %v1135_v61, %v1522_v42  ;;  %v647_v42 = vand.u32 2147483647, %v1125_v44  ;;  %v583_v31 = vmul.f32 %v1131_v20, %v582_v48 }
 0x183   : > { %v1139_v54 = vpop.eup %1138  ;;  %691 = vst [vmem:[%s1644_s11 + $0x10] sm:$0xff] %v678_v63  ;;  %v571_v10 = vmul.f32 0.6931472, %v1137_v9 }
 0x184   : > { %v1141_v62 = vpop.eup %1140  ;;  %699 = vst [vmem:[%s1644_s11 + $0x50] sm:$0xff] %v686_v27  ;;  %v679_v0 = vmul.f32 %v1139_v54, %v1527_v51  ;;  %v480_v51 = vmax.f32 %v1546_v29, 0.0  ;;  %vm648_vm10 = vcmp.lt.f32.partialorder %v647_v42, 0.0004427343 }
 0x185   : > { %v1143_v41 = vpop.eup %1142  ;;  %v687_v5 = vmul.f32 %v1141_v62, %v1530_v52  ;;  %v577_v7 = vsel %vm576_vm9, %v574_v58, %v571_v10  ;;  %v781_v10 = vld [vmem:[%s1644_s11 + $0x40] sm:$0xff] (%p1739_p11) }
 0x186   : > { %v1145_v38 = vpop.eup %1144  ;;  %692 = vst [vmem:[%s1644_s11 + $0x18] sm:$0xff] %v679_v0  ;;  %v654_v8 = vadd.f32 %v577_v7, %v472_v28  ;;  %v587_v13 = vadd.f32 1.0, %v1143_v41  ;;  %v590_v32 = vmul.f32 -0.5, %v1143_v41  ;;  %v593_v26 = vand.u32 2147483647, %v1143_v41  ;;  %782 = vst [vmem:[%s713_s23 + $0x80] sm:$0xff] (%p1739_p11), %v781_v10 }
 0x187   : > { %v1147_v14 = vpop.eup %1146  ;;  %700 = vst [vmem:[%s1644_s11 + $0x58] sm:$0xff] %v687_v5  ;;  %v596_v15 = vadd.f32 1.0, %v1145_v38  ;;  %v599_v4 = vmul.f32 -0.5, %v1145_v38  ;;  %v602_v40 = vand.u32 2147483647, %v1145_v38  ;;  %v783_v58 = vld [vmem:[%s1644_s11 + $0x48] sm:$0xff] (%p1739_p11) }
 0x188   : > { %1150 = vtanh.f32 %v654_v8  ;;  %v643_v17 = vmul.f32 0.6931472, %v1147_v14  ;;  %v591_v36 = vadd.f32 1.0, %v590_v32  ;;  %vm594_vm12 = vcmp.lt.f32.partialorder %v593_v26, 0.0004427343  ;;  %784 = vst [vmem:[%s713_s23 + $0x90] sm:$0xff] (%p1739_p11), %v783_v58 }
 0x189   : > { %1152 = vlog2.f32 %v587_v13  ;;  %v600_v24 = vadd.f32 1.0, %v599_v4  ;;  %vm603_vm13 = vcmp.lt.f32.partialorder %v602_v40, 0.0004427343 }
 0x18a   : > { %v649_v21 = vsel %vm648_vm10, %v646_v16, %v643_v17  ;;  %1154 = vlog2.f32 %v596_v15  ;;  %v1149_v52 = vpop.eup %1148  ;;  %v592_v44 = vmul.f32 %v1143_v41, %v591_v36 }
 0x18b   : > { %v662_v22 = vadd.f32 %v649_v21, %v480_v51  ;;  %v580_v23 = vmul.f32 0.6931472, %v1149_v52  ;;  %v601_v46 = vmul.f32 %v1145_v38, %v600_v24  ;;  %v785_v62 = vld [vmem:[%s1644_s11 + $0x50] sm:$0xff] (%p1739_p11) }
 0x18c   : > { %786 = vst [vmem:[%s713_s23 + $0xa0] sm:$0xff] (%p1739_p11), %v785_v62 }
 0x18d   : > { %1156 = vtanh.f32 %v662_v22  ;;  %v586_v34 = vsel %vm585_vm11, %v583_v31, %v580_v23 }
 0x18e   : > { %v655_v35 = vadd.f32 %v586_v34, %v473_v33  ;;  %v787_v0 = vld [vmem:[%s1644_s11 + $0x58] sm:$0xff] (%p1739_p11) }
 0x18f   : > { %788 = vst [vmem:[%s713_s23 + $0xb0] sm:$0xff] (%p1739_p11), %v787_v0 }
 0x190   : > { %1158 = vtanh.f32 %v655_v35 }
 0x192   : > { %v1151_v39 = vpop.eup %1150 }
 0x193   : > { %v1153_v37 = vpop.eup %1152  ;;  %v680_v6 = vmul.f32 %v1151_v39, %v1535_v1 }
 0x194   : > { %v1155_v12 = vpop.eup %1154  ;;  %v589_v43 = vmul.f32 0.6931472, %v1153_v37 }
 0x195   : > { %693 = vst [vmem:[%s1644_s11 + $0x20] sm:$0xff] %v680_v6  ;;  %v598_v45 = vmul.f32 0.6931472, %v1155_v12 }
 0x196   : > { %v595_v55 = vsel %vm594_vm12, %v592_v44, %v589_v43 }
 0x197   : > { %v1157_v19 = vpop.eup %1156  ;;  %v656_v56 = vadd.f32 %v595_v55, %v474_v30  ;;  %v604_v1 = vsel %vm603_vm13, %v601_v46, %v598_v45 }
 0x198   : > { %v688_v20 = vmul.f32 %v1157_v19, %v1546_v29  ;;  %v657_v59 = vadd.f32 %v604_v1, %v475_v47  ;;  %v765_v29 = vld [vmem:[%s1644_s11] sm:$0xff] (%p1739_p11) }
 0x199   : > { %1160 = vtanh.f32 %v656_v56  ;;  %766 = vst [vmem:[%s713_s23] sm:$0xff] (%p1739_p11), %v765_v29 }
 0x19a   : > { %701 = vst [vmem:[%s1644_s11 + $0x60] sm:$0xff] %v688_v20  ;;  %1162 = vtanh.f32 %v657_v59  ;;  %v1159_v60 = vpop.eup %1158 }
 0x19b   : > { %v681_v53 = vmul.f32 %v1159_v60, %v1580_v25  ;;  %v767_v25 = vld [vmem:[%s1644_s11 + $0x8] sm:$0xff] (%p1739_p11) }
 0x19c   : > { %v773_v9 = vld [vmem:[%s1644_s11 + $0x20] sm:$0xff] (%p1739_p11)  ;;  %768 = vst [vmem:[%s713_s23 + $0x10] sm:$0xff] (%p1739_p11), %v767_v25 }
 0x19d   : > { %694 = vst [vmem:[%s1644_s11 + $0x28] sm:$0xff] %v681_v53  ;;  %774 = vst [vmem:[%s713_s23 + $0x40] sm:$0xff] (%p1739_p11), %v773_v9 }
 0x1a1   : > { %708 = sbr.rel (!%p1739_p11) target bundleno = 432 (0x1b0), region = 44  ;;  %v789_v3 = vld [vmem:[%s1644_s11 + $0x60] sm:$0xff] (%p1739_p11) }
 0x1a2   : > { %790 = vst [vmem:[%s713_s23 + $0xc0] sm:$0xff] (%p1739_p11), %v789_v3 }
 0x1a3   : > { %v1161_v50 = vpop.eup %1160 }
 0x1a4   : > { %v1163_v49 = vpop.eup %1162  ;;  %v682_v61 = vmul.f32 %v1161_v50, %v1614_v57  ;;  %v769_v57 = vld [vmem:[%s1644_s11 + $0x10] sm:$0xff] (%p1739_p11)  ;;  %v775_v27 = vld [vmem:[%s1644_s11 + $0x28] sm:$0xff] (%p1739_p11) }
 0x1a5   : > { %v683_v63 = vmul.f32 %v1163_v49, %v1620_v2  ;;  %v771_v2 = vld [vmem:[%s1644_s11 + $0x18] sm:$0xff] (%p1739_p11)  ;;  %770 = vst [vmem:[%s713_s23 + $0x20] sm:$0xff] (%p1739_p11), %v769_v57  ;;  %776 = vst [vmem:[%s713_s23 + $0x50] sm:$0xff] (%p1739_p11), %v775_v27 }
 0x1a6   : > { %695 = vst [vmem:[%s1644_s11 + $0x30] sm:$0xff] %v682_v61  ;;  %772 = vst [vmem:[%s713_s23 + $0x30] sm:$0xff] (%p1739_p11), %v771_v2 }
 0x1a7   : > { %696 = vst [vmem:[%s1644_s11 + $0x38] sm:$0xff] %v683_v63 }
 0x1ad   : > { %v777_v54 = vld [vmem:[%s1644_s11 + $0x30] sm:$0xff] }
 0x1ae   : > { %v779_v28 = vld [vmem:[%s1644_s11 + $0x38] sm:$0xff]  ;;  %778 = vst [vmem:[%s713_s23 + $0x60] sm:$0xff] %v777_v54 }
 0x1af   : > { %780 = vst [vmem:[%s713_s23 + $0x70] sm:$0xff] %v779_v28 }
 0x1b0 PF: > { %s19_s17 = sadd.s32 1, %s1278_s17   ;;  %s1740_s12 = smov %s1262_s13 }
 0x1b1   : > { %p16_p0 = scmp.ge.s32.totalorder %s19_s17, 4   ;;  %s1741_s13 = smov %s1266_s14 }
 0x1b2   : > { %s1742_s14 = smov %s1355_s24  ;;  %s1743_s15 = smov %s1274_s16 }
 0x1b3   : > { %s1744_s16 = smov %s1746_s19  ;;  %18 = sbr.rel (!%p16_p0) target bundleno = 6 (0x6), region = 126 }
 0x1ba   :  { %806 = vsyncpa [#allocation3], 1 }
 0x1bb   :  { %808 = vsyncpa [#allocation3 + $0x1], 1 }
 0x1bc   :  { %809 = vsyncpa [#allocation5], 1 }
 0x1bd   :  { %811 = vsyncpa [#allocation5 + $0x1], 1 }

// kernel: forward.7
= control target key start
LH: loop header
LB: loop body
LE: loop exit
PB: predicated region body
PF: predicated region fallthrough
CT: control target
= control target key end

     0   :  { %8 = vsyncpa [#allocation3], 0  ;;  %s1572_s0 = inlined_call_operand.vmem [shape: bf16[104,512], index: 0, kind: input, shape index: {}]   ;;  %s1573_s1 = inlined_call_operand.hbm [shape: bf16[512,128], index: 1, kind: input, shape index: {}]   ;;  %s1574_s2 = inlined_call_operand.hbm [shape: f32[1,128], index: 2, kind: input, shape index: {}]   ;;  %s1575_s3 = inlined_call_operand.vmem [shape: f32[104,128], index: 3, kind: output, shape index: {}]  }
   0x1   :  { %9 = vsyncpa [#allocation5], 0  ;;  %s1259_s12 = smov [#allocation2]   ;;  %s1211_s16 = scalar_lea.hbm %s1573_s1, 4096 }
   0x2   :  { %s17_s13 = sshll.u32 %s1259_s12, 4  ;;  %p1212_p0 = scmp.ne.s32.totalorder %s1573_s1, %s1211_s16  ;;  %s18_s13 = int_to_ptr.vmem [resolvable:$true] %s17_s13 }
   0x3   :  { %p1215_p1 = scmp.lt.u32.totalorder %s1211_s16, %s1573_s1 }
   0x5   :  { %p1217_p2 = pnand %p1215_p1, %p1212_p0 }
   0x7   :  { %1220 = shalt.err (!%p1217_p2)
}
   0x8   :  { %s1221_s21 = scalar_lea.vmem %s18_s13, 4096  ;;  %p1226_p4 = scmp.lt.s32.totalorder %s18_s13, %s18_s13 }
   0x9   :  { %p1222_p3 = scmp.ne.s32.totalorder %s18_s13, %s1221_s21  ;;  %p1227_p5 = scmp.lt.s32.totalorder %s1221_s21, %s1221_s21 }
   0xb   :  { %p1228_p6 = por %p1227_p5, %p1226_p4 }
   0xd   :  { %p1229_p7 = pnand %p1228_p6, %p1222_p3 }
   0xf   :  { %1232 = shalt.err (!%p1229_p7)
}
  0x10   :  { %s1260_s22 = smov 64   ;;  %s1261_s23 = smov 4  }
  0x11   :  { %23 = dma.hbm_to_vmem [thread:$0]  %s1573_s1, 4096, %s18_s13, [#allocation3], %s1260_s22, %s1260_s22, %s1261_s23  }
  0x12   :  { %s1262_s26 = smov [#allocation4]   ;;  %s1233_s30 = scalar_lea.hbm %s1574_s2, 16 }
  0x13   :  { %s30_s27 = sshll.u32 %s1262_s26, 4  ;;  %p1234_p8 = scmp.ne.s32.totalorder %s1574_s2, %s1233_s30  ;;  %s31_s27 = int_to_ptr.vmem [resolvable:$true] %s30_s27 }
  0x14   :  { %p1237_p9 = scmp.lt.u32.totalorder %s1233_s30, %s1574_s2 }
  0x16   :  { %p1239_p10 = pnand %p1237_p9, %p1234_p8 }
  0x18   :  { %1242 = shalt.err (!%p1239_p10)
}
  0x19   :  { %s1243_s8 = scalar_lea.vmem %s31_s27, 16  ;;  %s1247_s1 = scalar_lea.vmem %s31_s27, 32 }
  0x1a   :  { %p1244_p11 = scmp.ne.s32.totalorder %s31_s27, %s1243_s8  ;;  %p1248_p12 = scmp.lt.s32.totalorder %s31_s27, %s31_s27 }
  0x1b   :  { %p1249_p13 = scmp.lt.s32.totalorder %s1247_s1, %s1243_s8 }
  0x1d   :  { %p1250_p0 = por %p1249_p13, %p1248_p12 }
  0x1f   :  { %p1251_p1 = pnand %p1250_p0, %p1244_p11 }
  0x21   :  { %1254 = shalt.err (!%p1251_p1)
}
  0x22   :  { %33 = dma.hbm_to_vmem [thread:$0]  %s1574_s2, 16, %s31_s27, [#allocation5]  }
  0x23   :  { %1255 = dma.done.wait [#allocation3], 4096  }
  0x24   :  { %1256 = vsyncadd [#allocation3], 4294963200 }
  0x25   :  { %1257 = dma.done.wait [#allocation5], 16  }
  0x26   :  { %1258 = vsyncadd [#allocation5], 4294967280  ;;  %v1061_v0 = vld [vmem:[#allocation2 + $0x40] sm:$0xff]   ;;  %v1065_v4 = vld [vmem:[#allocation2 + $0x48] sm:$0xff]  }
  0x27   :  { %v1062_v1 = vld [vmem:[#allocation2 + $0xc0] sm:$0xff]   ;;  %941 = vmatprep.subr.bf16.mxu0 %v1061_v0  ;;  %v1066_v5 = vld [vmem:[#allocation2 + $0xc8] sm:$0xff]   ;;  %v1069_v8 = vld [vmem:[#allocation2 + $0x50] sm:$0xff]  }
  0x28   :  { %v1063_v2 = vld [vmem:[#allocation2] sm:$0xff]   ;;  %999 = vmatprep.subr.bf16.mxu1 %v1062_v1  ;;  %v1067_v6 = vld [vmem:[#allocation2 + $0x8] sm:$0xff]   ;;  %v1070_v9 = vld [vmem:[#allocation2 + $0xd0] sm:$0xff]  }
  0x29   :  { %v1064_v3 = vld [vmem:[#allocation2 + $0x80] sm:$0xff]   ;;  %942 = vmatpush3.bf16.msra.mxu0 %v1063_v2  ;;  %v1068_v7 = vld [vmem:[#allocation2 + $0x88] sm:$0xff]   ;;  %v1071_v10 = vld [vmem:[#allocation2 + $0x10] sm:$0xff]  }
  0x2a   :  { %1000 = vmatpush3.bf16.msra.mxu1 %v1064_v3  ;;  %943 = vmatprep.subr.bf16.mxu0 %v1065_v4  ;;  %v1072_v11 = vld [vmem:[#allocation2 + $0x90] sm:$0xff]   ;;  %v1073_v12 = vld [vmem:[#allocation2 + $0x58] sm:$0xff]   ;;  %v1077_v16 = vld [vmem:[#allocation2 + $0x60] sm:$0xff]  }
  0x2b   :  { %1001 = vmatprep.subr.bf16.mxu1 %v1066_v5  ;;  %v1074_v13 = vld [vmem:[#allocation2 + $0xd8] sm:$0xff]   ;;  %v1078_v17 = vld [vmem:[#allocation2 + $0xe0] sm:$0xff]   ;;  %v1081_v20 = vld [vmem:[#allocation2 + $0x68] sm:$0xff]  }
  0x2c   :  { %v1075_v14 = vld [vmem:[#allocation2 + $0x18] sm:$0xff]   ;;  %v1079_v18 = vld [vmem:[#allocation2 + $0x20] sm:$0xff]   ;;  %v1082_v21 = vld [vmem:[#allocation2 + $0xe8] sm:$0xff]  }
  0x2d   :  { %944 = vmatpush3.bf16.msra.mxu0 %v1067_v6  ;;  %v1076_v15 = vld [vmem:[#allocation2 + $0x98] sm:$0xff]   ;;  %v1080_v19 = vld [vmem:[#allocation2 + $0xa0] sm:$0xff]   ;;  %v1083_v22 = vld [vmem:[#allocation2 + $0x28] sm:$0xff]  }
  0x2e   :  { %1002 = vmatpush3.bf16.msra.mxu1 %v1068_v7  ;;  %945 = vmatprep.subr.bf16.mxu0 %v1069_v8  ;;  %v1084_v23 = vld [vmem:[#allocation2 + $0xa8] sm:$0xff]   ;;  %v1085_v24 = vld [vmem:[#allocation2 + $0x70] sm:$0xff]   ;;  %v1089_v28 = vld [vmem:[#allocation2 + $0x78] sm:$0xff]  }
  0x2f   :  { %1003 = vmatprep.subr.bf16.mxu1 %v1070_v9  ;;  %v1086_v25 = vld [vmem:[#allocation2 + $0xf0] sm:$0xff]   ;;  %v1090_v29 = vld [vmem:[#allocation2 + $0xf8] sm:$0xff]   ;;  %v65_v54 = vld [vmem:[%s1572_s0 + $0xc0] sm:$0xff] }
  0x30   :  { %v1087_v26 = vld [vmem:[#allocation2 + $0x30] sm:$0xff]   ;;  %v1091_v30 = vld [vmem:[#allocation2 + $0x38] sm:$0xff]   ;;  %v66_v55 = vld [vmem:[%s1572_s0 + $0xc8] sm:$0xff]  ;;  %v906_v58 = vcombine.high %v65_v54, %v65_v54  ;;  %v905_v60 = vcombine.low %v65_v54, %v65_v54 }
  0x31   :  { %946 = vmatpush3.bf16.msra.mxu0 %v1071_v10  ;;  %v1088_v27 = vld [vmem:[#allocation2 + $0xb0] sm:$0xff]   ;;  %v1092_v31 = vld [vmem:[#allocation2 + $0xb8] sm:$0xff]   ;;  %v908_v59 = vcombine.high %v66_v55, %v66_v55  ;;  %v907_v61 = vcombine.low %v66_v55, %v66_v55  ;;  %v1385_v0 = vld [vmem:[#allocation4] ss:$0 sm:$0xff] }
  0x32   :  { %1004 = vmatpush3.bf16.msra.mxu1 %v1072_v11  ;;  %947 = vmatprep.subr.bf16.mxu0 %v1073_v12  ;;  %v1093_v32 = vld [vmem:[%s1572_s0] ss:$16 sps:$4 sm:$0xff]   ;;  %v1095_v33 = vld [vmem:[%s1572_s0 + $0x4] ss:$16 sps:$4 sm:$0xff]   ;;  %v1096_v34 = vld [vmem:[%s1572_s0 + $0x8] ss:$16 sps:$4 sm:$0xff]  }
  0x33   :  { %1005 = vmatprep.subr.bf16.mxu1 %v1074_v13  ;;  %v1098_v35 = vld [vmem:[%s1572_s0 + $0xc] ss:$16 sps:$4 sm:$0xff]   ;;  %496 = vmatprep.mubr.bf16.mxu0 %v1095_v33  ;;  %v1099_v36 = vld [vmem:[%s1572_s0 + $0x24] ss:$16 sps:$4 sm:$0xff]   ;;  %v1103_v38 = vld [vmem:[%s1572_s0 + $0x20] ss:$16 sps:$4 sm:$0xff]  }
  0x34   :  { %584 = vmatprep.mubr.bf16.mxu1 %v1098_v35  ;;  %v1101_v37 = vld [vmem:[%s1572_s0 + $0x2c] ss:$16 sps:$4 sm:$0xff]   ;;  %v1104_v39 = vld [vmem:[%s1572_s0 + $0x28] ss:$16 sps:$4 sm:$0xff]   ;;  %v1105_v40 = vld [vmem:[%s1572_s0 + $0x44] ss:$16 sps:$4 sm:$0xff]  }
  0x35   :  { %948 = vmatpush3.bf16.msra.mxu0 %v1075_v14  ;;  %v1107_v41 = vld [vmem:[%s1572_s0 + $0x4c] ss:$16 sps:$4 sm:$0xff]   ;;  %v1109_v42 = vld [vmem:[%s1572_s0 + $0x40] ss:$16 sps:$4 sm:$0xff]   ;;  %v1110_v43 = vld [vmem:[%s1572_s0 + $0x48] ss:$16 sps:$4 sm:$0xff]  }
  0x36   :  { %1006 = vmatpush3.bf16.msra.mxu1 %v1076_v15  ;;  %949 = vmatprep.subr.bf16.mxu0 %v1077_v16  ;;  %v1111_v44 = vld [vmem:[%s1572_s0 + $0x64] ss:$16 sps:$4 sm:$0xff]   ;;  %v1113_v45 = vld [vmem:[%s1572_s0 + $0x6c] ss:$16 sps:$4 sm:$0xff]   ;;  %v1115_v46 = vld [vmem:[%s1572_s0 + $0x60] ss:$16 sps:$4 sm:$0xff]  }
  0x37   :  { %1007 = vmatprep.subr.bf16.mxu1 %v1078_v17  ;;  %v1116_v47 = vld [vmem:[%s1572_s0 + $0x68] ss:$16 sps:$4 sm:$0xff]   ;;  %v1117_v48 = vld [vmem:[%s1572_s0 + $0x84] ss:$16 sps:$4 sm:$0xff]   ;;  %v1119_v49 = vld [vmem:[%s1572_s0 + $0x8c] ss:$16 sps:$4 sm:$0xff]  }
  0x38   :  { %v1121_v50 = vld [vmem:[%s1572_s0 + $0x80] ss:$16 sps:$4 sm:$0xff]   ;;  %v1122_v51 = vld [vmem:[%s1572_s0 + $0x88] ss:$16 sps:$4 sm:$0xff]   ;;  %v1123_v52 = vld [vmem:[%s1572_s0 + $0xa4] ss:$16 sps:$4 sm:$0xff]  }
  0x39   :  { %950 = vmatpush3.bf16.msra.mxu0 %v1079_v18  ;;  %v1125_v53 = vld [vmem:[%s1572_s0 + $0xac] ss:$16 sps:$4 sm:$0xff]   ;;  %v1127_v56 = vld [vmem:[%s1572_s0 + $0xa0] ss:$16 sps:$4 sm:$0xff]   ;;  %v1128_v57 = vld [vmem:[%s1572_s0 + $0xa8] ss:$16 sps:$4 sm:$0xff]  }
  0x3a   :  { %1008 = vmatpush3.bf16.msra.mxu1 %v1080_v19  ;;  %951 = vmatprep.subr.bf16.mxu0 %v1081_v20 }
  0x3b   :  { %1009 = vmatprep.subr.bf16.mxu1 %v1082_v21 }
  0x3d   :  { %952 = vmatpush3.bf16.msra.mxu0 %v1083_v22 }
  0x3e   :  { %1010 = vmatpush3.bf16.msra.mxu1 %v1084_v23  ;;  %953 = vmatprep.subr.bf16.mxu0 %v1085_v24 }
  0x3f   :  { %1011 = vmatprep.subr.bf16.mxu1 %v1086_v25 }
  0x41   :  { %954 = vmatpush3.bf16.msra.mxu0 %v1087_v26 }
  0x42   :  { %1012 = vmatpush3.bf16.msra.mxu1 %v1088_v27  ;;  %955 = vmatprep.subr.bf16.mxu0 %v1089_v28 }
  0x43   :  { %1013 = vmatprep.subr.bf16.mxu1 %v1090_v29 }
  0x45   :  { %956 = vmatpush3.bf16.msra.mxu0 %v1091_v30 }
  0x46   :  { %1014 = vmatpush3.bf16.msra.mxu1 %v1092_v31 }
  0x48   :  { %497 = vmatmul.mubr.bf16.vlgmr.msra.gmra.mrb[0].mxu0 %v1093_v32 }
  0x49   :  { %585 = vmatmul.mubr.bf16.vlgmr.msra.gmra.mrb[0].mxu1 %v1096_v34  ;;  %504 = vmatprep.mubr.bf16.mxu0 %v1099_v36 }
  0x4a   :  { %592 = vmatprep.mubr.bf16.mxu1 %v1101_v37 }
  0x50   :  { %505 = vmatmul.mubr.bf16.gmra.mrb[4].mxu0 %v1103_v38 }
  0x51   :  { %593 = vmatmul.mubr.bf16.gmra.mrb[4].mxu1 %v1104_v39  ;;  %512 = vmatprep.mubr.bf16.mxu0 %v1105_v40 }
  0x52   :  { %600 = vmatprep.mubr.bf16.mxu1 %v1107_v41 }
  0x58   :  { %513 = vmatmul.mubr.bf16.gmra.mrb[8].mxu0 %v1109_v42 }
  0x59   :  { %601 = vmatmul.mubr.bf16.gmra.mrb[8].mxu1 %v1110_v43  ;;  %520 = vmatprep.mubr.bf16.mxu0 %v1111_v44 }
  0x5a   :  { %608 = vmatprep.mubr.bf16.mxu1 %v1113_v45 }
  0x60   :  { %521 = vmatmul.mubr.bf16.gmra.mrb[12].mxu0 %v1115_v46 }
  0x61   :  { %609 = vmatmul.mubr.bf16.gmra.mrb[12].mxu1 %v1116_v47  ;;  %528 = vmatprep.mubr.bf16.mxu0 %v1117_v48 }
  0x62   :  { %616 = vmatprep.mubr.bf16.mxu1 %v1119_v49 }
  0x68   :  { %529 = vmatmul.mubr.bf16.gmra.mrb[16].mxu0 %v1121_v50 }
  0x69   :  { %617 = vmatmul.mubr.bf16.gmra.mrb[16].mxu1 %v1122_v51  ;;  %536 = vmatprep.mubr.bf16.mxu0 %v1123_v52 }
  0x6a   :  { %624 = vmatprep.mubr.bf16.mxu1 %v1125_v53 }
  0x70   :  { %537 = vmatmul.mubr.bf16.gmra.mrb[20].mxu0 %v1127_v56 }
  0x71   :  { %625 = vmatmul.mubr.bf16.gmra.mrb[20].mxu1 %v1128_v57  ;;  %544 = vmatprep.mubr.bf16.mxu0 %v906_v58 }
  0x72   :  { %632 = vmatprep.mubr.bf16.mxu1 %v908_v59 }
  0x78   :  { %545 = vmatmul.mubr.bf16.gmra.mrb[24].mxu0 %v905_v60 }
  0x79   :  { %633 = vmatmul.mubr.bf16.gmra.mrb[24].mxu1 %v907_v61 }
 0x11b   :  { %v957_v62 = vpop.f32.mrb[0].mxu0 }
 0x11c   :  { %v1015_v63 = vpop.f32.mrb[0].mxu1  ;;  %v958_v1 = vpop.f32.mrb[1].mxu0 }
 0x11d   :  { %v959_v2 = vadd.f32 %v958_v1, %v957_v62  ;;  %v1016_v3 = vpop.f32.mrb[1].mxu1  ;;  %v960_v4 = vpop.f32.mrb[2].mxu0 }
 0x11e   :  { %v1017_v5 = vadd.f32 %v1016_v3, %v1015_v63  ;;  %v1018_v6 = vpop.f32.mrb[2].mxu1  ;;  %v961_v7 = vpop.f32.mrb[3].mxu0 }
 0x11f   :  { %v499_v8 = vadd.f32 %v959_v2, %v1385_v0  ;;  %v962_v9 = vadd.f32 %v961_v7, %v960_v4  ;;  %v1019_v10 = vpop.f32.mrb[3].mxu1 }
 0x120   :  { %v1020_v11 = vadd.f32 %v1019_v10, %v1018_v6 }
 0x121   :  { %v1388_v12 = vadd.f32 %v1017_v5, %v499_v8  ;;  %v502_v13 = vadd.f32 %v962_v9, %v1385_v0 }
 0x123   :  { %v653_v14 = vand.u32 2147483647, %v1388_v12  ;;  %v1392_v15 = vadd.f32 %v1020_v11, %v502_v13  ;;  %v963_v16 = vpop.f32.mrb[4].mxu0 }
 0x124   :  { %v1021_v17 = vpop.f32.mrb[4].mxu1  ;;  %v964_v18 = vpop.f32.mrb[5].mxu0 }
 0x125   :  { %v666_v19 = vsub.f32 0.0, %v653_v14  ;;  %v654_v20 = vand.u32 2147483647, %v1392_v15  ;;  %v965_v21 = vadd.f32 %v964_v18, %v963_v16  ;;  %v1022_v22 = vpop.f32.mrb[5].mxu1  ;;  %v966_v23 = vpop.f32.mrb[6].mxu0 }
 0x126   :  { %v1023_v24 = vadd.f32 %v1022_v22, %v1021_v17  ;;  %v1024_v25 = vpop.f32.mrb[6].mxu1  ;;  %v967_v26 = vpop.f32.mrb[7].mxu0 }
 0x127   :  { %v679_v27 = vmul.f32 1.442695, %v666_v19  ;;  %v667_v28 = vsub.f32 0.0, %v654_v20  ;;  %v507_v29 = vadd.f32 %v965_v21, %v1385_v0  ;;  %v968_v30 = vadd.f32 %v967_v26, %v966_v23  ;;  %v1025_v31 = vpop.f32.mrb[7].mxu1 }
 0x128   :  { %v1026_v32 = vadd.f32 %v1025_v31, %v1024_v25 }
 0x129   :  { %1133 = vpow2.f32 %v679_v27  ;;  %v681_v33 = vmul.f32 1.442695, %v667_v28  ;;  %v1396_v34 = vadd.f32 %v1023_v24, %v507_v29  ;;  %v510_v35 = vadd.f32 %v968_v30, %v1385_v0 }
 0x12a   :  { %v640_v28 = vmax.f32 %v1388_v12, 0.0 }
 0x12b   :  { %1135 = vpow2.f32 %v681_v33  ;;  %v655_v36 = vand.u32 2147483647, %v1396_v34  ;;  %v1400_v37 = vadd.f32 %v1026_v32, %v510_v35  ;;  %v969_v38 = vpop.f32.mrb[8].mxu0  ;;  %v641_v33 = vmax.f32 %v1392_v15, 0.0 }
 0x12c   :  { %v1027_v39 = vpop.f32.mrb[8].mxu1  ;;  %v970_v40 = vpop.f32.mrb[9].mxu0 }
 0x12d   :  { %v668_v41 = vsub.f32 0.0, %v655_v36  ;;  %v656_v42 = vand.u32 2147483647, %v1400_v37  ;;  %v971_v43 = vadd.f32 %v970_v40, %v969_v38  ;;  %v1028_v44 = vpop.f32.mrb[9].mxu1  ;;  %v972_v45 = vpop.f32.mrb[10].mxu0 }
 0x12e   :  { %v1029_v46 = vadd.f32 %v1028_v44, %v1027_v39  ;;  %v1030_v47 = vpop.f32.mrb[10].mxu1  ;;  %v973_v48 = vpop.f32.mrb[11].mxu0 }
 0x12f   :  { %v683_v49 = vmul.f32 1.442695, %v668_v41  ;;  %v669_v50 = vsub.f32 0.0, %v656_v42  ;;  %v515_v51 = vadd.f32 %v971_v43, %v1385_v0  ;;  %v974_v52 = vadd.f32 %v973_v48, %v972_v45  ;;  %v1031_v53 = vpop.f32.mrb[11].mxu1 }
 0x130   :  { %v1032_v54 = vadd.f32 %v1031_v53, %v1030_v47  ;;  %v642_v42 = vmax.f32 %v1396_v34, 0.0 }
 0x131   :  { %1137 = vpow2.f32 %v683_v49  ;;  %v685_v55 = vmul.f32 1.442695, %v669_v50  ;;  %v1404_v56 = vadd.f32 %v1029_v46, %v515_v51  ;;  %v518_v57 = vadd.f32 %v974_v52, %v1385_v0 }
 0x133   :  { %v1134_v58 = vpop.eup %1133  ;;  %1139 = vpow2.f32 %v685_v55  ;;  %v657_v59 = vand.u32 2147483647, %v1404_v56  ;;  %v1408_v60 = vadd.f32 %v1032_v54, %v518_v57  ;;  %v975_v61 = vpop.f32.mrb[12].mxu0 }
 0x134   :  { %v705_v62 = vadd.f32 1.0, %v1134_v58  ;;  %v1033_v63 = vpop.f32.mrb[12].mxu1  ;;  %v976_v1 = vpop.f32.mrb[13].mxu0  ;;  %v708_v11 = vmul.f32 -0.5, %v1134_v58  ;;  %v711_v21 = vand.u32 2147483647, %v1134_v58 }
 0x135   :  { %v1136_v2 = vpop.eup %1135  ;;  %v670_v3 = vsub.f32 0.0, %v657_v59  ;;  %v658_v4 = vand.u32 2147483647, %v1408_v60  ;;  %v977_v5 = vadd.f32 %v976_v1, %v975_v61  ;;  %v1034_v6 = vpop.f32.mrb[13].mxu1 }
 0x136   :  { %v978_v7 = vpop.f32.mrb[14].mxu0  ;;  %1141 = vlog2.f32 %v705_v62  ;;  %v714_v8 = vadd.f32 1.0, %v1136_v2  ;;  %v1036_v9 = vpop.f32.mrb[14].mxu1  ;;  %v1035_v17 = vadd.f32 %v1034_v6, %v1033_v63  ;;  %v717_v19 = vmul.f32 -0.5, %v1136_v2 }
 0x137   :  { %v979_v10 = vpop.f32.mrb[15].mxu0  ;;  %v687_v13 = vmul.f32 1.442695, %v670_v3  ;;  %v671_v14 = vsub.f32 0.0, %v658_v4  ;;  %v523_v16 = vadd.f32 %v977_v5, %v1385_v0  ;;  %v1037_v18 = vpop.f32.mrb[15].mxu1  ;;  %v709_v26 = vadd.f32 1.0, %v708_v11 }
 0x138   :  { %1143 = vlog2.f32 %v714_v8  ;;  %v980_v23 = vadd.f32 %v979_v10, %v978_v7  ;;  %v1038_v24 = vadd.f32 %v1037_v18, %v1036_v9  ;;  %v720_v29 = vand.u32 2147483647, %v1136_v2 }
 0x139   :  { %1145 = vpow2.f32 %v687_v13  ;;  %v689_v20 = vmul.f32 1.442695, %v671_v14  ;;  %v1412_v22 = vadd.f32 %v1035_v17, %v523_v16  ;;  %v718_v35 = vadd.f32 1.0, %v717_v19 }
 0x13a   :  { %v526_v38 = vadd.f32 %v980_v23, %v1385_v0  ;;  %vm1423_vm0 = vcmp.lt.f32.partialorder %v711_v21, 0.0004427343  ;;  %v710_v46 = vmul.f32 %v1134_v58, %v709_v26  ;;  %vm1433_vm1 = vcmp.lt.f32.partialorder %v720_v29, 0.0004427343 }
 0x13b   :  { %v1414_v25 = vpop.eup %1137  ;;  %1147 = vpow2.f32 %v689_v20  ;;  %v981_v27 = vpop.f32.mrb[16].mxu0  ;;  %v659_v36 = vand.u32 2147483647, %v1412_v22  ;;  %v719_v59 = vmul.f32 %v1136_v2, %v718_v35 }
 0x13c   :  { %v723_v30 = vadd.f32 1.0, %v1414_v25  ;;  %v1039_v31 = vpop.f32.mrb[16].mxu1  ;;  %v982_v39 = vpop.f32.mrb[17].mxu0  ;;  %v726_v47 = vmul.f32 -0.5, %v1414_v25  ;;  %v1430_v49 = vadd.f32 %v1038_v24, %v526_v38  ;;  %v729_v58 = vand.u32 2147483647, %v1414_v25 }
 0x13d   :  { %v1418_v32 = vpop.eup %1139  ;;  %v1040_v40 = vpop.f32.mrb[17].mxu1  ;;  %v672_v48 = vsub.f32 0.0, %v659_v36  ;;  %v983_v54 = vadd.f32 %v982_v39, %v981_v27 }
 0x13e   :  { %1149 = vlog2.f32 %v723_v30  ;;  %v732_v43 = vadd.f32 1.0, %v1418_v32  ;;  %v984_v44 = vpop.f32.mrb[18].mxu0  ;;  %v1042_v45 = vpop.f32.mrb[18].mxu1  ;;  %v735_v53 = vmul.f32 -0.5, %v1418_v32  ;;  %v1041_v55 = vadd.f32 %v1040_v40, %v1039_v31 }
 0x13f   :  { %v985_v50 = vpop.f32.mrb[19].mxu0  ;;  %v1043_v51 = vpop.f32.mrb[19].mxu1  ;;  %v691_v63 = vmul.f32 1.442695, %v672_v48  ;;  %v660_v1 = vand.u32 2147483647, %v1430_v49  ;;  %v531_v3 = vadd.f32 %v983_v54, %v1385_v0 }
 0x140   :  { %v1142_v52 = vpop.eup %1141  ;;  %1151 = vlog2.f32 %v732_v43  ;;  %v986_v4 = vadd.f32 %v985_v50, %v984_v44  ;;  %v727_v2 = vadd.f32 1.0, %v726_v47  ;;  %v1044_v8 = vadd.f32 %v1043_v51, %v1042_v45 }
 0x141   :  { %v707_v57 = vmul.f32 0.6931472, %v1142_v52  ;;  %v736_v11 = vadd.f32 1.0, %v735_v53  ;;  %v738_v13 = vand.u32 2147483647, %v1418_v32  ;;  %1153 = vpow2.f32 %v691_v63 }
 0x142   :  { %v1144_v62 = vpop.eup %1143  ;;  %v673_v20 = vsub.f32 0.0, %v660_v1  ;;  %v1450_v21 = vadd.f32 %v1041_v55, %v531_v3  ;;  %vm1452_vm2 = vcmp.lt.f32.partialorder %v729_v58, 0.0004427343  ;;  %v728_v31 = vmul.f32 %v1414_v25, %v727_v2 }
 0x143   :  { %v1440_v5 = vpop.eup %1145  ;;  %v713_v6 = vsel %vm1423_vm0, %v710_v46, %v707_v57  ;;  %v716_v7 = vmul.f32 0.6931472, %v1144_v62  ;;  %v987_v9 = vpop.f32.mrb[20].mxu0  ;;  %vm1461_vm3 = vcmp.lt.f32.partialorder %v738_v13, 0.0004427343  ;;  %v534_v47 = vadd.f32 %v986_v4, %v1385_v0 }
 0x144   :  { %v822_v10 = vadd.f32 %v713_v6, %v640_v28  ;;  %v741_v14 = vadd.f32 1.0, %v1440_v5  ;;  %v1045_v16 = vpop.f32.mrb[20].mxu1  ;;  %v988_v17 = vpop.f32.mrb[21].mxu0  ;;  %v643_v28 = vmax.f32 %v1400_v37, 0.0  ;;  %v744_v35 = vmul.f32 -0.5, %v1440_v5 }
 0x145   :  { %v1446_v18 = vpop.eup %1147  ;;  %v722_v19 = vsel %vm1433_vm1, %v719_v59, %v716_v7  ;;  %v1046_v23 = vpop.f32.mrb[21].mxu1  ;;  %v693_v41 = vmul.f32 1.442695, %v673_v20  ;;  %v747_v44 = vand.u32 2147483647, %v1440_v5  ;;  %v989_v48 = vadd.f32 %v988_v17, %v987_v9 }
 0x146   :  { %v990_v24 = vpop.f32.mrb[22].mxu0  ;;  %1155 = vtanh.f32 %v822_v10  ;;  %v823_v26 = vadd.f32 %v722_v19, %v641_v33  ;;  %v1048_v29 = vpop.f32.mrb[22].mxu1  ;;  %v750_v36 = vadd.f32 1.0, %v1446_v18  ;;  %v737_v33 = vmul.f32 %v1418_v32, %v736_v11 }
 0x147   :  { %v991_v30 = vpop.f32.mrb[23].mxu0  ;;  %1157 = vlog2.f32 %v741_v14  ;;  %v1049_v38 = vpop.f32.mrb[23].mxu1  ;;  %v753_v25 = vmul.f32 -0.5, %v1446_v18  ;;  %v661_v46 = vand.u32 2147483647, %v1450_v21  ;;  %v745_v51 = vadd.f32 1.0, %v744_v35 }
 0x148   :  { %v1150_v39 = vpop.eup %1149  ;;  %1159 = vtanh.f32 %v823_v26  ;;  %v1047_v52 = vadd.f32 %v1046_v23, %v1045_v16  ;;  %v1473_v57 = vadd.f32 %v1044_v8, %v534_v47  ;;  %v539_v59 = vadd.f32 %v989_v48, %v1385_v0 }
 0x149   :  { %v725_v43 = vmul.f32 0.6931472, %v1150_v39  ;;  %1161 = vlog2.f32 %v750_v36  ;;  %v674_v55 = vsub.f32 0.0, %v661_v46  ;;  %v992_v63 = vadd.f32 %v991_v30, %v990_v24 }
 0x14a   :  { %v1152_v45 = vpop.eup %1151  ;;  %1163 = vpow2.f32 %v693_v41  ;;  %v1050_v1 = vadd.f32 %v1049_v38, %v1048_v29  ;;  %v754_v2 = vadd.f32 1.0, %v753_v25  ;;  %v644_v11 = vmax.f32 %v1404_v56, 0.0 }
 0x14b   :  { %v731_v32 = vsel %vm1452_vm2, %v728_v31, %v725_v43  ;;  %v734_v50 = vmul.f32 0.6931472, %v1152_v45  ;;  %v993_v53 = vpop.f32.mrb[24].mxu0  ;;  %v695_v9 = vmul.f32 1.442695, %v674_v55  ;;  %v1478_v8 = vpop.eup %1153  ;;  %v1482_v14 = vadd.f32 %v1047_v52, %v539_v59 }
 0x14c   :  { %v824_v54 = vadd.f32 %v731_v32, %v642_v42  ;;  %v1051_v61 = vpop.f32.mrb[24].mxu1  ;;  %v994_v58 = vpop.f32.mrb[25].mxu0  ;;  %v662_v13 = vand.u32 2147483647, %v1473_v57  ;;  %v542_v16 = vadd.f32 %v992_v63, %v1385_v0  ;;  %vm1485_vm4 = vcmp.lt.f32.partialorder %v747_v44, 0.0004427343 }
 0x14d   :  { %v740_v62 = vsel %vm1461_vm3, %v737_v33, %v734_v50  ;;  %v995_v3 = vadd.f32 %v994_v58, %v993_v53  ;;  %v1052_v4 = vpop.f32.mrb[25].mxu1  ;;  %v996_v6 = vpop.f32.mrb[26].mxu0  ;;  %v645_v23 = vmax.f32 %v1408_v60, 0.0  ;;  %v759_v24 = vadd.f32 1.0, %v1478_v8 }
 0x14e   :  { %1165 = vtanh.f32 %v824_v54  ;;  %v825_v7 = vadd.f32 %v740_v62, %v643_v28  ;;  %v1054_v42 = vpop.f32.mrb[26].mxu1  ;;  %v997_v10 = vpop.f32.mrb[27].mxu0  ;;  %v756_v28 = vand.u32 2147483647, %v1446_v18  ;;  %v675_v29 = vsub.f32 0.0, %v662_v13 }
 0x14f   :  { %v1055_v17 = vpop.f32.mrb[27].mxu1  ;;  %v746_v35 = vmul.f32 %v1440_v5, %v745_v51  ;;  %v755_v36 = vmul.f32 %v1446_v18, %v754_v2  ;;  %v1500_v40 = vadd.f32 %v1050_v1, %v542_v16  ;;  %v547_v18 = vadd.f32 %v995_v3, %v1385_v0 }
 0x150   :  { %v1156_v19 = vpop.eup %1155  ;;  %1167 = vtanh.f32 %v825_v7  ;;  %v697_v33 = vmul.f32 1.442695, %v675_v29  ;;  %v1053_v44 = vadd.f32 %v1052_v4, %v1051_v61  ;;  %vm757_vm5 = vcmp.lt.f32.partialorder %v756_v28, 0.0004427343 }
 0x151   :  { %v1158_v26 = vpop.eup %1157  ;;  %v848_v27 = vmul.f32 %v1156_v19, %v1388_v12  ;;  %1169 = vpow2.f32 %v695_v9  ;;  %v663_v12 = vand.u32 2147483647, %v1482_v14  ;;  %v664_v0 = vand.u32 2147483647, %v1500_v40 }
 0x152   :  { %v1160_v30 = vpop.eup %1159  ;;  %v743_v31 = vmul.f32 0.6931472, %v1158_v26  ;;  %1171 = vlog2.f32 %v759_v24  ;;  %v1513_v51 = vadd.f32 %v1053_v44, %v547_v18  ;;  %v765_v55 = vand.u32 2147483647, %v1478_v8 }
 0x153   :  { %v1162_v38 = vpop.eup %1161  ;;  %861 = vst [vmem:[%s1575_s3] sm:$0xff] %v848_v27  ;;  %v849_v39 = vmul.f32 %v1160_v30, %v1392_v15  ;;  %v762_v15 = vmul.f32 -0.5, %v1478_v8  ;;  %1173 = vpow2.f32 %v697_v33  ;;  %v676_v47 = vsub.f32 0.0, %v663_v12 }
 0x154   :  { %v1502_v41 = vpop.eup %1163  ;;  %v749_v5 = vsel %vm1485_vm4, %v746_v35, %v743_v31  ;;  %v752_v43 = vmul.f32 0.6931472, %v1162_v38  ;;  %v677_v59 = vsub.f32 0.0, %v664_v0  ;;  %v665_v61 = vand.u32 2147483647, %v1513_v51 }
 0x155   :  { %862 = vst [vmem:[%s1575_s3 + $0x8] sm:$0xff] %v849_v39  ;;  %v826_v25 = vadd.f32 %v749_v5, %v644_v11  ;;  %v768_v45 = vadd.f32 1.0, %v1502_v41  ;;  %v699_v50 = vmul.f32 1.442695, %v676_v47  ;;  %v763_v53 = vadd.f32 1.0, %v762_v15 }
 0x156   :  { %v758_v46 = vsel %vm757_vm5, %v755_v36, %v752_v43  ;;  %v771_v63 = vmul.f32 -0.5, %v1502_v41  ;;  %v701_v3 = vmul.f32 1.442695, %v677_v59  ;;  %v678_v7 = vsub.f32 0.0, %v665_v61 }
 0x157   :  { %1175 = vtanh.f32 %v826_v25  ;;  %v827_v48 = vadd.f32 %v758_v46, %v645_v23  ;;  %v764_v6 = vmul.f32 %v1478_v8, %v763_v53  ;;  %v646_v2 = vmax.f32 %v1412_v22, 0.0 }
 0x158   :  { %v1166_v32 = vpop.eup %1165  ;;  %1177 = vlog2.f32 %v768_v45  ;;  %vm766_vm6 = vcmp.lt.f32.partialorder %v765_v55, 0.0004427343  ;;  %v772_v42 = vadd.f32 1.0, %v771_v63  ;;  %v774_v13 = vand.u32 2147483647, %v1502_v41 }
 0x159   :  { %v850_v52 = vmul.f32 %v1166_v32, %v1396_v34  ;;  %1179 = vtanh.f32 %v827_v48  ;;  %v647_v29 = vmax.f32 %v1430_v49, 0.0  ;;  %v648_v12 = vmax.f32 %v1450_v21, 0.0 }
 0x15a   :  { %v1168_v54 = vpop.eup %1167  ;;  %1181 = vpow2.f32 %v699_v50  ;;  %v773_v26 = vmul.f32 %v1502_v41, %v772_v42  ;;  %vm775_vm7 = vcmp.lt.f32.partialorder %v774_v13, 0.0004427343  ;;  %v649_v32 = vmax.f32 %v1473_v57, 0.0 }
 0x15b   :  { %v1170_v58 = vpop.eup %1169  ;;  %863 = vst [vmem:[%s1575_s3 + $0x10] sm:$0xff] %v850_v52  ;;  %v851_v62 = vmul.f32 %v1168_v54, %v1400_v37  ;;  %v703_v37 = vmul.f32 1.442695, %v678_v7 }
 0x15c   :  { %v1172_v1 = vpop.eup %1171  ;;  %v777_v34 = vadd.f32 1.0, %v1170_v58  ;;  %v780_v17 = vmul.f32 -0.5, %v1170_v58  ;;  %v783_v36 = vand.u32 2147483647, %v1170_v58 }
 0x15d   :  { %864 = vst [vmem:[%s1575_s3 + $0x18] sm:$0xff] %v851_v62  ;;  %v761_v4 = vmul.f32 0.6931472, %v1172_v1  ;;  %v1174_v10 = vpop.eup %1173 }
 0x15e   :  { %1183 = vlog2.f32 %v777_v34  ;;  %v786_v19 = vadd.f32 1.0, %v1174_v10  ;;  %v781_v31 = vadd.f32 1.0, %v780_v17  ;;  %v789_v38 = vmul.f32 -0.5, %v1174_v10 }
 0x15f   :  { %v767_v9 = vsel %vm766_vm6, %v764_v6, %v761_v4  ;;  %1185 = vpow2.f32 %v701_v3  ;;  %vm784_vm8 = vcmp.lt.f32.partialorder %v783_v36, 0.0004427343  ;;  %v792_v15 = vand.u32 2147483647, %v1174_v10 }
 0x160   :  { %v828_v11 = vadd.f32 %v767_v9, %v646_v2  ;;  %1187 = vpow2.f32 %v703_v37  ;;  %v782_v41 = vmul.f32 %v1170_v58, %v781_v31  ;;  %v790_v5 = vadd.f32 1.0, %v789_v38 }
 0x161   :  { %v1176_v16 = vpop.eup %1175  ;;  %vm793_vm9 = vcmp.lt.f32.partialorder %v792_v15, 0.0004427343 }
 0x162   :  { %v1178_v20 = vpop.eup %1177  ;;  %v852_v8 = vmul.f32 %v1176_v16, %v1404_v56  ;;  %1189 = vtanh.f32 %v828_v11  ;;  %v791_v52 = vmul.f32 %v1174_v10, %v790_v5  ;;  %v651_v16 = vmax.f32 %v1500_v40, 0.0 }
 0x163   :  { %v1180_v23 = vpop.eup %1179  ;;  %v770_v24 = vmul.f32 0.6931472, %v1178_v20  ;;  %1191 = vlog2.f32 %v786_v19 }
 0x164   :  { %v1182_v27 = vpop.eup %1181  ;;  %865 = vst [vmem:[%s1575_s3 + $0x20] sm:$0xff] %v852_v8  ;;  %v853_v28 = vmul.f32 %v1180_v23, %v1408_v60 }
 0x165   :  { %v776_v30 = vsel %vm775_vm7, %v773_v26, %v770_v24  ;;  %v795_v35 = vadd.f32 1.0, %v1182_v27  ;;  %v798_v43 = vmul.f32 -0.5, %v1182_v27  ;;  %v801_v54 = vand.u32 2147483647, %v1182_v27 }
 0x166   :  { %866 = vst [vmem:[%s1575_s3 + $0x28] sm:$0xff] %v853_v28  ;;  %v829_v56 = vadd.f32 %v776_v30, %v647_v29  ;;  %v652_v24 = vmax.f32 %v1513_v51, 0.0 }
 0x167   :  { %1193 = vlog2.f32 %v795_v35  ;;  %v799_v53 = vadd.f32 1.0, %v798_v43  ;;  %vm802_vm10 = vcmp.lt.f32.partialorder %v801_v54, 0.0004427343 }
 0x168   :  { %v1184_v39 = vpop.eup %1183  ;;  %1195 = vtanh.f32 %v829_v56 }
 0x169   :  { %v1186_v33 = vpop.eup %1185  ;;  %v779_v60 = vmul.f32 0.6931472, %v1184_v39  ;;  %v800_v1 = vmul.f32 %v1182_v27, %v799_v53 }
 0x16a   :  { %v804_v18 = vadd.f32 1.0, %v1186_v33  ;;  %v1188_v44 = vpop.eup %1187  ;;  %v807_v55 = vmul.f32 -0.5, %v1186_v33  ;;  %v810_v7 = vand.u32 2147483647, %v1186_v33 }
 0x16b   :  { %v785_v25 = vsel %vm784_vm8, %v782_v41, %v779_v60  ;;  %v813_v50 = vadd.f32 1.0, %v1188_v44  ;;  %v816_v34 = vmul.f32 -0.5, %v1188_v44  ;;  %v819_v11 = vand.u32 2147483647, %v1188_v44 }
 0x16c   :  { %v1190_v45 = vpop.eup %1189  ;;  %v830_v46 = vadd.f32 %v785_v25, %v648_v12  ;;  %1197 = vlog2.f32 %v804_v18  ;;  %v808_v4 = vadd.f32 1.0, %v807_v55  ;;  %vm811_vm11 = vcmp.lt.f32.partialorder %v810_v7, 0.0004427343 }
 0x16d   :  { %v1192_v47 = vpop.eup %1191  ;;  %v854_v48 = vmul.f32 %v1190_v45, %v1412_v22  ;;  %v650_v22 = vmax.f32 %v1482_v14, 0.0  ;;  %v817_v42 = vadd.f32 1.0, %v816_v34  ;;  %vm820_vm12 = vcmp.lt.f32.partialorder %v819_v11, 0.0004427343 }
 0x16e   :  { %1199 = vtanh.f32 %v830_v46  ;;  %v788_v0 = vmul.f32 0.6931472, %v1192_v47  ;;  %v809_v10 = vmul.f32 %v1186_v33, %v808_v4 }
 0x16f   :  { %867 = vst [vmem:[%s1575_s3 + $0x30] sm:$0xff] %v854_v48  ;;  %1201 = vlog2.f32 %v813_v50  ;;  %v818_v23 = vmul.f32 %v1188_v44, %v817_v42 }
 0x170   :  { %v794_v59 = vsel %vm793_vm9, %v791_v52, %v788_v0 }
 0x171   :  { %v1194_v61 = vpop.eup %1193  ;;  %v831_v58 = vadd.f32 %v794_v59, %v649_v32 }
 0x172   :  { %v1196_v62 = vpop.eup %1195  ;;  %v797_v63 = vmul.f32 0.6931472, %v1194_v61 }
 0x173   :  { %v855_v3 = vmul.f32 %v1196_v62, %v1430_v49  ;;  %1203 = vtanh.f32 %v831_v58 }
 0x174   :  { %v803_v6 = vsel %vm802_vm10, %v800_v1, %v797_v63 }
 0x175   :  { %868 = vst [vmem:[%s1575_s3 + $0x38] sm:$0xff] %v855_v3  ;;  %v832_v2 = vadd.f32 %v803_v6, %v650_v22 }
 0x176   :  { %v1198_v9 = vpop.eup %1197 }
 0x177   :  { %1205 = vtanh.f32 %v832_v2  ;;  %v806_v37 = vmul.f32 0.6931472, %v1198_v9 }
 0x178   :  { %v1200_v13 = vpop.eup %1199 }
 0x179   :  { %v1202_v49 = vpop.eup %1201  ;;  %v856_v17 = vmul.f32 %v1200_v13, %v1450_v21  ;;  %v812_v19 = vsel %vm811_vm11, %v809_v10, %v806_v37 }
 0x17a   :  { %v833_v20 = vadd.f32 %v812_v19, %v651_v16  ;;  %v815_v8 = vmul.f32 0.6931472, %v1202_v49 }
 0x17b   :  { %869 = vst [vmem:[%s1575_s3 + $0x40] sm:$0xff] %v856_v17 }
 0x17c   :  { %1207 = vtanh.f32 %v833_v20  ;;  %v821_v26 = vsel %vm820_vm12, %v818_v23, %v815_v8 }
 0x17d   :  { %v1204_v27 = vpop.eup %1203  ;;  %v834_v28 = vadd.f32 %v821_v26, %v652_v24 }
 0x17e   :  { %v857_v29 = vmul.f32 %v1204_v27, %v1473_v57 }
 0x17f   :  { %1209 = vtanh.f32 %v834_v28 }
 0x180   :  { %870 = vst [vmem:[%s1575_s3 + $0x48] sm:$0xff] %v857_v29 }
 0x181   :  { %v1206_v21 = vpop.eup %1205 }
 0x182   :  { %v858_v30 = vmul.f32 %v1206_v21, %v1482_v14 }
 0x184   :  { %871 = vst [vmem:[%s1575_s3 + $0x50] sm:$0xff] %v858_v30 }
 0x186   :  { %v1208_v31 = vpop.eup %1207 }
 0x187   :  { %v859_v35 = vmul.f32 %v1208_v31, %v1500_v40 }
 0x189   :  { %v1210_v56 = vpop.eup %1209  ;;  %872 = vst [vmem:[%s1575_s3 + $0x58] sm:$0xff] %v859_v35 }
 0x18a   :  { %v860_v57 = vmul.f32 %v1210_v56, %v1513_v51 }
 0x18c   :  { %873 = vst [vmem:[%s1575_s3 + $0x60] sm:$0xff] %v860_v57 }
 0x18d   :  { %878 = vsyncpa [#allocation3], 1 }
 0x18e   :  { %879 = vsyncpa [#allocation5], 1 }

// kernel: forward.9
= control target key start
LH: loop header
LB: loop body
LE: loop exit
PB: predicated region body
PF: predicated region fallthrough
CT: control target
= control target key end

     0   :  { %s2305_s1 = inlined_call_operand.vmem [shape: bf16[256,128], index: 1, kind: input, shape index: {}]   ;;  %s2306_s0 = inlined_call_operand.vmem [shape: bf16[248,256], index: 0, kind: input, shape index: {}]   ;;  %s2307_s2 = inlined_call_operand.vmem [shape: f32[1,128], index: 2, kind: input, shape index: {}]   ;;  %s2308_s3 = inlined_call_operand.vmem [shape: f32[248,128], index: 3, kind: output, shape index: {}]  }
   0x1   :  { %v1237_v0 = vld [vmem:[%s2305_s1 + $0x40] sm:$0xff]   ;;  %v1239_v2 = vld [vmem:[%s2305_s1 + $0x48] sm:$0xff]   ;;  %v1241_v4 = vld [vmem:[%s2305_s1 + $0x50] sm:$0xff]  }
   0x2   :  { %v1238_v1 = vld [vmem:[%s2305_s1] sm:$0xff]   ;;  %1109 = vmatprep.subr.bf16.mxu0 %v1237_v0  ;;  %1221 = vmatprep.subr.bf16.mxu1 %v1237_v0  ;;  %v1240_v3 = vld [vmem:[%s2305_s1 + $0x8] sm:$0xff]   ;;  %v1242_v5 = vld [vmem:[%s2305_s1 + $0x10] sm:$0xff]  }
   0x3   :  { %1110 = vmatpush3.bf16.msra.mxu0 %v1238_v1  ;;  %1229 = vmatpush3.bf16.msra.mxu1 %v1238_v1  ;;  %v1243_v6 = vld [vmem:[%s2305_s1 + $0x58] sm:$0xff]   ;;  %v1245_v8 = vld [vmem:[%s2305_s1 + $0x60] sm:$0xff]   ;;  %v1247_v10 = vld [vmem:[%s2305_s1 + $0x68] sm:$0xff]  }
   0x4   :  { %1111 = vmatprep.subr.bf16.mxu0 %v1239_v2  ;;  %1222 = vmatprep.subr.bf16.mxu1 %v1239_v2  ;;  %v1244_v7 = vld [vmem:[%s2305_s1 + $0x18] sm:$0xff]   ;;  %v1246_v9 = vld [vmem:[%s2305_s1 + $0x20] sm:$0xff]   ;;  %v1248_v13 = vld [vmem:[%s2305_s1 + $0x28] sm:$0xff]  }
   0x5   :  { %v1255_v11 = vld [vmem:[%s2306_s0 + $0x4] ss:$8 sps:$4 sm:$0xff]   ;;  %v1249_v14 = vld [vmem:[%s2305_s1 + $0x70] sm:$0xff]   ;;  %v1251_v16 = vld [vmem:[%s2305_s1 + $0x78] sm:$0xff]  }
   0x6   :  { %v1258_v12 = vld [vmem:[%s2306_s0 + $0x84] ss:$8 sps:$4 sm:$0xff]   ;;  %370 = vmatprep.mubr.bf16.mxu0 %v1255_v11  ;;  %v1250_v15 = vld [vmem:[%s2305_s1 + $0x30] sm:$0xff]   ;;  %v1252_v17 = vld [vmem:[%s2305_s1 + $0x38] sm:$0xff]  }
   0x7   :  { %1112 = vmatpush3.bf16.msra.mxu0 %v1240_v3  ;;  %1230 = vmatpush3.bf16.msra.mxu1 %v1240_v3  ;;  %v1253_v18 = vld [vmem:[%s2306_s0] ss:$8 sps:$4 sm:$0xff]   ;;  %v1259_v20 = vld [vmem:[%s2306_s0 + $0x14] ss:$8 sps:$4 sm:$0xff]   ;;  %v1263_v22 = vld [vmem:[%s2306_s0 + $0x10] ss:$8 sps:$4 sm:$0xff]  }
   0x8   :  { %1113 = vmatprep.subr.bf16.mxu0 %v1241_v4  ;;  %1223 = vmatprep.subr.bf16.mxu1 %v1241_v4  ;;  %v1256_v19 = vld [vmem:[%s2306_s0 + $0x80] ss:$8 sps:$4 sm:$0xff]   ;;  %v1261_v21 = vld [vmem:[%s2306_s0 + $0x94] ss:$8 sps:$4 sm:$0xff]   ;;  %v1264_v23 = vld [vmem:[%s2306_s0 + $0x90] ss:$8 sps:$4 sm:$0xff]  }
   0x9   :  { %434 = vmatprep.mubr.bf16.mxu1 %v1258_v12  ;;  %v1265_v24 = vld [vmem:[%s2306_s0 + $0x24] ss:$8 sps:$4 sm:$0xff]   ;;  %v1269_v26 = vld [vmem:[%s2306_s0 + $0x20] ss:$8 sps:$4 sm:$0xff]   ;;  %v1271_v28 = vld [vmem:[%s2306_s0 + $0x34] ss:$8 sps:$4 sm:$0xff]  }
   0xa   :  { %v1267_v25 = vld [vmem:[%s2306_s0 + $0xa4] ss:$8 sps:$4 sm:$0xff]   ;;  %v1270_v27 = vld [vmem:[%s2306_s0 + $0xa0] ss:$8 sps:$4 sm:$0xff]   ;;  %v1273_v29 = vld [vmem:[%s2306_s0 + $0xb4] ss:$8 sps:$4 sm:$0xff]  }
   0xb   :  { %1114 = vmatpush3.bf16.msra.mxu0 %v1242_v5  ;;  %1231 = vmatpush3.bf16.msra.mxu1 %v1242_v5  ;;  %v1275_v30 = vld [vmem:[%s2306_s0 + $0x30] ss:$8 sps:$4 sm:$0xff]   ;;  %v1277_v32 = vld [vmem:[%s2306_s0 + $0x44] ss:$8 sps:$4 sm:$0xff]   ;;  %v1281_v34 = vld [vmem:[%s2306_s0 + $0x40] ss:$8 sps:$4 sm:$0xff]  }
   0xc   :  { %1115 = vmatprep.subr.bf16.mxu0 %v1243_v6  ;;  %1224 = vmatprep.subr.bf16.mxu1 %v1243_v6  ;;  %v1276_v31 = vld [vmem:[%s2306_s0 + $0xb0] ss:$8 sps:$4 sm:$0xff]   ;;  %v1279_v33 = vld [vmem:[%s2306_s0 + $0xc4] ss:$8 sps:$4 sm:$0xff]   ;;  %v1282_v35 = vld [vmem:[%s2306_s0 + $0xc0] ss:$8 sps:$4 sm:$0xff]  }
   0xd   :  { %v1283_v36 = vld [vmem:[%s2306_s0 + $0x54] ss:$8 sps:$4 sm:$0xff]   ;;  %v1287_v38 = vld [vmem:[%s2306_s0 + $0x50] ss:$8 sps:$4 sm:$0xff]   ;;  %v1289_v40 = vld [vmem:[%s2306_s0 + $0x64] ss:$8 sps:$4 sm:$0xff]  }
   0xe   :  { %v1285_v37 = vld [vmem:[%s2306_s0 + $0xd4] ss:$8 sps:$4 sm:$0xff]   ;;  %v1288_v39 = vld [vmem:[%s2306_s0 + $0xd0] ss:$8 sps:$4 sm:$0xff]   ;;  %v1291_v41 = vld [vmem:[%s2306_s0 + $0xe4] ss:$8 sps:$4 sm:$0xff]  }
   0xf   :  { %1116 = vmatpush3.bf16.msra.mxu0 %v1244_v7  ;;  %1232 = vmatpush3.bf16.msra.mxu1 %v1244_v7  ;;  %v45_v42 = vld [vmem:[%s2306_s0 + $0xf0] sm:$0xff]  ;;  %v1293_v43 = vld [vmem:[%s2306_s0 + $0x60] ss:$8 sps:$4 sm:$0xff]  }
  0x10   :  { %1117 = vmatprep.subr.bf16.mxu0 %v1245_v8  ;;  %1225 = vmatprep.subr.bf16.mxu1 %v1245_v8  ;;  %v1294_v44 = vld [vmem:[%s2306_s0 + $0xe0] ss:$8 sps:$4 sm:$0xff]   ;;  %v1295_v45 = vld [vmem:[%s2306_s0 + $0x74] ss:$8 sps:$4 sm:$0xff]   ;;  %v1092_v46 = vcombine.high %v45_v42, %v45_v42  ;;  %v1298_v47 = vld [vmem:[%s2306_s0 + $0x70] ss:$8 sps:$4 sm:$0xff]   ;;  %v1091_v48 = vcombine.low %v45_v42, %v45_v42 }
  0x11   :  { %v1651_v51 = vld [vmem:[%s2307_s2] ss:$0 sm:$0xff] }
  0x13   :  { %1118 = vmatpush3.bf16.msra.mxu0 %v1246_v9  ;;  %1233 = vmatpush3.bf16.msra.mxu1 %v1246_v9 }
  0x14   :  { %1119 = vmatprep.subr.bf16.mxu0 %v1247_v10  ;;  %1226 = vmatprep.subr.bf16.mxu1 %v1247_v10 }
  0x17   :  { %1120 = vmatpush3.bf16.msra.mxu0 %v1248_v13  ;;  %1234 = vmatpush3.bf16.msra.mxu1 %v1248_v13 }
  0x18   :  { %1121 = vmatprep.subr.bf16.mxu0 %v1249_v14  ;;  %1227 = vmatprep.subr.bf16.mxu1 %v1249_v14 }
  0x1b   :  { %1122 = vmatpush3.bf16.msra.mxu0 %v1250_v15  ;;  %1235 = vmatpush3.bf16.msra.mxu1 %v1250_v15 }
  0x1c   :  { %1123 = vmatprep.subr.bf16.mxu0 %v1251_v16  ;;  %1228 = vmatprep.subr.bf16.mxu1 %v1251_v16 }
  0x1f   :  { %1124 = vmatpush3.bf16.msra.mxu0 %v1252_v17  ;;  %1236 = vmatpush3.bf16.msra.mxu1 %v1252_v17 }
  0x22   :  { %371 = vmatmul.mubr.bf16.vlgmr.msra.gmra.mrb[0].mxu0 %v1253_v18  ;;  %435 = vmatmul.mubr.bf16.vlgmr.msra.gmra.mrb[0].mxu1 %v1256_v19 }
  0x23   :  { %378 = vmatprep.mubr.bf16.mxu0 %v1259_v20  ;;  %442 = vmatprep.mubr.bf16.mxu1 %v1261_v21 }
  0x2a   :  { %379 = vmatmul.mubr.bf16.gmra.mrb[4].mxu0 %v1263_v22  ;;  %443 = vmatmul.mubr.bf16.gmra.mrb[4].mxu1 %v1264_v23 }
  0x2b   :  { %386 = vmatprep.mubr.bf16.mxu0 %v1265_v24  ;;  %450 = vmatprep.mubr.bf16.mxu1 %v1267_v25 }
  0x32   :  { %387 = vmatmul.mubr.bf16.gmra.mrb[8].mxu0 %v1269_v26  ;;  %451 = vmatmul.mubr.bf16.gmra.mrb[8].mxu1 %v1270_v27 }
  0x33   :  { %394 = vmatprep.mubr.bf16.mxu0 %v1271_v28  ;;  %458 = vmatprep.mubr.bf16.mxu1 %v1273_v29 }
  0x3a   :  { %395 = vmatmul.mubr.bf16.gmra.mrb[12].mxu0 %v1275_v30  ;;  %459 = vmatmul.mubr.bf16.gmra.mrb[12].mxu1 %v1276_v31 }
  0x3b   :  { %402 = vmatprep.mubr.bf16.mxu0 %v1277_v32  ;;  %466 = vmatprep.mubr.bf16.mxu1 %v1279_v33 }
  0x42   :  { %403 = vmatmul.mubr.bf16.gmra.mrb[16].mxu0 %v1281_v34  ;;  %467 = vmatmul.mubr.bf16.gmra.mrb[16].mxu1 %v1282_v35 }
  0x43   :  { %410 = vmatprep.mubr.bf16.mxu0 %v1283_v36  ;;  %474 = vmatprep.mubr.bf16.mxu1 %v1285_v37 }
  0x4a   :  { %411 = vmatmul.mubr.bf16.gmra.mrb[20].mxu0 %v1287_v38  ;;  %475 = vmatmul.mubr.bf16.gmra.mrb[20].mxu1 %v1288_v39 }
  0x4b   :  { %418 = vmatprep.mubr.bf16.mxu0 %v1289_v40  ;;  %482 = vmatprep.mubr.bf16.mxu1 %v1291_v41 }
  0x52   :  { %419 = vmatmul.mubr.bf16.gmra.mrb[24].mxu0 %v1293_v43  ;;  %483 = vmatmul.mubr.bf16.gmra.mrb[24].mxu1 %v1294_v44 }
  0x53   :  { %426 = vmatprep.mubr.bf16.mxu0 %v1295_v45  ;;  %490 = vmatprep.mubr.bf16.mxu1 %v1092_v46 }
  0x5a   :  { %427 = vmatmul.mubr.bf16.gmra.mrb[28].mxu0 %v1298_v47  ;;  %491 = vmatmul.mubr.bf16.gmra.mrb[28].mxu1 %v1091_v48 }
  0xf5   :  { %v1125_v49 = vpop.f32.mrb[0].mxu0  ;;  %v1173_v50 = vpop.f32.mrb[0].mxu1 }
  0xf6   :  { %v1126_v52 = vpop.f32.mrb[1].mxu0  ;;  %v1174_v53 = vpop.f32.mrb[1].mxu1 }
  0xf7   :  { %v1127_v54 = vadd.f32 %v1126_v52, %v1125_v49  ;;  %v1175_v55 = vadd.f32 %v1174_v53, %v1173_v50  ;;  %v1128_v56 = vpop.f32.mrb[2].mxu0  ;;  %v1176_v57 = vpop.f32.mrb[2].mxu1 }
  0xf8   :  { %v1129_v58 = vpop.f32.mrb[3].mxu0  ;;  %v1177_v59 = vpop.f32.mrb[3].mxu1 }
  0xf9   :  { %v1654_v60 = vadd.f32 %v1127_v54, %v1651_v51  ;;  %v1657_v61 = vadd.f32 %v1175_v55, %v1651_v51  ;;  %v1130_v62 = vadd.f32 %v1129_v58, %v1128_v56  ;;  %v1178_v63 = vadd.f32 %v1177_v59, %v1176_v57 }
  0xfb   :  { %v529_v0 = vand.u32 2147483647, %v1654_v60  ;;  %v545_v1 = vand.u32 2147483647, %v1657_v61  ;;  %v1662_v2 = vadd.f32 %v1130_v62, %v1651_v51  ;;  %v1665_v3 = vadd.f32 %v1178_v63, %v1651_v51 }
  0xfc   :  { %v498_v52 = vmax.f32 %v1654_v60, 0.0  ;;  %v514_v53 = vmax.f32 %v1657_v61, 0.0 }
  0xfd   :  { %v560_v4 = vsub.f32 0.0, %v529_v0  ;;  %v576_v5 = vsub.f32 0.0, %v545_v1  ;;  %v1131_v6 = vpop.f32.mrb[4].mxu0  ;;  %v1179_v7 = vpop.f32.mrb[4].mxu1  ;;  %v530_v8 = vand.u32 2147483647, %v1662_v2 }
  0xfe   :  { %v546_v9 = vand.u32 2147483647, %v1665_v3  ;;  %v1132_v12 = vpop.f32.mrb[5].mxu0  ;;  %v1180_v13 = vpop.f32.mrb[5].mxu1  ;;  %v499_v63 = vmax.f32 %v1662_v2, 0.0 }
  0xff   :  { %v591_v10 = vmul.f32 1.442695, %v560_v4  ;;  %v623_v11 = vmul.f32 1.442695, %v576_v5  ;;  %v561_v14 = vsub.f32 0.0, %v530_v8  ;;  %v1133_v16 = vadd.f32 %v1132_v12, %v1131_v6  ;;  %v1134_v18 = vpop.f32.mrb[6].mxu0 }
 0x100   :  { %v577_v15 = vsub.f32 0.0, %v546_v9  ;;  %v1181_v17 = vadd.f32 %v1180_v13, %v1179_v7  ;;  %v1182_v19 = vpop.f32.mrb[6].mxu1  ;;  %v1135_v20 = vpop.f32.mrb[7].mxu0 }
 0x101   :  { %1300 = vpow2.f32 %v591_v10  ;;  %v1183_v21 = vpop.f32.mrb[7].mxu1  ;;  %v593_v22 = vmul.f32 1.442695, %v561_v14  ;;  %v1670_v24 = vadd.f32 %v1133_v16, %v1651_v51  ;;  %v1136_v26 = vadd.f32 %v1135_v20, %v1134_v18 }
 0x102   :  { %1302 = vpow2.f32 %v623_v11  ;;  %v625_v23 = vmul.f32 1.442695, %v577_v15  ;;  %v1673_v25 = vadd.f32 %v1181_v17, %v1651_v51  ;;  %v1184_v27 = vadd.f32 %v1183_v21, %v1182_v19 }
 0x103   :  { %1304 = vpow2.f32 %v593_v22  ;;  %v531_v28 = vand.u32 2147483647, %v1670_v24  ;;  %v1678_v30 = vadd.f32 %v1136_v26, %v1651_v51 }
 0x104   :  { %1306 = vpow2.f32 %v625_v23  ;;  %v547_v29 = vand.u32 2147483647, %v1673_v25  ;;  %v1681_v34 = vadd.f32 %v1184_v27, %v1651_v51 }
 0x105   :  { %v1137_v31 = vpop.f32.mrb[8].mxu0  ;;  %v1185_v32 = vpop.f32.mrb[8].mxu1  ;;  %v562_v33 = vsub.f32 0.0, %v531_v28  ;;  %v532_v38 = vand.u32 2147483647, %v1678_v30 }
 0x106   :  { %v1138_v35 = vpop.f32.mrb[9].mxu0  ;;  %v1186_v36 = vpop.f32.mrb[9].mxu1  ;;  %v578_v37 = vsub.f32 0.0, %v547_v29  ;;  %v548_v43 = vand.u32 2147483647, %v1681_v34 }
 0x107   :  { %v1139_v39 = vadd.f32 %v1138_v35, %v1137_v31  ;;  %v1140_v40 = vpop.f32.mrb[10].mxu0  ;;  %v1188_v41 = vpop.f32.mrb[10].mxu1  ;;  %v595_v42 = vmul.f32 1.442695, %v562_v33  ;;  %v1187_v44 = vadd.f32 %v1186_v36, %v1185_v32  ;;  %v563_v47 = vsub.f32 0.0, %v532_v38 }
 0x108   :  { %v1141_v45 = vpop.f32.mrb[11].mxu0  ;;  %v627_v46 = vmul.f32 1.442695, %v578_v37  ;;  %v1189_v50 = vpop.f32.mrb[11].mxu1  ;;  %v579_v57 = vsub.f32 0.0, %v548_v43 }
 0x109   :  { %v1686_v48 = vadd.f32 %v1139_v39, %v1651_v51  ;;  %v1688_v49 = vadd.f32 %v1141_v45, %v1140_v40  ;;  %1308 = vpow2.f32 %v595_v42  ;;  %v1692_v54 = vadd.f32 %v1189_v50, %v1188_v41 }
 0x10a   :  { %1310 = vpow2.f32 %v627_v46  ;;  %v597_v56 = vmul.f32 1.442695, %v563_v47  ;;  %v629_v18 = vmul.f32 1.442695, %v579_v57  ;;  %v1713_v26 = vadd.f32 %v1187_v44, %v1651_v51 }
 0x10b   :  { %v1301_v55 = vpop.eup %1300  ;;  %v533_v58 = vand.u32 2147483647, %v1686_v48 }
 0x10c   :  { %v1303_v59 = vpop.eup %1302  ;;  %v653_v62 = vadd.f32 1.0, %v1301_v55  ;;  %v656_v4 = vmul.f32 -0.5, %v1301_v55  ;;  %1312 = vpow2.f32 %v597_v56  ;;  %v659_v10 = vand.u32 2147483647, %v1301_v55 }
 0x10d   :  { %v797_v5 = vadd.f32 1.0, %v1303_v59  ;;  %v800_v6 = vmul.f32 -0.5, %v1303_v59  ;;  %v1698_v7 = vpop.f32.mrb[12].mxu0  ;;  %v1700_v8 = vpop.f32.mrb[12].mxu1  ;;  %v564_v12 = vsub.f32 0.0, %v533_v58 }
 0x10e   :  { %v1305_v9 = vpop.eup %1304  ;;  %1314 = vlog2.f32 %v653_v62  ;;  %v1703_v13 = vpop.f32.mrb[13].mxu0  ;;  %v803_v21 = vand.u32 2147483647, %v1303_v59  ;;  %v657_v29 = vadd.f32 1.0, %v656_v4  ;;  %vm1720_vm0 = vcmp.lt.f32.partialorder %v659_v10, 0.0004427343 }
 0x10f   :  { %v1705_v14 = vpop.f32.mrb[13].mxu1  ;;  %v1307_v15 = vpop.eup %1306  ;;  %1316 = vlog2.f32 %v797_v5  ;;  %v662_v16 = vadd.f32 1.0, %v1305_v9  ;;  %v665_v22 = vmul.f32 -0.5, %v1305_v9  ;;  %v801_v31 = vadd.f32 1.0, %v800_v6 }
 0x110   :  { %v1708_v19 = vpop.f32.mrb[14].mxu0  ;;  %v1710_v20 = vpop.f32.mrb[14].mxu1  ;;  %v806_v23 = vadd.f32 1.0, %v1307_v15  ;;  %v809_v32 = vmul.f32 -0.5, %v1307_v15  ;;  %v668_v33 = vand.u32 2147483647, %v1305_v9  ;;  %v658_v45 = vmul.f32 %v1301_v55, %v657_v29 }
 0x111   :  { %v1715_v27 = vpop.f32.mrb[15].mxu0  ;;  %v1717_v28 = vpop.f32.mrb[15].mxu1  ;;  %1318 = vlog2.f32 %v662_v16  ;;  %v599_v36 = vmul.f32 1.442695, %v564_v12  ;;  %v812_v38 = vand.u32 2147483647, %v1307_v15  ;;  %v802_v46 = vmul.f32 %v1303_v59, %v801_v31 }
 0x112   :  { %1320 = vlog2.f32 %v806_v23  ;;  %vm1727_vm1 = vcmp.lt.f32.partialorder %v803_v21, 0.0004427343  ;;  %v666_v42 = vadd.f32 1.0, %v665_v22  ;;  %v549_v43 = vand.u32 2147483647, %v1713_v26 }
 0x113   :  { %1322 = vpow2.f32 %v629_v18  ;;  %v1725_v40 = vpop.eup %1308  ;;  %v810_v47 = vadd.f32 1.0, %v809_v32  ;;  %vm1739_vm2 = vcmp.lt.f32.partialorder %v668_v33, 0.0004427343  ;;  %vm1749_vm3 = vcmp.lt.f32.partialorder %v812_v38, 0.0004427343 }
 0x114   :  { %1324 = vpow2.f32 %v599_v36  ;;  %v1732_v44 = vpop.eup %1310  ;;  %v671_v50 = vadd.f32 1.0, %v1725_v40  ;;  %v674_v62 = vmul.f32 -0.5, %v1725_v40  ;;  %v580_v5 = vsub.f32 0.0, %v549_v43 }
 0x115   :  { %v1735_v56 = vpop.f32.mrb[16].mxu0  ;;  %v1737_v57 = vpop.f32.mrb[16].mxu1  ;;  %v815_v4 = vadd.f32 1.0, %v1732_v44  ;;  %v677_v10 = vand.u32 2147483647, %v1725_v40  ;;  %v1756_v12 = vadd.f32 %v1688_v49, %v1651_v51  ;;  %v667_v22 = vmul.f32 %v1305_v9, %v666_v42 }
 0x116   :  { %v1745_v6 = vpop.f32.mrb[17].mxu0  ;;  %v1747_v55 = vpop.eup %1312  ;;  %1326 = vlog2.f32 %v671_v50  ;;  %v818_v23 = vmul.f32 -0.5, %v1732_v44  ;;  %v811_v38 = vmul.f32 %v1307_v15, %v810_v47  ;;  %v821_v49 = vand.u32 2147483647, %v1732_v44 }
 0x117   :  { %v1758_v16 = vpop.f32.mrb[17].mxu1  ;;  %v1760_v18 = vpop.f32.mrb[18].mxu0  ;;  %1328 = vlog2.f32 %v815_v4  ;;  %v680_v29 = vadd.f32 1.0, %v1747_v55  ;;  %v683_v43 = vmul.f32 -0.5, %v1747_v55  ;;  %v675_v9 = vadd.f32 1.0, %v674_v62 }
 0x118   :  { %v1315_v21 = vpop.eup %1314  ;;  %v1764_v31 = vpop.f32.mrb[18].mxu1  ;;  %v631_v42 = vmul.f32 1.442695, %v580_v5  ;;  %vm1774_vm4 = vcmp.lt.f32.partialorder %v677_v10, 0.0004427343  ;;  %v819_v10 = vadd.f32 1.0, %v818_v23 }
 0x119   :  { %v1766_v32 = vpop.f32.mrb[19].mxu0  ;;  %v1317_v33 = vpop.eup %1316  ;;  %v655_v36 = vmul.f32 0.6931472, %v1315_v21  ;;  %1330 = vlog2.f32 %v680_v29  ;;  %v686_v15 = vand.u32 2147483647, %v1747_v55 }
 0x11a   :  { %v1770_v50 = vpop.f32.mrb[19].mxu1  ;;  %v799_v39 = vmul.f32 0.6931472, %v1317_v33  ;;  %v534_v47 = vand.u32 2147483647, %v1756_v12  ;;  %1332 = vpow2.f32 %v631_v42  ;;  %v684_v33 = vadd.f32 1.0, %v683_v43 }
 0x11b   :  { %v1319_v4 = vpop.eup %1318  ;;  %v661_v35 = vsel %vm1720_vm0, %v658_v45, %v655_v36  ;;  %vm1812_vm5 = vcmp.lt.f32.partialorder %v821_v49, 0.0004427343  ;;  %vm1823_vm6 = vcmp.lt.f32.partialorder %v686_v15, 0.0004427343 }
 0x11c   :  { %v1321_v21 = vpop.eup %1320  ;;  %v932_v11 = vadd.f32 %v661_v35, %v498_v52  ;;  %v805_v62 = vsel %vm1727_vm1, %v802_v46, %v799_v39  ;;  %v664_v5 = vmul.f32 0.6931472, %v1319_v4  ;;  %v565_v39 = vsub.f32 0.0, %v534_v47 }
 0x11d   :  { %v1784_v29 = vpop.eup %1322  ;;  %v948_v37 = vadd.f32 %v805_v62, %v514_v53  ;;  %v808_v45 = vmul.f32 0.6931472, %v1321_v21  ;;  %v1788_v36 = vpop.f32.mrb[20].mxu0  ;;  %v676_v21 = vmul.f32 %v1725_v40, %v675_v9  ;;  %v820_v62 = vmul.f32 %v1732_v44, %v819_v10 }
 0x11e   :  { %v1790_v1 = vpop.f32.mrb[20].mxu1  ;;  %v1792_v0 = vpop.eup %1324  ;;  %1334 = vtanh.f32 %v932_v11  ;;  %v670_v52 = vsel %vm1739_vm2, %v667_v22, %v664_v5  ;;  %v824_v35 = vadd.f32 1.0, %v1784_v29  ;;  %v827_v43 = vmul.f32 -0.5, %v1784_v29 }
 0x11f   :  { %v1797_v41 = vpop.f32.mrb[21].mxu0  ;;  %v1799_v46 = vpop.f32.mrb[21].mxu1  ;;  %1336 = vtanh.f32 %v948_v37  ;;  %v933_v53 = vadd.f32 %v670_v52, %v499_v63  ;;  %v814_v23 = vsel %vm1749_vm3, %v811_v38, %v808_v45  ;;  %v2319_v22 = vmax.f32 %v1665_v3, 0.0 }
 0x120   :  { %v1806_v11 = vpop.f32.mrb[22].mxu0  ;;  %v1808_v58 = vpop.f32.mrb[22].mxu1  ;;  %1338 = vlog2.f32 %v824_v35  ;;  %v689_v47 = vadd.f32 1.0, %v1792_v0  ;;  %v685_v45 = vmul.f32 %v1747_v55, %v684_v33  ;;  %v601_v52 = vmul.f32 1.442695, %v565_v39 }
 0x121   :  { %v949_v42 = vadd.f32 %v814_v23, %v2319_v22  ;;  %v1817_v63 = vpop.f32.mrb[23].mxu0  ;;  %v1819_v59 = vpop.f32.mrb[23].mxu1  ;;  %1340 = vtanh.f32 %v933_v53  ;;  %v828_v23 = vadd.f32 1.0, %v827_v43  ;;  %v830_v22 = vand.u32 2147483647, %v1784_v29 }
 0x122   :  { %v1327_v38 = vpop.eup %1326  ;;  %v1833_v44 = vadd.f32 %v1692_v54, %v1651_v51  ;;  %v1145_v9 = vadd.f32 %v1703_v13, %v1698_v7  ;;  %v2324_v55 = vmax.f32 %v1670_v24, 0.0  ;;  %v692_v39 = vmul.f32 -0.5, %v1792_v0 }
 0x123   :  { %v1329_v49 = vpop.eup %1328  ;;  %1342 = vtanh.f32 %v949_v42  ;;  %v673_v37 = vmul.f32 0.6931472, %v1327_v38  ;;  %v2325_v54 = vmax.f32 %v1673_v25, 0.0  ;;  %v695_v7 = vand.u32 2147483647, %v1792_v0 }
 0x124   :  { %v817_v35 = vmul.f32 0.6931472, %v1329_v49  ;;  %1344 = vlog2.f32 %v689_v47  ;;  %v1331_v53 = vpop.eup %1330  ;;  %v550_v13 = vand.u32 2147483647, %v1833_v44  ;;  %v1860_v49 = vadd.f32 %v1145_v9, %v1651_v51 }
 0x125   :  { %v679_v40 = vsel %vm1774_vm4, %v676_v21, %v673_v37  ;;  %1346 = vpow2.f32 %v601_v52  ;;  %v682_v33 = vmul.f32 0.6931472, %v1331_v53  ;;  %v1842_v43 = vpop.f32.mrb[24].mxu0  ;;  %v1844_v17 = vpop.f32.mrb[24].mxu1  ;;  %v2327_v53 = vmax.f32 %v1678_v30, 0.0 }
 0x126   :  { %v934_v15 = vadd.f32 %v679_v40, %v2324_v55  ;;  %v823_v10 = vsel %vm1812_vm5, %v820_v62, %v817_v35  ;;  %v1846_v42 = vpop.eup %1332  ;;  %v1852_v38 = vpop.f32.mrb[25].mxu0  ;;  %vm1868_vm7 = vcmp.lt.f32.partialorder %v830_v22, 0.0004427343  ;;  %v581_v5 = vsub.f32 0.0, %v550_v13 }
 0x127   :  { %v950_v47 = vadd.f32 %v823_v10, %v2325_v54  ;;  %v1854_v4 = vpop.f32.mrb[25].mxu1  ;;  %v688_v21 = vsel %vm1823_vm6, %v685_v45, %v682_v33  ;;  %v833_v62 = vadd.f32 1.0, %v1846_v42  ;;  %v1862_v37 = vpop.f32.mrb[26].mxu0  ;;  %v829_v33 = vmul.f32 %v1784_v29, %v828_v23 }
 0x128   :  { %1348 = vtanh.f32 %v934_v15  ;;  %v1864_v52 = vpop.f32.mrb[26].mxu1  ;;  %v1335_v35 = vpop.eup %1334  ;;  %v935_v40 = vadd.f32 %v688_v21, %v2327_v53  ;;  %v693_v54 = vadd.f32 1.0, %v692_v39  ;;  %vm1879_vm8 = vcmp.lt.f32.partialorder %v695_v7, 0.0004427343 }
 0x129   :  { %2326 = vst [vmem:[#allocation2_spill] sm:$0xff] %v1864_v52  ;;  %1350 = vtanh.f32 %v950_v47  ;;  %v1872_v45 = vpop.f32.mrb[27].mxu0  ;;  %v1874_v15 = vpop.f32.mrb[27].mxu1  ;;  %v994_v10 = vmul.f32 %v1335_v35, %v1654_v60  ;;  %v633_v13 = vmul.f32 1.442695, %v581_v5  ;;  %v836_v60 = vmul.f32 -0.5, %v1846_v42 }
 0x12a   :  { %v1337_v9 = vpop.eup %1336  ;;  %1352 = vlog2.f32 %v833_v62  ;;  %v535_v29 = vand.u32 2147483647, %v1860_v49  ;;  %v1193_v23 = vadd.f32 %v1705_v14, %v1700_v8  ;;  %v1148_v7 = vadd.f32 %v1715_v27, %v1708_v19 }
 0x12b   :  { %v1339_v47 = vpop.eup %1338  ;;  %v1010_v52 = vmul.f32 %v1337_v9, %v1657_v61  ;;  %1354 = vtanh.f32 %v935_v40  ;;  %1025 = vst [vmem:[%s2308_s3] sm:$0xff] %v994_v10  ;;  %v1196_v62 = vadd.f32 %v1717_v28, %v1710_v20  ;;  %v2332_v19 = vmax.f32 %v1681_v34, 0.0 }
 0x12c   :  { %v1341_v21 = vpop.eup %1340  ;;  %v826_v53 = vmul.f32 0.6931472, %v1339_v47  ;;  %1356 = vpow2.f32 %v633_v13  ;;  %v566_v14 = vsub.f32 0.0, %v535_v29  ;;  %v1902_v5 = vadd.f32 %v1193_v23, %v1651_v51 }
 0x12d   :  { %v1343_v61 = vpop.eup %1342  ;;  %1041 = vst [vmem:[%s2308_s3 + $0x80] sm:$0xff] %v1010_v52  ;;  %v995_v39 = vmul.f32 %v1341_v21, %v1662_v2  ;;  %v1904_v52 = vpop.f32.mrb[28].mxu0  ;;  %v694_v27 = vmul.f32 %v1792_v0, %v693_v54  ;;  %v839_v28 = vand.u32 2147483647, %v1846_v42  ;;  %v1926_v21 = vadd.f32 %v1148_v7, %v1651_v51 }
 0x12e   :  { %v1345_v35 = vpop.eup %1344  ;;  %v1011_v40 = vmul.f32 %v1343_v61, %v1665_v3  ;;  %v832_v8 = vsel %vm1868_vm7, %v829_v33, %v826_v53  ;;  %v1906_v2 = vpop.f32.mrb[28].mxu1  ;;  %v837_v33 = vadd.f32 1.0, %v836_v60  ;;  %v603_v13 = vmul.f32 1.442695, %v566_v14 }
 0x12f   :  { %v1908_v9 = vpop.eup %1346  ;;  %1026 = vst [vmem:[%s2308_s3 + $0x8] sm:$0xff] %v995_v39  ;;  %v951_v3 = vadd.f32 %v832_v8, %v2332_v19  ;;  %v691_v20 = vmul.f32 0.6931472, %v1345_v35  ;;  %v1917_v55 = vpop.f32.mrb[29].mxu0  ;;  %v551_v53 = vand.u32 2147483647, %v1902_v5  ;;  %v1938_v7 = vadd.f32 %v1196_v62, %v1651_v51 }
 0x130   :  { %v1919_v10 = vpop.f32.mrb[29].mxu1  ;;  %1042 = vst [vmem:[%s2308_s3 + $0x88] sm:$0xff] %v1011_v40  ;;  %v698_v47 = vadd.f32 1.0, %v1908_v9  ;;  %v701_v54 = vmul.f32 -0.5, %v1908_v9  ;;  %v1932_v29 = vpop.f32.mrb[30].mxu0  ;;  %v2333_v60 = vmax.f32 %v1686_v48, 0.0 }
 0x131   :  { %1358 = vtanh.f32 %v951_v3  ;;  %v697_v0 = vsel %vm1879_vm8, %v694_v27, %v691_v20  ;;  %v1218_v23 = vpop.f32.mrb[30].mxu1  ;;  %v518_v35 = vmax.f32 %v1713_v26, 0.0  ;;  %v1940_v40 = vpop.f32.mrb[31].mxu0  ;;  %vm1943_vm9 = vcmp.lt.f32.partialorder %v839_v28, 0.0004427343 }
 0x132   :  { %v1349_v61 = vpop.eup %1348  ;;  %v936_v39 = vadd.f32 %v697_v0, %v2333_v60  ;;  %1360 = vlog2.f32 %v698_v47  ;;  %v1219_v22 = vpop.f32.mrb[31].mxu1  ;;  %v582_v3 = vsub.f32 0.0, %v551_v53  ;;  %v838_v47 = vmul.f32 %v1846_v42, %v837_v33 }
 0x133   :  { %v1351_v8 = vpop.eup %1350  ;;  %v996_v14 = vmul.f32 %v1349_v61, %v1670_v24  ;;  %1362 = vpow2.f32 %v603_v13  ;;  %v536_v62 = vand.u32 2147483647, %v1926_v21  ;;  %v702_v28 = vadd.f32 1.0, %v701_v54 }
 0x134   :  { %v1353_v20 = vpop.eup %1352  ;;  %v1012_v27 = vmul.f32 %v1351_v8, %v1673_v25  ;;  %1364 = vtanh.f32 %v936_v39  ;;  %v635_v23 = vmul.f32 1.442695, %v582_v3  ;;  %v1151_v13 = vadd.f32 %v1745_v6, %v1735_v56 }
 0x135   :  { %v1355_v0 = vpop.eup %1354  ;;  %1027 = vst [vmem:[%s2308_s3 + $0x10] sm:$0xff] %v996_v14  ;;  %v835_v24 = vmul.f32 0.6931472, %v1353_v20  ;;  %v567_v42 = vsub.f32 0.0, %v536_v62  ;;  %v552_v33 = vand.u32 2147483647, %v1938_v7  ;;  %v1199_v53 = vadd.f32 %v1758_v16, %v1737_v57 }
 0x136   :  { %1043 = vst [vmem:[%s2308_s3 + $0x90] sm:$0xff] %v1012_v27  ;;  %v997_v25 = vmul.f32 %v1355_v0, %v1678_v30  ;;  %v1962_v61 = vpop.eup %1356  ;;  %1366 = vpow2.f32 %v635_v23  ;;  %v1967_v56 = vadd.f32 %v1151_v13, %v1651_v51  ;;  %v1154_v6 = vadd.f32 %v1766_v32, %v1760_v18 }
 0x137   :  { %v841_v54 = vsel %vm1943_vm9, %v838_v47, %v835_v24  ;;  %v503_v60 = vmax.f32 %v1756_v12, 0.0  ;;  %v842_v57 = vadd.f32 1.0, %v1962_v61  ;;  %v519_v16 = vmax.f32 %v1833_v44, 0.0 }
 0x138   :  { %1028 = vst [vmem:[%s2308_s3 + $0x18] sm:$0xff] %v997_v25  ;;  %v952_v30 = vadd.f32 %v841_v54, %v518_v35  ;;  %v605_v39 = vmul.f32 1.442695, %v567_v42  ;;  %v583_v22 = vsub.f32 0.0, %v552_v33  ;;  %v537_v8 = vand.u32 2147483647, %v1967_v56 }
 0x139   :  { %v704_v14 = vand.u32 2147483647, %v1908_v9  ;;  %v504_v18 = vmax.f32 %v1860_v49, 0.0  ;;  %v1981_v32 = vadd.f32 %v1199_v53, %v1651_v51  ;;  %v703_v35 = vmul.f32 %v1908_v9, %v702_v28 }
 0x13a   :  { %1368 = vtanh.f32 %v952_v30  ;;  %v637_v3 = vmul.f32 1.442695, %v583_v22  ;;  %v568_v20 = vsub.f32 0.0, %v537_v8  ;;  %v845_v62 = vmul.f32 -0.5, %v1962_v61 }
 0x13b   :  { %v1359_v19 = vpop.eup %1358  ;;  %1370 = vlog2.f32 %v842_v57  ;;  %v1987_v0 = vadd.f32 %v1154_v6, %v1651_v51  ;;  %v553_v25 = vand.u32 2147483647, %v1981_v32  ;;  %vm705_vm10 = vcmp.lt.f32.partialorder %v704_v14, 0.0004427343 }
 0x13c   :  { %v1361_v27 = vpop.eup %1360  ;;  %v1013_v47 = vmul.f32 %v1359_v19, %v1681_v34  ;;  %1372 = vpow2.f32 %v605_v39  ;;  %v607_v13 = vmul.f32 1.442695, %v568_v20  ;;  %v520_v28 = vmax.f32 %v1902_v5, 0.0 }
 0x13d   :  { %v1363_v24 = vpop.eup %1362  ;;  %v700_v23 = vmul.f32 0.6931472, %v1361_v27  ;;  %1374 = vpow2.f32 %v637_v3  ;;  %v584_v54 = vsub.f32 0.0, %v553_v25  ;;  %v846_v30 = vadd.f32 1.0, %v845_v62 }
 0x13e   :  { %v1365_v42 = vpop.eup %1364  ;;  %1044 = vst [vmem:[%s2308_s3 + $0x98] sm:$0xff] %v1013_v47  ;;  %v707_v9 = vadd.f32 1.0, %v1363_v24  ;;  %v710_v34 = vmul.f32 -0.5, %v1363_v24  ;;  %1376 = vpow2.f32 %v607_v13  ;;  %v848_v57 = vand.u32 2147483647, %v1962_v61 }
 0x13f   :  { %v998_v33 = vmul.f32 %v1365_v42, %v1686_v48  ;;  %v706_v53 = vsel %vm705_vm10, %v703_v35, %v700_v23  ;;  %v639_v22 = vmul.f32 1.442695, %v584_v54  ;;  %v538_v8 = vand.u32 2147483647, %v1987_v0 }
 0x140   :  { %v937_v6 = vadd.f32 %v706_v53, %v503_v60  ;;  %1378 = vlog2.f32 %v707_v9  ;;  %v1996_v39 = vpop.eup %1366  ;;  %v1202_v48 = vadd.f32 %v1770_v50, %v1764_v31  ;;  %v1157_v14 = vadd.f32 %v1797_v41, %v1788_v36 }
 0x141   :  { %1029 = vst [vmem:[%s2308_s3 + $0x20] sm:$0xff] %v998_v33  ;;  %v713_v60 = vand.u32 2147483647, %v1363_v24  ;;  %v851_v19 = vadd.f32 1.0, %v1996_v39  ;;  %v505_v35 = vmax.f32 %v1926_v21, 0.0  ;;  %v711_v3 = vadd.f32 1.0, %v710_v34 }
 0x142   :  { %1380 = vtanh.f32 %v937_v6  ;;  %v521_v20 = vmax.f32 %v1938_v7, 0.0  ;;  %v569_v27 = vsub.f32 0.0, %v538_v8  ;;  %v506_v62 = vmax.f32 %v1967_v56, 0.0 }
 0x143   :  { %1382 = vpow2.f32 %v639_v22  ;;  %v2011_v31 = vadd.f32 %v1202_v48, %v1651_v51  ;;  %v1205_v50 = vadd.f32 %v1799_v46, %v1790_v1  ;;  %v847_v23 = vmul.f32 %v1962_v61, %v846_v30 }
 0x144   :  { %v1369_v47 = vpop.eup %1368  ;;  %1384 = vlog2.f32 %v851_v19  ;;  %vm2017_vm11 = vcmp.lt.f32.partialorder %v848_v57, 0.0004427343  ;;  %v609_v25 = vmul.f32 1.442695, %v569_v27  ;;  %vm2021_vm12 = vcmp.lt.f32.partialorder %v713_v60, 0.0004427343 }
 0x145   :  { %v1371_v36 = vpop.eup %1370  ;;  %v1014_v41 = vmul.f32 %v1369_v47, %v1713_v26  ;;  %v854_v33 = vmul.f32 -0.5, %v1996_v39  ;;  %v522_v1 = vmax.f32 %v1981_v32, 0.0  ;;  %v712_v26 = vmul.f32 %v1363_v24, %v711_v3 }
 0x146   :  { %v1373_v42 = vpop.eup %1372  ;;  %v844_v9 = vmul.f32 0.6931472, %v1371_v36  ;;  %v857_v61 = vand.u32 2147483647, %v1996_v39  ;;  %1386 = vpow2.f32 %v609_v25  ;;  %v554_v57 = vand.u32 2147483647, %v2011_v31 }
 0x147   :  { %v1375_v46 = vpop.eup %1374  ;;  %1045 = vst [vmem:[%s2308_s3 + $0xa0] sm:$0xff] %v1014_v41  ;;  %v716_v53 = vadd.f32 1.0, %v1373_v42  ;;  %v719_v6 = vmul.f32 -0.5, %v1373_v42  ;;  %v722_v48 = vand.u32 2147483647, %v1373_v42  ;;  %v2037_v60 = vadd.f32 %v1157_v14, %v1651_v51 }
 0x148   :  { %v850_v54 = vsel %vm2017_vm11, %v847_v23, %v844_v9  ;;  %v860_v30 = vadd.f32 1.0, %v1375_v46  ;;  %v1377_v22 = vpop.eup %1376  ;;  %v855_v19 = vadd.f32 1.0, %v854_v33  ;;  %v863_v3 = vmul.f32 -0.5, %v1375_v46 }
 0x149   :  { %v953_v8 = vadd.f32 %v850_v54, %v519_v16  ;;  %1388 = vlog2.f32 %v716_v53  ;;  %v725_v27 = vadd.f32 1.0, %v1377_v22  ;;  %vm2039_vm13 = vcmp.lt.f32.partialorder %v857_v61, 0.0004427343 }
 0x14a   :  { %v1379_v24 = vpop.eup %1378  ;;  %1390 = vlog2.f32 %v860_v30  ;;  %v866_v41 = vand.u32 2147483647, %v1375_v46  ;;  %v720_v13 = vadd.f32 1.0, %v719_v6  ;;  %v728_v16 = vmul.f32 -0.5, %v1377_v22 }
 0x14b   :  { %1392 = vtanh.f32 %v953_v8  ;;  %v709_v47 = vmul.f32 0.6931472, %v1379_v24  ;;  %v585_v25 = vsub.f32 0.0, %v554_v57  ;;  %vm2048_vm14 = vcmp.lt.f32.partialorder %v722_v48, 0.0004427343 }
 0x14c   :  { %v1381_v23 = vpop.eup %1380  ;;  %1394 = vlog2.f32 %v725_v27  ;;  %v539_v61 = vand.u32 2147483647, %v2037_v60  ;;  %v864_v30 = vadd.f32 1.0, %v863_v3  ;;  %v856_v34 = vmul.f32 %v1996_v39, %v855_v19 }
 0x14d   :  { %v2043_v9 = vpop.eup %1382  ;;  %v999_v14 = vmul.f32 %v1381_v23, %v1756_v12  ;;  %v715_v33 = vsel %vm2021_vm12, %v712_v26, %v709_v47  ;;  %v731_v26 = vand.u32 2147483647, %v1377_v22  ;;  %v641_v48 = vmul.f32 1.442695, %v585_v25 }
 0x14e   :  { %v1385_v54 = vpop.eup %1384  ;;  %v938_v6 = vadd.f32 %v715_v33, %v504_v18  ;;  %v869_v57 = vadd.f32 1.0, %v2043_v9  ;;  %v872_v8 = vmul.f32 -0.5, %v2043_v9  ;;  %v729_v24 = vadd.f32 1.0, %v728_v16 }
 0x14f   :  { %1030 = vst [vmem:[%s2308_s3 + $0x28] sm:$0xff] %v999_v14  ;;  %v853_v12 = vmul.f32 0.6931472, %v1385_v54  ;;  %v570_v27 = vsub.f32 0.0, %v539_v61  ;;  %v2062_v47 = vadd.f32 %v1205_v50, %v1651_v51  ;;  %vm2068_vm15 = vcmp.lt.f32.partialorder %v866_v41, 0.0004427343 }
 0x150   :  { %1396 = vtanh.f32 %v938_v6  ;;  %v2064_v18 = vpop.eup %1386  ;;  %v1160_v39 = vadd.f32 %v1817_v63, %v1806_v11  ;;  %v721_v16 = vmul.f32 %v1373_v42, %v720_v13  ;;  %v873_v25 = vadd.f32 1.0, %v872_v8 }
 0x151   :  { %v859_v3 = vsel %vm2039_vm13, %v856_v34, %v853_v12  ;;  %1398 = vlog2.f32 %v869_v57  ;;  %v734_v50 = vadd.f32 1.0, %v2064_v18  ;;  %v865_v33 = vmul.f32 %v1375_v46, %v864_v30 }
 0x152   :  { %v954_v19 = vadd.f32 %v859_v3, %v520_v28  ;;  %vm2077_vm0 = vcmp.lt.f32.partialorder %v731_v26, 0.0004427343  ;;  %1400 = vpow2.f32 %v641_v48  ;;  %v611_v41 = vmul.f32 1.442695, %v570_v27 }
 0x153   :  { %v1389_v14 = vpop.eup %1388  ;;  %v730_v6 = vmul.f32 %v1377_v22, %v729_v24  ;;  %v555_v11 = vand.u32 2147483647, %v2062_v47  ;;  %v875_v42 = vand.u32 2147483647, %v2043_v9  ;;  %v2084_v13 = vadd.f32 %v1160_v39, %v1651_v51 }
 0x154   :  { %v1391_v61 = vpop.eup %1390  ;;  %1402 = vtanh.f32 %v954_v19  ;;  %v718_v54 = vmul.f32 0.6931472, %v1389_v14  ;;  %v874_v8 = vmul.f32 %v2043_v9, %v873_v25  ;;  %v737_v53 = vmul.f32 -0.5, %v2064_v18 }
 0x155   :  { %v1393_v63 = vpop.eup %1392  ;;  %v862_v28 = vmul.f32 0.6931472, %v1391_v61  ;;  %1404 = vlog2.f32 %v734_v50  ;;  %v586_v26 = vsub.f32 0.0, %v555_v11  ;;  %v540_v9 = vand.u32 2147483647, %v2084_v13 }
 0x156   :  { %v1395_v46 = vpop.eup %1394  ;;  %v1015_v30 = vmul.f32 %v1393_v63, %v1833_v44  ;;  %v724_v57 = vsel %vm2048_vm14, %v721_v16, %v718_v54  ;;  %1406 = vpow2.f32 %v611_v41  ;;  %v1208_v48 = vadd.f32 %v1819_v59, %v1808_v58 }
 0x157   :  { %v939_v22 = vadd.f32 %v724_v57, %v505_v35  ;;  %v868_v12 = vsel %vm2068_vm15, %v865_v33, %v862_v28  ;;  %v727_v34 = vmul.f32 0.6931472, %v1395_v46  ;;  %v643_v24 = vmul.f32 1.442695, %v586_v26 }
 0x158   :  { %1046 = vst [vmem:[%s2308_s3 + $0xa8] sm:$0xff] %v1015_v30  ;;  %v955_v44 = vadd.f32 %v868_v12, %v521_v20  ;;  %v1163_v27 = vadd.f32 %v1852_v38, %v1842_v43  ;;  %v571_v23 = vsub.f32 0.0, %v540_v9  ;;  %v2110_v39 = vadd.f32 %v1208_v48, %v1651_v51 }
 0x159   :  { %1408 = vtanh.f32 %v939_v22  ;;  %v733_v35 = vsel %vm2077_vm0, %v730_v6, %v727_v34  ;;  %v1211_v16 = vadd.f32 %v1854_v4, %v1844_v17  ;;  %v738_v38 = vadd.f32 1.0, %v737_v53 }
 0x15a   :  { %v1397_v3 = vpop.eup %1396  ;;  %1410 = vtanh.f32 %v955_v44  ;;  %v940_v20 = vadd.f32 %v733_v35, %v506_v62  ;;  %v2114_v59 = vadd.f32 %v1163_v27, %v1651_v51  ;;  %v613_v25 = vmul.f32 1.442695, %v571_v23 }
 0x15b   :  { %v1399_v19 = vpop.eup %1398  ;;  %v1000_v58 = vmul.f32 %v1397_v3, %v1860_v49  ;;  %1412 = vpow2.f32 %v643_v24  ;;  %vm876_vm1 = vcmp.lt.f32.partialorder %v875_v42, 0.0004427343  ;;  %v740_v49 = vand.u32 2147483647, %v2064_v18 }
 0x15c   :  { %1414 = vtanh.f32 %v940_v20  ;;  %v871_v43 = vmul.f32 0.6931472, %v1399_v19  ;;  %v2118_v50 = vpop.eup %1400  ;;  %v556_v62 = vand.u32 2147483647, %v2110_v39  ;;  %v541_v17 = vand.u32 2147483647, %v2114_v59 }
 0x15d   :  { %1031 = vst [vmem:[%s2308_s3 + $0x30] sm:$0xff] %v1000_v58  ;;  %v878_v33 = vadd.f32 1.0, %v2118_v50  ;;  %1416 = vpow2.f32 %v613_v25  ;;  %v507_v6 = vmax.f32 %v1987_v0, 0.0  ;;  %v739_v63 = vmul.f32 %v2064_v18, %v738_v38  ;;  %v2348_v20 = vld [vmem:[#allocation2_spill] sm:$0xff] }
 0x15e   :  { %v1403_v51 = vpop.eup %1402  ;;  %v877_v14 = vsel %vm876_vm1, %v874_v8, %v871_v43  ;;  %v587_v61 = vsub.f32 0.0, %v556_v62  ;;  %vm741_vm2 = vcmp.lt.f32.partialorder %v740_v49, 0.0004427343  ;;  %v881_v18 = vmul.f32 -0.5, %v2118_v50 }
 0x15f   :  { %v1405_v4 = vpop.eup %1404  ;;  %v1016_v36 = vmul.f32 %v1403_v51, %v1902_v5  ;;  %v956_v41 = vadd.f32 %v877_v14, %v522_v1  ;;  %1418 = vlog2.f32 %v878_v33  ;;  %v2141_v1 = vld [vmem:[%s2307_s2] ss:$0 sm:$0xff]  ;;  %v572_v30 = vsub.f32 0.0, %v541_v17 }
 0x160   :  { %v2130_v54 = vpop.eup %1406  ;;  %v736_v11 = vmul.f32 0.6931472, %v1405_v4  ;;  %v2144_v28 = vadd.f32 %v2141_v1, %v1211_v16  ;;  %v645_v46 = vmul.f32 1.442695, %v587_v61  ;;  %v882_v35 = vadd.f32 1.0, %v881_v18 }
 0x161   :  { %1047 = vst [vmem:[%s2308_s3 + $0xb0] sm:$0xff] %v1016_v36  ;;  %1420 = vtanh.f32 %v956_v41  ;;  %v743_v5 = vadd.f32 1.0, %v2130_v54  ;;  %v746_v34 = vmul.f32 -0.5, %v2130_v54  ;;  %v615_v26 = vmul.f32 1.442695, %v572_v30 }
 0x162   :  { %v742_v42 = vsel %vm741_vm2, %v739_v63, %v736_v11  ;;  %v557_v9 = vand.u32 2147483647, %v2144_v28  ;;  %v884_v24 = vand.u32 2147483647, %v2118_v50  ;;  %v1166_v3 = vadd.f32 %v1872_v45, %v1862_v37 }
 0x163   :  { %v1409_v57 = vpop.eup %1408  ;;  %v941_v8 = vadd.f32 %v742_v42, %v507_v6  ;;  %1422 = vlog2.f32 %v743_v5  ;;  %v1214_v23 = vadd.f32 %v1874_v15, %v2348_v20  ;;  %v747_v19 = vadd.f32 1.0, %v746_v34 }
 0x164   :  { %v1411_v22 = vpop.eup %1410  ;;  %v1001_v12 = vmul.f32 %v1409_v57, %v1926_v21  ;;  %1424 = vpow2.f32 %v645_v46  ;;  %v588_v27 = vsub.f32 0.0, %v557_v9  ;;  %v749_v58 = vand.u32 2147483647, %v2130_v54 }
 0x165   :  { %v2149_v44 = vpop.eup %1412  ;;  %v1017_v53 = vmul.f32 %v1411_v22, %v1938_v7  ;;  %1426 = vtanh.f32 %v941_v8  ;;  %v1169_v16 = vadd.f32 %v1917_v55, %v1904_v52  ;;  %v2175_v38 = vadd.f32 %v2141_v1, %v1166_v3 }
 0x166   :  { %v1415_v48 = vpop.eup %1414  ;;  %1032 = vst [vmem:[%s2308_s3 + $0x38] sm:$0xff] %v1001_v12  ;;  %v887_v21 = vadd.f32 1.0, %v2149_v44  ;;  %1428 = vpow2.f32 %v615_v26  ;;  %v2178_v37 = vadd.f32 %v2141_v1, %v1214_v23  ;;  %v1217_v45 = vadd.f32 %v1919_v10, %v1906_v2 }
 0x167   :  { %1048 = vst [vmem:[%s2308_s3 + $0xb8] sm:$0xff] %v1017_v53  ;;  %v1002_v7 = vmul.f32 %v1415_v48, %v1967_v56  ;;  %v2169_v43 = vpop.eup %1416  ;;  %v647_v56 = vmul.f32 1.442695, %v588_v27  ;;  %v523_v25 = vmax.f32 %v2011_v31, 0.0  ;;  %v890_v52 = vmul.f32 -0.5, %v2149_v44 }
 0x168   :  { %1430 = vlog2.f32 %v887_v21  ;;  %v752_v55 = vadd.f32 1.0, %v2169_v43  ;;  %v883_v51 = vmul.f32 %v2118_v50, %v882_v35  ;;  %v542_v14 = vand.u32 2147483647, %v2175_v38 }
 0x169   :  { %1033 = vst [vmem:[%s2308_s3 + $0x40] sm:$0xff] %v1002_v7  ;;  %v1419_v15 = vpop.eup %1418  ;;  %1432 = vpow2.f32 %v647_v56  ;;  %vm885_vm3 = vcmp.lt.f32.partialorder %v884_v24, 0.0004427343  ;;  %vm2188_vm4 = vcmp.lt.f32.partialorder %v749_v58, 0.0004427343  ;;  %v748_v4 = vmul.f32 %v2130_v54, %v747_v19 }
 0x16a   :  { %v880_v62 = vmul.f32 0.6931472, %v1419_v15  ;;  %1434 = vlog2.f32 %v752_v55  ;;  %v573_v36 = vsub.f32 0.0, %v542_v14  ;;  %v558_v41 = vand.u32 2147483647, %v2178_v37 }
 0x16b   :  { %v1421_v49 = vpop.eup %1420  ;;  %v891_v6 = vadd.f32 1.0, %v890_v52  ;;  %v755_v11 = vmul.f32 -0.5, %v2169_v43  ;;  %v508_v5 = vmax.f32 %v2037_v60, 0.0  ;;  %v893_v42 = vand.u32 2147483647, %v2149_v44 }
 0x16c   :  { %v1018_v33 = vmul.f32 %v1421_v49, %v1981_v32  ;;  %v886_v10 = vsel %vm885_vm3, %v883_v51, %v880_v62  ;;  %v617_v18 = vmul.f32 1.442695, %v573_v36  ;;  %v589_v8 = vsub.f32 0.0, %v558_v41 }
 0x16d   :  { %v1423_v2 = vpop.eup %1422  ;;  %v957_v32 = vadd.f32 %v886_v10, %v523_v25  ;;  %v2209_v12 = vadd.f32 %v2141_v1, %v1169_v16  ;;  %v892_v26 = vmul.f32 %v2149_v44, %v891_v6  ;;  %v756_v53 = vadd.f32 1.0, %v755_v11 }
 0x16e   :  { %v2194_v61 = vpop.eup %1424  ;;  %1049 = vst [vmem:[%s2308_s3 + $0xc0] sm:$0xff] %v1018_v33  ;;  %v745_v50 = vmul.f32 0.6931472, %v1423_v2  ;;  %v649_v35 = vmul.f32 1.442695, %v589_v8  ;;  %v524_v24 = vmax.f32 %v2062_v47, 0.0  ;;  %v2223_v3 = vadd.f32 %v2141_v1, %v1217_v45 }
 0x16f   :  { %v1427_v63 = vpop.eup %1426  ;;  %v896_v54 = vadd.f32 1.0, %v2194_v61  ;;  %1436 = vtanh.f32 %v957_v32  ;;  %v899_v48 = vmul.f32 -0.5, %v2194_v61  ;;  %vm894_vm5 = vcmp.lt.f32.partialorder %v893_v42, 0.0004427343 }
 0x170   :  { %v2203_v46 = vpop.eup %1428  ;;  %v1003_v30 = vmul.f32 %v1427_v63, %v1987_v0  ;;  %v751_v57 = vsel %vm2188_vm4, %v748_v4, %v745_v50  ;;  %v758_v21 = vand.u32 2147483647, %v2169_v43  ;;  %v543_v44 = vand.u32 2147483647, %v2209_v12 }
 0x171   :  { %v942_v22 = vadd.f32 %v751_v57, %v508_v5  ;;  %1438 = vlog2.f32 %v896_v54  ;;  %v761_v0 = vadd.f32 1.0, %v2203_v46  ;;  %v509_v19 = vmax.f32 %v2084_v13, 0.0 }
 0x172   :  { %v1431_v34 = vpop.eup %1430  ;;  %1034 = vst [vmem:[%s2308_s3 + $0x48] sm:$0xff] %v1003_v30  ;;  %1440 = vpow2.f32 %v617_v18  ;;  %v757_v58 = vmul.f32 %v2169_v43, %v756_v53  ;;  %v900_v15 = vadd.f32 1.0, %v899_v48  ;;  %v764_v25 = vmul.f32 -0.5, %v2203_v46 }
 0x173   :  { %1442 = vtanh.f32 %v942_v22  ;;  %v889_v9 = vmul.f32 0.6931472, %v1431_v34  ;;  %v2219_v7 = vpop.eup %1432  ;;  %v574_v52 = vsub.f32 0.0, %v543_v44  ;;  %vm759_vm6 = vcmp.lt.f32.partialorder %v758_v21, 0.0004427343 }
 0x174   :  { %1444 = vlog2.f32 %v761_v0  ;;  %v1435_v20 = vpop.eup %1434  ;;  %v905_v16 = vadd.f32 1.0, %v2219_v7  ;;  %v559_v55 = vand.u32 2147483647, %v2223_v3  ;;  %v1172_v45 = vadd.f32 %v1940_v40, %v1932_v29 }
 0x175   :  { %v895_v27 = vsel %vm894_vm5, %v892_v26, %v889_v9  ;;  %1446 = vpow2.f32 %v649_v35  ;;  %v754_v56 = vmul.f32 0.6931472, %v1435_v20  ;;  %v902_v62 = vand.u32 2147483647, %v2194_v61 }
 0x176   :  { %v958_v23 = vadd.f32 %v895_v27, %v524_v24  ;;  %v619_v51 = vmul.f32 1.442695, %v574_v52  ;;  %v767_v33 = vand.u32 2147483647, %v2203_v46  ;;  %v590_v17 = vsub.f32 0.0, %v559_v55 }
 0x177   :  { %v760_v49 = vsel %vm759_vm6, %v757_v58, %v754_v56  ;;  %v2235_v2 = vadd.f32 %v2141_v1, %v1172_v45  ;;  %v901_v36 = vmul.f32 %v2194_v61, %v900_v15  ;;  %v765_v41 = vadd.f32 1.0, %v764_v25 }
 0x178   :  { %1448 = vtanh.f32 %v958_v23  ;;  %v943_v14 = vadd.f32 %v760_v49, %v509_v19  ;;  %v908_v32 = vmul.f32 -0.5, %v2219_v7  ;;  %v651_v50 = vmul.f32 1.442695, %v590_v17 }
 0x179   :  { %1450 = vlog2.f32 %v905_v16  ;;  %v1437_v43 = vpop.eup %1436  ;;  %v525_v1 = vmax.f32 %v2110_v39, 0.0  ;;  %vm903_vm7 = vcmp.lt.f32.partialorder %v902_v62, 0.0004427343  ;;  %v544_v61 = vand.u32 2147483647, %v2235_v2 }
 0x17a   :  { %v1019_v4 = vmul.f32 %v1437_v43, %v2011_v31  ;;  %1452 = vpow2.f32 %v619_v51  ;;  %v766_v30 = vmul.f32 %v2203_v46, %v765_v41  ;;  %v510_v57 = vmax.f32 %v2114_v59, 0.0 }
 0x17b   :  { %v1439_v10 = vpop.eup %1438  ;;  %1454 = vtanh.f32 %v943_v14  ;;  %vm768_vm8 = vcmp.lt.f32.partialorder %v767_v33, 0.0004427343  ;;  %v909_v8 = vadd.f32 1.0, %v908_v32  ;;  %v575_v26 = vsub.f32 0.0, %v544_v61 }
 0x17c   :  { %v2239_v29 = vpop.eup %1440  ;;  %v898_v40 = vmul.f32 0.6931472, %v1439_v10  ;;  %1050 = vst [vmem:[%s2308_s3 + $0xc8] sm:$0xff] %v1019_v4  ;;  %1456 = vpow2.f32 %v651_v50  ;;  %v526_v44 = vmax.f32 %v2144_v28, 0.0 }
 0x17d   :  { %v1443_v6 = vpop.eup %1442  ;;  %v770_v31 = vadd.f32 1.0, %v2239_v29  ;;  %v773_v9 = vmul.f32 -0.5, %v2239_v29  ;;  %v621_v35 = vmul.f32 1.442695, %v575_v26  ;;  %v910_v21 = vmul.f32 %v2219_v7, %v909_v8 }
 0x17e   :  { %v1445_v11 = vpop.eup %1444  ;;  %v1004_v63 = vmul.f32 %v1443_v6, %v2037_v60  ;;  %v904_v5 = vsel %vm903_vm7, %v901_v36, %v898_v40  ;;  %v911_v60 = vand.u32 2147483647, %v2219_v7  ;;  %v776_v15 = vand.u32 2147483647, %v2239_v29 }
 0x17f   :  { %v1447_v42 = vpop.eup %1446  ;;  %v959_v54 = vadd.f32 %v904_v5, %v525_v1  ;;  %v763_v18 = vmul.f32 0.6931472, %v1445_v11  ;;  %1458 = vlog2.f32 %v770_v31  ;;  %v774_v58 = vadd.f32 1.0, %v773_v9 }
 0x180   :  { %1035 = vst [vmem:[%s2308_s3 + $0x50] sm:$0xff] %v1004_v63  ;;  %v914_v22 = vadd.f32 1.0, %v1447_v42  ;;  %vm912_vm9 = vcmp.lt.f32.partialorder %v911_v60, 0.0004427343  ;;  %v917_v20 = vmul.f32 -0.5, %v1447_v42 }
 0x181   :  { %1460 = vtanh.f32 %v959_v54  ;;  %v769_v34 = vsel %vm768_vm8, %v766_v30, %v763_v18  ;;  %v775_v49 = vmul.f32 %v2239_v29, %v774_v58  ;;  %v920_v62 = vand.u32 2147483647, %v1447_v42 }
 0x182   :  { %v1449_v53 = vpop.eup %1448  ;;  %v944_v0 = vadd.f32 %v769_v34, %v510_v57  ;;  %1462 = vlog2.f32 %v914_v22  ;;  %v918_v52 = vadd.f32 1.0, %v917_v20  ;;  %vm777_vm10 = vcmp.lt.f32.partialorder %v776_v15, 0.0004427343 }
 0x183   :  { %v1451_v46 = vpop.eup %1450  ;;  %v1020_v48 = vmul.f32 %v1449_v53, %v2062_v47  ;;  %v527_v29 = vmax.f32 %v2178_v37, 0.0  ;;  %vm921_vm11 = vcmp.lt.f32.partialorder %v920_v62, 0.0004427343  ;;  %v512_v30 = vmax.f32 %v2209_v12, 0.0 }
 0x184   :  { %1464 = vtanh.f32 %v944_v0  ;;  %v907_v24 = vmul.f32 0.6931472, %v1451_v46  ;;  %v1453_v27 = vpop.eup %1452  ;;  %v919_v36 = vmul.f32 %v1447_v42, %v918_v52  ;;  %v528_v53 = vmax.f32 %v2223_v3, 0.0 }
 0x185   :  { %1051 = vst [vmem:[%s2308_s3 + $0xd0] sm:$0xff] %v1020_v48  ;;  %1466 = vpow2.f32 %v621_v35  ;;  %v1455_v23 = vpop.eup %1454  ;;  %v779_v16 = vadd.f32 1.0, %v1453_v27  ;;  %v782_v43 = vmul.f32 -0.5, %v1453_v27  ;;  %v785_v31 = vand.u32 2147483647, %v1453_v27 }
 0x186   :  { %v913_v19 = vsel %vm912_vm9, %v910_v21, %v907_v24  ;;  %v1005_v47 = vmul.f32 %v1455_v23, %v2084_v13  ;;  %v1457_v7 = vpop.eup %1456  ;;  %v511_v13 = vmax.f32 %v2175_v38, 0.0  ;;  %v513_v23 = vmax.f32 %v2235_v2, 0.0 }
 0x187   :  { %v960_v56 = vadd.f32 %v913_v19, %v526_v44  ;;  %1468 = vlog2.f32 %v779_v16  ;;  %v923_v55 = vadd.f32 1.0, %v1457_v7  ;;  %v926_v40 = vmul.f32 -0.5, %v1457_v7 }
 0x188   :  { %1036 = vst [vmem:[%s2308_s3 + $0x58] sm:$0xff] %v1005_v47  ;;  %v783_v1 = vadd.f32 1.0, %v782_v43  ;;  %v929_v18 = vand.u32 2147483647, %v1457_v7  ;;  %vm786_vm12 = vcmp.lt.f32.partialorder %v785_v31, 0.0004427343 }
 0x189   :  { %v1459_v25 = vpop.eup %1458  ;;  %1470 = vtanh.f32 %v960_v56  ;;  %v927_v63 = vadd.f32 1.0, %v926_v40 }
 0x18a   :  { %v772_v45 = vmul.f32 0.6931472, %v1459_v25  ;;  %1472 = vlog2.f32 %v923_v55  ;;  %v784_v54 = vmul.f32 %v1453_v27, %v783_v1  ;;  %vm930_vm13 = vcmp.lt.f32.partialorder %v929_v18, 0.0004427343 }
 0x18b   :  { %v1461_v51 = vpop.eup %1460  ;;  %v928_v60 = vmul.f32 %v1457_v7, %v927_v63 }
 0x18c   :  { %v1463_v14 = vpop.eup %1462  ;;  %v1021_v33 = vmul.f32 %v1461_v51, %v2110_v39  ;;  %v778_v17 = vsel %vm777_vm10, %v775_v49, %v772_v45 }
 0x18d   :  { %v945_v10 = vadd.f32 %v778_v17, %v511_v13  ;;  %v916_v4 = vmul.f32 0.6931472, %v1463_v14 }
 0x18e   :  { %v1465_v41 = vpop.eup %1464  ;;  %1052 = vst [vmem:[%s2308_s3 + $0xd8] sm:$0xff] %v1021_v33 }
 0x18f   :  { %v1467_v32 = vpop.eup %1466  ;;  %v1006_v50 = vmul.f32 %v1465_v41, %v2114_v59  ;;  %1474 = vtanh.f32 %v945_v10  ;;  %v922_v6 = vsel %vm921_vm11, %v919_v36, %v916_v4 }
 0x190   :  { %v961_v39 = vadd.f32 %v922_v6, %v527_v29  ;;  %v788_v61 = vadd.f32 1.0, %v1467_v32  ;;  %v791_v26 = vmul.f32 -0.5, %v1467_v32  ;;  %v794_v35 = vand.u32 2147483647, %v1467_v32 }
 0x191   :  { %1037 = vst [vmem:[%s2308_s3 + $0x60] sm:$0xff] %v1006_v50  ;;  %v1469_v11 = vpop.eup %1468 }
 0x192   :  { %1476 = vtanh.f32 %v961_v39  ;;  %v781_v42 = vmul.f32 0.6931472, %v1469_v11  ;;  %v792_v48 = vadd.f32 1.0, %v791_v26  ;;  %vm795_vm14 = vcmp.lt.f32.partialorder %v794_v35, 0.0004427343 }
 0x193   :  { %v1471_v5 = vpop.eup %1470  ;;  %1478 = vlog2.f32 %v788_v61 }
 0x194   :  { %v1022_v59 = vmul.f32 %v1471_v5, %v2144_v28  ;;  %v1473_v57 = vpop.eup %1472  ;;  %v787_v8 = vsel %vm786_vm12, %v784_v54, %v781_v42  ;;  %v793_v20 = vmul.f32 %v1467_v32, %v792_v48 }
 0x195   :  { %v946_v22 = vadd.f32 %v787_v8, %v512_v30  ;;  %v925_v34 = vmul.f32 0.6931472, %v1473_v57 }
 0x196   :  { %1053 = vst [vmem:[%s2308_s3 + $0xe0] sm:$0xff] %v1022_v59 }
 0x197   :  { %1480 = vtanh.f32 %v946_v22  ;;  %v931_v0 = vsel %vm930_vm13, %v928_v60, %v925_v34 }
 0x198   :  { %v962_v28 = vadd.f32 %v931_v0, %v528_v53 }
 0x199   :  { %v1475_v9 = vpop.eup %1474 }
 0x19a   :  { %v1007_v46 = vmul.f32 %v1475_v9, %v2175_v38  ;;  %1482 = vtanh.f32 %v962_v28 }
 0x19c   :  { %v1477_v24 = vpop.eup %1476  ;;  %1038 = vst [vmem:[%s2308_s3 + $0x68] sm:$0xff] %v1007_v46 }
 0x19d   :  { %v1479_v21 = vpop.eup %1478  ;;  %v1023_v27 = vmul.f32 %v1477_v24, %v2178_v37 }
 0x19e   :  { %v790_v44 = vmul.f32 0.6931472, %v1479_v21 }
 0x19f   :  { %1054 = vst [vmem:[%s2308_s3 + $0xe8] sm:$0xff] %v1023_v27 }
 0x1a0   :  { %v796_v38 = vsel %vm795_vm14, %v793_v20, %v790_v44 }
 0x1a1   :  { %v947_v19 = vadd.f32 %v796_v38, %v513_v23  ;;  %v1481_v58 = vpop.eup %1480 }
 0x1a2   :  { %v1008_v16 = vmul.f32 %v1481_v58, %v2209_v12 }
 0x1a3   :  { %1484 = vtanh.f32 %v947_v19 }
 0x1a4   :  { %v1483_v47 = vpop.eup %1482  ;;  %1039 = vst [vmem:[%s2308_s3 + $0x70] sm:$0xff] %v1008_v16 }
 0x1a5   :  { %v1024_v37 = vmul.f32 %v1483_v47, %v2223_v3 }
 0x1a7   :  { %1055 = vst [vmem:[%s2308_s3 + $0xf0] sm:$0xff] %v1024_v37 }
 0x1ad   :  { %v1485_v56 = vpop.eup %1484 }
 0x1ae   :  { %v1009_v15 = vmul.f32 %v1485_v56, %v2235_v2 }
 0x1b0   :  { %1040 = vst [vmem:[%s2308_s3 + $0x78] sm:$0xff] %v1009_v15 }

// kernel: forward.10
= control target key start
LH: loop header
LB: loop body
LE: loop exit
PB: predicated region body
PF: predicated region fallthrough
CT: control target
= control target key end

     0   :  { %s1924_s12 = smov 0   ;;  %s1926_s13 = smov 0   ;;  %s2652_s0 = inlined_call_operand.vmem [shape: bf16[248,128], index: 0, kind: input, shape index: {}]   ;;  %s2653_s1 = inlined_call_operand.vmem [shape: bf16[128,256], index: 1, kind: input, shape index: {}]   ;;  %s2654_s2 = inlined_call_operand.vmem [shape: f32[1,256], index: 2, kind: input, shape index: {}]   ;;  %s2655_s3 = inlined_call_operand.vmem [shape: f32[248,256], index: 3, kind: output, shape index: {}]  }
   0x1   :  { %s1928_s14 = smov 0   ;;  %s1930_s15 = smov 0  }
   0x2   :  { %s1932_s16 = smov 0  }
   0x3 LB: > { %s22_s17 = sadd.s32 1, %s1898_s15  ;;  %s1487_s18 = sadd.s32 4294967295, %s1902_s16   ;;  %s1902_s16 = sphi %s1932_s16, %s13_s16   ;;  %s1898_s15 = sphi %s1930_s15, %s2717_s15   ;;  %s1894_s14 = sphi %s1928_s14, %s2716_s14   ;;  %s1890_s13 = sphi %s1926_s13, %s2715_s13   ;;  %s1886_s12 = sphi %s1924_s12, %s2714_s12  }
   0x4   : > { %p23_p0 = scmp.ge.s32.totalorder %s22_s17, 2  ;;  %p65_p1 = scmp.ne.s32.totalorder %s1890_s13, %s1886_s12 }
   0x5   : > { %p66_p2 = scmp.eq.s32.totalorder %s1902_s16, 0  ;;  %p123_p4 = scmp.eq.s32.totalorder %s1487_s18, 1 }
   0x6   : > { %s2719_s17 = smov (%p23_p0, %s22_s17), 0  ;;  %s58_s20 = sadd.s32 1, %s1890_s13 }
   0x7   : > { %p67_p3 = por %p66_p2, %p65_p1  ;;  %s55_s19 = ssub.s32 %s1898_s15, %s2719_s17 }
   0x8   : > { %p56_p5 = scmp.eq.s32.totalorder %s55_s19, 0  ;;  %p1959_p6 = por %p123_p4, %p65_p1 }
   0x9   : > { %p1491_p7 = scmp.ge.s32.totalorder %s1902_s16, 2 }
   0xa   : > { %s1964_s22 = scalar_select %p56_p5, %s1890_s13, %s58_s20  }
   0xb   : > { %154 = sbr.rel (%p1491_p7) target bundleno = 32 (0x20), region = 20 }
  0x12   : > { %157 = sbr.rel (!%p67_p3) target bundleno = 32 (0x20), region = 24  ;;  %s159_s23 = sand.u32 (%p67_p3), 1, %s1890_s13  }
  0x13   : > { %s1493_s24 = sshll.u32 (%p67_p3), %s1898_s15, 2  ;;  %s1492_s25 = sshll.u32 (%p67_p3), %s159_s23, 6 }
  0x14   : > { %s1972_s28 = scalar_lea.vmem (%p67_p3), %s2653_s1, %s1493_s24  ;;  %s161_s29 = scalar_lea.vmem (%p67_p3), [#allocation2], %s1492_s25 }
  0x15   : > { %v179_v0 = vld [vmem:[%s1972_s28] sm:$0xf] (%p67_p3)  ;;  %v181_v1 = vld [vmem:[%s1972_s28 + $0x8] sm:$0xf] (%p67_p3)  ;;  %v183_v2 = vld [vmem:[%s1972_s28 + $0x10] sm:$0xf] (%p67_p3) }
  0x16   : > { %180 = vst [vmem:[%s161_s29] sm:$0xf] (%p67_p3), %v179_v0  ;;  %182 = vst [vmem:[%s161_s29 + $0x4] sm:$0xf] (%p67_p3), %v181_v1  ;;  %v185_v3 = vld [vmem:[%s1972_s28 + $0x18] sm:$0xf] (%p67_p3) }
  0x17   : > { %v187_v4 = vld [vmem:[%s1972_s28 + $0x20] sm:$0xf] (%p67_p3)  ;;  %184 = vst [vmem:[%s161_s29 + $0x8] sm:$0xf] (%p67_p3), %v183_v2  ;;  %186 = vst [vmem:[%s161_s29 + $0xc] sm:$0xf] (%p67_p3), %v185_v3 }
  0x18   : > { %188 = vst [vmem:[%s161_s29 + $0x10] sm:$0xf] (%p67_p3), %v187_v4  ;;  %v189_v5 = vld [vmem:[%s1972_s28 + $0x28] sm:$0xf] (%p67_p3)  ;;  %v191_v6 = vld [vmem:[%s1972_s28 + $0x30] sm:$0xf] (%p67_p3) }
  0x19   : > { %v193_v7 = vld [vmem:[%s1972_s28 + $0x38] sm:$0xf]  ;;  %190 = vst [vmem:[%s161_s29 + $0x14] sm:$0xf] %v189_v5  ;;  %192 = vst [vmem:[%s161_s29 + $0x18] sm:$0xf] %v191_v6 }
  0x1a   : > { %194 = vst [vmem:[%s161_s29 + $0x1c] sm:$0xf] %v193_v7  ;;  %v195_v8 = vld [vmem:[%s1972_s28 + $0x40] sm:$0xf]  ;;  %v197_v9 = vld [vmem:[%s1972_s28 + $0x48] sm:$0xf] }
  0x1b   : > { %v199_v10 = vld [vmem:[%s1972_s28 + $0x50] sm:$0xf]  ;;  %196 = vst [vmem:[%s161_s29 + $0x20] sm:$0xf] %v195_v8  ;;  %198 = vst [vmem:[%s161_s29 + $0x24] sm:$0xf] %v197_v9 }
  0x1c   : > { %200 = vst [vmem:[%s161_s29 + $0x28] sm:$0xf] %v199_v10  ;;  %v201_v11 = vld [vmem:[%s1972_s28 + $0x58] sm:$0xf]  ;;  %v203_v12 = vld [vmem:[%s1972_s28 + $0x60] sm:$0xf] }
  0x1d   : > { %v205_v13 = vld [vmem:[%s1972_s28 + $0x68] sm:$0xf]  ;;  %202 = vst [vmem:[%s161_s29 + $0x2c] sm:$0xf] %v201_v11  ;;  %204 = vst [vmem:[%s161_s29 + $0x30] sm:$0xf] %v203_v12 }
  0x1e   : > { %206 = vst [vmem:[%s161_s29 + $0x34] sm:$0xf] %v205_v13  ;;  %v207_v14 = vld [vmem:[%s1972_s28 + $0x70] sm:$0xf]  ;;  %v209_v15 = vld [vmem:[%s1972_s28 + $0x78] sm:$0xf] }
  0x1f   : > { %208 = vst [vmem:[%s161_s29 + $0x38] sm:$0xf] %v207_v14  ;;  %210 = vst [vmem:[%s161_s29 + $0x3c] sm:$0xf] %v209_v15 }
  0x20 PF: > { %p1494_p8 = scmp.ge.s32.totalorder %s1902_s16, 1  ;;  %p270_p9 = scmp.lt.s32.totalorder %s1902_s16, 3 }
  0x22   : > { %p271_p10 = pnand %p1494_p8, %p270_p9 }
  0x24   : > { %274 = sbr.rel (%p271_p10) target bundleno = 476 (0x1dc), region = 69 }
  0x2b   : > { %s277_s30 = sand.u32 1, %s1886_s12   ;;  %v1661_v16 = vld [vmem:[%s2652_s0] sm:$0xff]   ;;  %v1663_v26 = vld [vmem:[%s2652_s0 + $0x8] sm:$0xff]   ;;  %v1665_v28 = vld [vmem:[%s2652_s0 + $0x10] sm:$0xff]   ;;  %p313_p11 = scmp.lt.s32.totalorder %s1894_s14, 1 }
  0x2c   : > { %s1495_s6 = sshll.u32 %s277_s30, 6  ;;  %1564 = vmatprep.mubr.bf16.mxu0 %v1661_v16  ;;  %v1662_v17 = vld [vmem:[%s2652_s0 + $0x40] sm:$0xff]   ;;  %v1664_v27 = vld [vmem:[%s2652_s0 + $0x48] sm:$0xff]   ;;  %v1666_v29 = vld [vmem:[%s2652_s0 + $0x50] sm:$0xff]  }
  0x2d   : > { %s2001_s9 = scalar_lea.vmem [#allocation2], %s1495_s6  ;;  %1580 = vmatprep.mubr.bf16.mxu1 %v1662_v17  ;;  %v1667_v30 = vld [vmem:[%s2652_s0 + $0x18] sm:$0xff]   ;;  %v1669_v32 = vld [vmem:[%s2652_s0 + $0x20] sm:$0xff]   ;;  %v1671_v34 = vld [vmem:[%s2652_s0 + $0x28] sm:$0xff]   ;;  %s2236_s6 = smul.u32 248, %s277_s30 }
  0x2e   : > { %v1653_v18 = vld [vmem:[%s2001_s9] sm:$0xff]   ;;  %v1654_v19 = vld [vmem:[%s2001_s9 + $0x8] sm:$0xff]   ;;  %v1655_v20 = vld [vmem:[%s2001_s9 + $0x10] sm:$0xff]   ;;  %s314_s28 = scalar_select %p313_p11, %s1894_s14, 1 }
  0x2f   : > { %1548 = vmatprep.subr.bf16.mxu0 %v1653_v18  ;;  %1596 = vmatprep.subr.bf16.mxu1 %v1653_v18  ;;  %v1656_v21 = vld [vmem:[%s2001_s9 + $0x18] sm:$0xff]   ;;  %v1657_v22 = vld [vmem:[%s2001_s9 + $0x20] sm:$0xff]   ;;  %v1658_v23 = vld [vmem:[%s2001_s9 + $0x28] sm:$0xff]   ;;  %s2265_s12 = scalar_lea.vmem [#allocation3], %s2236_s6  ;;  %s1521_s30 = sshll.u32 (%p1959_p6), %s1894_s14, 3 }
  0x30   : > { %1549 = vmatpush3.bf16.msra.mxu0 %v1653_v18  ;;  %1604 = vmatpush3.bf16.msra.mxu1 %v1653_v18  ;;  %v1659_v24 = vld [vmem:[%s2001_s9 + $0x30] sm:$0xff]   ;;  %v1660_v25 = vld [vmem:[%s2001_s9 + $0x38] sm:$0xff]   ;;  %v1670_v33 = vld [vmem:[%s2652_s0 + $0x60] sm:$0xff]   ;;  %s2058_s5 = scalar_lea.vmem %s2654_s2, %s314_s28  ;;  %s2576_s9 = scalar_lea.vmem (%p1959_p6), %s2655_s3, %s1521_s30 }
  0x31   : > { %1550 = vmatprep.subr.bf16.mxu0 %v1654_v19  ;;  %1597 = vmatprep.subr.bf16.mxu1 %v1654_v19  ;;  %v1668_v31 = vld [vmem:[%s2652_s0 + $0x58] sm:$0xff]   ;;  %v1672_v35 = vld [vmem:[%s2652_s0 + $0x68] sm:$0xff]   ;;  %v1673_v36 = vld [vmem:[%s2652_s0 + $0x30] sm:$0xff]  }
  0x32   : > { %v1674_v37 = vld [vmem:[%s2652_s0 + $0x70] sm:$0xff]   ;;  %v1675_v38 = vld [vmem:[%s2652_s0 + $0x38] sm:$0xff]   ;;  %v2061_v40 = vld [vmem:[%s2058_s5] ss:$0 sm:$0xff] }
  0x33   : > { %v1676_v39 = vld [vmem:[%s2652_s0 + $0x78] ss:$0 sps:$4 sm:$0xff]  }
  0x34   : > { %1551 = vmatpush3.bf16.msra.mxu0 %v1654_v19  ;;  %1605 = vmatpush3.bf16.msra.mxu1 %v1654_v19 }
  0x35   : > { %1552 = vmatprep.subr.bf16.mxu0 %v1655_v20  ;;  %1598 = vmatprep.subr.bf16.mxu1 %v1655_v20 }
  0x38   : > { %1553 = vmatpush3.bf16.msra.mxu0 %v1655_v20  ;;  %1606 = vmatpush3.bf16.msra.mxu1 %v1655_v20 }
  0x39   : > { %1554 = vmatprep.subr.bf16.mxu0 %v1656_v21  ;;  %1599 = vmatprep.subr.bf16.mxu1 %v1656_v21 }
  0x3c   : > { %1555 = vmatpush3.bf16.msra.mxu0 %v1656_v21  ;;  %1607 = vmatpush3.bf16.msra.mxu1 %v1656_v21 }
  0x3d   : > { %1556 = vmatprep.subr.bf16.mxu0 %v1657_v22  ;;  %1600 = vmatprep.subr.bf16.mxu1 %v1657_v22 }
  0x40   : > { %1557 = vmatpush3.bf16.msra.mxu0 %v1657_v22  ;;  %1608 = vmatpush3.bf16.msra.mxu1 %v1657_v22 }
  0x41   : > { %1558 = vmatprep.subr.bf16.mxu0 %v1658_v23  ;;  %1601 = vmatprep.subr.bf16.mxu1 %v1658_v23 }
  0x44   : > { %1559 = vmatpush3.bf16.msra.mxu0 %v1658_v23  ;;  %1609 = vmatpush3.bf16.msra.mxu1 %v1658_v23 }
  0x45   : > { %1560 = vmatprep.subr.bf16.mxu0 %v1659_v24  ;;  %1602 = vmatprep.subr.bf16.mxu1 %v1659_v24 }
  0x48   : > { %1561 = vmatpush3.bf16.msra.mxu0 %v1659_v24  ;;  %1610 = vmatpush3.bf16.msra.mxu1 %v1659_v24 }
  0x49   : > { %1562 = vmatprep.subr.bf16.mxu0 %v1660_v25  ;;  %1603 = vmatprep.subr.bf16.mxu1 %v1660_v25 }
  0x4c   : > { %1563 = vmatpush3.bf16.msra.mxu0 %v1660_v25  ;;  %1611 = vmatpush3.bf16.msra.mxu1 %v1660_v25 }
  0x4f   : > { %1565 = vmatmul.mubr.bf16.vlgmr.msra.gmra.mrb[0].mxu0 %v1663_v26  ;;  %1581 = vmatmul.mubr.bf16.vlgmr.msra.gmra.mrb[0].mxu1 %v1664_v27 }
  0x50   : > { %1568 = vmatprep.mubr.bf16.mxu0 %v1665_v28  ;;  %1584 = vmatprep.mubr.bf16.mxu1 %v1666_v29 }
  0x57   : > { %1569 = vmatmul.mubr.bf16.gmra.mrb[4].mxu0 %v1667_v30  ;;  %1585 = vmatmul.mubr.bf16.gmra.mrb[4].mxu1 %v1668_v31 }
  0x58   : > { %1572 = vmatprep.mubr.bf16.mxu0 %v1669_v32  ;;  %1588 = vmatprep.mubr.bf16.mxu1 %v1670_v33 }
  0x5f   : > { %1573 = vmatmul.mubr.bf16.gmra.mrb[8].mxu0 %v1671_v34  ;;  %1589 = vmatmul.mubr.bf16.gmra.mrb[8].mxu1 %v1672_v35 }
  0x60   : > { %1576 = vmatprep.mubr.bf16.mxu0 %v1673_v36  ;;  %1592 = vmatprep.mubr.bf16.mxu1 %v1674_v37 }
  0x67   : > { %1577 = vmatmul.mubr.bf16.gmra.mrb[12].mxu0 %v1675_v38  ;;  %1593 = vmatmul.mubr.bf16.gmra.mrb[12].mxu1 %v1676_v39 }
 0x122   : > { %v1566_v41 = vpop.f32.mrb[0].mxu0  ;;  %v1582_v42 = vpop.f32.mrb[0].mxu1 }
 0x123   : > { %v2064_v43 = vadd.f32 %v1566_v41, %v2061_v40  ;;  %v2067_v44 = vadd.f32 %v1582_v42, %v2061_v40  ;;  %v548_v45 = vpop.f32.mrb[1].mxu0  ;;  %v612_v46 = vpop.f32.mrb[1].mxu1 }
 0x124   : > { %v2070_v47 = vadd.f32 %v2061_v40, %v548_v45  ;;  %v2073_v48 = vadd.f32 %v2061_v40, %v612_v46  ;;  %v1567_v49 = vpop.f32.mrb[2].mxu0  ;;  %v1583_v50 = vpop.f32.mrb[2].mxu1 }
 0x125   : > { %v707_v51 = vand.u32 2147483647, %v2064_v43  ;;  %v723_v52 = vand.u32 2147483647, %v2067_v44  ;;  %v2080_v57 = vadd.f32 %v1567_v49, %v2061_v40  ;;  %v2083_v58 = vadd.f32 %v1583_v50, %v2061_v40  ;;  %v551_v59 = vpop.f32.mrb[3].mxu0  ;;  %v615_v60 = vpop.f32.mrb[3].mxu1 }
 0x126   : > { %v705_v53 = vand.u32 2147483647, %v2070_v47  ;;  %v721_v54 = vand.u32 2147483647, %v2073_v48  ;;  %v2086_v63 = vadd.f32 %v2061_v40, %v551_v59  ;;  %v2089_v0 = vadd.f32 %v2061_v40, %v615_v60 }
 0x127   : > { %v738_v55 = vsub.f32 0.0, %v707_v51  ;;  %v754_v56 = vsub.f32 0.0, %v723_v52  ;;  %v708_v5 = vand.u32 2147483647, %v2080_v57  ;;  %v724_v6 = vand.u32 2147483647, %v2083_v58 }
 0x128   : > { %v736_v61 = vsub.f32 0.0, %v705_v53  ;;  %v752_v62 = vsub.f32 0.0, %v721_v54  ;;  %v706_v7 = vand.u32 2147483647, %v2086_v63  ;;  %v722_v10 = vand.u32 2147483647, %v2089_v0 }
 0x129   : > { %v771_v1 = vmul.f32 1.442695, %v738_v55  ;;  %v803_v2 = vmul.f32 1.442695, %v754_v56  ;;  %v739_v9 = vsub.f32 0.0, %v708_v5  ;;  %v755_v13 = vsub.f32 0.0, %v724_v6 }
 0x12a   : > { %v767_v3 = vmul.f32 1.442695, %v736_v61  ;;  %v799_v4 = vmul.f32 1.442695, %v752_v62  ;;  %v1570_v8 = vpop.f32.mrb[4].mxu0  ;;  %v1586_v11 = vpop.f32.mrb[4].mxu1 }
 0x12b   : > { %1677 = vpow2.f32 %v771_v1  ;;  %v564_v12 = vpop.f32.mrb[5].mxu0  ;;  %v737_v14 = vsub.f32 0.0, %v706_v7  ;;  %v2096_v15 = vadd.f32 %v1570_v8, %v2061_v40  ;;  %v628_v16 = vpop.f32.mrb[5].mxu1  ;;  %v773_v18 = vmul.f32 1.442695, %v739_v9 }
 0x12c   : > { %1679 = vpow2.f32 %v803_v2  ;;  %v1571_v17 = vpop.f32.mrb[6].mxu0  ;;  %v753_v19 = vsub.f32 0.0, %v722_v10  ;;  %v2099_v20 = vadd.f32 %v1586_v11, %v2061_v40  ;;  %v1587_v21 = vpop.f32.mrb[6].mxu1  ;;  %v805_v23 = vmul.f32 1.442695, %v755_v13 }
 0x12d   : > { %1681 = vpow2.f32 %v767_v3  ;;  %v567_v22 = vpop.f32.mrb[7].mxu0  ;;  %v769_v24 = vmul.f32 1.442695, %v737_v14  ;;  %v2102_v25 = vadd.f32 %v2061_v40, %v564_v12  ;;  %v2104_v26 = vpop.f32.mrb[7].mxu1  ;;  %v711_v29 = vand.u32 2147483647, %v2096_v15 }
 0x12e   : > { %1683 = vpow2.f32 %v799_v4  ;;  %v801_v28 = vmul.f32 1.442695, %v753_v19  ;;  %v727_v31 = vand.u32 2147483647, %v2099_v20  ;;  %v2113_v35 = vadd.f32 %v2061_v40, %v628_v16 }
 0x12f   : > { %1685 = vpow2.f32 %v773_v18  ;;  %v709_v32 = vand.u32 2147483647, %v2102_v25  ;;  %v742_v34 = vsub.f32 0.0, %v711_v29  ;;  %v2127_v51 = vadd.f32 %v1571_v17, %v2061_v40 }
 0x130   : > { %1687 = vpow2.f32 %v805_v23  ;;  %v758_v41 = vsub.f32 0.0, %v727_v31  ;;  %v2140_v7 = vadd.f32 %v1587_v21, %v2061_v40  ;;  %v2148_v21 = vadd.f32 %v2061_v40, %v567_v22 }
 0x131   : > { %1689 = vpow2.f32 %v769_v24  ;;  %v740_v42 = vsub.f32 0.0, %v709_v32  ;;  %v779_v50 = vmul.f32 1.442695, %v742_v34 }
 0x132   : > { %v2115_v36 = vpop.f32.mrb[8].mxu0  ;;  %v2117_v37 = vpop.f32.mrb[8].mxu1  ;;  %1691 = vpow2.f32 %v801_v28  ;;  %v811_v62 = vmul.f32 1.442695, %v758_v41 }
 0x133   : > { %v2121_v45 = vpop.f32.mrb[9].mxu0  ;;  %v2123_v46 = vpop.f32.mrb[9].mxu1  ;;  %1693 = vpow2.f32 %v779_v50  ;;  %v2137_v6 = vmul.f32 1.442695, %v740_v42 }
 0x134   : > { %v2133_v1 = vpop.f32.mrb[10].mxu0  ;;  %v2135_v2 = vpop.f32.mrb[10].mxu1 }
 0x135   : > { %v1678_v52 = vpop.eup %1677  ;;  %v2142_v8 = vpop.f32.mrb[11].mxu0 }
 0x136   : > { %v1680_v59 = vpop.eup %1679  ;;  %v847_v60 = vadd.f32 1.0, %v1678_v52  ;;  %v850_v61 = vmul.f32 -0.5, %v1678_v52  ;;  %v2144_v9 = vpop.f32.mrb[11].mxu1  ;;  %v853_v11 = vand.u32 2147483647, %v1678_v52 }
 0x137   : > { %v1682_v3 = vpop.eup %1681  ;;  %v991_v4 = vadd.f32 1.0, %v1680_v59  ;;  %v994_v5 = vmul.f32 -0.5, %v1680_v59  ;;  %v997_v16 = vand.u32 2147483647, %v1680_v59 }
 0x138   : > { %v1684_v10 = vpop.eup %1683  ;;  %1695 = vlog2.f32 %v847_v60  ;;  %v829_v12 = vadd.f32 1.0, %v1682_v3  ;;  %v851_v14 = vadd.f32 1.0, %v850_v61  ;;  %v832_v17 = vmul.f32 -0.5, %v1682_v3 }
 0x139   : > { %1697 = vlog2.f32 %v991_v4  ;;  %v1686_v18 = vpop.eup %1685  ;;  %v995_v19 = vadd.f32 1.0, %v994_v5  ;;  %v973_v23 = vadd.f32 1.0, %v1684_v10  ;;  %v835_v32 = vand.u32 2147483647, %v1682_v3 }
 0x13a   : > { %1699 = vlog2.f32 %v829_v12  ;;  %v2150_v24 = vpop.f32.mrb[12].mxu0  ;;  %v2152_v28 = vpop.f32.mrb[12].mxu1  ;;  %v833_v31 = vadd.f32 1.0, %v832_v17  ;;  %v976_v34 = vmul.f32 -0.5, %v1684_v10  ;;  %vm2158_vm0 = vcmp.lt.f32.partialorder %v853_v11, 0.0004427343 }
 0x13b   : > { %v1688_v29 = vpop.eup %1687  ;;  %1701 = vpow2.f32 %v811_v62  ;;  %v2154_v41 = vpop.f32.mrb[13].mxu0  ;;  %v856_v22 = vadd.f32 1.0, %v1686_v18  ;;  %v859_v61 = vmul.f32 -0.5, %v1686_v18  ;;  %v852_v12 = vmul.f32 %v1678_v52, %v851_v14 }
 0x13c   : > { %v2156_v42 = vpop.f32.mrb[13].mxu1  ;;  %v1690_v50 = vpop.eup %1689  ;;  %1703 = vlog2.f32 %v973_v23  ;;  %vm2164_vm1 = vcmp.lt.f32.partialorder %v997_v16, 0.0004427343  ;;  %v977_v62 = vadd.f32 1.0, %v976_v34  ;;  %v979_v55 = vand.u32 2147483647, %v1684_v10 }
 0x13d   : > { %2657 = vst [vmem:[#allocation4_spill] sm:$0xff] %v2156_v42  ;;  %v2162_v4 = vpop.f32.mrb[14].mxu0  ;;  %v1595_v5 = vpop.f32.mrb[14].mxu1  ;;  %v862_v54 = vand.u32 2147483647, %v1686_v18  ;;  %1705 = vlog2.f32 %v856_v22  ;;  %v860_v53 = vadd.f32 1.0, %v859_v61  ;;  %v996_v56 = vmul.f32 %v1680_v59, %v995_v19 }
 0x13e   : > { %2660 = vst [vmem:[#allocation5_spill] sm:$0xff] %v2162_v4  ;;  %v2168_v13 = vpop.f32.mrb[15].mxu0  ;;  %v1692_v11 = vpop.eup %1691  ;;  %v1000_v49 = vadd.f32 1.0, %v1688_v29  ;;  %v1003_v23 = vmul.f32 -0.5, %v1688_v29  ;;  %v834_v38 = vmul.f32 %v1682_v3, %v833_v31  ;;  %vm2172_vm2 = vcmp.lt.f32.partialorder %v835_v32, 0.0004427343 }
 0x13f   : > { %2663 = vst [vmem:[#allocation6_spill] sm:$0xff] %v2168_v13  ;;  %v2170_v39 = vpop.f32.mrb[15].mxu1  ;;  %v838_v14 = vadd.f32 1.0, %v1690_v50  ;;  %v2176_v16 = vpop.eup %1693  ;;  %v1006_v5 = vand.u32 2147483647, %v1688_v29  ;;  %v841_v33 = vmul.f32 -0.5, %v1690_v50  ;;  %v978_v3 = vmul.f32 %v1684_v10, %v977_v62 }
 0x140   : > { %2664 = vst [vmem:[#allocation7_spill] sm:$0xff] %v2170_v39  ;;  %1707 = vlog2.f32 %v1000_v49  ;;  %v1004_v34 = vadd.f32 1.0, %v1003_v23  ;;  %vm2178_vm3 = vcmp.lt.f32.partialorder %v979_v55, 0.0004427343  ;;  %v844_v61 = vand.u32 2147483647, %v1690_v50 }
 0x141   : > { %1709 = vlog2.f32 %v838_v14  ;;  %v982_v30 = vadd.f32 1.0, %v1692_v11  ;;  %v861_v19 = vmul.f32 %v1686_v18, %v860_v53  ;;  %vm2182_vm4 = vcmp.lt.f32.partialorder %v862_v54, 0.0004427343 }
 0x142   : > { %v1696_v59 = vpop.eup %1695  ;;  %v985_v32 = vmul.f32 -0.5, %v1692_v11  ;;  %v842_v23 = vadd.f32 1.0, %v841_v33  ;;  %v883_v55 = vadd.f32 1.0, %v2176_v16  ;;  %v1005_v4 = vmul.f32 %v1688_v29, %v1004_v34 }
 0x143   : > { %v1698_v27 = vpop.eup %1697  ;;  %v849_v49 = vmul.f32 0.6931472, %v1696_v59  ;;  %1711 = vlog2.f32 %v982_v30  ;;  %vm2187_vm5 = vcmp.lt.f32.partialorder %v1006_v5, 0.0004427343  ;;  %v988_v10 = vand.u32 2147483647, %v1692_v11 }
 0x144   : > { %v1700_v39 = vpop.eup %1699  ;;  %v993_v13 = vmul.f32 0.6931472, %v1698_v27  ;;  %vm2195_vm6 = vcmp.lt.f32.partialorder %v844_v61, 0.0004427343  ;;  %1713 = vlog2.f32 %v883_v55  ;;  %v2675_v27 = vmax.f32 %v2064_v43, 0.0 }
 0x145   : > { %v2191_v53 = vpop.eup %1701  ;;  %v855_v54 = vsel %vm2158_vm0, %v852_v12, %v849_v49  ;;  %v831_v18 = vmul.f32 0.6931472, %v1700_v39  ;;  %v986_v34 = vadd.f32 1.0, %v985_v32  ;;  %v886_v5 = vmul.f32 -0.5, %v2176_v16 }
 0x146   : > { %v1704_v30 = vpop.eup %1703  ;;  %v1110_v33 = vadd.f32 %v855_v54, %v2675_v27  ;;  %v999_v29 = vsel %vm2164_vm1, %v996_v56, %v993_v13  ;;  %v2676_v59 = vmax.f32 %v2067_v44, 0.0  ;;  %v843_v61 = vmul.f32 %v1690_v50, %v842_v23 }
 0x147   : > { %v837_v39 = vsel %vm2172_vm2, %v834_v38, %v831_v18  ;;  %v975_v12 = vmul.f32 0.6931472, %v1704_v30  ;;  %v1706_v49 = vpop.eup %1705  ;;  %v2677_v55 = vmax.f32 %v2070_v47, 0.0  ;;  %v889_v54 = vand.u32 2147483647, %v2176_v16 }
 0x148   : > { %v1126_v60 = vadd.f32 %v999_v29, %v2676_v59  ;;  %1715 = vtanh.f32 %v1110_v33  ;;  %v1027_v56 = vadd.f32 1.0, %v2191_v53  ;;  %v858_v17 = vmul.f32 0.6931472, %v1706_v49 }
 0x149   : > { %v1108_v42 = vadd.f32 %v837_v39, %v2677_v55  ;;  %v981_v13 = vsel %vm2178_vm3, %v978_v3, %v975_v12  ;;  %vm2214_vm7 = vcmp.lt.f32.partialorder %v988_v10, 0.0004427343  ;;  %v2680_v50 = vmax.f32 %v2073_v48, 0.0 }
 0x14a   : > { %1717 = vtanh.f32 %v1126_v60  ;;  %v1708_v38 = vpop.eup %1707  ;;  %v987_v23 = vmul.f32 %v1692_v11, %v986_v34  ;;  %v887_v18 = vadd.f32 1.0, %v886_v5  ;;  %v864_v27 = vsel %vm2182_vm4, %v861_v19, %v858_v17 }
 0x14b   : > { %1719 = vtanh.f32 %v1108_v42  ;;  %v1124_v52 = vadd.f32 %v981_v13, %v2680_v50  ;;  %v1710_v30 = vpop.eup %1709  ;;  %v1002_v33 = vmul.f32 0.6931472, %v1708_v38  ;;  %v2681_v22 = vand.u32 2147483647, %v2113_v35 }
 0x14c   : > { %1721 = vlog2.f32 %v1027_v56  ;;  %v2682_v10 = vmax.f32 %v2080_v57, 0.0  ;;  %v840_v42 = vmul.f32 0.6931472, %v1710_v30  ;;  %vm2226_vm8 = vcmp.lt.f32.partialorder %v889_v54, 0.0004427343 }
 0x14d   : > { %v756_v3 = vsub.f32 0.0, %v2681_v22  ;;  %1723 = vtanh.f32 %v1124_v52  ;;  %v1712_v11 = vpop.eup %1711  ;;  %v1008_v34 = vsel %vm2187_vm5, %v1005_v4, %v1002_v33  ;;  %v1030_v19 = vmul.f32 -0.5, %v2191_v53 }
 0x14e   : > { %v1111_v29 = vadd.f32 %v864_v27, %v2682_v10  ;;  %1725 = vpow2.f32 %v2137_v6  ;;  %v2685_v5 = vmax.f32 %v2083_v58, 0.0  ;;  %v846_v39 = vsel %vm2195_vm6, %v843_v61, %v840_v42  ;;  %v1714_v49 = vpop.eup %1713 }
 0x14f   : > { %v807_v31 = vmul.f32 1.442695, %v756_v3  ;;  %v984_v12 = vmul.f32 0.6931472, %v1712_v11  ;;  %v2686_v14 = vmax.f32 %v2086_v63, 0.0  ;;  %v888_v55 = vmul.f32 %v2176_v16, %v887_v18 }
 0x150   : > { %1727 = vtanh.f32 %v1111_v29  ;;  %v1127_v60 = vadd.f32 %v1008_v34, %v2685_v5  ;;  %v2687_v6 = vand.u32 2147483647, %v2127_v51  ;;  %v885_v13 = vmul.f32 0.6931472, %v1714_v49 }
 0x151   : > { %v1109_v4 = vadd.f32 %v846_v39, %v2686_v14  ;;  %1729 = vpow2.f32 %v807_v31  ;;  %v990_v56 = vsel %vm2214_vm7, %v987_v23, %v984_v12  ;;  %v1033_v17 = vand.u32 2147483647, %v2191_v53 }
 0x152   : > { %v743_v54 = vsub.f32 0.0, %v2687_v6  ;;  %1731 = vtanh.f32 %v1127_v60  ;;  %v2688_v62 = vmax.f32 %v2089_v0, 0.0  ;;  %v728_v50 = vand.u32 2147483647, %v2140_v7  ;;  %v1716_v16 = vpop.eup %1715 }
 0x153   : > { %1733 = vtanh.f32 %v1109_v4  ;;  %v891_v52 = vsel %vm2226_vm8, %v888_v55, %v885_v13  ;;  %v1031_v18 = vadd.f32 1.0, %v1030_v19  ;;  %v710_v30 = vand.u32 2147483647, %v2148_v21 }
 0x154   : > { %v1125_v61 = vadd.f32 %v990_v56, %v2688_v62  ;;  %v781_v38 = vmul.f32 1.442695, %v743_v54  ;;  %v2258_v32 = vadd.f32 %v2061_v40, %v2104_v26  ;;  %v1718_v23 = vpop.eup %1717  ;;  %v1172_v27 = vmul.f32 %v1716_v16, %v2064_v43 }
 0x155   : > { %v2689_v33 = vmax.f32 %v2096_v15, 0.0  ;;  %v759_v3 = vsub.f32 0.0, %v728_v50  ;;  %v1720_v10 = vpop.eup %1719  ;;  %v1188_v29 = vmul.f32 %v1718_v23, %v2067_v44  ;;  %v741_v42 = vsub.f32 0.0, %v710_v30 }
 0x156   : > { %1735 = vtanh.f32 %v1125_v61  ;;  %v1722_v59 = vpop.eup %1721  ;;  %1203 = vst [vmem:[%s2265_s12 + $0x10] sm:$0xff] %v1172_v27  ;;  %v1170_v26 = vmul.f32 %v1720_v10, %v2070_v47  ;;  %v726_v11 = vand.u32 2147483647, %v2258_v32  ;;  %v696_v44 = vmax.f32 %v2099_v20, 0.0 }
 0x157   : > { %v1114_v22 = vadd.f32 %v891_v52, %v2689_v33  ;;  %1737 = vpow2.f32 %v781_v38  ;;  %v813_v43 = vmul.f32 1.442695, %v759_v3  ;;  %v1724_v34 = vpop.eup %1723  ;;  %1219 = vst [vmem:[%s2265_s12 + $0x90] sm:$0xff] %v1188_v29  ;;  %v1029_v19 = vmul.f32 0.6931472, %v1722_v59 }
 0x158   : > { %v1032_v31 = vmul.f32 %v2191_v53, %v1031_v18  ;;  %v777_v5 = vmul.f32 1.442695, %v741_v42  ;;  %v1726_v60 = vpop.eup %1725  ;;  %1201 = vst [vmem:[%s2265_s12] sm:$0xff] %v1170_v26  ;;  %v1186_v39 = vmul.f32 %v1724_v34, %v2073_v48  ;;  %vm1034_vm9 = vcmp.lt.f32.partialorder %v1033_v17, 0.0004427343 }
 0x159   : > { %1739 = vtanh.f32 %v1114_v22  ;;  %v757_v47 = vsub.f32 0.0, %v726_v11  ;;  %v865_v14 = vadd.f32 1.0, %v1726_v60  ;;  %v2277_v4 = vadd.f32 %v2115_v36, %v2061_v40 }
 0x15a   : > { %1741 = vpow2.f32 %v813_v43  ;;  %v1728_v12 = vpop.eup %1727  ;;  %v1035_v49 = vsel %vm1034_vm9, %v1032_v31, %v1029_v19  ;;  %1217 = vst [vmem:[%s2265_s12 + $0x80] sm:$0xff] %v1186_v39  ;;  %v2283_v13 = vadd.f32 %v2117_v37, %v2061_v40  ;;  %v868_v62 = vmul.f32 -0.5, %v1726_v60 }
 0x15b   : > { %v1730_v55 = vpop.eup %1729  ;;  %v1173_v53 = vmul.f32 %v1728_v12, %v2080_v57  ;;  %v1130_v6 = vadd.f32 %v1035_v49, %v696_v44  ;;  %1743 = vpow2.f32 %v777_v5  ;;  %v809_v54 = vmul.f32 1.442695, %v757_v47 }
 0x15c   : > { %v1732_v48 = vpop.eup %1731  ;;  %1745 = vlog2.f32 %v865_v14  ;;  %v1009_v56 = vadd.f32 1.0, %v1730_v55  ;;  %v678_v61 = vmax.f32 %v2102_v25, 0.0  ;;  %v1012_v38 = vmul.f32 -0.5, %v1730_v55 }
 0x15d   : > { %v1734_v17 = vpop.eup %1733  ;;  %1204 = vst [vmem:[%s2265_s12 + $0x18] sm:$0xff] %v1173_v53  ;;  %v1189_v36 = vmul.f32 %v1732_v48, %v2083_v58  ;;  %1747 = vtanh.f32 %v1130_v6  ;;  %v694_v16 = vmax.f32 %v2113_v35, 0.0  ;;  %v715_v37 = vand.u32 2147483647, %v2277_v4 }
 0x15e   : > { %v1171_v57 = vmul.f32 %v1734_v17, %v2086_v63  ;;  %1749 = vlog2.f32 %v1009_v56  ;;  %v2294_v52 = vadd.f32 %v2061_v40, %v2121_v45  ;;  %v871_v18 = vand.u32 2147483647, %v1726_v60 }
 0x15f   : > { %1220 = vst [vmem:[%s2265_s12 + $0x98] sm:$0xff] %v1189_v36  ;;  %1751 = vpow2.f32 %v809_v54  ;;  %v681_v30 = vmax.f32 %v2127_v51, 0.0  ;;  %v731_v23 = vand.u32 2147483647, %v2283_v13  ;;  %v869_v33 = vadd.f32 1.0, %v868_v62 }
 0x160   : > { %v1736_v50 = vpop.eup %1735  ;;  %1202 = vst [vmem:[%s2265_s12 + $0x8] sm:$0xff] %v1171_v57  ;;  %v1015_v22 = vand.u32 2147483647, %v1730_v55  ;;  %v697_v10 = vmax.f32 %v2140_v7, 0.0  ;;  %v1013_v29 = vadd.f32 1.0, %v1012_v38  ;;  %v679_v42 = vmax.f32 %v2148_v21, 0.0 }
 0x161   : > { %v1738_v58 = vpop.eup %1737  ;;  %v1187_v63 = vmul.f32 %v1736_v50, %v2089_v0  ;;  %v746_v59 = vsub.f32 0.0, %v715_v37  ;;  %v695_v26 = vmax.f32 %v2258_v32, 0.0  ;;  %v762_v43 = vsub.f32 0.0, %v731_v23 }
 0x162   : > { %v892_v3 = vadd.f32 1.0, %v1738_v58  ;;  %v713_v11 = vand.u32 2147483647, %v2294_v52  ;;  %vm2307_vm10 = vcmp.lt.f32.partialorder %v871_v18, 0.0004427343  ;;  %v895_v44 = vmul.f32 -0.5, %v1738_v58 }
 0x163   : > { %v1740_v27 = vpop.eup %1739  ;;  %1218 = vst [vmem:[%s2265_s12 + $0x88] sm:$0xff] %v1187_v63  ;;  %v787_v31 = vmul.f32 1.442695, %v746_v59  ;;  %v870_v5 = vmul.f32 %v1726_v60, %v869_v33  ;;  %vm2311_vm11 = vcmp.lt.f32.partialorder %v1015_v22, 0.0004427343  ;;  %v1014_v14 = vmul.f32 %v1730_v55, %v1013_v29 }
 0x164   : > { %v1176_v45 = vmul.f32 %v1740_v27, %v2096_v15  ;;  %v1742_v0 = vpop.eup %1741  ;;  %1753 = vlog2.f32 %v892_v3  ;;  %v898_v47 = vand.u32 2147483647, %v1738_v58  ;;  %v2317_v6 = vadd.f32 %v2061_v40, %v2123_v46 }
 0x165   : > { %v1036_v19 = vadd.f32 1.0, %v1742_v0  ;;  %v1744_v15 = vpop.eup %1743  ;;  %v1039_v12 = vmul.f32 -0.5, %v1742_v0  ;;  %v819_v56 = vmul.f32 1.442695, %v762_v43  ;;  %v744_v60 = vsub.f32 0.0, %v713_v11 }
 0x166   : > { %1207 = vst [vmem:[%s2265_s12 + $0x30] sm:$0xff] %v1176_v45  ;;  %v1746_v49 = vpop.eup %1745  ;;  %v874_v53 = vadd.f32 1.0, %v1744_v15  ;;  %v896_v62 = vadd.f32 1.0, %v895_v44  ;;  %v1042_v57 = vand.u32 2147483647, %v1742_v0  ;;  %v877_v18 = vmul.f32 -0.5, %v1744_v15 }
 0x167   : > { %1755 = vlog2.f32 %v1036_v19  ;;  %v1748_v54 = vpop.eup %1747  ;;  %v867_v48 = vmul.f32 0.6931472, %v1746_v49  ;;  %vm2324_vm12 = vcmp.lt.f32.partialorder %v898_v47, 0.0004427343  ;;  %v1040_v37 = vadd.f32 1.0, %v1039_v12 }
 0x168   : > { %1757 = vpow2.f32 %v787_v31  ;;  %v1750_v17 = vpop.eup %1749  ;;  %v1192_v36 = vmul.f32 %v1748_v54, %v2099_v20  ;;  %v880_v23 = vand.u32 2147483647, %v1744_v15  ;;  %v783_v33 = vmul.f32 1.442695, %v744_v60 }
 0x169   : > { %1759 = vlog2.f32 %v874_v53  ;;  %v2320_v38 = vpop.eup %1751  ;;  %v873_v55 = vsel %vm2307_vm10, %v870_v5, %v867_v48  ;;  %v1011_v50 = vmul.f32 0.6931472, %v1750_v17  ;;  %v729_v22 = vand.u32 2147483647, %v2317_v6 }
 0x16a   : > { %1223 = vst [vmem:[%s2265_s12 + $0xb0] sm:$0xff] %v1192_v36  ;;  %v1112_v63 = vadd.f32 %v873_v55, %v678_v61  ;;  %v1018_v20 = vadd.f32 1.0, %v2320_v38  ;;  %1761 = vpow2.f32 %v819_v56  ;;  %v897_v45 = vmul.f32 %v1738_v58, %v896_v62 }
 0x16b   : > { %v1017_v27 = vsel %vm2311_vm11, %v1014_v14, %v1011_v50  ;;  %vm2335_vm13 = vcmp.lt.f32.partialorder %v1042_v57, 0.0004427343  ;;  %v760_v59 = vsub.f32 0.0, %v729_v22  ;;  %v2341_v43 = vadd.f32 %v2133_v1, %v2061_v40 }
 0x16c   : > { %1763 = vtanh.f32 %v1112_v63  ;;  %v1128_v3 = vadd.f32 %v1017_v27, %v694_v16  ;;  %v2345_v11 = vadd.f32 %v2135_v2, %v2061_v40  ;;  %v1041_v44 = vmul.f32 %v1742_v0, %v1040_v37 }
 0x16d   : > { %1765 = vlog2.f32 %v1018_v20  ;;  %v878_v16 = vadd.f32 1.0, %v877_v18  ;;  %vm2347_vm14 = vcmp.lt.f32.partialorder %v880_v23, 0.0004427343  ;;  %v815_v19 = vmul.f32 1.442695, %v760_v59 }
 0x16e   : > { %v1754_v61 = vpop.eup %1753  ;;  %1767 = vtanh.f32 %v1128_v3  ;;  %v716_v31 = vand.u32 2147483647, %v2341_v43  ;;  %v1021_v39 = vmul.f32 -0.5, %v2320_v38  ;;  %v732_v2 = vand.u32 2147483647, %v2345_v11 }
 0x16f   : > { %v894_v34 = vmul.f32 0.6931472, %v1754_v61  ;;  %1769 = vpow2.f32 %v783_v33  ;;  %v2358_v0 = vadd.f32 %v2061_v40, %v2142_v8  ;;  %v879_v54 = vmul.f32 %v1744_v15, %v878_v16 }
 0x170   : > { %1771 = vpow2.f32 %v815_v19  ;;  %v747_v14 = vsub.f32 0.0, %v716_v31  ;;  %v1024_v48 = vand.u32 2147483647, %v2320_v38  ;;  %v763_v60 = vsub.f32 0.0, %v732_v2 }
 0x171   : > { %v1756_v5 = vpop.eup %1755  ;;  %v900_v1 = vsel %vm2324_vm12, %v897_v45, %v894_v34  ;;  %v714_v46 = vand.u32 2147483647, %v2358_v0  ;;  %v700_v33 = vmax.f32 %v2283_v13, 0.0  ;;  %v682_v16 = vmax.f32 %v2294_v52, 0.0 }
 0x172   : > { %v2360_v47 = vpop.eup %1757  ;;  %v1115_v12 = vadd.f32 %v900_v1, %v681_v30  ;;  %v1038_v49 = vmul.f32 0.6931472, %v1756_v5  ;;  %v789_v36 = vmul.f32 1.442695, %v747_v14  ;;  %v1022_v30 = vadd.f32 1.0, %v1021_v39 }
 0x173   : > { %v1760_v53 = vpop.eup %1759  ;;  %v919_v56 = vadd.f32 1.0, %v2360_v47  ;;  %v922_v57 = vmul.f32 -0.5, %v2360_v47  ;;  %v821_v50 = vmul.f32 1.442695, %v763_v60  ;;  %vm2381_vm15 = vcmp.lt.f32.partialorder %v1024_v48, 0.0004427343 }
 0x174   : > { %1773 = vtanh.f32 %v1115_v12  ;;  %v1044_v8 = vsel %vm2335_vm13, %v1041_v44, %v1038_v49  ;;  %v876_v17 = vmul.f32 0.6931472, %v1760_v53  ;;  %v2371_v55 = vpop.eup %1761  ;;  %v745_v45 = vsub.f32 0.0, %v714_v46 }
 0x175   : > { %v1131_v62 = vadd.f32 %v1044_v8, %v697_v10  ;;  %1775 = vlog2.f32 %v919_v56  ;;  %v684_v10 = vmax.f32 %v2277_v4, 0.0  ;;  %v1063_v18 = vadd.f32 1.0, %v2371_v55 }
 0x176   : > { %v882_v15 = vsel %vm2347_vm14, %v879_v54, %v876_v17  ;;  %1777 = vpow2.f32 %v789_v36  ;;  %v1764_v37 = vpop.eup %1763  ;;  %v923_v59 = vadd.f32 1.0, %v922_v57  ;;  %v1066_v44 = vmul.f32 -0.5, %v2371_v55 }
 0x177   : > { %1779 = vtanh.f32 %v1131_v62  ;;  %v1113_v63 = vadd.f32 %v882_v15, %v679_v42  ;;  %v1766_v23 = vpop.eup %1765  ;;  %v1174_v20 = vmul.f32 %v1764_v37, %v2102_v25  ;;  %v1023_v42 = vmul.f32 %v2320_v38, %v1022_v30 }
 0x178   : > { %1781 = vpow2.f32 %v821_v50  ;;  %v1768_v22 = vpop.eup %1767  ;;  %v1020_v3 = vmul.f32 0.6931472, %v1766_v23  ;;  %v2391_v25 = vadd.f32 %v2061_v40, %v2144_v9  ;;  %v698_v31 = vmax.f32 %v2317_v6, 0.0 }
 0x179   : > { %1783 = vtanh.f32 %v1113_v63  ;;  %v1770_v29 = vpop.eup %1769  ;;  %1205 = vst [vmem:[%s2265_s12 + $0x20] sm:$0xff] %v1174_v20  ;;  %v1190_v61 = vmul.f32 %v1768_v22, %v2113_v35  ;;  %v785_v5 = vmul.f32 1.442695, %v745_v45  ;;  %v925_v9 = vand.u32 2147483647, %v2360_v47 }
 0x17a   : > { %1785 = vlog2.f32 %v1063_v18  ;;  %v1026_v34 = vsel %vm2381_vm15, %v1023_v42, %v1020_v3  ;;  %v901_v58 = vadd.f32 1.0, %v1770_v29  ;;  %v2397_v38 = vpop.eup %1771  ;;  %v904_v19 = vmul.f32 -0.5, %v1770_v29 }
 0x17b   : > { %1221 = vst [vmem:[%s2265_s12 + $0xa0] sm:$0xff] %v1190_v61  ;;  %v1129_v35 = vadd.f32 %v1026_v34, %v695_v26  ;;  %v1069_v1 = vand.u32 2147483647, %v2371_v55  ;;  %v1045_v39 = vadd.f32 1.0, %v2397_v38  ;;  %v924_v12 = vmul.f32 %v2360_v47, %v923_v59 }
 0x17c   : > { %1787 = vlog2.f32 %v901_v58  ;;  %v685_v49 = vmax.f32 %v2341_v43, 0.0  ;;  %v730_v26 = vand.u32 2147483647, %v2391_v25  ;;  %v1067_v54 = vadd.f32 1.0, %v1066_v44 }
 0x17d   : > { %1789 = vtanh.f32 %v1129_v35  ;;  %v907_v48 = vand.u32 2147483647, %v1770_v29  ;;  %v905_v8 = vadd.f32 1.0, %v904_v19  ;;  %v1048_v17 = vmul.f32 -0.5, %v2397_v38 }
 0x17e   : > { %v1774_v2 = vpop.eup %1773  ;;  %1791 = vlog2.f32 %v1045_v39  ;;  %vm926_vm0 = vcmp.lt.f32.partialorder %v925_v9, 0.0004427343  ;;  %vm2414_vm1 = vcmp.lt.f32.partialorder %v1069_v1, 0.0004427343  ;;  %v761_v62 = vsub.f32 0.0, %v730_v26 }
 0x17f   : > { %v1776_v14 = vpop.eup %1775  ;;  %v1177_v53 = vmul.f32 %v1774_v2, %v2127_v51  ;;  %1793 = vpow2.f32 %v785_v5  ;;  %v1051_v50 = vand.u32 2147483647, %v2397_v38  ;;  %v2425_v46 = vadd.f32 %v2150_v24, %v2061_v40 }
 0x180   : > { %v2410_v56 = vpop.eup %1777  ;;  %v921_v60 = vmul.f32 0.6931472, %v1776_v14  ;;  %v1068_v18 = vmul.f32 %v2371_v55, %v1067_v54  ;;  %vm2428_vm2 = vcmp.lt.f32.partialorder %v907_v48, 0.0004427343  ;;  %v906_v27 = vmul.f32 %v1770_v29, %v905_v8 }
 0x181   : > { %v1780_v36 = vpop.eup %1779  ;;  %1208 = vst [vmem:[%s2265_s12 + $0x38] sm:$0xff] %v1177_v53  ;;  %v928_v51 = vadd.f32 1.0, %v2410_v56  ;;  %v1049_v22 = vadd.f32 1.0, %v1048_v17  ;;  %v931_v42 = vmul.f32 -0.5, %v2410_v56  ;;  %vm2437_vm3 = vcmp.lt.f32.partialorder %v1051_v50, 0.0004427343 }
 0x182   : > { %v2419_v30 = vpop.eup %1781  ;;  %v1193_v57 = vmul.f32 %v1780_v36, %v2140_v7  ;;  %v927_v15 = vsel %vm926_vm0, %v924_v12, %v921_v60  ;;  %v934_v45 = vand.u32 2147483647, %v2410_v56  ;;  %v719_v61 = vand.u32 2147483647, %v2425_v46  ;;  %v1863_v50 = vld [vmem:[%s2058_s5] ss:$0 sm:$0xff] }
 0x183   : > { %v1784_v37 = vpop.eup %1783  ;;  %v1118_v63 = vadd.f32 %v927_v15, %v684_v10  ;;  %1795 = vlog2.f32 %v928_v51  ;;  %v1072_v3 = vadd.f32 1.0, %v2419_v30  ;;  %v817_v10 = vmul.f32 1.442695, %v761_v62 }
 0x184   : > { %v1786_v20 = vpop.eup %1785  ;;  %1224 = vst [vmem:[%s2265_s12 + $0xb8] sm:$0xff] %v1193_v57  ;;  %v1175_v7 = vmul.f32 %v1784_v37, %v2148_v21  ;;  %v1075_v59 = vmul.f32 -0.5, %v2419_v30  ;;  %v2448_v34 = vadd.f32 %v2152_v28, %v2061_v40  ;;  %v750_v19 = vsub.f32 0.0, %v719_v61  ;;  %v2710_v37 = vld [vmem:[#allocation4_spill] sm:$0xff] }
 0x185   : > { %1797 = vtanh.f32 %v1118_v63  ;;  %v1065_v24 = vmul.f32 0.6931472, %v1786_v20  ;;  %v2454_v5 = vadd.f32 %v2061_v40, %v2154_v41  ;;  %v1050_v39 = vmul.f32 %v2397_v38, %v1049_v22  ;;  %v2711_v22 = vld [vmem:[#allocation5_spill] sm:$0xff] }
 0x186   : > { %1206 = vst [vmem:[%s2265_s12 + $0x28] sm:$0xff] %v1175_v7  ;;  %1799 = vlog2.f32 %v1072_v3  ;;  %v1788_v21 = vpop.eup %1787  ;;  %v932_v2 = vadd.f32 1.0, %v931_v42  ;;  %v735_v28 = vand.u32 2147483647, %v2448_v34  ;;  %v795_v14 = vmul.f32 1.442695, %v750_v19 }
 0x187   : > { %v1071_v29 = vsel %vm2414_vm1, %v1068_v18, %v1065_v24  ;;  %1801 = vpow2.f32 %v817_v10  ;;  %v1790_v44 = vpop.eup %1789  ;;  %v903_v35 = vmul.f32 0.6931472, %v1788_v21  ;;  %vm2466_vm4 = vcmp.lt.f32.partialorder %v934_v45, 0.0004427343 }
 0x188   : > { %v1134_v58 = vadd.f32 %v1071_v29, %v700_v33  ;;  %v1792_v9 = vpop.eup %1791  ;;  %v1191_v1 = vmul.f32 %v1790_v44, %v2258_v32  ;;  %v1076_v32 = vadd.f32 1.0, %v1075_v59  ;;  %v766_v54 = vsub.f32 0.0, %v735_v28  ;;  %v2712_v44 = vld [vmem:[#allocation6_spill] sm:$0xff] }
 0x189   : > { %v2459_v12 = vpop.eup %1793  ;;  %v909_v33 = vsel %vm2428_vm2, %v906_v27, %v903_v35  ;;  %v1047_v26 = vmul.f32 0.6931472, %v1792_v9  ;;  %v717_v48 = vand.u32 2147483647, %v2454_v5  ;;  %v933_v8 = vmul.f32 %v2410_v56, %v932_v2 }
 0x18a   : > { %1803 = vtanh.f32 %v1134_v58  ;;  %1222 = vst [vmem:[%s2265_s12 + $0xa8] sm:$0xff] %v1191_v1  ;;  %v1116_v40 = vadd.f32 %v909_v33, %v682_v16  ;;  %v910_v38 = vadd.f32 1.0, %v2459_v12  ;;  %v1078_v17 = vand.u32 2147483647, %v2419_v30 }
 0x18b   : > { %v1053_v53 = vsel %vm2437_vm3, %v1050_v39, %v1047_v26  ;;  %1805 = vpow2.f32 %v795_v14  ;;  %v827_v47 = vmul.f32 1.442695, %v766_v54  ;;  %v748_v51 = vsub.f32 0.0, %v717_v48 }
 0x18c   : > { %1807 = vtanh.f32 %v1116_v40  ;;  %v1132_v16 = vadd.f32 %v1053_v53, %v698_v31  ;;  %v1077_v57 = vmul.f32 %v2419_v30, %v1076_v32  ;;  %v913_v15 = vmul.f32 -0.5, %v2459_v12 }
 0x18d   : > { %v1796_v60 = vpop.eup %1795  ;;  %1809 = vlog2.f32 %v910_v38  ;;  %v2482_v63 = vadd.f32 %v1863_v50, %v2710_v37  ;;  %v791_v23 = vmul.f32 1.442695, %v748_v51  ;;  %v2493_v3 = vadd.f32 %v1863_v50, %v2711_v22 }
 0x18e   : > { %v930_v36 = vmul.f32 0.6931472, %v1796_v60  ;;  %1811 = vtanh.f32 %v1132_v16  ;;  %v701_v24 = vmax.f32 %v2345_v11, 0.0  ;;  %vm1079_vm5 = vcmp.lt.f32.partialorder %v1078_v17, 0.0004427343  ;;  %v2713_v16 = vld [vmem:[#allocation7_spill] sm:$0xff] }
 0x18f   : > { %v1798_v62 = vpop.eup %1797  ;;  %1813 = vpow2.f32 %v827_v47  ;;  %v733_v27 = vand.u32 2147483647, %v2482_v63  ;;  %v916_v61 = vand.u32 2147483647, %v2459_v12  ;;  %v720_v59 = vand.u32 2147483647, %v2493_v3 }
 0x190   : > { %v1800_v31 = vpop.eup %1799  ;;  %v1180_v56 = vmul.f32 %v1798_v62, %v2277_v4  ;;  %v936_v18 = vsel %vm2466_vm4, %v933_v8, %v930_v36  ;;  %1815 = vpow2.f32 %v791_v23  ;;  %v2502_v58 = vadd.f32 %v1863_v50, %v2712_v44 }
 0x191   : > { %v2487_v20 = vpop.eup %1801  ;;  %v1119_v7 = vadd.f32 %v936_v18, %v685_v49  ;;  %v1074_v30 = vmul.f32 0.6931472, %v1800_v31  ;;  %v764_v10 = vsub.f32 0.0, %v733_v27  ;;  %v914_v49 = vadd.f32 1.0, %v913_v15 }
 0x192   : > { %1211 = vst [vmem:[%s2265_s12 + $0x50] sm:$0xff] %v1180_v56  ;;  %v1054_v4 = vadd.f32 1.0, %v2487_v20  ;;  %v1057_v9 = vmul.f32 -0.5, %v2487_v20  ;;  %v683_v2 = vmax.f32 %v2358_v0, 0.0  ;;  %v751_v28 = vsub.f32 0.0, %v720_v59 }
 0x193   : > { %1817 = vtanh.f32 %v1119_v7  ;;  %v1080_v42 = vsel %vm1079_vm5, %v1077_v57, %v1074_v30  ;;  %v823_v29 = vmul.f32 1.442695, %v764_v10  ;;  %v718_v33 = vand.u32 2147483647, %v2502_v58 }
 0x194   : > { %v1804_v55 = vpop.eup %1803  ;;  %v1135_v45 = vadd.f32 %v1080_v42, %v701_v24  ;;  %1819 = vlog2.f32 %v1054_v4  ;;  %v915_v40 = vmul.f32 %v2459_v12, %v914_v49  ;;  %vm917_vm6 = vcmp.lt.f32.partialorder %v916_v61, 0.0004427343 }
 0x195   : > { %v1196_v21 = vmul.f32 %v1804_v55, %v2283_v13  ;;  %v2504_v35 = vpop.eup %1805  ;;  %v1060_v38 = vand.u32 2147483647, %v2487_v20  ;;  %v749_v53 = vsub.f32 0.0, %v718_v33  ;;  %v1058_v48 = vadd.f32 1.0, %v1057_v9 }
 0x196   : > { %1821 = vtanh.f32 %v1135_v45  ;;  %v1808_v19 = vpop.eup %1807  ;;  %v955_v1 = vadd.f32 1.0, %v2504_v35  ;;  %v2520_v8 = vadd.f32 %v1863_v50, %v2713_v16  ;;  %v958_v36 = vmul.f32 -0.5, %v2504_v35 }
 0x197   : > { %1227 = vst [vmem:[%s2265_s12 + $0xd0] sm:$0xff] %v1196_v21  ;;  %1823 = vpow2.f32 %v823_v29  ;;  %v1810_v39 = vpop.eup %1809  ;;  %v1178_v13 = vmul.f32 %v1808_v19, %v2294_v52  ;;  %v797_v52 = vmul.f32 1.442695, %v751_v28  ;;  %v699_v15 = vmax.f32 %v2391_v25, 0.0 }
 0x198   : > { %v1812_v26 = vpop.eup %1811  ;;  %v912_v14 = vmul.f32 0.6931472, %v1810_v39  ;;  %1825 = vlog2.f32 %v955_v1  ;;  %v1059_v37 = vmul.f32 %v2487_v20, %v1058_v48  ;;  %vm1061_vm7 = vcmp.lt.f32.partialorder %v1060_v38, 0.0004427343 }
 0x199   : > { %v2513_v41 = vpop.eup %1813  ;;  %1209 = vst [vmem:[%s2265_s12 + $0x40] sm:$0xff] %v1178_v13  ;;  %v1194_v32 = vmul.f32 %v1812_v26, %v2317_v6  ;;  %1827 = vpow2.f32 %v797_v52  ;;  %v793_v6 = vmul.f32 1.442695, %v749_v53  ;;  %v959_v56 = vadd.f32 1.0, %v958_v36 }
 0x19a   : > { %v918_v54 = vsel %vm917_vm6, %v915_v40, %v912_v14  ;;  %v1099_v60 = vadd.f32 1.0, %v2513_v41  ;;  %v2522_v17 = vpop.eup %1815  ;;  %v1102_v18 = vmul.f32 -0.5, %v2513_v41  ;;  %v734_v23 = vand.u32 2147483647, %v2520_v8 }
 0x19b   : > { %1225 = vst [vmem:[%s2265_s12 + $0xc0] sm:$0xff] %v1194_v32  ;;  %v1117_v12 = vadd.f32 %v918_v54, %v683_v2  ;;  %v937_v51 = vadd.f32 1.0, %v2522_v17  ;;  %v961_v27 = vand.u32 2147483647, %v2504_v35  ;;  %v940_v20 = vmul.f32 -0.5, %v2522_v17 }
 0x19c   : > { %1829 = vlog2.f32 %v1099_v60  ;;  %v688_v42 = vmax.f32 %v2425_v46, 0.0  ;;  %v765_v10 = vsub.f32 0.0, %v734_v23  ;;  %v960_v45 = vmul.f32 %v2504_v35, %v959_v56 }
 0x19d   : > { %v1818_v47 = vpop.eup %1817  ;;  %1831 = vtanh.f32 %v1117_v12  ;;  %v1103_v49 = vadd.f32 1.0, %v1102_v18  ;;  %vm962_vm8 = vcmp.lt.f32.partialorder %v961_v27, 0.0004427343  ;;  %v941_v59 = vadd.f32 1.0, %v940_v20 }
 0x19e   : > { %v1820_v62 = vpop.eup %1819  ;;  %v1181_v57 = vmul.f32 %v1818_v47, %v2341_v43  ;;  %1833 = vlog2.f32 %v937_v51  ;;  %v825_v61 = vmul.f32 1.442695, %v765_v10  ;;  %v943_v9 = vand.u32 2147483647, %v2522_v17 }
 0x19f   : > { %v1056_v50 = vmul.f32 0.6931472, %v1820_v62  ;;  %1835 = vpow2.f32 %v793_v6  ;;  %v1104_v2 = vmul.f32 %v2513_v41, %v1103_v49  ;;  %v704_v26 = vmax.f32 %v2448_v34, 0.0 }
 0x1a0   : > { %v1822_v31 = vpop.eup %1821  ;;  %1212 = vst [vmem:[%s2265_s12 + $0x58] sm:$0xff] %v1181_v57  ;;  %v942_v38 = vmul.f32 %v2522_v17, %v941_v59  ;;  %v686_v53 = vmax.f32 %v2454_v5, 0.0  ;;  %vm944_vm10 = vcmp.lt.f32.partialorder %v943_v9, 0.0004427343  ;;  %v702_v51 = vmax.f32 %v2482_v63, 0.0 }
 0x1a1   : > { %v1824_v7 = vpop.eup %1823  ;;  %v1197_v43 = vmul.f32 %v1822_v31, %v2345_v11  ;;  %v1062_v30 = vsel %vm1061_vm7, %v1059_v37, %v1056_v50  ;;  %v1105_v11 = vand.u32 2147483647, %v2513_v41  ;;  %v689_v27 = vmax.f32 %v2493_v3, 0.0 }
 0x1a2   : > { %v1133_v22 = vadd.f32 %v1062_v30, %v699_v15  ;;  %v1081_v24 = vadd.f32 1.0, %v1824_v7  ;;  %v1826_v4 = vpop.eup %1825  ;;  %v1084_v35 = vmul.f32 -0.5, %v1824_v7  ;;  %v1087_v60 = vand.u32 2147483647, %v1824_v7 }
 0x1a3   : > { %1228 = vst [vmem:[%s2265_s12 + $0xd8] sm:$0xff] %v1197_v43  ;;  %v957_v55 = vmul.f32 0.6931472, %v1826_v4  ;;  %v1828_v21 = vpop.eup %1827  ;;  %vm1106_vm9 = vcmp.lt.f32.partialorder %v1105_v11, 0.0004427343 }
 0x1a4   : > { %1837 = vtanh.f32 %v1133_v22  ;;  %v964_v1 = vadd.f32 1.0, %v1828_v21  ;;  %v1085_v48 = vadd.f32 1.0, %v1084_v35  ;;  %v967_v16 = vmul.f32 -0.5, %v1828_v21 }
 0x1a5   : > { %1839 = vlog2.f32 %v1081_v24  ;;  %v963_v29 = vsel %vm962_vm8, %v960_v45, %v957_v55  ;;  %vm1088_vm11 = vcmp.lt.f32.partialorder %v1087_v60, 0.0004427343  ;;  %v970_v37 = vand.u32 2147483647, %v1828_v21 }
 0x1a6   : > { %v1830_v44 = vpop.eup %1829  ;;  %v1122_v19 = vadd.f32 %v963_v29, %v688_v42  ;;  %1841 = vpow2.f32 %v825_v61  ;;  %v1086_v47 = vmul.f32 %v1824_v7, %v1085_v48  ;;  %v968_v62 = vadd.f32 1.0, %v967_v16  ;;  %v1351_v48 = vld [vmem:[%s2265_s12 + $0x50] sm:$0xff] (%p1959_p6) }
 0x1a7   : > { %v1832_v39 = vpop.eup %1831  ;;  %v1101_v13 = vmul.f32 0.6931472, %v1830_v44  ;;  %vm971_vm12 = vcmp.lt.f32.partialorder %v970_v37, 0.0004427343  ;;  %v687_v61 = vmax.f32 %v2502_v58, 0.0  ;;  %1352 = vst [vmem:[%s2576_s9 + $0xa0] sm:$0xff] (%p1959_p6), %v1351_v48 }
 0x1a8   : > { %v1834_v28 = vpop.eup %1833  ;;  %v1179_v33 = vmul.f32 %v1832_v39, %v2358_v0  ;;  %1843 = vtanh.f32 %v1122_v19  ;;  %v969_v30 = vmul.f32 %v1828_v21, %v968_v62  ;;  %v1371_v62 = vld [vmem:[%s2265_s12 + $0xa0] sm:$0xff] (%p1959_p6) }
 0x1a9   : > { %v1836_v14 = vpop.eup %1835  ;;  %v1107_v40 = vsel %vm1106_vm9, %v1104_v2, %v1101_v13  ;;  %v939_v32 = vmul.f32 0.6931472, %v1834_v28  ;;  %1845 = vlog2.f32 %v964_v1  ;;  %1372 = vst [vmem:[%s2576_s9 + $0x140] sm:$0xff] (%p1959_p6), %v1371_v62  ;;  %v1379_v37 = vld [vmem:[%s2265_s12 + $0xc0] sm:$0xff] (%p1959_p6) }
 0x1aa   : > { %1210 = vst [vmem:[%s2265_s12 + $0x48] sm:$0xff] %v1179_v33  ;;  %v1138_v52 = vadd.f32 %v1107_v40, %v704_v26  ;;  %v946_v41 = vadd.f32 1.0, %v1836_v14  ;;  %v949_v57 = vmul.f32 -0.5, %v1836_v14  ;;  %v952_v22 = vand.u32 2147483647, %v1836_v14  ;;  %v1335_v40 = vld [vmem:[%s2265_s12 + $0x10] sm:$0xff] (%p1959_p6) }
 0x1ab   : > { %v945_v54 = vsel %vm944_vm10, %v942_v38, %v939_v32  ;;  %v1339_v32 = vld [vmem:[%s2265_s12 + $0x20] sm:$0xff] (%p1959_p6)  ;;  %v1341_v38 = vld [vmem:[%s2265_s12 + $0x28] sm:$0xff] (%p1959_p6)  ;;  %1336 = vst [vmem:[%s2576_s9 + $0x20] sm:$0xff] (%p1959_p6), %v1335_v40  ;;  %1380 = vst [vmem:[%s2576_s9 + $0x180] sm:$0xff] (%p1959_p6), %v1379_v37 }
 0x1ac   : > { %1847 = vtanh.f32 %v1138_v52  ;;  %v1120_v0 = vadd.f32 %v945_v54, %v686_v53  ;;  %v950_v7 = vadd.f32 1.0, %v949_v57  ;;  %vm953_vm13 = vcmp.lt.f32.partialorder %v952_v22, 0.0004427343  ;;  %1340 = vst [vmem:[%s2576_s9 + $0x40] sm:$0xff] (%p1959_p6), %v1339_v32  ;;  %1342 = vst [vmem:[%s2576_s9 + $0x50] sm:$0xff] (%p1959_p6), %v1341_v38  ;;  %v1343_v52 = vld [vmem:[%s2265_s12 + $0x30] sm:$0xff] (%p1959_p6) }
 0x1ad   : > { %1849 = vlog2.f32 %v946_v41  ;;  %v1345_v53 = vld [vmem:[%s2265_s12 + $0x38] sm:$0xff] (%p1959_p6)  ;;  %v1347_v41 = vld [vmem:[%s2265_s12 + $0x40] sm:$0xff] (%p1959_p6)  ;;  %1344 = vst [vmem:[%s2576_s9 + $0x60] sm:$0xff] (%p1959_p6), %v1343_v52  ;;  %v1373_v57 = vld [vmem:[%s2265_s12 + $0xa8] sm:$0xff] (%p1959_p6) }
 0x1ae   : > { %v1838_v12 = vpop.eup %1837  ;;  %1851 = vtanh.f32 %v1120_v0  ;;  %v951_v45 = vmul.f32 %v1836_v14, %v950_v7  ;;  %1346 = vst [vmem:[%s2576_s9 + $0x70] sm:$0xff] (%p1959_p6), %v1345_v53  ;;  %1348 = vst [vmem:[%s2576_s9 + $0x80] sm:$0xff] (%p1959_p6), %v1347_v41  ;;  %v1353_v0 = vld [vmem:[%s2265_s12 + $0x58] sm:$0xff] (%p1959_p6) }
 0x1af   : > { %v1840_v36 = vpop.eup %1839  ;;  %v1195_v6 = vmul.f32 %v1838_v12, %v2391_v25  ;;  %1354 = vst [vmem:[%s2576_s9 + $0xb0] sm:$0xff] (%p1959_p6), %v1353_v0  ;;  %1374 = vst [vmem:[%s2576_s9 + $0x150] sm:$0xff] (%p1959_p6), %v1373_v57 }
 0x1b0   : > { %v1083_v17 = vmul.f32 0.6931472, %v1840_v36  ;;  %v1842_v15 = vpop.eup %1841 }
 0x1b1   : > { %1226 = vst [vmem:[%s2265_s12 + $0xc8] sm:$0xff] %v1195_v6  ;;  %v1090_v18 = vadd.f32 1.0, %v1842_v15  ;;  %v1093_v49 = vmul.f32 -0.5, %v1842_v15  ;;  %v1349_v54 = vld [vmem:[%s2265_s12 + $0x48] sm:$0xff] (%p1959_p6)  ;;  %v1363_v6 = vld [vmem:[%s2265_s12 + $0x80] sm:$0xff] (%p1959_p6) }
 0x1b2   : > { %v1089_v50 = vsel %vm1088_vm11, %v1086_v47, %v1083_v17  ;;  %v1844_v31 = vpop.eup %1843  ;;  %1350 = vst [vmem:[%s2576_s9 + $0x90] sm:$0xff] (%p1959_p6), %v1349_v54  ;;  %v1365_v17 = vld [vmem:[%s2265_s12 + $0x88] sm:$0xff] (%p1959_p6)  ;;  %1364 = vst [vmem:[%s2576_s9 + $0x100] sm:$0xff] (%p1959_p6), %v1363_v6  ;;  %v1367_v47 = vld [vmem:[%s2265_s12 + $0x90] sm:$0xff] (%p1959_p6) }
 0x1b3   : > { %v1136_v56 = vadd.f32 %v1089_v50, %v702_v51  ;;  %v1846_v23 = vpop.eup %1845  ;;  %v1184_v43 = vmul.f32 %v1844_v31, %v2425_v46  ;;  %v1094_v59 = vadd.f32 1.0, %v1093_v49  ;;  %1366 = vst [vmem:[%s2576_s9 + $0x110] sm:$0xff] (%p1959_p6), %v1365_v17  ;;  %v1369_v51 = vld [vmem:[%s2265_s12 + $0x98] sm:$0xff] (%p1959_p6)  ;;  %1368 = vst [vmem:[%s2576_s9 + $0x120] sm:$0xff] (%p1959_p6), %v1367_v47 }
 0x1b4   : > { %v966_v25 = vmul.f32 0.6931472, %v1846_v23  ;;  %1370 = vst [vmem:[%s2576_s9 + $0x130] sm:$0xff] (%p1959_p6), %v1369_v51  ;;  %v1377_v50 = vld [vmem:[%s2265_s12 + $0xb8] sm:$0xff] (%p1959_p6) }
 0x1b5   : > { %1853 = vtanh.f32 %v1136_v56  ;;  %1215 = vst [vmem:[%s2265_s12 + $0x70] sm:$0xff] %v1184_v43  ;;  %v1095_v39 = vmul.f32 %v1842_v15, %v1094_v59  ;;  %1378 = vst [vmem:[%s2576_s9 + $0x170] sm:$0xff] (%p1959_p6), %v1377_v50  ;;  %v1383_v56 = vld [vmem:[%s2265_s12 + $0xd0] sm:$0xff] (%p1959_p6) }
 0x1b6   : > { %1855 = vlog2.f32 %v1090_v18  ;;  %v1848_v20 = vpop.eup %1847  ;;  %v972_v24 = vsel %vm971_vm12, %v969_v30, %v966_v25  ;;  %1384 = vst [vmem:[%s2576_s9 + $0x1a0] sm:$0xff] (%p1959_p6), %v1383_v56  ;;  %v1385_v18 = vld [vmem:[%s2265_s12 + $0xd8] sm:$0xff] (%p1959_p6) }
 0x1b7   : > { %v1850_v4 = vpop.eup %1849  ;;  %v1200_v42 = vmul.f32 %v1848_v20, %v2448_v34  ;;  %v1123_v10 = vadd.f32 %v972_v24, %v689_v27  ;;  %v1096_v34 = vand.u32 2147483647, %v1842_v15  ;;  %v1375_v15 = vld [vmem:[%s2265_s12 + $0xb0] sm:$0xff] (%p1959_p6)  ;;  %1386 = vst [vmem:[%s2576_s9 + $0x1b0] sm:$0xff] (%p1959_p6), %v1385_v18 }
 0x1b8   : > { %v1852_v55 = vpop.eup %1851  ;;  %v948_v46 = vmul.f32 0.6931472, %v1850_v4  ;;  %1376 = vst [vmem:[%s2576_s9 + $0x160] sm:$0xff] (%p1959_p6), %v1375_v15  ;;  %v1381_v31 = vld [vmem:[%s2265_s12 + $0xc8] sm:$0xff] (%p1959_p6) }
 0x1b9   : > { %1231 = vst [vmem:[%s2265_s12 + $0xf0] sm:$0xff] %v1200_v42  ;;  %v1182_v11 = vmul.f32 %v1852_v55, %v2454_v5  ;;  %1857 = vtanh.f32 %v1123_v10  ;;  %v703_v5 = vmax.f32 %v2520_v8, 0.0  ;;  %vm1097_vm14 = vcmp.lt.f32.partialorder %v1096_v34, 0.0004427343  ;;  %1382 = vst [vmem:[%s2576_s9 + $0x190] sm:$0xff] (%p1959_p6), %v1381_v31 }
 0x1ba   : > { %v954_v21 = vsel %vm953_vm13, %v951_v45, %v948_v46 }
 0x1bb   : > { %1213 = vst [vmem:[%s2265_s12 + $0x60] sm:$0xff] %v1182_v11  ;;  %v1121_v29 = vadd.f32 %v954_v21, %v687_v61 }
 0x1bc   : > { %v1359_v12 = vld [vmem:[%s2265_s12 + $0x70] sm:$0xff] (%p1959_p6) }
 0x1bd   : > { %1859 = vtanh.f32 %v1121_v29  ;;  %1360 = vst [vmem:[%s2576_s9 + $0xe0] sm:$0xff] (%p1959_p6), %v1359_v12 }
 0x1bf   : > { %v1854_v44 = vpop.eup %1853 }
 0x1c0   : > { %v1856_v19 = vpop.eup %1855  ;;  %v1198_v9 = vmul.f32 %v1854_v44, %v2482_v63  ;;  %v1391_v25 = vld [vmem:[%s2265_s12 + $0xf0] sm:$0xff] (%p1959_p6) }
 0x1c1   : > { %v1092_v1 = vmul.f32 0.6931472, %v1856_v19  ;;  %1392 = vst [vmem:[%s2576_s9 + $0x1e0] sm:$0xff] (%p1959_p6), %v1391_v25 }
 0x1c2   : > { %1229 = vst [vmem:[%s2265_s12 + $0xe0] sm:$0xff] %v1198_v9  ;;  %v1355_v60 = vld [vmem:[%s2265_s12 + $0x60] sm:$0xff] (%p1959_p6) }
 0x1c3   : > { %v1098_v13 = vsel %vm1097_vm14, %v1095_v39, %v1092_v1  ;;  %v1858_v2 = vpop.eup %1857  ;;  %1356 = vst [vmem:[%s2576_s9 + $0xc0] sm:$0xff] (%p1959_p6), %v1355_v60 }
 0x1c4   : > { %v1137_v35 = vadd.f32 %v1098_v13, %v703_v5  ;;  %v1185_v28 = vmul.f32 %v1858_v2, %v2493_v3  ;;  %v1331_v3 = vld [vmem:[%s2265_s12] sm:$0xff] (%p1959_p6) }
 0x1c5   : > { %1332 = vst [vmem:[%s2576_s9] sm:$0xff] (%p1959_p6), %v1331_v3 }
 0x1c6   : > { %1861 = vtanh.f32 %v1137_v35  ;;  %1216 = vst [vmem:[%s2265_s12 + $0x78] sm:$0xff] %v1185_v28 }
 0x1c7   : > { %v1860_v33 = vpop.eup %1859 }
 0x1c8   : > { %v1183_v26 = vmul.f32 %v1860_v33, %v2502_v58  ;;  %v1333_v58 = vld [vmem:[%s2265_s12 + $0x8] sm:$0xff] (%p1959_p6) }
 0x1c9   : > { %1334 = vst [vmem:[%s2576_s9 + $0x10] sm:$0xff] (%p1959_p6), %v1333_v58  ;;  %v1387_v23 = vld [vmem:[%s2265_s12 + $0xe0] sm:$0xff] (%p1959_p6) }
 0x1ca   : > { %1214 = vst [vmem:[%s2265_s12 + $0x68] sm:$0xff] %v1183_v26  ;;  %1388 = vst [vmem:[%s2576_s9 + $0x1c0] sm:$0xff] (%p1959_p6), %v1387_v23 }
 0x1cd   : > { %1238 = sbr.rel (!%p1959_p6) target bundleno = 476 (0x1dc), region = 77  ;;  %v1361_v36 = vld [vmem:[%s2265_s12 + $0x78] sm:$0xff] (%p1959_p6) }
 0x1ce   : > { %1362 = vst [vmem:[%s2576_s9 + $0xf0] sm:$0xff] (%p1959_p6), %v1361_v36 }
 0x1d0   : > { %v1862_v14 = vpop.eup %1861 }
 0x1d1   : > { %v1199_v63 = vmul.f32 %v1862_v14, %v2520_v8  ;;  %v1337_v8 = vld [vmem:[%s2265_s12 + $0x18] sm:$0xff] (%p1959_p6)  ;;  %v1357_v16 = vld [vmem:[%s2265_s12 + $0x68] sm:$0xff] (%p1959_p6) }
 0x1d2   : > { %1338 = vst [vmem:[%s2576_s9 + $0x30] sm:$0xff] (%p1959_p6), %v1337_v8  ;;  %1358 = vst [vmem:[%s2576_s9 + $0xd0] sm:$0xff] (%p1959_p6), %v1357_v16 }
 0x1d3   : > { %1230 = vst [vmem:[%s2265_s12 + $0xe8] sm:$0xff] %v1199_v63 }
 0x1da   : > { %v1389_v43 = vld [vmem:[%s2265_s12 + $0xe8] sm:$0xff] }
 0x1db   : > { %1390 = vst [vmem:[%s2576_s9 + $0x1d0] sm:$0xff] %v1389_v43 }
 0x1dc PF: > { %s13_s16 = sadd.s32 1, %s1902_s16   ;;  %s2714_s12 = smov %s1890_s13 }
 0x1dd   : > { %p10_p12 = scmp.ge.s32.totalorder %s13_s16, 4   ;;  %s2715_s13 = smov %s1964_s22 }
 0x1de   : > { %s2716_s14 = smov %s1898_s15  ;;  %s2717_s15 = smov %s2719_s17 }
 0x1df   :  { %12 = sbr.rel (!%p10_p12) target bundleno = 3 (0x3), region = 152 }

// kernel: forward.11
= control target key start
LH: loop header
LB: loop body
LE: loop exit
PB: predicated region body
PF: predicated region fallthrough
CT: control target
= control target key end

     0   :  { %s2987_s12 = smov 0   ;;  %s2989_s13 = smov 0   ;;  %s4462_s0 = inlined_call_operand.vmem [shape: bf16[1024,256], index: 0, kind: input, shape index: {}]   ;;  %s4463_s1 = inlined_call_operand.vmem [shape: bf16[256,128], index: 1, kind: input, shape index: {}]   ;;  %s4464_s2 = inlined_call_operand.vmem [shape: f32[1,128], index: 2, kind: input, shape index: {}]   ;;  %s4465_s3 = inlined_call_operand.vmem [shape: f32[1024,128], index: 3, kind: output, shape index: {}]  }
   0x1   :  { %s2991_s14 = smov 0  }
   0x2 LB: > { %s25_s15 = sadd.s32 1, %s2960_s13  ;;  %p2297_p0 = scmp.ge.s32.totalorder %s2964_s14, 1  ;;  %s2964_s14 = sphi %s2991_s14, %s13_s14   ;;  %s2960_s13 = sphi %s2989_s13, %s4585_s13   ;;  %s2956_s12 = sphi %s2987_s12, %s4584_s12  }
   0x3   : > { %p27_p1 = scmp.ge.s32.totalorder %s25_s15, 2  ;;  %p170_p2 = scmp.lt.s32.totalorder %s2964_s14, 3 }
   0x5   : > { %s4587_s15 = smov (%p27_p1, %s25_s15), 0  ;;  %p171_p3 = pnand %p2297_p0, %p170_p2 }
   0x7   : > { %174 = sbr.rel (%p171_p3) target bundleno = 619 (0x26b), region = 32 }
   0xe   : > { %v2444_v0 = vld [vmem:[%s4463_s1] sm:$0xff]   ;;  %v2966_v1 = vmov 0   ;;  %s2298_s18 = sshll.u32 %s2956_s12, 6  ;;  %v2445_v2 = vld [vmem:[%s4463_s1 + $0x8] sm:$0xff]   ;;  %v2446_v3 = vld [vmem:[%s4463_s1 + $0x10] sm:$0xff]  }
   0xf   : > { %748 = vmatprep.subr.bf16.mxu0 %v2966_v1  ;;  %2387 = vmatprep.subr.bf16.mxu1 %v2966_v1  ;;  %p206_p4 = scmp.lt.s32.totalorder %s2298_s18, 127  ;;  %v2447_v4 = vld [vmem:[%s4463_s1 + $0x18] sm:$0xff]   ;;  %v2448_v5 = vld [vmem:[%s4463_s1 + $0x20] sm:$0xff]   ;;  %v2449_v7 = vld [vmem:[%s4463_s1 + $0x28] sm:$0xff]  }
  0x10   : > { %749 = vmatpush1.bf16.msra.mxu0 %v2444_v0  ;;  %2403 = vmatpush1.bf16.msra.mxu1 %v2444_v0  ;;  %v2450_v9 = vld [vmem:[%s4463_s1 + $0x30] sm:$0xff]   ;;  %v2451_v10 = vld [vmem:[%s4463_s1 + $0x38] sm:$0xff]   ;;  %v2452_v11 = vld [vmem:[%s4463_s1 + $0x40] sm:$0xff]  }
  0x11   : > { %750 = vmatprep.subr.bf16.mxu0 %v2966_v1  ;;  %2388 = vmatprep.subr.bf16.mxu1 %v2966_v1  ;;  %s4589_s18 = smov (!%p206_p4, %s2298_s18), 127  ;;  %v2453_v12 = vld [vmem:[%s4463_s1 + $0x48] sm:$0xff]   ;;  %v2454_v13 = vld [vmem:[%s4463_s1 + $0x50] sm:$0xff]   ;;  %v2455_v14 = vld [vmem:[%s4463_s1 + $0x58] sm:$0xff]  }
  0x12   : > { %s2386_s25 = sshll.u32 %s4589_s18, 3  ;;  %v2456_v15 = vld [vmem:[%s4463_s1 + $0x60] sm:$0xff]   ;;  %v2457_v16 = vld [vmem:[%s4463_s1 + $0x68] sm:$0xff]   ;;  %v2458_v17 = vld [vmem:[%s4463_s1 + $0x70] sm:$0xff]  }
  0x13   : > { %s3036_s30 = scalar_lea.vmem %s4462_s0, %s2386_s25  ;;  %v2459_v18 = vld [vmem:[%s4463_s1 + $0x78] sm:$0xff]   ;;  %s3341_s8 = scalar_lea.vmem %s4465_s3, %s2386_s25 }
  0x14   : > { %751 = vmatpush1.bf16.msra.mxu0 %v2445_v2  ;;  %2404 = vmatpush1.bf16.msra.mxu1 %v2445_v2  ;;  %v2462_v6 = vld [vmem:[%s3036_s30 + $0x4] ss:$8 sps:$4 sm:$0xff]   ;;  %v2460_v19 = vld [vmem:[%s3036_s30] ss:$8 sps:$4 sm:$0xff]   ;;  %v2466_v21 = vld [vmem:[%s3036_s30 + $0x14] ss:$8 sps:$4 sm:$0xff]  }
  0x15   : > { %752 = vmatprep.subr.bf16.mxu0 %v2966_v1  ;;  %2389 = vmatprep.subr.bf16.mxu1 %v2966_v1  ;;  %v2465_v8 = vld [vmem:[%s3036_s30 + $0x104] ss:$8 sps:$4 sm:$0xff]   ;;  %v2463_v20 = vld [vmem:[%s3036_s30 + $0x100] ss:$8 sps:$4 sm:$0xff]   ;;  %v2468_v22 = vld [vmem:[%s3036_s30 + $0x114] ss:$8 sps:$4 sm:$0xff]  }
  0x16   : > { %780 = vmatprep.mubr.bf16.mxu0 %v2462_v6  ;;  %908 = vmatprep.mubr.bf16.mxu1 %v2465_v8  ;;  %v2470_v23 = vld [vmem:[%s3036_s30 + $0x10] ss:$8 sps:$4 sm:$0xff]   ;;  %v2472_v25 = vld [vmem:[%s3036_s30 + $0x24] ss:$8 sps:$4 sm:$0xff]   ;;  %v2476_v27 = vld [vmem:[%s3036_s30 + $0x20] ss:$8 sps:$4 sm:$0xff]  }
  0x17   : > { %v2471_v24 = vld [vmem:[%s3036_s30 + $0x110] ss:$8 sps:$4 sm:$0xff]   ;;  %v2474_v26 = vld [vmem:[%s3036_s30 + $0x124] ss:$8 sps:$4 sm:$0xff]   ;;  %v2477_v28 = vld [vmem:[%s3036_s30 + $0x120] ss:$8 sps:$4 sm:$0xff]  }
  0x18   : > { %753 = vmatpush1.bf16.msra.mxu0 %v2446_v3  ;;  %2405 = vmatpush1.bf16.msra.mxu1 %v2446_v3  ;;  %v2478_v29 = vld [vmem:[%s3036_s30 + $0x34] ss:$8 sps:$4 sm:$0xff]   ;;  %v2482_v31 = vld [vmem:[%s3036_s30 + $0x30] ss:$8 sps:$4 sm:$0xff]   ;;  %v2484_v33 = vld [vmem:[%s3036_s30 + $0x44] ss:$8 sps:$4 sm:$0xff]  }
  0x19   : > { %754 = vmatprep.subr.bf16.mxu0 %v2966_v1  ;;  %2390 = vmatprep.subr.bf16.mxu1 %v2966_v1  ;;  %v2480_v30 = vld [vmem:[%s3036_s30 + $0x134] ss:$8 sps:$4 sm:$0xff]   ;;  %v2483_v32 = vld [vmem:[%s3036_s30 + $0x130] ss:$8 sps:$4 sm:$0xff]   ;;  %v2486_v34 = vld [vmem:[%s3036_s30 + $0x144] ss:$8 sps:$4 sm:$0xff]  }
  0x1a   : > { %v2488_v35 = vld [vmem:[%s3036_s30 + $0x40] ss:$8 sps:$4 sm:$0xff]   ;;  %v2490_v37 = vld [vmem:[%s3036_s30 + $0x54] ss:$8 sps:$4 sm:$0xff]   ;;  %v2494_v39 = vld [vmem:[%s3036_s30 + $0x50] ss:$8 sps:$4 sm:$0xff]  }
  0x1b   : > { %v2489_v36 = vld [vmem:[%s3036_s30 + $0x140] ss:$8 sps:$4 sm:$0xff]   ;;  %v2492_v38 = vld [vmem:[%s3036_s30 + $0x154] ss:$8 sps:$4 sm:$0xff]   ;;  %v2495_v40 = vld [vmem:[%s3036_s30 + $0x150] ss:$8 sps:$4 sm:$0xff]  }
  0x1c   : > { %755 = vmatpush1.bf16.msra.mxu0 %v2447_v4  ;;  %2406 = vmatpush1.bf16.msra.mxu1 %v2447_v4  ;;  %v2496_v41 = vld [vmem:[%s3036_s30 + $0x64] ss:$8 sps:$4 sm:$0xff]   ;;  %v2500_v43 = vld [vmem:[%s3036_s30 + $0x60] ss:$8 sps:$4 sm:$0xff]   ;;  %v2502_v45 = vld [vmem:[%s3036_s30 + $0x74] ss:$8 sps:$4 sm:$0xff]  }
  0x1d   : > { %756 = vmatprep.subr.bf16.mxu0 %v2966_v1  ;;  %2391 = vmatprep.subr.bf16.mxu1 %v2966_v1  ;;  %v2498_v42 = vld [vmem:[%s3036_s30 + $0x164] ss:$8 sps:$4 sm:$0xff]   ;;  %v2501_v44 = vld [vmem:[%s3036_s30 + $0x160] ss:$8 sps:$4 sm:$0xff]   ;;  %v2504_v46 = vld [vmem:[%s3036_s30 + $0x174] ss:$8 sps:$4 sm:$0xff]  }
  0x1e   : > { %v2506_v47 = vld [vmem:[%s3036_s30 + $0x70] ss:$8 sps:$4 sm:$0xff]   ;;  %v2508_v49 = vld [vmem:[%s3036_s30 + $0x84] ss:$8 sps:$4 sm:$0xff]   ;;  %v2512_v51 = vld [vmem:[%s3036_s30 + $0x80] ss:$8 sps:$4 sm:$0xff]  }
  0x1f   : > { %v2507_v48 = vld [vmem:[%s3036_s30 + $0x170] ss:$8 sps:$4 sm:$0xff]   ;;  %v2510_v50 = vld [vmem:[%s3036_s30 + $0x184] ss:$8 sps:$4 sm:$0xff]   ;;  %v2513_v52 = vld [vmem:[%s3036_s30 + $0x180] ss:$8 sps:$4 sm:$0xff]  }
  0x20   : > { %757 = vmatpush1.bf16.msra.mxu0 %v2448_v5  ;;  %2407 = vmatpush1.bf16.msra.mxu1 %v2448_v5  ;;  %v2514_v53 = vld [vmem:[%s3036_s30 + $0x94] ss:$8 sps:$4 sm:$0xff]   ;;  %v2518_v55 = vld [vmem:[%s3036_s30 + $0x90] ss:$8 sps:$4 sm:$0xff]   ;;  %v2520_v57 = vld [vmem:[%s3036_s30 + $0xa4] ss:$8 sps:$4 sm:$0xff]  }
  0x21   : > { %758 = vmatprep.subr.bf16.mxu0 %v2966_v1  ;;  %2392 = vmatprep.subr.bf16.mxu1 %v2966_v1  ;;  %v2516_v54 = vld [vmem:[%s3036_s30 + $0x194] ss:$8 sps:$4 sm:$0xff]   ;;  %v2519_v56 = vld [vmem:[%s3036_s30 + $0x190] ss:$8 sps:$4 sm:$0xff]   ;;  %v2522_v58 = vld [vmem:[%s3036_s30 + $0x1a4] ss:$8 sps:$4 sm:$0xff]  }
  0x22   : > { %v2524_v59 = vld [vmem:[%s3036_s30 + $0xa0] ss:$8 sps:$4 sm:$0xff]   ;;  %v2526_v61 = vld [vmem:[%s3036_s30 + $0xb4] ss:$8 sps:$4 sm:$0xff]   ;;  %v2530_v63 = vld [vmem:[%s3036_s30 + $0xb0] ss:$8 sps:$4 sm:$0xff]  }
  0x23   : > { %v2525_v60 = vld [vmem:[%s3036_s30 + $0x1a0] ss:$8 sps:$4 sm:$0xff]   ;;  %v2528_v62 = vld [vmem:[%s3036_s30 + $0x1b4] ss:$8 sps:$4 sm:$0xff]   ;;  %v2531_v0 = vld [vmem:[%s3036_s30 + $0x1b0] ss:$8 sps:$4 sm:$0xff]  }
  0x24   : > { %759 = vmatpush1.bf16.msra.mxu0 %v2449_v7  ;;  %2408 = vmatpush1.bf16.msra.mxu1 %v2449_v7  ;;  %v2534_v2 = vld [vmem:[%s3036_s30 + $0x1c4] ss:$8 sps:$4 sm:$0xff]   ;;  %v2536_v3 = vld [vmem:[%s3036_s30 + $0xc0] ss:$8 sps:$4 sm:$0xff]   ;;  %v2538_v5 = vld [vmem:[%s3036_s30 + $0xd4] ss:$8 sps:$4 sm:$0xff]  }
  0x25   : > { %760 = vmatprep.subr.bf16.mxu0 %v2966_v1  ;;  %2393 = vmatprep.subr.bf16.mxu1 %v2966_v1  ;;  %v2537_v4 = vld [vmem:[%s3036_s30 + $0x1c0] ss:$8 sps:$4 sm:$0xff]   ;;  %v2540_v6 = vld [vmem:[%s3036_s30 + $0x1d4] ss:$8 sps:$4 sm:$0xff]   ;;  %v2542_v7 = vld [vmem:[%s3036_s30 + $0xd0] ss:$8 sps:$4 sm:$0xff]  }
  0x26   : > { %v2543_v8 = vld [vmem:[%s3036_s30 + $0x1d0] ss:$8 sps:$4 sm:$0xff]  }
  0x28   : > { %761 = vmatpush1.bf16.msra.mxu0 %v2450_v9  ;;  %2409 = vmatpush1.bf16.msra.mxu1 %v2450_v9  ;;  %v2544_v9 = vld [vmem:[%s3036_s30 + $0xe4] ss:$8 sps:$4 sm:$0xff]  }
  0x29   : > { %762 = vmatprep.subr.bf16.mxu0 %v2966_v1  ;;  %2394 = vmatprep.subr.bf16.mxu1 %v2966_v1 }
  0x2c   : > { %763 = vmatpush1.bf16.msra.mxu0 %v2451_v10  ;;  %2410 = vmatpush1.bf16.msra.mxu1 %v2451_v10  ;;  %v2546_v10 = vld [vmem:[%s3036_s30 + $0x1e4] ss:$8 sps:$4 sm:$0xff]  }
  0x2d   : > { %764 = vmatprep.subr.bf16.mxu0 %v2966_v1  ;;  %2395 = vmatprep.subr.bf16.mxu1 %v2966_v1 }
  0x30   : > { %765 = vmatpush1.bf16.msra.mxu0 %v2452_v11  ;;  %2411 = vmatpush1.bf16.msra.mxu1 %v2452_v11  ;;  %v2548_v11 = vld [vmem:[%s3036_s30 + $0xe0] ss:$8 sps:$4 sm:$0xff]  }
  0x31   : > { %766 = vmatprep.subr.bf16.mxu0 %v2966_v1  ;;  %2396 = vmatprep.subr.bf16.mxu1 %v2966_v1 }
  0x34   : > { %767 = vmatpush1.bf16.msra.mxu0 %v2453_v12  ;;  %2412 = vmatpush1.bf16.msra.mxu1 %v2453_v12  ;;  %v2549_v12 = vld [vmem:[%s3036_s30 + $0x1e0] ss:$8 sps:$4 sm:$0xff]  }
  0x35   : > { %768 = vmatprep.subr.bf16.mxu0 %v2966_v1  ;;  %2397 = vmatprep.subr.bf16.mxu1 %v2966_v1 }
  0x38   : > { %769 = vmatpush1.bf16.msra.mxu0 %v2454_v13  ;;  %2413 = vmatpush1.bf16.msra.mxu1 %v2454_v13  ;;  %v2550_v13 = vld [vmem:[%s3036_s30 + $0xf4] ss:$8 sps:$4 sm:$0xff]  }
  0x39   : > { %770 = vmatprep.subr.bf16.mxu0 %v2966_v1  ;;  %2398 = vmatprep.subr.bf16.mxu1 %v2966_v1 }
  0x3c   : > { %771 = vmatpush1.bf16.msra.mxu0 %v2455_v14  ;;  %2414 = vmatpush1.bf16.msra.mxu1 %v2455_v14  ;;  %v2552_v14 = vld [vmem:[%s3036_s30 + $0x1f4] ss:$8 sps:$4 sm:$0xff]  }
  0x3d   : > { %772 = vmatprep.subr.bf16.mxu0 %v2966_v1  ;;  %2399 = vmatprep.subr.bf16.mxu1 %v2966_v1 }
  0x40   : > { %773 = vmatpush1.bf16.msra.mxu0 %v2456_v15  ;;  %2415 = vmatpush1.bf16.msra.mxu1 %v2456_v15  ;;  %v2554_v15 = vld [vmem:[%s3036_s30 + $0xf0] ss:$8 sps:$4 sm:$0xff]  }
  0x41   : > { %774 = vmatprep.subr.bf16.mxu0 %v2966_v1  ;;  %2400 = vmatprep.subr.bf16.mxu1 %v2966_v1 }
  0x44   : > { %775 = vmatpush1.bf16.msra.mxu0 %v2457_v16  ;;  %2416 = vmatpush1.bf16.msra.mxu1 %v2457_v16  ;;  %v2555_v16 = vld [vmem:[%s3036_s30 + $0x1f0] ss:$8 sps:$4 sm:$0xff]  }
  0x45   : > { %776 = vmatprep.subr.bf16.mxu0 %v2966_v1  ;;  %2401 = vmatprep.subr.bf16.mxu1 %v2966_v1 }
  0x48   : > { %777 = vmatpush1.bf16.msra.mxu0 %v2458_v17  ;;  %2417 = vmatpush1.bf16.msra.mxu1 %v2458_v17  ;;  %v3162_v17 = vld [vmem:[%s4464_s2] ss:$0 sm:$0xff] }
  0x49   : > { %778 = vmatprep.subr.bf16.mxu0 %v2966_v1  ;;  %2402 = vmatprep.subr.bf16.mxu1 %v2966_v1  ;;  %v2532_v1 = vld [vmem:[%s3036_s30 + $0xc4] ss:$8 sps:$4 sm:$0xff]  }
  0x4c   : > { %779 = vmatpush1.bf16.msra.mxu0 %v2459_v18  ;;  %2418 = vmatpush1.bf16.msra.mxu1 %v2459_v18 }
  0x4f   : > { %781 = vmatmul.mubr.bf16.vlgmr.msra.gmra.mrb[0].mxu0 %v2460_v19  ;;  %909 = vmatmul.mubr.bf16.vlgmr.msra.gmra.mrb[0].mxu1 %v2463_v20 }
  0x50   : > { %788 = vmatprep.mubr.bf16.mxu0 %v2466_v21  ;;  %916 = vmatprep.mubr.bf16.mxu1 %v2468_v22 }
  0x57   : > { %789 = vmatmul.mubr.bf16.gmra.mrb[4].mxu0 %v2470_v23  ;;  %917 = vmatmul.mubr.bf16.gmra.mrb[4].mxu1 %v2471_v24 }
  0x58   : > { %796 = vmatprep.mubr.bf16.mxu0 %v2472_v25  ;;  %924 = vmatprep.mubr.bf16.mxu1 %v2474_v26 }
  0x5f   : > { %797 = vmatmul.mubr.bf16.gmra.mrb[8].mxu0 %v2476_v27  ;;  %925 = vmatmul.mubr.bf16.gmra.mrb[8].mxu1 %v2477_v28 }
  0x60   : > { %804 = vmatprep.mubr.bf16.mxu0 %v2478_v29  ;;  %932 = vmatprep.mubr.bf16.mxu1 %v2480_v30 }
  0x67   : > { %805 = vmatmul.mubr.bf16.gmra.mrb[12].mxu0 %v2482_v31  ;;  %933 = vmatmul.mubr.bf16.gmra.mrb[12].mxu1 %v2483_v32 }
  0x68   : > { %812 = vmatprep.mubr.bf16.mxu0 %v2484_v33  ;;  %940 = vmatprep.mubr.bf16.mxu1 %v2486_v34 }
  0x6f   : > { %813 = vmatmul.mubr.bf16.gmra.mrb[16].mxu0 %v2488_v35  ;;  %941 = vmatmul.mubr.bf16.gmra.mrb[16].mxu1 %v2489_v36 }
  0x70   : > { %820 = vmatprep.mubr.bf16.mxu0 %v2490_v37  ;;  %948 = vmatprep.mubr.bf16.mxu1 %v2492_v38 }
  0x77   : > { %821 = vmatmul.mubr.bf16.gmra.mrb[20].mxu0 %v2494_v39  ;;  %949 = vmatmul.mubr.bf16.gmra.mrb[20].mxu1 %v2495_v40 }
  0x78   : > { %828 = vmatprep.mubr.bf16.mxu0 %v2496_v41  ;;  %956 = vmatprep.mubr.bf16.mxu1 %v2498_v42 }
  0x7f   : > { %829 = vmatmul.mubr.bf16.gmra.mrb[24].mxu0 %v2500_v43  ;;  %957 = vmatmul.mubr.bf16.gmra.mrb[24].mxu1 %v2501_v44 }
  0x80   : > { %836 = vmatprep.mubr.bf16.mxu0 %v2502_v45  ;;  %964 = vmatprep.mubr.bf16.mxu1 %v2504_v46 }
  0x87   : > { %837 = vmatmul.mubr.bf16.gmra.mrb[28].mxu0 %v2506_v47  ;;  %965 = vmatmul.mubr.bf16.gmra.mrb[28].mxu1 %v2507_v48 }
  0x88   : > { %844 = vmatprep.mubr.bf16.mxu0 %v2508_v49  ;;  %972 = vmatprep.mubr.bf16.mxu1 %v2510_v50 }
  0x8f   : > { %845 = vmatmul.mubr.bf16.gmra.mrb[32].mxu0 %v2512_v51  ;;  %973 = vmatmul.mubr.bf16.gmra.mrb[32].mxu1 %v2513_v52 }
  0x90   : > { %852 = vmatprep.mubr.bf16.mxu0 %v2514_v53  ;;  %980 = vmatprep.mubr.bf16.mxu1 %v2516_v54 }
  0x97   : > { %853 = vmatmul.mubr.bf16.gmra.mrb[36].mxu0 %v2518_v55  ;;  %981 = vmatmul.mubr.bf16.gmra.mrb[36].mxu1 %v2519_v56 }
  0x98   : > { %860 = vmatprep.mubr.bf16.mxu0 %v2520_v57  ;;  %988 = vmatprep.mubr.bf16.mxu1 %v2522_v58 }
  0x9f   : > { %861 = vmatmul.mubr.bf16.gmra.mrb[40].mxu0 %v2524_v59  ;;  %989 = vmatmul.mubr.bf16.gmra.mrb[40].mxu1 %v2525_v60 }
  0xa0   : > { %868 = vmatprep.mubr.bf16.mxu0 %v2526_v61  ;;  %996 = vmatprep.mubr.bf16.mxu1 %v2528_v62 }
  0xa7   : > { %869 = vmatmul.mubr.bf16.gmra.mrb[44].mxu0 %v2530_v63  ;;  %997 = vmatmul.mubr.bf16.gmra.mrb[44].mxu1 %v2531_v0 }
  0xa8   : > { %876 = vmatprep.mubr.bf16.mxu0 %v2532_v1  ;;  %1004 = vmatprep.mubr.bf16.mxu1 %v2534_v2 }
  0xaf   : > { %877 = vmatmul.mubr.bf16.gmra.mrb[48].mxu0 %v2536_v3  ;;  %1005 = vmatmul.mubr.bf16.gmra.mrb[48].mxu1 %v2537_v4 }
  0xb0   : > { %884 = vmatprep.mubr.bf16.mxu0 %v2538_v5  ;;  %1012 = vmatprep.mubr.bf16.mxu1 %v2540_v6 }
  0xb7   : > { %885 = vmatmul.mubr.bf16.gmra.mrb[52].mxu0 %v2542_v7  ;;  %1013 = vmatmul.mubr.bf16.gmra.mrb[52].mxu1 %v2543_v8 }
  0xb8   : > { %892 = vmatprep.mubr.bf16.mxu0 %v2544_v9  ;;  %1020 = vmatprep.mubr.bf16.mxu1 %v2546_v10 }
  0xbf   : > { %893 = vmatmul.mubr.bf16.gmra.mrb[56].mxu0 %v2548_v11  ;;  %1021 = vmatmul.mubr.bf16.gmra.mrb[56].mxu1 %v2549_v12 }
  0xc0   : > { %900 = vmatprep.mubr.bf16.mxu0 %v2550_v13  ;;  %1028 = vmatprep.mubr.bf16.mxu1 %v2552_v14 }
  0xc7   : > { %901 = vmatmul.mubr.bf16.gmra.mrb[60].mxu0 %v2554_v15  ;;  %1029 = vmatmul.mubr.bf16.gmra.mrb[60].mxu1 %v2555_v16 }
 0x122   : > { %v782_v18 = vpop.f32.mrb[0].mxu0  ;;  %v910_v19 = vpop.f32.mrb[0].mxu1 }
 0x123   : > { %v3165_v20 = vadd.f32 %v3162_v17, %v782_v18  ;;  %v3168_v21 = vadd.f32 %v3162_v17, %v910_v19  ;;  %v784_v22 = vpop.f32.mrb[1].mxu0  ;;  %v912_v23 = vpop.f32.mrb[1].mxu1 }
 0x124   : > { %v785_v24 = vpop.f32.mrb[2].mxu0  ;;  %v913_v25 = vpop.f32.mrb[2].mxu1 }
 0x125   : > { %v1101_v26 = vand.u32 2147483647, %v3165_v20  ;;  %v1133_v27 = vand.u32 2147483647, %v3168_v21  ;;  %v3173_v28 = vadd.f32 %v3162_v17, %v785_v24  ;;  %v3176_v29 = vadd.f32 %v3162_v17, %v913_v25  ;;  %v787_v30 = vpop.f32.mrb[3].mxu0  ;;  %v915_v31 = vpop.f32.mrb[3].mxu1 }
 0x126   : > { %v1037_v11 = vmax.f32 %v3165_v20, 0.0  ;;  %v1069_v12 = vmax.f32 %v3168_v21, 0.0 }
 0x127   : > { %v1165_v32 = vsub.f32 0.0, %v1101_v26  ;;  %v1197_v33 = vsub.f32 0.0, %v1133_v27  ;;  %v1102_v34 = vand.u32 2147483647, %v3173_v28  ;;  %v1134_v35 = vand.u32 2147483647, %v3176_v29 }
 0x128   : > { %v1038_v13 = vmax.f32 %v3173_v28, 0.0  ;;  %v1070_v18 = vmax.f32 %v3176_v29, 0.0 }
 0x129   : > { %v1229_v36 = vmul.f32 1.442695, %v1165_v32  ;;  %v1293_v37 = vmul.f32 1.442695, %v1197_v33  ;;  %v1166_v38 = vsub.f32 0.0, %v1102_v34  ;;  %v1198_v39 = vsub.f32 0.0, %v1134_v35 }
 0x12a   : > { %v790_v40 = vpop.f32.mrb[4].mxu0  ;;  %v918_v41 = vpop.f32.mrb[4].mxu1 }
 0x12b   : > { %2556 = vpow2.f32 %v1229_v36  ;;  %v3181_v42 = vadd.f32 %v3162_v17, %v790_v40  ;;  %v3184_v43 = vadd.f32 %v3162_v17, %v918_v41  ;;  %v792_v44 = vpop.f32.mrb[5].mxu0  ;;  %v920_v45 = vpop.f32.mrb[5].mxu1  ;;  %v1231_v46 = vmul.f32 1.442695, %v1166_v38 }
 0x12c   : > { %2558 = vpow2.f32 %v1293_v37  ;;  %v1295_v47 = vmul.f32 1.442695, %v1198_v39  ;;  %v793_v48 = vpop.f32.mrb[6].mxu0  ;;  %v921_v49 = vpop.f32.mrb[6].mxu1 }
 0x12d   : > { %v1103_v50 = vand.u32 2147483647, %v3181_v42  ;;  %v1135_v51 = vand.u32 2147483647, %v3184_v43  ;;  %2560 = vpow2.f32 %v1231_v46  ;;  %v3189_v52 = vadd.f32 %v3162_v17, %v793_v48  ;;  %v795_v54 = vpop.f32.mrb[7].mxu0  ;;  %v923_v55 = vpop.f32.mrb[7].mxu1 }
 0x12e   : > { %v3192_v53 = vadd.f32 %v3162_v17, %v921_v49  ;;  %2562 = vpow2.f32 %v1295_v47  ;;  %v1039_v30 = vmax.f32 %v3181_v42, 0.0  ;;  %v1071_v39 = vmax.f32 %v3184_v43, 0.0 }
 0x12f   : > { %v1167_v56 = vsub.f32 0.0, %v1103_v50  ;;  %v1199_v57 = vsub.f32 0.0, %v1135_v51  ;;  %v1104_v58 = vand.u32 2147483647, %v3189_v52  ;;  %v1040_v50 = vmax.f32 %v3189_v52, 0.0 }
 0x130   : > { %v1136_v59 = vand.u32 2147483647, %v3192_v53  ;;  %v1072_v51 = vmax.f32 %v3192_v53, 0.0 }
 0x131   : > { %v1233_v60 = vmul.f32 1.442695, %v1167_v56  ;;  %v1297_v61 = vmul.f32 1.442695, %v1199_v57  ;;  %v1168_v62 = vsub.f32 0.0, %v1104_v58 }
 0x132   : > { %v1200_v63 = vsub.f32 0.0, %v1136_v59  ;;  %v798_v0 = vpop.f32.mrb[8].mxu0  ;;  %v926_v1 = vpop.f32.mrb[8].mxu1 }
 0x133   : > { %2564 = vpow2.f32 %v1233_v60  ;;  %v3197_v2 = vadd.f32 %v3162_v17, %v798_v0  ;;  %v800_v3 = vpop.f32.mrb[9].mxu0  ;;  %v928_v4 = vpop.f32.mrb[9].mxu1  ;;  %v1235_v5 = vmul.f32 1.442695, %v1168_v62  ;;  %v3200_v7 = vadd.f32 %v3162_v17, %v926_v1 }
 0x134   : > { %2566 = vpow2.f32 %v1297_v61  ;;  %v1299_v6 = vmul.f32 1.442695, %v1200_v63  ;;  %v3202_v8 = vpop.f32.mrb[10].mxu0  ;;  %v3204_v9 = vpop.f32.mrb[10].mxu1 }
 0x135   : > { %v2557_v10 = vpop.eup %2556  ;;  %2568 = vpow2.f32 %v1235_v5  ;;  %v803_v19 = vpop.f32.mrb[11].mxu0  ;;  %v1105_v25 = vand.u32 2147483647, %v3197_v2  ;;  %v1137_v31 = vand.u32 2147483647, %v3200_v7 }
 0x136   : > { %v2559_v14 = vpop.eup %2558  ;;  %v1357_v15 = vadd.f32 1.0, %v2557_v10  ;;  %v1360_v16 = vmul.f32 -0.5, %v2557_v10  ;;  %v931_v22 = vpop.f32.mrb[11].mxu1  ;;  %2570 = vpow2.f32 %v1299_v6  ;;  %v1363_v27 = vand.u32 2147483647, %v2557_v10 }
 0x137   : > { %v1645_v23 = vadd.f32 1.0, %v2559_v14  ;;  %v1648_v24 = vmul.f32 -0.5, %v2559_v14  ;;  %v2561_v26 = vpop.eup %2560  ;;  %v1651_v34 = vand.u32 2147483647, %v2559_v14  ;;  %v1169_v46 = vsub.f32 0.0, %v1105_v25 }
 0x138   : > { %2572 = vlog2.f32 %v1357_v15  ;;  %v2563_v32 = vpop.eup %2562  ;;  %v1361_v33 = vadd.f32 1.0, %v1360_v16  ;;  %v1366_v35 = vadd.f32 1.0, %v2561_v26  ;;  %v1369_v37 = vmul.f32 -0.5, %v2561_v26 }
 0x139   : > { %2574 = vlog2.f32 %v1645_v23  ;;  %v1649_v36 = vadd.f32 1.0, %v1648_v24  ;;  %v1654_v38 = vadd.f32 1.0, %v2563_v32  ;;  %v1372_v44 = vand.u32 2147483647, %v2561_v26 }
 0x13a   : > { %v3214_v40 = vpop.f32.mrb[12].mxu0  ;;  %v3216_v41 = vpop.f32.mrb[12].mxu1  ;;  %2576 = vlog2.f32 %v1366_v35  ;;  %v1657_v45 = vmul.f32 -0.5, %v2563_v32  ;;  %v1660_v49 = vand.u32 2147483647, %v2563_v32  ;;  %v1362_v56 = vmul.f32 %v2557_v10, %v1361_v33 }
 0x13b   : > { %v808_v47 = vpop.f32.mrb[13].mxu0  ;;  %v936_v48 = vpop.f32.mrb[13].mxu1  ;;  %2578 = vlog2.f32 %v1654_v38  ;;  %vm3222_vm0 = vcmp.lt.f32.partialorder %v1363_v27, 0.0004427343  ;;  %vm3226_vm1 = vcmp.lt.f32.partialorder %v1651_v34, 0.0004427343  ;;  %v1650_v62 = vmul.f32 %v2559_v14, %v1649_v36 }
 0x13c   : > { %v3220_v54 = vpop.f32.mrb[14].mxu0  ;;  %v3230_v59 = vpop.f32.mrb[14].mxu1  ;;  %v1370_v63 = vadd.f32 1.0, %v1369_v37  ;;  %vm3234_vm2 = vcmp.lt.f32.partialorder %v1372_v44, 0.0004427343  ;;  %v1658_v5 = vadd.f32 1.0, %v1657_v45  ;;  %v3248_v23 = vadd.f32 %v3162_v17, %v3202_v8 }
 0x13d   : > { %v2565_v55 = vpop.eup %2564  ;;  %v811_v60 = vpop.f32.mrb[15].mxu0  ;;  %v1237_v10 = vmul.f32 1.442695, %v1169_v46  ;;  %v1201_v15 = vsub.f32 0.0, %v1137_v31  ;;  %vm3241_vm3 = vcmp.lt.f32.partialorder %v1660_v49, 0.0004427343 }
 0x13e   : > { %v3232_v61 = vpop.eup %2566  ;;  %v1375_v0 = vadd.f32 1.0, %v2565_v55  ;;  %v1378_v1 = vmul.f32 -0.5, %v2565_v55  ;;  %v939_v3 = vpop.f32.mrb[15].mxu1  ;;  %v1381_v14 = vand.u32 2147483647, %v2565_v55  ;;  %v1371_v34 = vmul.f32 %v2561_v26, %v1370_v63 }
 0x13f   : > { %v1663_v6 = vadd.f32 1.0, %v3232_v61  ;;  %v3239_v16 = vpop.eup %2568  ;;  %v1666_v22 = vmul.f32 -0.5, %v3232_v61  ;;  %v1669_v27 = vand.u32 2147483647, %v3232_v61  ;;  %v1659_v46 = vmul.f32 %v2563_v32, %v1658_v5 }
 0x140   : > { %2580 = vlog2.f32 %v1375_v0  ;;  %v3250_v24 = vpop.eup %2570  ;;  %v1379_v25 = vadd.f32 1.0, %v1378_v1  ;;  %v1384_v31 = vadd.f32 1.0, %v3239_v16  ;;  %v1387_v35 = vmul.f32 -0.5, %v3239_v16 }
 0x141   : > { %2582 = vlog2.f32 %v1663_v6  ;;  %v1390_v36 = vand.u32 2147483647, %v3239_v16  ;;  %v1672_v37 = vadd.f32 1.0, %v3250_v24  ;;  %v1675_v47 = vmul.f32 -0.5, %v3250_v24 }
 0x142   : > { %v2573_v33 = vpop.eup %2572  ;;  %v3257_v38 = vpop.f32.mrb[16].mxu0  ;;  %2584 = vlog2.f32 %v1384_v31  ;;  %vm3262_vm4 = vcmp.lt.f32.partialorder %v1381_v14, 0.0004427343  ;;  %v1667_v63 = vadd.f32 1.0, %v1666_v22  ;;  %v1301_v0 = vmul.f32 1.442695, %v1201_v15 }
 0x143   : > { %v3259_v8 = vpop.f32.mrb[16].mxu1  ;;  %v2575_v44 = vpop.eup %2574  ;;  %v1359_v45 = vmul.f32 0.6931472, %v2573_v33  ;;  %2586 = vlog2.f32 %v1672_v37  ;;  %v1380_v32 = vmul.f32 %v2565_v55, %v1379_v25  ;;  %vm3270_vm5 = vcmp.lt.f32.partialorder %v1669_v27, 0.0004427343 }
 0x144   : > { %v816_v48 = vpop.f32.mrb[17].mxu0  ;;  %v944_v49 = vpop.f32.mrb[17].mxu1  ;;  %v1647_v60 = vmul.f32 0.6931472, %v2575_v44  ;;  %2588 = vpow2.f32 %v1237_v10  ;;  %v1388_v44 = vadd.f32 1.0, %v1387_v35  ;;  %v1676_v10 = vadd.f32 1.0, %v1675_v47 }
 0x145   : > { %v3266_v1 = vpop.f32.mrb[18].mxu0  ;;  %v2577_v3 = vpop.eup %2576  ;;  %v1365_v6 = vsel %vm3222_vm0, %v1362_v56, %v1359_v45  ;;  %vm3282_vm6 = vcmp.lt.f32.partialorder %v1390_v36, 0.0004427343  ;;  %v1106_v58 = vand.u32 2147483647, %v3248_v23  ;;  %v3296_v35 = vadd.f32 %v3162_v17, %v3204_v9 }
 0x146   : > { %v3274_v31 = vpop.f32.mrb[18].mxu1  ;;  %v819_v14 = vpop.f32.mrb[19].mxu0  ;;  %v1933_v22 = vadd.f32 %v1365_v6, %v1037_v11  ;;  %v1653_v15 = vsel %vm3226_vm1, %v1650_v62, %v1647_v60  ;;  %v1368_v37 = vmul.f32 0.6931472, %v2577_v3  ;;  %v1678_v11 = vand.u32 2147483647, %v3250_v24 }
 0x147   : > { %v2579_v33 = vpop.eup %2578  ;;  %v947_v57 = vpop.f32.mrb[19].mxu1  ;;  %v1965_v55 = vadd.f32 %v1653_v15, %v1069_v12  ;;  %v3302_v45 = vadd.f32 %v3162_v17, %v3214_v40  ;;  %v1668_v9 = vmul.f32 %v3232_v61, %v1667_v63  ;;  %v1138_v48 = vand.u32 2147483647, %v3296_v35 }
 0x148   : > { %v1656_v56 = vmul.f32 0.6931472, %v2579_v33  ;;  %2590 = vtanh.f32 %v1933_v22  ;;  %v1374_v27 = vsel %vm3234_vm2, %v1371_v34, %v1368_v37  ;;  %v1170_v34 = vsub.f32 0.0, %v1106_v58 }
 0x149   : > { %2592 = vtanh.f32 %v1965_v55  ;;  %v1934_v62 = vadd.f32 %v1374_v27, %v1038_v13  ;;  %v1389_v60 = vmul.f32 %v3239_v16, %v1388_v44  ;;  %v1677_v14 = vmul.f32 %v3250_v24, %v1676_v10 }
 0x14a   : > { %v1662_v12 = vsel %vm3241_vm3, %v1659_v46, %v1656_v56  ;;  %v2581_v36 = vpop.eup %2580  ;;  %2594 = vpow2.f32 %v1301_v0  ;;  %v3304_v47 = vpop.f32.mrb[20].mxu0  ;;  %v1239_v0 = vmul.f32 1.442695, %v1170_v34  ;;  %v1202_v33 = vsub.f32 0.0, %v1138_v48 }
 0x14b   : > { %v1966_v4 = vadd.f32 %v1662_v12, %v1070_v18  ;;  %v3306_v13 = vpop.f32.mrb[20].mxu1  ;;  %v2583_v19 = vpop.eup %2582  ;;  %2596 = vtanh.f32 %v1934_v62  ;;  %v1377_v46 = vmul.f32 0.6931472, %v2581_v36  ;;  %v1107_v22 = vand.u32 2147483647, %v3302_v45 }
 0x14c   : > { %v824_v49 = vpop.f32.mrb[21].mxu0  ;;  %v1665_v18 = vmul.f32 0.6931472, %v2583_v19  ;;  %v952_v3 = vpop.f32.mrb[21].mxu1  ;;  %vm1679_vm7 = vcmp.lt.f32.partialorder %v1678_v11, 0.0004427343  ;;  %v3332_v10 = vadd.f32 %v3162_v17, %v3216_v41 }
 0x14d   : > { %2598 = vtanh.f32 %v1966_v4  ;;  %v2585_v40 = vpop.eup %2584  ;;  %v1383_v6 = vsel %vm3262_vm4, %v1380_v32, %v1377_v46  ;;  %v3315_v15 = vpop.f32.mrb[22].mxu0  ;;  %v1171_v56 = vsub.f32 0.0, %v1107_v22  ;;  %v1303_v62 = vmul.f32 1.442695, %v1202_v33 }
 0x14e   : > { %v3317_v61 = vpop.f32.mrb[22].mxu1  ;;  %v2587_v63 = vpop.eup %2586  ;;  %v1935_v37 = vadd.f32 %v1383_v6, %v1039_v30  ;;  %v1671_v16 = vsel %vm3270_vm5, %v1668_v9, %v1665_v18  ;;  %v1386_v44 = vmul.f32 0.6931472, %v2585_v40  ;;  %2600 = vpow2.f32 %v1239_v0 }
 0x14f   : > { %v827_v26 = vpop.f32.mrb[23].mxu0  ;;  %v955_v32 = vpop.f32.mrb[23].mxu1  ;;  %v1967_v57 = vadd.f32 %v1671_v16, %v1071_v39  ;;  %v1674_v55 = vmul.f32 0.6931472, %v2587_v63  ;;  %v1241_v11 = vmul.f32 1.442695, %v1171_v56  ;;  %v3367_v33 = vadd.f32 %v3162_v17, %v3220_v54 }
 0x150   : > { %v3323_v24 = vpop.eup %2588  ;;  %2602 = vtanh.f32 %v1935_v37  ;;  %v1392_v30 = vsel %vm3282_vm6, %v1389_v60, %v1386_v44  ;;  %v1139_v9 = vand.u32 2147483647, %v3332_v10  ;;  %v1073_v63 = vmax.f32 %v3200_v7, 0.0 }
 0x151   : > { %v1393_v5 = vadd.f32 1.0, %v3323_v24  ;;  %2604 = vtanh.f32 %v1967_v57  ;;  %v1936_v27 = vadd.f32 %v1392_v30, %v1040_v50  ;;  %v1680_v58 = vsel %vm1679_vm7, %v1677_v14, %v1674_v55 }
 0x152   : > { %v2591_v39 = vpop.eup %2590  ;;  %v1968_v25 = vadd.f32 %v1680_v58, %v1072_v51  ;;  %v3345_v41 = vpop.f32.mrb[24].mxu0  ;;  %v1041_v51 = vmax.f32 %v3197_v2, 0.0  ;;  %v1399_v60 = vand.u32 2147483647, %v3323_v24  ;;  %v1203_v14 = vsub.f32 0.0, %v1139_v9 }
 0x153   : > { %2606 = vlog2.f32 %v1393_v5  ;;  %v3347_v12 = vpop.f32.mrb[24].mxu1  ;;  %v2593_v50 = vpop.eup %2592  ;;  %v2061_v36 = vmul.f32 %v2591_v39, %v3165_v20  ;;  %v1396_v20 = vmul.f32 -0.5, %v3323_v24  ;;  %v1042_v37 = vmax.f32 %v3248_v23, 0.0 }
 0x154   : > { %2608 = vtanh.f32 %v1936_v27  ;;  %v832_v4 = vpop.f32.mrb[25].mxu0  ;;  %v960_v34 = vpop.f32.mrb[25].mxu1  ;;  %v2093_v46 = vmul.f32 %v2593_v50, %v3168_v21  ;;  %v1074_v44 = vmax.f32 %v3296_v35, 0.0  ;;  %v1305_v26 = vmul.f32 1.442695, %v1203_v14 }
 0x155   : > { %v3350_v19 = vpop.eup %2594  ;;  %2610 = vtanh.f32 %v1968_v25  ;;  %v3355_v48 = vpop.f32.mrb[26].mxu0  ;;  %2125 = vst [vmem:[%s3341_s8] sm:$0xff] %v2061_v36  ;;  %v3379_v32 = vadd.f32 %v3162_v17, %v3230_v59  ;;  %v1397_v54 = vadd.f32 1.0, %v1396_v20  ;;  %vm3382_vm8 = vcmp.lt.f32.partialorder %v1399_v60, 0.0004427343 }
 0x156   : > { %v3357_v49 = vpop.f32.mrb[26].mxu1  ;;  %v2597_v18 = vpop.eup %2596  ;;  %v1681_v0 = vadd.f32 1.0, %v3350_v19  ;;  %2612 = vpow2.f32 %v1303_v62  ;;  %2157 = vst [vmem:[%s3341_s8 + $0x100] sm:$0xff] %v2093_v46  ;;  %v1684_v57 = vmul.f32 -0.5, %v3350_v19  ;;  %v1043_v30 = vmax.f32 %v3302_v45, 0.0 }
 0x157   : > { %v835_v21 = vpop.f32.mrb[27].mxu0  ;;  %v963_v3 = vpop.f32.mrb[27].mxu1  ;;  %v2062_v6 = vmul.f32 %v2597_v18, %v3173_v28  ;;  %2614 = vpow2.f32 %v1241_v11  ;;  %v1108_v28 = vand.u32 2147483647, %v3367_v33  ;;  %v1140_v27 = vand.u32 2147483647, %v3379_v32 }
 0x158   : > { %v2599_v40 = vpop.eup %2598  ;;  %2616 = vlog2.f32 %v1681_v0  ;;  %v1687_v25 = vand.u32 2147483647, %v3350_v19  ;;  %v3400_v18 = vadd.f32 %v3162_v17, %v3257_v38  ;;  %v1398_v21 = vmul.f32 %v3323_v24, %v1397_v54 }
 0x159   : > { %v2094_v22 = vmul.f32 %v2599_v40, %v3176_v29  ;;  %v3372_v16 = vpop.eup %2600  ;;  %2126 = vst [vmem:[%s3341_s8 + $0x8] sm:$0xff] %v2062_v6  ;;  %2618 = vpow2.f32 %v1305_v26  ;;  %v1172_v5 = vsub.f32 0.0, %v1108_v28  ;;  %v1204_v9 = vsub.f32 0.0, %v1140_v27 }
 0x15a   : > { %v1402_v55 = vadd.f32 1.0, %v3372_v16  ;;  %v2603_v56 = vpop.eup %2602  ;;  %v3390_v58 = vpop.f32.mrb[28].mxu0  ;;  %v1405_v11 = vmul.f32 -0.5, %v3372_v16  ;;  %v1685_v3 = vadd.f32 1.0, %v1684_v57  ;;  %v1075_v40 = vmax.f32 %v3332_v10, 0.0 }
 0x15b   : > { %2158 = vst [vmem:[%s3341_s8 + $0x108] sm:$0xff] %v2094_v22  ;;  %v3392_v59 = vpop.f32.mrb[28].mxu1  ;;  %v2605_v62 = vpop.eup %2604  ;;  %v2063_v39 = vmul.f32 %v2603_v56, %v3181_v42  ;;  %v1243_v46 = vmul.f32 1.442695, %v1172_v5  ;;  %v1408_v22 = vand.u32 2147483647, %v3372_v16 }
 0x15c   : > { %2620 = vlog2.f32 %v1402_v55  ;;  %v840_v50 = vpop.f32.mrb[29].mxu0  ;;  %v968_v36 = vpop.f32.mrb[29].mxu1  ;;  %v2095_v34 = vmul.f32 %v2605_v62, %v3184_v43  ;;  %v1307_v26 = vmul.f32 1.442695, %v1204_v9  ;;  %v1406_v54 = vadd.f32 1.0, %v1405_v11 }
 0x15d   : > { %v2607_v4 = vpop.eup %2606  ;;  %v3402_v20 = vpop.f32.mrb[30].mxu0  ;;  %2127 = vst [vmem:[%s3341_s8 + $0x10] sm:$0xff] %v2063_v39  ;;  %2622 = vpow2.f32 %v1243_v46  ;;  %v1109_v57 = vand.u32 2147483647, %v3400_v18  ;;  %vm3423_vm9 = vcmp.lt.f32.partialorder %v1687_v25, 0.0004427343  ;;  %v1686_v62 = vmul.f32 %v3350_v19, %v1685_v3 }
 0x15e   : > { %v3404_v42 = vpop.f32.mrb[30].mxu1  ;;  %v2609_v60 = vpop.eup %2608  ;;  %v1395_v0 = vmul.f32 0.6931472, %v2607_v4  ;;  %2159 = vst [vmem:[%s3341_s8 + $0x110] sm:$0xff] %v2095_v34  ;;  %2624 = vpow2.f32 %v1307_v26  ;;  %vm3436_vm10 = vcmp.lt.f32.partialorder %v1408_v22, 0.0004427343  ;;  %v3446_v19 = vadd.f32 %v3162_v17, %v3266_v1 }
 0x15f   : > { %v843_v43 = vpop.f32.mrb[31].mxu0  ;;  %v971_v6 = vpop.f32.mrb[31].mxu1  ;;  %v2064_v38 = vmul.f32 %v2609_v60, %v3189_v52  ;;  %v1173_v4 = vsub.f32 0.0, %v1109_v57 }
 0x160   : > { %v2611_v14 = vpop.eup %2610  ;;  %v1401_v24 = vsel %vm3382_vm8, %v1398_v21, %v1395_v0 }
 0x161   : > { %v3412_v28 = vpop.eup %2612  ;;  %v2096_v55 = vmul.f32 %v2611_v14, %v3192_v53  ;;  %2128 = vst [vmem:[%s3341_s8 + $0x18] sm:$0xff] %v2064_v38  ;;  %v1937_v52 = vadd.f32 %v1401_v24, %v1041_v51  ;;  %v3430_v53 = vadd.f32 %v3162_v17, %v3259_v8  ;;  %v1407_v8 = vmul.f32 %v3372_v16, %v1406_v54 }
 0x162   : > { %v3418_v56 = vpop.eup %2614  ;;  %v1690_v27 = vadd.f32 1.0, %v3412_v28  ;;  %v3441_v36 = vpop.f32.mrb[32].mxu0  ;;  %v1693_v0 = vmul.f32 -0.5, %v3412_v28  ;;  %v1696_v6 = vand.u32 2147483647, %v3412_v28 }
 0x163   : > { %v2617_v29 = vpop.eup %2616  ;;  %2160 = vst [vmem:[%s3341_s8 + $0x118] sm:$0xff] %v2096_v55  ;;  %v1411_v39 = vadd.f32 1.0, %v3418_v56  ;;  %2626 = vtanh.f32 %v1937_v52  ;;  %v3448_v34 = vpop.f32.mrb[32].mxu1  ;;  %v1141_v21 = vand.u32 2147483647, %v3430_v53  ;;  %v1414_v14 = vmul.f32 -0.5, %v3418_v56 }
 0x164   : > { %v1683_v51 = vmul.f32 0.6931472, %v2617_v29  ;;  %2628 = vlog2.f32 %v1690_v27  ;;  %v848_v46 = vpop.f32.mrb[33].mxu0  ;;  %v3450_v9 = vpop.eup %2618  ;;  %v1245_v54 = vmul.f32 1.442695, %v1173_v4 }
 0x165   : > { %2630 = vlog2.f32 %v1411_v39  ;;  %v976_v16 = vpop.f32.mrb[33].mxu1  ;;  %v3456_v3 = vpop.f32.mrb[34].mxu0  ;;  %v1699_v38 = vadd.f32 1.0, %v3450_v9  ;;  %v1417_v52 = vand.u32 2147483647, %v3418_v56  ;;  %v1205_v5 = vsub.f32 0.0, %v1141_v21 }
 0x166   : > { %v1689_v60 = vsel %vm3423_vm9, %v1686_v62, %v1683_v51  ;;  %v2621_v43 = vpop.eup %2620  ;;  %v3463_v22 = vpop.f32.mrb[34].mxu1  ;;  %v1694_v39 = vadd.f32 1.0, %v1693_v0  ;;  %v1110_v51 = vand.u32 2147483647, %v3446_v19  ;;  %vm3479_vm11 = vcmp.lt.f32.partialorder %v1696_v6, 0.0004427343 }
 0x167   : > { %v1969_v1 = vadd.f32 %v1689_v60, %v1073_v63  ;;  %v851_v26 = vpop.f32.mrb[35].mxu0  ;;  %v1404_v55 = vmul.f32 0.6931472, %v2621_v43  ;;  %v3470_v63 = vadd.f32 %v3162_v17, %v3274_v31  ;;  %v979_v27 = vpop.f32.mrb[35].mxu1  ;;  %v1415_v60 = vadd.f32 1.0, %v1414_v14 }
 0x168   : > { %v3472_v29 = vpop.eup %2622  ;;  %v1702_v21 = vmul.f32 -0.5, %v3450_v9  ;;  %v1309_v16 = vmul.f32 1.442695, %v1205_v5  ;;  %v1174_v25 = vsub.f32 0.0, %v1110_v51  ;;  %vm3489_vm12 = vcmp.lt.f32.partialorder %v1417_v52, 0.0004427343 }
 0x169   : > { %2632 = vtanh.f32 %v1969_v1  ;;  %v1410_v62 = vsel %vm3436_vm10, %v1407_v8, %v1404_v55  ;;  %v1420_v31 = vadd.f32 1.0, %v3472_v29  ;;  %v3487_v0 = vpop.eup %2624  ;;  %v1705_v26 = vand.u32 2147483647, %v3450_v9 }
 0x16a   : > { %2634 = vlog2.f32 %v1699_v38  ;;  %v1938_v4 = vadd.f32 %v1410_v62, %v1042_v37  ;;  %v3485_v8 = vpop.f32.mrb[36].mxu0  ;;  %v1142_v37 = vand.u32 2147483647, %v3470_v63  ;;  %v3494_v1 = vpop.f32.mrb[36].mxu1  ;;  %v1695_v38 = vmul.f32 %v3412_v28, %v1694_v39 }
 0x16b   : > { %2636 = vpow2.f32 %v1245_v54  ;;  %v856_v6 = vpop.f32.mrb[37].mxu0  ;;  %v1708_v55 = vadd.f32 1.0, %v3487_v0  ;;  %v984_v54 = vpop.f32.mrb[37].mxu1  ;;  %v1416_v62 = vmul.f32 %v3418_v56, %v1415_v60  ;;  %v1423_v51 = vmul.f32 -0.5, %v3472_v29 }
 0x16c   : > { %2638 = vtanh.f32 %v1938_v4  ;;  %v3499_v5 = vpop.f32.mrb[38].mxu0  ;;  %v3504_v4 = vpop.f32.mrb[38].mxu1  ;;  %v1247_v57 = vmul.f32 1.442695, %v1174_v25  ;;  %v1206_v11 = vsub.f32 0.0, %v1142_v37 }
 0x16d   : > { %v2627_v14 = vpop.eup %2626  ;;  %2640 = vlog2.f32 %v1420_v31  ;;  %v859_v28 = vpop.f32.mrb[39].mxu0  ;;  %v1703_v31 = vadd.f32 1.0, %v1702_v21  ;;  %vm3514_vm13 = vcmp.lt.f32.partialorder %v1705_v26, 0.0004427343  ;;  %v1711_v21 = vmul.f32 -0.5, %v3487_v0 }
 0x16e   : > { %v2629_v52 = vpop.eup %2628  ;;  %v2065_v27 = vmul.f32 %v2627_v14, %v3197_v2  ;;  %2642 = vpow2.f32 %v1309_v16  ;;  %v987_v24 = vpop.f32.mrb[39].mxu1  ;;  %v3510_v2 = vadd.f32 %v3162_v17, %v3304_v47  ;;  %v1424_v37 = vadd.f32 1.0, %v1423_v51 }
 0x16f   : > { %v2631_v39 = vpop.eup %2630  ;;  %v1692_v6 = vmul.f32 0.6931472, %v2629_v52  ;;  %2644 = vlog2.f32 %v1708_v55  ;;  %v1426_v47 = vand.u32 2147483647, %v3472_v29  ;;  %v1311_v26 = vmul.f32 1.442695, %v1206_v11 }
 0x170   : > { %2129 = vst [vmem:[%s3341_s8 + $0x20] sm:$0xff] %v2065_v27  ;;  %v1413_v54 = vmul.f32 0.6931472, %v2631_v39  ;;  %2646 = vpow2.f32 %v1247_v57  ;;  %v1111_v57 = vand.u32 2147483647, %v3510_v2  ;;  %v1704_v43 = vmul.f32 %v3450_v9, %v1703_v31 }
 0x171   : > { %v1698_v56 = vsel %vm3479_vm11, %v1695_v38, %v1692_v6  ;;  %v1714_v27 = vand.u32 2147483647, %v3487_v0  ;;  %v3539_v11 = vadd.f32 %v3162_v17, %v3306_v13  ;;  %vm3547_vm14 = vcmp.lt.f32.partialorder %v1426_v47, 0.0004427343 }
 0x172   : > { %v1970_v16 = vadd.f32 %v1698_v56, %v1074_v44  ;;  %v1419_v25 = vsel %vm3489_vm12, %v1416_v62, %v1413_v54  ;;  %v3528_v55 = vpop.f32.mrb[40].mxu0  ;;  %v3530_v52 = vpop.f32.mrb[40].mxu1 }
 0x173   : > { %v2633_v24 = vpop.eup %2632  ;;  %v1939_v38 = vadd.f32 %v1419_v25, %v1043_v30  ;;  %v864_v62 = vpop.f32.mrb[41].mxu0  ;;  %v1175_v30 = vsub.f32 0.0, %v1111_v57  ;;  %vm3559_vm15 = vcmp.lt.f32.partialorder %v1714_v27, 0.0004427343  ;;  %v4496_v27 = vmax.f32 %v3367_v33, 0.0 }
 0x174   : > { %v2635_v46 = vpop.eup %2634  ;;  %v2097_v14 = vmul.f32 %v2633_v24, %v3200_v7  ;;  %2648 = vtanh.f32 %v1970_v16  ;;  %v992_v51 = vpop.f32.mrb[41].mxu1  ;;  %v1712_v7 = vadd.f32 1.0, %v1711_v21 }
 0x175   : > { %v1701_v44 = vmul.f32 0.6931472, %v2635_v46  ;;  %v3534_v28 = vpop.eup %2636  ;;  %2650 = vtanh.f32 %v1939_v38  ;;  %v3541_v39 = vpop.f32.mrb[42].mxu0  ;;  %v1249_v60 = vmul.f32 1.442695, %v1175_v30  ;;  %v1425_v38 = vmul.f32 %v3472_v29, %v1424_v37 }
 0x176   : > { %2161 = vst [vmem:[%s3341_s8 + $0x120] sm:$0xff] %v2097_v14  ;;  %v3543_v6 = vpop.f32.mrb[42].mxu1  ;;  %v2639_v54 = vpop.eup %2638  ;;  %v1429_v56 = vadd.f32 1.0, %v3534_v28  ;;  %2652 = vpow2.f32 %v1311_v26  ;;  %v1432_v29 = vmul.f32 -0.5, %v3534_v28 }
 0x177   : > { %v1707_v9 = vsel %vm3514_vm13, %v1704_v43, %v1701_v44  ;;  %v867_v24 = vpop.f32.mrb[43].mxu0  ;;  %v995_v13 = vpop.f32.mrb[43].mxu1  ;;  %v2066_v25 = vmul.f32 %v2639_v54, %v3248_v23  ;;  %v1713_v23 = vmul.f32 %v3487_v0, %v1712_v7  ;;  %v3576_v0 = vadd.f32 %v3162_v17, %v3315_v15 }
 0x178   : > { %v2641_v16 = vpop.eup %2640  ;;  %v1971_v46 = vadd.f32 %v1707_v9, %v1075_v40  ;;  %2654 = vlog2.f32 %v1429_v56  ;;  %v1143_v40 = vand.u32 2147483647, %v3539_v11  ;;  %v3580_v7 = vadd.f32 %v3162_v17, %v3317_v61 }
 0x179   : > { %v3556_v14 = vpop.eup %2642  ;;  %v1422_v47 = vmul.f32 0.6931472, %v2641_v16  ;;  %2130 = vst [vmem:[%s3341_s8 + $0x28] sm:$0xff] %v2066_v25  ;;  %v3592_v24 = vadd.f32 %v3162_v17, %v3345_v41  ;;  %v4497_v61 = vmax.f32 %v3379_v32, 0.0  ;;  %v1435_v25 = vand.u32 2147483647, %v3534_v28 }
 0x17a   : > { %v2645_v44 = vpop.eup %2644  ;;  %2656 = vtanh.f32 %v1971_v46  ;;  %v1717_v43 = vadd.f32 1.0, %v3556_v14  ;;  %v3582_v30 = vpop.f32.mrb[44].mxu0  ;;  %v1720_v31 = vmul.f32 -0.5, %v3556_v14  ;;  %v1207_v46 = vsub.f32 0.0, %v1143_v40 }
 0x17b   : > { %v1428_v26 = vsel %vm3547_vm14, %v1425_v38, %v1422_v47  ;;  %v1710_v62 = vmul.f32 0.6931472, %v2645_v44  ;;  %2658 = vpow2.f32 %v1249_v60  ;;  %v3570_v37 = vpop.eup %2646  ;;  %v3584_v54 = vpop.f32.mrb[44].mxu1  ;;  %v1433_v57 = vadd.f32 1.0, %v1432_v29 }
 0x17c   : > { %v1940_v51 = vadd.f32 %v1428_v26, %v4496_v27  ;;  %2660 = vlog2.f32 %v1717_v43  ;;  %v1438_v56 = vadd.f32 1.0, %v3570_v37  ;;  %v872_v15 = vpop.f32.mrb[45].mxu0  ;;  %v1000_v13 = vpop.f32.mrb[45].mxu1  ;;  %v1723_v44 = vand.u32 2147483647, %v3556_v14 }
 0x17d   : > { %v1716_v9 = vsel %vm3559_vm15, %v1713_v23, %v1710_v62  ;;  %v3597_v60 = vpop.f32.mrb[46].mxu0  ;;  %v3599_v47 = vpop.f32.mrb[46].mxu1  ;;  %v1441_v17 = vmul.f32 -0.5, %v3570_v37  ;;  %v1313_v40 = vmul.f32 1.442695, %v1207_v46 }
 0x17e   : > { %2662 = vtanh.f32 %v1940_v51  ;;  %v1972_v16 = vadd.f32 %v1716_v9, %v4497_v61  ;;  %v2649_v38 = vpop.eup %2648  ;;  %v875_v41 = vpop.f32.mrb[47].mxu0  ;;  %v1112_v62 = vand.u32 2147483647, %v3576_v0  ;;  %v1721_v51 = vadd.f32 1.0, %v1720_v31 }
 0x17f   : > { %2664 = vlog2.f32 %v1438_v56  ;;  %v1003_v23 = vpop.f32.mrb[47].mxu1  ;;  %v2651_v43 = vpop.eup %2650  ;;  %v2098_v26 = vmul.f32 %v2649_v38, %v3296_v35  ;;  %v1144_v9 = vand.u32 2147483647, %v3580_v7  ;;  %v1444_v15 = vand.u32 2147483647, %v3570_v37 }
 0x180   : > { %2666 = vtanh.f32 %v1972_v16  ;;  %v2067_v27 = vmul.f32 %v2651_v43, %v3302_v45  ;;  %v3608_v56 = vpop.eup %2652  ;;  %v1176_v13 = vsub.f32 0.0, %v1112_v62  ;;  %v1113_v35 = vand.u32 2147483647, %v3592_v24 }
 0x181   : > { %2162 = vst [vmem:[%s3341_s8 + $0x128] sm:$0xff] %v2098_v26  ;;  %2668 = vpow2.f32 %v1313_v40  ;;  %vm3614_vm0 = vcmp.lt.f32.partialorder %v1435_v25, 0.0004427343  ;;  %vm3618_vm1 = vcmp.lt.f32.partialorder %v1723_v44, 0.0004427343  ;;  %v1442_v31 = vadd.f32 1.0, %v1441_v17 }
 0x182   : > { %v2655_v61 = vpop.eup %2654  ;;  %2131 = vst [vmem:[%s3341_s8 + $0x30] sm:$0xff] %v2067_v27  ;;  %v1726_v46 = vadd.f32 1.0, %v3608_v56  ;;  %v1434_v23 = vmul.f32 %v3534_v28, %v1433_v57  ;;  %v1251_v43 = vmul.f32 1.442695, %v1176_v13  ;;  %v1208_v26 = vsub.f32 0.0, %v1144_v9  ;;  %v3624_v40 = vpop.f32.mrb[48].mxu0 }
 0x183   : > { %v1431_v41 = vmul.f32 0.6931472, %v2655_v61  ;;  %v1722_v44 = vmul.f32 %v3556_v14, %v1721_v51  ;;  %v1177_v27 = vsub.f32 0.0, %v1113_v35  ;;  %v3630_v17 = vpop.f32.mrb[48].mxu1  ;;  %v880_v29 = vpop.f32.mrb[49].mxu0  ;;  %v1729_v9 = vmul.f32 -0.5, %v3608_v56 }
 0x184   : > { %v2657_v38 = vpop.eup %2656  ;;  %2670 = vlog2.f32 %v1726_v46  ;;  %vm3634_vm2 = vcmp.lt.f32.partialorder %v1444_v15, 0.0004427343  ;;  %v3640_v61 = vpop.f32.mrb[50].mxu0  ;;  %v4504_v14 = vmax.f32 %v3400_v18, 0.0  ;;  %v3648_v15 = vld [vmem:[%s4464_s2] ss:$0 sm:$0xff] }
 0x185   : > { %v3626_v25 = vpop.eup %2658  ;;  %v2099_v62 = vmul.f32 %v2657_v38, %v3332_v10  ;;  %v1437_v28 = vsel %vm3614_vm0, %v1434_v23, %v1431_v41  ;;  %v1008_v10 = vpop.f32.mrb[49].mxu1  ;;  %2672 = vpow2.f32 %v1251_v43  ;;  %v3652_v35 = vadd.f32 %v3648_v15, %v3347_v12 }
 0x186   : > { %v2661_v21 = vpop.eup %2660  ;;  %v1447_v13 = vadd.f32 1.0, %v3626_v25  ;;  %v1941_v51 = vadd.f32 %v1437_v28, %v4504_v14  ;;  %v3654_v16 = vpop.f32.mrb[50].mxu1  ;;  %v1443_v41 = vmul.f32 %v3570_v37, %v1442_v31  ;;  %v1732_v23 = vand.u32 2147483647, %v3608_v56 }
 0x187   : > { %2163 = vst [vmem:[%s3341_s8 + $0x130] sm:$0xff] %v2099_v62  ;;  %v1719_v29 = vmul.f32 0.6931472, %v2661_v21  ;;  %4505 = vst [vmem:[#allocation2_spill] sm:$0xff] %v3654_v16  ;;  %v883_v46 = vpop.f32.mrb[51].mxu0  ;;  %v1011_v43 = vpop.f32.mrb[51].mxu1 }
 0x188   : > { %v2663_v38 = vpop.eup %2662  ;;  %2674 = vlog2.f32 %v1447_v13  ;;  %v1315_v21 = vmul.f32 1.442695, %v1208_v26  ;;  %v1253_v10 = vmul.f32 1.442695, %v1177_v27  ;;  %v4506_v46 = vmax.f32 %v3430_v53, 0.0 }
 0x189   : > { %v2665_v62 = vpop.eup %2664  ;;  %v2068_v28 = vmul.f32 %v2663_v38, %v3367_v33  ;;  %2676 = vtanh.f32 %v1941_v51  ;;  %v1725_v12 = vsel %vm3618_vm1, %v1722_v44, %v1719_v29  ;;  %v1450_v37 = vmul.f32 -0.5, %v3626_v25 }
 0x18a   : > { %v2667_v14 = vpop.eup %2666  ;;  %v1973_v50 = vadd.f32 %v1725_v12, %v4506_v46  ;;  %v1440_v16 = vmul.f32 0.6931472, %v2665_v62  ;;  %2678 = vpow2.f32 %v1315_v21  ;;  %v1730_v26 = vadd.f32 1.0, %v1729_v9  ;;  %v3679_v51 = vpop.f32.mrb[52].mxu0 }
 0x18b   : > { %2132 = vst [vmem:[%s3341_s8 + $0x38] sm:$0xff] %v2068_v28  ;;  %v2100_v31 = vmul.f32 %v2667_v14, %v3379_v32  ;;  %2680 = vpow2.f32 %v1253_v10  ;;  %v1145_v33 = vand.u32 2147483647, %v3652_v35  ;;  %v3667_v13 = vpop.eup %2668  ;;  %v3673_v44 = vadd.f32 %v3648_v15, %v3355_v48  ;;  %v3681_v32 = vpop.f32.mrb[52].mxu1 }
 0x18c   : > { %2682 = vtanh.f32 %v1973_v50  ;;  %v1446_v45 = vsel %vm3634_vm2, %v1443_v41, %v1440_v16  ;;  %v3677_v27 = vadd.f32 %v3648_v15, %v3357_v49  ;;  %v4507_v9 = vmax.f32 %v3446_v19, 0.0  ;;  %v888_v48 = vpop.f32.mrb[53].mxu0  ;;  %v1016_v38 = vpop.f32.mrb[53].mxu1 }
 0x18d   : > { %2164 = vst [vmem:[%s3341_s8 + $0x138] sm:$0xff] %v2100_v31  ;;  %v1453_v50 = vand.u32 2147483647, %v3626_v25  ;;  %v1735_v16 = vadd.f32 1.0, %v3667_v13  ;;  %v1451_v41 = vadd.f32 1.0, %v1450_v37  ;;  %v1209_v21 = vsub.f32 0.0, %v1145_v33 }
 0x18e   : > { %v1942_v29 = vadd.f32 %v1446_v45, %v4507_v9  ;;  %v1114_v43 = vand.u32 2147483647, %v3673_v44  ;;  %v2671_v62 = vpop.eup %2670  ;;  %v1146_v10 = vand.u32 2147483647, %v3677_v27  ;;  %v3694_v14 = vpop.f32.mrb[54].mxu0  ;;  %v1731_v31 = vmul.f32 %v3608_v56, %v1730_v26 }
 0x18f   : > { %v1728_v46 = vmul.f32 0.6931472, %v2671_v62  ;;  %v1317_v37 = vmul.f32 1.442695, %v1209_v21  ;;  %v3697_v45 = vpop.f32.mrb[54].mxu1  ;;  %v3699_v33 = vpop.eup %2672  ;;  %v1452_v28 = vmul.f32 %v3626_v25, %v1451_v41 }
 0x190   : > { %2684 = vtanh.f32 %v1942_v29  ;;  %vm1733_vm3 = vcmp.lt.f32.partialorder %v1732_v23, 0.0004427343  ;;  %vm3701_vm4 = vcmp.lt.f32.partialorder %v1453_v50, 0.0004427343  ;;  %v891_v29 = vpop.f32.mrb[55].mxu0  ;;  %v1019_v48 = vpop.f32.mrb[55].mxu1 }
 0x191   : > { %2686 = vlog2.f32 %v1735_v16  ;;  %v1734_v12 = vsel %vm1733_vm3, %v1731_v31, %v1728_v46  ;;  %v1456_v62 = vadd.f32 1.0, %v3699_v33  ;;  %v1178_v56 = vsub.f32 0.0, %v1114_v43 }
 0x192   : > { %v2675_v38 = vpop.eup %2674  ;;  %v4510_v16 = vmax.f32 %v3470_v63, 0.0  ;;  %v1738_v23 = vmul.f32 -0.5, %v3667_v13  ;;  %2688 = vpow2.f32 %v1317_v37  ;;  %v1210_v25 = vsub.f32 0.0, %v1146_v10 }
 0x193   : > { %v2677_v26 = vpop.eup %2676  ;;  %v1449_v49 = vmul.f32 0.6931472, %v2675_v38  ;;  %2690 = vlog2.f32 %v1456_v62  ;;  %v4511_v37 = vmax.f32 %v3510_v2, 0.0  ;;  %v1255_v62 = vmul.f32 1.442695, %v1178_v56 }
 0x194   : > { %v1974_v21 = vadd.f32 %v1734_v12, %v4510_v16  ;;  %v3710_v50 = vpop.eup %2678  ;;  %v2069_v29 = vmul.f32 %v2677_v26, %v3400_v18  ;;  %v1459_v12 = vmul.f32 -0.5, %v3699_v33  ;;  %v3726_v10 = vadd.f32 %v3648_v15, %v3390_v58  ;;  %v3730_v26 = vpop.f32.mrb[56].mxu0 }
 0x195   : > { %v3714_v41 = vpop.eup %2680  ;;  %v1455_v43 = vsel %vm3701_vm4, %v1452_v28, %v1449_v49  ;;  %v1744_v31 = vadd.f32 1.0, %v3710_v50  ;;  %v1739_v49 = vadd.f32 1.0, %v1738_v23  ;;  %v1741_v28 = vand.u32 2147483647, %v3667_v13  ;;  %v3732_v16 = vpop.f32.mrb[56].mxu1 }
 0x196   : > { %2692 = vtanh.f32 %v1974_v21  ;;  %v2683_v48 = vpop.eup %2682  ;;  %2133 = vst [vmem:[%s3341_s8 + $0x40] sm:$0xff] %v2069_v29  ;;  %v1943_v18 = vadd.f32 %v1455_v43, %v4511_v37  ;;  %v1465_v38 = vadd.f32 1.0, %v3714_v41  ;;  %v1319_v29 = vmul.f32 1.442695, %v1210_v25 }
 0x197   : > { %v2101_v9 = vmul.f32 %v2683_v48, %v3430_v53  ;;  %2694 = vlog2.f32 %v1744_v31  ;;  %v3737_v56 = vadd.f32 %v3648_v15, %v3392_v59  ;;  %v1460_v43 = vadd.f32 1.0, %v1459_v12  ;;  %v896_v31 = vpop.f32.mrb[57].mxu0  ;;  %v1024_v48 = vpop.f32.mrb[57].mxu1 }
 0x198   : > { %2696 = vtanh.f32 %v1943_v18  ;;  %v1462_v53 = vand.u32 2147483647, %v3699_v33  ;;  %v1747_v23 = vmul.f32 -0.5, %v3710_v50  ;;  %v1750_v25 = vand.u32 2147483647, %v3710_v50  ;;  %v3745_v21 = vpop.f32.mrb[58].mxu0 }
 0x199   : > { %2165 = vst [vmem:[%s3341_s8 + $0x140] sm:$0xff] %v2101_v9  ;;  %2698 = vlog2.f32 %v1465_v38  ;;  %v1115_v59 = vand.u32 2147483647, %v3726_v10  ;;  %4512 = vst [vmem:[#allocation3_spill] sm:$0xff] %v3745_v21  ;;  %v1740_v12 = vmul.f32 %v3667_v13, %v1739_v49  ;;  %v1468_v46 = vmul.f32 -0.5, %v3714_v41  ;;  %v899_v57 = vpop.f32.mrb[59].mxu0 }
 0x19a   : > { %v2685_v58 = vpop.eup %2684  ;;  %2700 = vpow2.f32 %v1255_v62  ;;  %vm1742_vm5 = vcmp.lt.f32.partialorder %v1741_v28, 0.0004427343  ;;  %v1461_v48 = vmul.f32 %v3699_v33, %v1460_v43  ;;  %vm3755_vm6 = vcmp.lt.f32.partialorder %v1462_v53, 0.0004427343 }
 0x19b   : > { %v2687_v37 = vpop.eup %2686  ;;  %v2070_v18 = vmul.f32 %v2685_v58, %v3446_v19  ;;  %2702 = vpow2.f32 %v1319_v29  ;;  %v1179_v31 = vsub.f32 0.0, %v1115_v59  ;;  %v1147_v19 = vand.u32 2147483647, %v3737_v56 }
 0x19c   : > { %v1737_v9 = vmul.f32 0.6931472, %v2687_v37  ;;  %v3752_v58 = vpop.eup %2688  ;;  %v3761_v13 = vadd.f32 %v3648_v15, %v3402_v20  ;;  %v4515_v49 = vmax.f32 %v3539_v11, 0.0  ;;  %v1748_v29 = vadd.f32 1.0, %v1747_v23 }
 0x19d   : > { %2134 = vst [vmem:[%s3341_s8 + $0x48] sm:$0xff] %v2070_v18  ;;  %v2691_v57 = vpop.eup %2690  ;;  %vm3765_vm7 = vcmp.lt.f32.partialorder %v1750_v25, 0.0004427343  ;;  %v1753_v59 = vadd.f32 1.0, %v3752_v58  ;;  %v1469_v53 = vadd.f32 1.0, %v1468_v46  ;;  %v3774_v23 = vadd.f32 %v3648_v15, %v3404_v42  ;;  %v3776_v25 = vpop.f32.mrb[58].mxu1 }
 0x19e   : > { %v1743_v62 = vsel %vm1742_vm5, %v1740_v12, %v1737_v9  ;;  %v1458_v43 = vmul.f32 0.6931472, %v2691_v57  ;;  %v1257_v9 = vmul.f32 1.442695, %v1179_v31  ;;  %v1211_v12 = vsub.f32 0.0, %v1147_v19  ;;  %4518 = vst [vmem:[#allocation4_spill] sm:$0xff] %v3776_v25 }
 0x19f   : > { %v1975_v28 = vadd.f32 %v1743_v62, %v4515_v49  ;;  %v1471_v38 = vand.u32 2147483647, %v3714_v41  ;;  %v1116_v46 = vand.u32 2147483647, %v3761_v13  ;;  %v1027_v31 = vpop.f32.mrb[59].mxu1  ;;  %v1749_v42 = vmul.f32 %v3710_v50, %v1748_v29 }
 0x1a0   : > { %v2693_v33 = vpop.eup %2692  ;;  %v1464_v49 = vsel %vm3755_vm6, %v1461_v48, %v1458_v43  ;;  %v1321_v57 = vmul.f32 1.442695, %v1211_v12  ;;  %v1470_v48 = vmul.f32 %v3714_v41, %v1469_v53  ;;  %v1756_v37 = vmul.f32 -0.5, %v3752_v58 }
 0x1a1   : > { %v2102_v20 = vmul.f32 %v2693_v33, %v3470_v63  ;;  %2704 = vtanh.f32 %v1975_v28  ;;  %v2695_v62 = vpop.eup %2694  ;;  %v4519_v63 = vmax.f32 %v3576_v0, 0.0  ;;  %v4520_v50 = vmax.f32 %v3580_v7, 0.0 }
 0x1a2   : > { %2706 = vlog2.f32 %v1753_v59  ;;  %v2697_v19 = vpop.eup %2696  ;;  %v1746_v33 = vmul.f32 0.6931472, %v2695_v62  ;;  %vm1472_vm8 = vcmp.lt.f32.partialorder %v1471_v38, 0.0004427343  ;;  %v1148_v41 = vand.u32 2147483647, %v3774_v23 }
 0x1a3   : > { %2166 = vst [vmem:[%s3341_s8 + $0x148] sm:$0xff] %v2102_v20  ;;  %v1944_v28 = vadd.f32 %v1464_v49, %v4519_v63  ;;  %2708 = vpow2.f32 %v1257_v9  ;;  %v2699_v25 = vpop.eup %2698  ;;  %v2071_v21 = vmul.f32 %v2697_v19, %v3510_v2  ;;  %v1180_v20 = vsub.f32 0.0, %v1116_v46 }
 0x1a4   : > { %2710 = vpow2.f32 %v1321_v57  ;;  %v2701_v59 = vpop.eup %2700  ;;  %v1752_v43 = vsel %vm3765_vm7, %v1749_v42, %v1746_v33  ;;  %v1467_v12 = vmul.f32 0.6931472, %v2699_v25  ;;  %v1759_v9 = vand.u32 2147483647, %v3752_v58  ;;  %v3811_v33 = vpop.f32.mrb[60].mxu0 }
 0x1a5   : > { %2712 = vtanh.f32 %v1944_v28  ;;  %v3790_v49 = vpop.eup %2702  ;;  %2135 = vst [vmem:[%s3341_s8 + $0x50] sm:$0xff] %v2071_v21  ;;  %v1976_v29 = vadd.f32 %v1752_v43, %v4520_v50  ;;  %v1474_v2 = vadd.f32 1.0, %v2701_v59  ;;  %v3800_v18 = vadd.f32 %v3648_v15, %v3441_v36 }
 0x1a6   : > { %v1473_v53 = vsel %vm1472_vm8, %v1470_v48, %v1467_v12  ;;  %v1762_v62 = vadd.f32 1.0, %v3790_v49  ;;  %v4521_v25 = vmax.f32 %v3592_v24, 0.0  ;;  %v1757_v57 = vadd.f32 1.0, %v1756_v37  ;;  %v904_v12 = vpop.f32.mrb[61].mxu0 }
 0x1a7   : > { %2714 = vtanh.f32 %v1976_v29  ;;  %v1051_v46 = vmax.f32 %v3726_v10, 0.0  ;;  %v1477_v38 = vmul.f32 -0.5, %v2701_v59  ;;  %v1765_v31 = vmul.f32 -0.5, %v3790_v49 }
 0x1a8   : > { %v1945_v21 = vadd.f32 %v1473_v53, %v4521_v25  ;;  %2716 = vlog2.f32 %v1474_v2  ;;  %v1259_v19 = vmul.f32 1.442695, %v1180_v20  ;;  %v1083_v63 = vmax.f32 %v3737_v56, 0.0 }
 0x1a9   : > { %v1212_v28 = vsub.f32 0.0, %v1148_v41  ;;  %v3809_v36 = vadd.f32 %v3648_v15, %v3448_v34  ;;  %vm3813_vm9 = vcmp.lt.f32.partialorder %v1759_v9, 0.0004427343  ;;  %v1117_v37 = vand.u32 2147483647, %v3800_v18 }
 0x1aa   : > { %2718 = vtanh.f32 %v1945_v21  ;;  %v3820_v43 = vadd.f32 %v3648_v15, %v3456_v3  ;;  %v1758_v50 = vmul.f32 %v3752_v58, %v1757_v57  ;;  %v1478_v53 = vadd.f32 1.0, %v1477_v38 }
 0x1ab   : > { %v2705_v42 = vpop.eup %2704  ;;  %2720 = vlog2.f32 %v1762_v62  ;;  %v1323_v29 = vmul.f32 1.442695, %v1212_v28  ;;  %v1480_v9 = vand.u32 2147483647, %v2701_v59  ;;  %v1766_v62 = vadd.f32 1.0, %v1765_v31 }
 0x1ac   : > { %v2707_v20 = vpop.eup %2706  ;;  %v2103_v34 = vmul.f32 %v2705_v42, %v3539_v11  ;;  %2722 = vpow2.f32 %v1259_v19  ;;  %v1181_v21 = vsub.f32 0.0, %v1117_v37  ;;  %v1149_v11 = vand.u32 2147483647, %v3809_v36 }
 0x1ad   : > { %v3824_v2 = vpop.eup %2708  ;;  %v1755_v41 = vmul.f32 0.6931472, %v2707_v20  ;;  %2724 = vpow2.f32 %v1323_v29  ;;  %v1118_v31 = vand.u32 2147483647, %v3820_v43  ;;  %v4524_v28 = vmax.f32 %v3652_v35, 0.0 }
 0x1ae   : > { %v3826_v25 = vpop.eup %2710  ;;  %2167 = vst [vmem:[%s3341_s8 + $0x150] sm:$0xff] %v2103_v34  ;;  %v1483_v3 = vadd.f32 1.0, %v3824_v2  ;;  %v1768_v37 = vand.u32 2147483647, %v3790_v49  ;;  %v1479_v20 = vmul.f32 %v2701_v59, %v1478_v53  ;;  %vm3840_vm10 = vcmp.lt.f32.partialorder %v1480_v9, 0.0004427343 }
 0x1af   : > { %v2713_v42 = vpop.eup %2712  ;;  %v1761_v58 = vsel %vm3813_vm9, %v1758_v50, %v1755_v41  ;;  %v1771_v57 = vadd.f32 1.0, %v3826_v25  ;;  %v1767_v48 = vmul.f32 %v3790_v49, %v1766_v62  ;;  %v1486_v29 = vmul.f32 -0.5, %v3824_v2  ;;  %v3853_v49 = vpop.f32.mrb[60].mxu1 }
 0x1b0   : > { %v2072_v19 = vmul.f32 %v2713_v42, %v3576_v0  ;;  %v1977_v12 = vadd.f32 %v1761_v58, %v4524_v28  ;;  %2726 = vlog2.f32 %v1483_v3  ;;  %v1261_v0 = vmul.f32 1.442695, %v1181_v21 }
 0x1b1   : > { %2728 = vlog2.f32 %v1771_v57  ;;  %v2715_v50 = vpop.eup %2714  ;;  %v1213_v41 = vsub.f32 0.0, %v1149_v11  ;;  %v1489_v59 = vand.u32 2147483647, %v3824_v2  ;;  %v1182_v53 = vsub.f32 0.0, %v1118_v31  ;;  %v1032_v11 = vpop.f32.mrb[61].mxu1 }
 0x1b2   : > { %2136 = vst [vmem:[%s3341_s8 + $0x58] sm:$0xff] %v2072_v19  ;;  %2730 = vtanh.f32 %v1977_v12  ;;  %v2717_v42 = vpop.eup %2716  ;;  %v2104_v58 = vmul.f32 %v2715_v50, %v3580_v7  ;;  %v3851_v9 = vadd.f32 %v3648_v15, %v3463_v22  ;;  %v1774_v57 = vmul.f32 -0.5, %v3826_v25  ;;  %v3874_v11 = vpop.f32.mrb[62].mxu1 }
 0x1b3   : > { %v1476_v3 = vmul.f32 0.6931472, %v2717_v42  ;;  %2732 = vpow2.f32 %v1261_v0  ;;  %v1325_v21 = vmul.f32 1.442695, %v1213_v41  ;;  %v1777_v31 = vand.u32 2147483647, %v3826_v25 }
 0x1b4   : > { %v2719_v62 = vpop.eup %2718  ;;  %2168 = vst [vmem:[%s3341_s8 + $0x158] sm:$0xff] %v2104_v58  ;;  %v1263_v28 = vmul.f32 1.442695, %v1182_v53  ;;  %v1150_v22 = vand.u32 2147483647, %v3851_v9  ;;  %v3866_v0 = vadd.f32 %v3648_v15, %v3485_v8  ;;  %v4527_v41 = vmax.f32 %v3673_v44, 0.0 }
 0x1b5   : > { %v2721_v19 = vpop.eup %2720  ;;  %v2073_v7 = vmul.f32 %v2719_v62, %v3592_v24  ;;  %v1482_v50 = vsel %vm3840_vm10, %v1479_v20, %v1476_v3  ;;  %2734 = vpow2.f32 %v1325_v21  ;;  %vm1769_vm11 = vcmp.lt.f32.partialorder %v1768_v37, 0.0004427343  ;;  %v3872_v62 = vpop.f32.mrb[62].mxu0 }
 0x1b6   : > { %v3860_v12 = vpop.eup %2722  ;;  %v1764_v42 = vmul.f32 0.6931472, %v2721_v19  ;;  %v1946_v24 = vadd.f32 %v1482_v50, %v4527_v41  ;;  %v1487_v58 = vadd.f32 1.0, %v1486_v29  ;;  %v1775_v3 = vadd.f32 1.0, %v1774_v57  ;;  %v907_v8 = vpop.f32.mrb[63].mxu0 }
 0x1b7   : > { %2137 = vst [vmem:[%s3341_s8 + $0x60] sm:$0xff] %v2073_v7  ;;  %v1492_v53 = vadd.f32 1.0, %v3860_v12  ;;  %v3876_v34 = vpop.eup %2724  ;;  %2736 = vpow2.f32 %v1263_v28  ;;  %v1214_v21 = vsub.f32 0.0, %v1150_v22  ;;  %v1035_v19 = vpop.f32.mrb[63].mxu1  ;;  %v4528_v7 = vmax.f32 %v3677_v27, 0.0 }
 0x1b8   : > { %v1770_v20 = vsel %vm1769_vm11, %v1767_v48, %v1764_v42  ;;  %2738 = vtanh.f32 %v1946_v24  ;;  %vm3880_vm12 = vcmp.lt.f32.partialorder %v1489_v59, 0.0004427343  ;;  %v1084_v29 = vmax.f32 %v3774_v23, 0.0 }
 0x1b9   : > { %v1978_v50 = vadd.f32 %v1770_v20, %v4528_v7  ;;  %vm3885_vm13 = vcmp.lt.f32.partialorder %v1777_v31, 0.0004427343  ;;  %2740 = vlog2.f32 %v1492_v53  ;;  %v1780_v48 = vadd.f32 1.0, %v3876_v34 }
 0x1ba   : > { %v2727_v41 = vpop.eup %2726  ;;  %v1119_v57 = vand.u32 2147483647, %v3866_v0  ;;  %v1488_v59 = vmul.f32 %v3824_v2, %v1487_v58  ;;  %v1327_v42 = vmul.f32 1.442695, %v1214_v21  ;;  %v1776_v8 = vmul.f32 %v3826_v25, %v1775_v3 }
 0x1bb   : > { %v2729_v28 = vpop.eup %2728  ;;  %2742 = vtanh.f32 %v1978_v50  ;;  %v1485_v22 = vmul.f32 0.6931472, %v2727_v41  ;;  %v1495_v31 = vmul.f32 -0.5, %v3860_v12  ;;  %v1783_v7 = vmul.f32 -0.5, %v3876_v34 }
 0x1bc   : > { %v2731_v24 = vpop.eup %2730  ;;  %v1773_v20 = vmul.f32 0.6931472, %v2729_v28  ;;  %2744 = vlog2.f32 %v1780_v48  ;;  %v1183_v25 = vsub.f32 0.0, %v1119_v57  ;;  %v3906_v3 = vadd.f32 %v3648_v15, %v3494_v1 }
 0x1bd   : > { %v2105_v53 = vmul.f32 %v2731_v24, %v3652_v35  ;;  %v1491_v19 = vsel %vm3880_vm12, %v1488_v59, %v1485_v22  ;;  %2746 = vpow2.f32 %v1327_v42  ;;  %v3898_v50 = vpop.eup %2732  ;;  %v1498_v21 = vand.u32 2147483647, %v3860_v12 }
 0x1be   : > { %v1947_v2 = vadd.f32 %v1491_v19, %v1051_v46  ;;  %v1779_v58 = vsel %vm3885_vm13, %v1776_v8, %v1773_v20  ;;  %v1053_v37 = vmax.f32 %v3800_v18, 0.0  ;;  %v1501_v41 = vadd.f32 1.0, %v3898_v50 }
 0x1bf   : > { %2169 = vst [vmem:[%s3341_s8 + $0x160] sm:$0xff] %v2105_v53  ;;  %v1979_v35 = vadd.f32 %v1779_v58, %v1083_v63  ;;  %v3914_v48 = vpop.eup %2734  ;;  %v1496_v46 = vadd.f32 1.0, %v1495_v31  ;;  %v1786_v38 = vand.u32 2147483647, %v3876_v34  ;;  %v1151_v57 = vand.u32 2147483647, %v3906_v3 }
 0x1c0   : > { %2748 = vtanh.f32 %v1947_v2  ;;  %v1085_v1 = vmax.f32 %v3809_v36, 0.0  ;;  %v1789_v28 = vadd.f32 1.0, %v3914_v48  ;;  %v1054_v63 = vmax.f32 %v3820_v43, 0.0 }
 0x1c1   : > { %2750 = vtanh.f32 %v1979_v35  ;;  %v3921_v22 = vpop.eup %2736  ;;  %v1784_v59 = vadd.f32 1.0, %v1783_v7  ;;  %v1265_v42 = vmul.f32 1.442695, %v1183_v25  ;;  %v1215_v24 = vsub.f32 0.0, %v1151_v57 }
 0x1c2   : > { %2752 = vlog2.f32 %v1501_v41  ;;  %v2739_v20 = vpop.eup %2738  ;;  %vm3923_vm14 = vcmp.lt.f32.partialorder %v1498_v21, 0.0004427343  ;;  %v1510_v31 = vadd.f32 1.0, %v3921_v22  ;;  %v1497_v58 = vmul.f32 %v3860_v12, %v1496_v46 }
 0x1c3   : > { %2754 = vlog2.f32 %v1789_v28  ;;  %v2741_v19 = vpop.eup %2740  ;;  %v2074_v2 = vmul.f32 %v2739_v20, %v3673_v44  ;;  %vm3931_vm15 = vcmp.lt.f32.partialorder %v1786_v38, 0.0004427343  ;;  %v1504_v25 = vmul.f32 -0.5, %v3898_v50 }
 0x1c4   : > { %v1494_v21 = vmul.f32 0.6931472, %v2741_v19  ;;  %v1792_v41 = vmul.f32 -0.5, %v3914_v48  ;;  %2756 = vlog2.f32 %v1510_v31  ;;  %v1329_v57 = vmul.f32 1.442695, %v1215_v24 }
 0x1c5   : > { %v2743_v35 = vpop.eup %2742  ;;  %2138 = vst [vmem:[%s3341_s8 + $0x68] sm:$0xff] %v2074_v2  ;;  %v1785_v44 = vmul.f32 %v3876_v34, %v1784_v59  ;;  %v1507_v12 = vand.u32 2147483647, %v3898_v50  ;;  %2758 = vpow2.f32 %v1265_v42  ;;  %v1513_v19 = vmul.f32 -0.5, %v3921_v22 }
 0x1c6   : > { %v2745_v28 = vpop.eup %2744  ;;  %v2106_v53 = vmul.f32 %v2743_v35, %v3677_v27  ;;  %v1500_v38 = vsel %vm3923_vm14, %v1497_v58, %v1494_v21  ;;  %2760 = vpow2.f32 %v1329_v57  ;;  %v4537_v24 = vmax.f32 %v3761_v13, 0.0 }
 0x1c7   : > { %v3941_v46 = vpop.eup %2746  ;;  %v1782_v20 = vmul.f32 0.6931472, %v2745_v28  ;;  %v1505_v2 = vadd.f32 1.0, %v1504_v25  ;;  %v1795_v27 = vand.u32 2147483647, %v3914_v48  ;;  %v1793_v42 = vadd.f32 1.0, %v1792_v41 }
 0x1c8   : > { %2170 = vst [vmem:[%s3341_s8 + $0x168] sm:$0xff] %v2106_v53  ;;  %v1948_v31 = vadd.f32 %v1500_v38, %v4537_v24  ;;  %v1798_v34 = vadd.f32 1.0, %v3941_v46  ;;  %v3955_v8 = vadd.f32 %v3648_v15, %v3499_v5  ;;  %v3959_v58 = vadd.f32 %v3648_v15, %v3504_v4 }
 0x1c9   : > { %v1788_v59 = vsel %vm3931_vm15, %v1785_v44, %v1782_v20  ;;  %v1516_v35 = vand.u32 2147483647, %v3921_v22  ;;  %v3966_v7 = vadd.f32 %v3648_v15, %v3528_v55  ;;  %v1514_v41 = vadd.f32 1.0, %v1513_v19 }
 0x1ca   : > { %v2749_v53 = vpop.eup %2748  ;;  %2762 = vtanh.f32 %v1948_v31  ;;  %v1980_v25 = vadd.f32 %v1788_v59, %v1084_v29  ;;  %v1120_v4 = vand.u32 2147483647, %v3955_v8  ;;  %vm3971_vm0 = vcmp.lt.f32.partialorder %v1507_v12, 0.0004427343 }
 0x1cb   : > { %v2751_v21 = vpop.eup %2750  ;;  %v2075_v5 = vmul.f32 %v2749_v53, %v3726_v10  ;;  %2764 = vlog2.f32 %v1798_v34  ;;  %v1055_v44 = vmax.f32 %v3866_v0, 0.0  ;;  %v1506_v20 = vmul.f32 %v3898_v50, %v1505_v2 }
 0x1cc   : > { %v2753_v57 = vpop.eup %2752  ;;  %v2107_v28 = vmul.f32 %v2751_v21, %v3737_v56  ;;  %2766 = vtanh.f32 %v1980_v25  ;;  %vm3978_vm1 = vcmp.lt.f32.partialorder %v1795_v27, 0.0004427343  ;;  %v1152_v19 = vand.u32 2147483647, %v3959_v58 }
 0x1cd   : > { %v2755_v55 = vpop.eup %2754  ;;  %2139 = vst [vmem:[%s3341_s8 + $0x70] sm:$0xff] %v2075_v5  ;;  %v1503_v38 = vmul.f32 0.6931472, %v2753_v57  ;;  %v1794_v12 = vmul.f32 %v3914_v48, %v1793_v42  ;;  %v1801_v24 = vmul.f32 -0.5, %v3941_v46  ;;  %v1121_v31 = vand.u32 2147483647, %v3966_v7 }
 0x1ce   : > { %2171 = vst [vmem:[%s3341_s8 + $0x170] sm:$0xff] %v2107_v28  ;;  %v1791_v56 = vmul.f32 0.6931472, %v2755_v55  ;;  %v2757_v34 = vpop.eup %2756  ;;  %v1515_v50 = vmul.f32 %v3921_v22, %v1514_v41  ;;  %vm3990_vm2 = vcmp.lt.f32.partialorder %v1516_v35, 0.0004427343  ;;  %v1184_v27 = vsub.f32 0.0, %v1120_v4 }
 0x1cf   : > { %v1509_v59 = vsel %vm3971_vm0, %v1506_v20, %v1503_v38  ;;  %v3994_v53 = vpop.eup %2758  ;;  %v1512_v25 = vmul.f32 0.6931472, %v2757_v34  ;;  %v1216_v21 = vsub.f32 0.0, %v1152_v19  ;;  %v1804_v35 = vand.u32 2147483647, %v3941_v46 }
 0x1d0   : > { %v1949_v48 = vadd.f32 %v1509_v59, %v1053_v37  ;;  %v1797_v42 = vsel %vm3978_vm1, %v1794_v12, %v1791_v56  ;;  %v4000_v5 = vpop.eup %2760  ;;  %v1519_v41 = vadd.f32 1.0, %v3994_v53  ;;  %v1185_v4 = vsub.f32 0.0, %v1121_v31 }
 0x1d1   : > { %v1981_v22 = vadd.f32 %v1797_v42, %v1085_v1  ;;  %v1518_v57 = vsel %vm3990_vm2, %v1515_v50, %v1512_v25  ;;  %v1802_v37 = vadd.f32 1.0, %v1801_v24  ;;  %v1807_v28 = vadd.f32 1.0, %v4000_v5 }
 0x1d2   : > { %2768 = vtanh.f32 %v1949_v48  ;;  %v1950_v29 = vadd.f32 %v1518_v57, %v1054_v63  ;;  %v1267_v55 = vmul.f32 1.442695, %v1184_v27  ;;  %v4013_v1 = vadd.f32 %v3648_v15, %v3530_v52 }
 0x1d3   : > { %2770 = vtanh.f32 %v1981_v22  ;;  %v1087_v20 = vmax.f32 %v3906_v3, 0.0  ;;  %v1331_v10 = vmul.f32 1.442695, %v1216_v21  ;;  %v4018_v19 = vadd.f32 %v3648_v15, %v3541_v39 }
 0x1d4   : > { %v2763_v38 = vpop.eup %2762  ;;  %2772 = vlog2.f32 %v1519_v41  ;;  %vm4021_vm3 = vcmp.lt.f32.partialorder %v1804_v35, 0.0004427343  ;;  %v1269_v52 = vmul.f32 1.442695, %v1185_v4  ;;  %v1803_v34 = vmul.f32 %v3941_v46, %v1802_v37 }
 0x1d5   : > { %v2765_v56 = vpop.eup %2764  ;;  %v2076_v12 = vmul.f32 %v2763_v38, %v3761_v13  ;;  %2774 = vtanh.f32 %v1950_v29  ;;  %v4028_v59 = vadd.f32 %v3648_v15, %v3543_v6  ;;  %v1522_v13 = vmul.f32 -0.5, %v3994_v53 }
 0x1d6   : > { %v2767_v24 = vpop.eup %2766  ;;  %v1800_v31 = vmul.f32 0.6931472, %v2765_v56  ;;  %2776 = vlog2.f32 %v1807_v28  ;;  %v1153_v50 = vand.u32 2147483647, %v4013_v1  ;;  %v1810_v27 = vmul.f32 -0.5, %v4000_v5 }
 0x1d7   : > { %2140 = vst [vmem:[%s3341_s8 + $0x78] sm:$0xff] %v2076_v12  ;;  %v2108_v39 = vmul.f32 %v2767_v24, %v3774_v23  ;;  %2778 = vpow2.f32 %v1267_v55  ;;  %v1122_v46 = vand.u32 2147483647, %v4018_v19  ;;  %v4546_v6 = vmax.f32 %v3851_v9, 0.0 }
 0x1d8   : > { %v1806_v2 = vsel %vm4021_vm3, %v1803_v34, %v1800_v31  ;;  %2780 = vpow2.f32 %v1331_v10  ;;  %v1056_v42 = vmax.f32 %v3955_v8, 0.0  ;;  %v1217_v23 = vsub.f32 0.0, %v1153_v50 }
 0x1d9   : > { %2172 = vst [vmem:[%s3341_s8 + $0x178] sm:$0xff] %v2108_v39  ;;  %v1982_v48 = vadd.f32 %v1806_v2, %v4546_v6  ;;  %2782 = vpow2.f32 %v1269_v52  ;;  %v1088_v25 = vmax.f32 %v3959_v58, 0.0  ;;  %v1186_v21 = vsub.f32 0.0, %v1122_v46 }
 0x1da   : > { %v1154_v22 = vand.u32 2147483647, %v4028_v59  ;;  %v4046_v35 = vadd.f32 %v3648_v15, %v3582_v30  ;;  %v1523_v41 = vadd.f32 1.0, %v1522_v13  ;;  %v1525_v4 = vand.u32 2147483647, %v3994_v53 }
 0x1db   : > { %2784 = vtanh.f32 %v1982_v48  ;;  %v1333_v57 = vmul.f32 1.442695, %v1217_v23  ;;  %v1811_v28 = vadd.f32 1.0, %v1810_v27  ;;  %v1813_v29 = vand.u32 2147483647, %v4000_v5 }
 0x1dc   : > { %v2769_v37 = vpop.eup %2768  ;;  %v1271_v55 = vmul.f32 1.442695, %v1186_v21  ;;  %v1218_v38 = vsub.f32 0.0, %v1154_v22  ;;  %v1057_v12 = vmax.f32 %v3966_v7, 0.0  ;;  %v4054_v30 = vadd.f32 %v3648_v15, %v3584_v54 }
 0x1dd   : > { %v2771_v10 = vpop.eup %2770  ;;  %v2077_v56 = vmul.f32 %v2769_v37, %v3800_v18  ;;  %2786 = vpow2.f32 %v1333_v57  ;;  %v1123_v31 = vand.u32 2147483647, %v4046_v35  ;;  %v1524_v18 = vmul.f32 %v3994_v53, %v1523_v41 }
 0x1de   : > { %v2773_v63 = vpop.eup %2772  ;;  %v2109_v52 = vmul.f32 %v2771_v10, %v3809_v36  ;;  %2788 = vpow2.f32 %v1271_v55  ;;  %v1335_v24 = vmul.f32 1.442695, %v1218_v38  ;;  %vm1526_vm4 = vcmp.lt.f32.partialorder %v1525_v4, 0.0004427343 }
 0x1df   : > { %v2775_v34 = vpop.eup %2774  ;;  %2141 = vst [vmem:[%s3341_s8 + $0x80] sm:$0xff] %v2077_v56  ;;  %v1521_v39 = vmul.f32 0.6931472, %v2773_v63  ;;  %v4062_v13 = vadd.f32 %v3648_v15, %v3597_v60  ;;  %v1812_v36 = vmul.f32 %v4000_v5, %v1811_v28  ;;  %vm4067_vm5 = vcmp.lt.f32.partialorder %v1813_v29, 0.0004427343 }
 0x1e0   : > { %v2777_v54 = vpop.eup %2776  ;;  %2173 = vst [vmem:[%s3341_s8 + $0x180] sm:$0xff] %v2109_v52  ;;  %v2078_v50 = vmul.f32 %v2775_v34, %v3820_v43  ;;  %2790 = vpow2.f32 %v1335_v24  ;;  %v1089_v53 = vmax.f32 %v4013_v1, 0.0  ;;  %v1155_v48 = vand.u32 2147483647, %v4054_v30 }
 0x1e1   : > { %v2779_v27 = vpop.eup %2778  ;;  %v1527_v46 = vsel %vm1526_vm4, %v1524_v18, %v1521_v39  ;;  %v1809_v6 = vmul.f32 0.6931472, %v2777_v54  ;;  %v1058_v5 = vmax.f32 %v4018_v19, 0.0  ;;  %v1187_v21 = vsub.f32 0.0, %v1123_v31 }
 0x1e2   : > { %v2781_v60 = vpop.eup %2780  ;;  %2142 = vst [vmem:[%s3341_s8 + $0x88] sm:$0xff] %v2078_v50  ;;  %v1951_v23 = vadd.f32 %v1527_v46, %v1055_v44  ;;  %v1528_v43 = vadd.f32 1.0, %v2779_v27  ;;  %v1531_v4 = vmul.f32 -0.5, %v2779_v27  ;;  %v1124_v37 = vand.u32 2147483647, %v4062_v13 }
 0x1e3   : > { %v2783_v22 = vpop.eup %2782  ;;  %v1815_v41 = vsel %vm4067_vm5, %v1812_v36, %v1809_v6  ;;  %v1816_v57 = vadd.f32 1.0, %v2781_v60  ;;  %v1819_v29 = vmul.f32 -0.5, %v2781_v60  ;;  %v1090_v55 = vmax.f32 %v4028_v59, 0.0 }
 0x1e4   : > { %2792 = vtanh.f32 %v1951_v23  ;;  %v1983_v28 = vadd.f32 %v1815_v41, %v1087_v20  ;;  %v1534_v38 = vand.u32 2147483647, %v2779_v27  ;;  %v1537_v10 = vadd.f32 1.0, %v2783_v22 }
 0x1e5   : > { %v2785_v44 = vpop.eup %2784  ;;  %2794 = vlog2.f32 %v1528_v43  ;;  %v1219_v56 = vsub.f32 0.0, %v1155_v48  ;;  %v1540_v52 = vmul.f32 -0.5, %v2783_v22  ;;  %v1273_v24 = vmul.f32 1.442695, %v1187_v21 }
 0x1e6   : > { %v2110_v63 = vmul.f32 %v2785_v44, %v3851_v9  ;;  %2796 = vtanh.f32 %v1983_v28  ;;  %v1532_v34 = vadd.f32 1.0, %v1531_v4  ;;  %v1822_v39 = vand.u32 2147483647, %v2781_v60 }
 0x1e7   : > { %v2787_v31 = vpop.eup %2786  ;;  %2798 = vlog2.f32 %v1816_v57  ;;  %v1188_v18 = vsub.f32 0.0, %v1124_v37  ;;  %v1820_v54 = vadd.f32 1.0, %v1819_v29  ;;  %vm4087_vm6 = vcmp.lt.f32.partialorder %v1534_v38, 0.0004427343 }
 0x1e8   : > { %v4084_v20 = vpop.eup %2788  ;;  %2174 = vst [vmem:[%s3341_s8 + $0x188] sm:$0xff] %v2110_v63  ;;  %2800 = vlog2.f32 %v1537_v10  ;;  %v1825_v50 = vadd.f32 1.0, %v2787_v31  ;;  %v1828_v36 = vmul.f32 -0.5, %v2787_v31  ;;  %v1337_v46 = vmul.f32 1.442695, %v1219_v56 }
 0x1e9   : > { %v1546_v9 = vadd.f32 1.0, %v4084_v20  ;;  %v4094_v6 = vadd.f32 %v3648_v15, %v3599_v47  ;;  %v1541_v23 = vadd.f32 1.0, %v1540_v52  ;;  %v1543_v43 = vand.u32 2147483647, %v2783_v22 }
 0x1ea   : > { %v4096_v48 = vpop.eup %2790  ;;  %2802 = vlog2.f32 %v1825_v50  ;;  %v1831_v21 = vand.u32 2147483647, %v2787_v31  ;;  %v1533_v41 = vmul.f32 %v2779_v27, %v1532_v34  ;;  %vm4098_vm7 = vcmp.lt.f32.partialorder %v1822_v39, 0.0004427343  ;;  %v4110_v27 = vld [vmem:[%s4464_s2] ss:$0 sm:$0xff] }
 0x1eb   : > { %2804 = vlog2.f32 %v1546_v9  ;;  %v1549_v57 = vmul.f32 -0.5, %v4084_v20  ;;  %v1834_v37 = vadd.f32 1.0, %v4096_v48  ;;  %v1821_v28 = vmul.f32 %v2781_v60, %v1820_v54 }
 0x1ec   : > { %v1829_v29 = vadd.f32 1.0, %v1828_v36  ;;  %v1552_v47 = vand.u32 2147483647, %v4084_v20  ;;  %v1275_v15 = vmul.f32 1.442695, %v1188_v18  ;;  %v1837_v44 = vmul.f32 -0.5, %v4096_v48 }
 0x1ed   : > { %2806 = vlog2.f32 %v1834_v37  ;;  %v1156_v38 = vand.u32 2147483647, %v4094_v6  ;;  %v4114_v10 = vadd.f32 %v4110_v27, %v3624_v40  ;;  %v1542_v60 = vmul.f32 %v2783_v22, %v1541_v23 }
 0x1ee   : > { %v2793_v56 = vpop.eup %2792  ;;  %vm4116_vm8 = vcmp.lt.f32.partialorder %v1543_v43, 0.0004427343  ;;  %vm4120_vm9 = vcmp.lt.f32.partialorder %v1831_v21, 0.0004427343  ;;  %2808 = vpow2.f32 %v1273_v24  ;;  %v1550_v18 = vadd.f32 1.0, %v1549_v57 }
 0x1ef   : > { %v2795_v34 = vpop.eup %2794  ;;  %v2079_v39 = vmul.f32 %v2793_v56, %v3866_v0  ;;  %2810 = vpow2.f32 %v1337_v46  ;;  %v1220_v54 = vsub.f32 0.0, %v1156_v38  ;;  %v1830_v36 = vmul.f32 %v2787_v31, %v1829_v29 }
 0x1f0   : > { %v2797_v40 = vpop.eup %2796  ;;  %v1530_v50 = vmul.f32 0.6931472, %v2795_v34  ;;  %2812 = vpow2.f32 %v1275_v15  ;;  %v1125_v22 = vand.u32 2147483647, %v4114_v10  ;;  %vm4128_vm10 = vcmp.lt.f32.partialorder %v1552_v47, 0.0004427343 }
 0x1f1   : > { %v2799_v9 = vpop.eup %2798  ;;  %2143 = vst [vmem:[%s3341_s8 + $0x90] sm:$0xff] %v2079_v39  ;;  %v2111_v23 = vmul.f32 %v2797_v40, %v3906_v3  ;;  %v1838_v24 = vadd.f32 1.0, %v1837_v44  ;;  %v1339_v0 = vmul.f32 1.442695, %v1220_v54  ;;  %v4136_v31 = vadd.f32 %v4110_v27, %v3630_v17 }
 0x1f2   : > { %v2801_v21 = vpop.eup %2800  ;;  %v1536_v46 = vsel %vm4087_vm6, %v1533_v41, %v1530_v50  ;;  %v1818_v57 = vmul.f32 0.6931472, %v2799_v9  ;;  %v1189_v37 = vsub.f32 0.0, %v1125_v22  ;;  %v4143_v47 = vadd.f32 %v4110_v27, %v3640_v61 }
 0x1f3   : > { %2175 = vst [vmem:[%s3341_s8 + $0x190] sm:$0xff] %v2111_v23  ;;  %v1952_v3 = vadd.f32 %v1536_v46, %v1056_v42  ;;  %v1539_v29 = vmul.f32 0.6931472, %v2801_v21  ;;  %2814 = vpow2.f32 %v1339_v0  ;;  %v1551_v41 = vmul.f32 %v4084_v20, %v1550_v18 }
 0x1f4   : > { %v2803_v15 = vpop.eup %2802  ;;  %v1824_v2 = vsel %vm4098_vm7, %v1821_v28, %v1818_v57  ;;  %v1840_v44 = vand.u32 2147483647, %v4096_v48  ;;  %v1277_v17 = vmul.f32 1.442695, %v1189_v37  ;;  %v1157_v4 = vand.u32 2147483647, %v4136_v31 }
 0x1f5   : > { %v2805_v38 = vpop.eup %2804  ;;  %2816 = vtanh.f32 %v1952_v3  ;;  %v1984_v42 = vadd.f32 %v1824_v2, %v1088_v25  ;;  %v1545_v56 = vsel %vm4116_vm8, %v1542_v60, %v1539_v29  ;;  %v1827_v34 = vmul.f32 0.6931472, %v2803_v15 }
 0x1f6   : > { %v1953_v61 = vadd.f32 %v1545_v56, %v1057_v12  ;;  %v1548_v39 = vmul.f32 0.6931472, %v2805_v38  ;;  %2818 = vpow2.f32 %v1277_v17  ;;  %v1839_v18 = vmul.f32 %v4096_v48, %v1838_v24  ;;  %v4559_v17 = vld [vmem:[#allocation2_spill] sm:$0xff] }
 0x1f7   : > { %v2807_v20 = vpop.eup %2806  ;;  %2820 = vtanh.f32 %v1984_v42  ;;  %v1833_v28 = vsel %vm4120_vm9, %v1830_v36, %v1827_v34  ;;  %v1126_v25 = vand.u32 2147483647, %v4143_v47  ;;  %vm1841_vm11 = vcmp.lt.f32.partialorder %v1840_v44, 0.0004427343 }
 0x1f8   : > { %v2809_v54 = vpop.eup %2808  ;;  %2822 = vtanh.f32 %v1953_v61  ;;  %v1985_v60 = vadd.f32 %v1833_v28, %v1089_v53  ;;  %v1554_v12 = vsel %vm4128_vm10, %v1551_v41, %v1548_v39  ;;  %v1836_v63 = vmul.f32 0.6931472, %v2807_v20 }
 0x1f9   : > { %v2811_v40 = vpop.eup %2810  ;;  %v1954_v50 = vadd.f32 %v1554_v12, %v1058_v5  ;;  %v1555_v52 = vadd.f32 1.0, %v2809_v54  ;;  %v1558_v36 = vmul.f32 -0.5, %v2809_v54  ;;  %v1221_v23 = vsub.f32 0.0, %v1157_v4 }
 0x1fa   : > { %v4166_v22 = vpop.eup %2812  ;;  %2824 = vtanh.f32 %v1985_v60  ;;  %v1842_v48 = vsel %vm1841_vm11, %v1839_v18, %v1836_v63  ;;  %v1843_v9 = vadd.f32 1.0, %v2811_v40  ;;  %v1059_v43 = vmax.f32 %v4046_v35, 0.0 }
 0x1fb   : > { %2826 = vtanh.f32 %v1954_v50  ;;  %v1986_v53 = vadd.f32 %v1842_v48, %v1090_v55  ;;  %v1091_v24 = vmax.f32 %v4054_v30, 0.0  ;;  %v1846_v0 = vmul.f32 -0.5, %v2811_v40 }
 0x1fc   : > { %2828 = vlog2.f32 %v1555_v52  ;;  %v1564_v5 = vadd.f32 1.0, %v4166_v22  ;;  %v1190_v21 = vsub.f32 0.0, %v1126_v25  ;;  %v1559_v57 = vadd.f32 1.0, %v1558_v36 }
 0x1fd   : > { %v4173_v46 = vpop.eup %2814  ;;  %2830 = vtanh.f32 %v1986_v53  ;;  %v1561_v37 = vand.u32 2147483647, %v2809_v54  ;;  %v1060_v3 = vmax.f32 %v4062_v13, 0.0  ;;  %v1567_v29 = vmul.f32 -0.5, %v4166_v22 }
 0x1fe   : > { %2832 = vlog2.f32 %v1843_v9  ;;  %v1852_v55 = vadd.f32 1.0, %v4173_v46  ;;  %v1341_v15 = vmul.f32 1.442695, %v1221_v23  ;;  %v1092_v41 = vmax.f32 %v4094_v6, 0.0 }
 0x1ff   : > { %v2817_v2 = vpop.eup %2816  ;;  %2834 = vlog2.f32 %v1564_v5  ;;  %v1061_v44 = vmax.f32 %v4114_v10, 0.0  ;;  %v4182_v38 = vadd.f32 %v4110_v27, %v4559_v17  ;;  %v1847_v34 = vadd.f32 1.0, %v1846_v0 }
 0x200   : > { %v4184_v42 = vpop.eup %2818  ;;  %v2080_v56 = vmul.f32 %v2817_v2, %v3955_v8  ;;  %2836 = vlog2.f32 %v1852_v55  ;;  %v1279_v61 = vmul.f32 1.442695, %v1190_v21  ;;  %v1560_v4 = vmul.f32 %v2809_v54, %v1559_v57 }
 0x201   : > { %v2821_v39 = vpop.eup %2820  ;;  %vm4187_vm12 = vcmp.lt.f32.partialorder %v1561_v37, 0.0004427343  ;;  %v1849_v28 = vand.u32 2147483647, %v2811_v40  ;;  %v1573_v18 = vadd.f32 1.0, %v4184_v42  ;;  %v1568_v12 = vadd.f32 1.0, %v1567_v29 }
 0x202   : > { %v2823_v25 = vpop.eup %2822  ;;  %2144 = vst [vmem:[%s3341_s8 + $0x98] sm:$0xff] %v2080_v56  ;;  %v2112_v60 = vmul.f32 %v2821_v39, %v3959_v58  ;;  %v1570_v8 = vand.u32 2147483647, %v4166_v22  ;;  %2838 = vpow2.f32 %v1341_v15  ;;  %v1855_v54 = vmul.f32 -0.5, %v4173_v46 }
 0x203   : > { %v2081_v63 = vmul.f32 %v2823_v25, %v3966_v7  ;;  %2840 = vlog2.f32 %v1573_v18  ;;  %v1576_v50 = vmul.f32 -0.5, %v4184_v42  ;;  %v1848_v36 = vmul.f32 %v2811_v40, %v1847_v34 }
 0x204   : > { %v2825_v52 = vpop.eup %2824  ;;  %2176 = vst [vmem:[%s3341_s8 + $0x198] sm:$0xff] %v2112_v60  ;;  %v1858_v48 = vand.u32 2147483647, %v4173_v46  ;;  %2842 = vpow2.f32 %v1279_v61  ;;  %v1158_v58 = vand.u32 2147483647, %v4182_v38  ;;  %v4209_v53 = vadd.f32 %v4110_v27, %v3679_v51 }
 0x205   : > { %v2827_v9 = vpop.eup %2826  ;;  %2145 = vst [vmem:[%s3341_s8 + $0xa0] sm:$0xff] %v2081_v63  ;;  %v2113_v23 = vmul.f32 %v2825_v52, %v4013_v1  ;;  %vm4203_vm13 = vcmp.lt.f32.partialorder %v1849_v28, 0.0004427343  ;;  %v4213_v40 = vadd.f32 %v4110_v27, %v3681_v32  ;;  %vm4216_vm14 = vcmp.lt.f32.partialorder %v1570_v8, 0.0004427343 }
 0x206   : > { %v2829_v0 = vpop.eup %2828  ;;  %v2082_v5 = vmul.f32 %v2827_v9, %v4018_v19  ;;  %v1222_v1 = vsub.f32 0.0, %v1158_v58  ;;  %v4222_v57 = vadd.f32 %v4110_v27, %v3694_v14  ;;  %v1569_v29 = vmul.f32 %v4166_v22, %v1568_v12 }
 0x207   : > { %v2831_v37 = vpop.eup %2830  ;;  %2177 = vst [vmem:[%s3341_s8 + $0x1a0] sm:$0xff] %v2113_v23  ;;  %v1557_v51 = vmul.f32 0.6931472, %v2829_v0  ;;  %v1856_v32 = vadd.f32 1.0, %v1855_v54  ;;  %v1577_v55 = vadd.f32 1.0, %v1576_v50 }
 0x208   : > { %v2833_v15 = vpop.eup %2832  ;;  %2146 = vst [vmem:[%s3341_s8 + $0xa8] sm:$0xff] %v2082_v5  ;;  %v2114_v19 = vmul.f32 %v2831_v37, %v4028_v59  ;;  %vm4228_vm15 = vcmp.lt.f32.partialorder %v1858_v48, 0.0004427343  ;;  %v1343_v17 = vmul.f32 1.442695, %v1222_v1 }
 0x209   : > { %v1127_v14 = vand.u32 2147483647, %v4209_v53  ;;  %v2835_v56 = vpop.eup %2834  ;;  %v1563_v34 = vsel %vm4187_vm12, %v1560_v4, %v1557_v51  ;;  %v1845_v61 = vmul.f32 0.6931472, %v2833_v15  ;;  %v1579_v22 = vand.u32 2147483647, %v4184_v42 }
 0x20a   : > { %v1159_v39 = vand.u32 2147483647, %v4213_v40  ;;  %v2837_v28 = vpop.eup %2836  ;;  %2178 = vst [vmem:[%s3341_s8 + $0x1a8] sm:$0xff] %v2114_v19  ;;  %v1955_v59 = vadd.f32 %v1563_v34, %v1059_v43  ;;  %v1566_v18 = vmul.f32 0.6931472, %v2835_v56  ;;  %2844 = vpow2.f32 %v1343_v17  ;;  %v4568_v19 = vld [vmem:[#allocation3_spill] sm:$0xff] }
 0x20b   : > { %v1128_v25 = vand.u32 2147483647, %v4222_v57  ;;  %v1851_v60 = vsel %vm4203_vm13, %v1848_v36, %v1845_v61  ;;  %v1854_v12 = vmul.f32 0.6931472, %v2837_v28  ;;  %v1857_v4 = vmul.f32 %v4173_v46, %v1856_v32 }
 0x20c   : > { %v1578_v20 = vmul.f32 %v4184_v42, %v1577_v55  ;;  %v4245_v8 = vpop.eup %2838  ;;  %2846 = vtanh.f32 %v1955_v59  ;;  %v1987_v63 = vadd.f32 %v1851_v60, %v1091_v24  ;;  %v1572_v43 = vsel %vm4216_vm14, %v1569_v29, %v1566_v18 }
 0x20d   : > { %v1191_v54 = vsub.f32 0.0, %v1127_v14  ;;  %v2841_v50 = vpop.eup %2840  ;;  %v1956_v52 = vadd.f32 %v1572_v43, %v1060_v3  ;;  %v1860_v36 = vsel %vm4228_vm15, %v1857_v4, %v1854_v12  ;;  %v1861_v46 = vadd.f32 1.0, %v4245_v8 }
 0x20e   : > { %v1223_v42 = vsub.f32 0.0, %v1159_v39  ;;  %v4256_v48 = vpop.eup %2842  ;;  %2848 = vtanh.f32 %v1987_v63  ;;  %v1988_v24 = vadd.f32 %v1860_v36, %v1092_v41  ;;  %v1575_v58 = vmul.f32 0.6931472, %v2841_v50 }
 0x20f   : > { %v1192_v9 = vsub.f32 0.0, %v1128_v25  ;;  %2850 = vtanh.f32 %v1956_v52  ;;  %vm1580_vm0 = vcmp.lt.f32.partialorder %v1579_v22, 0.0004427343  ;;  %v1582_v23 = vadd.f32 1.0, %v4256_v48 }
 0x210   : > { %v4263_v3 = vadd.f32 %v4110_v27, %v3697_v45  ;;  %2852 = vtanh.f32 %v1988_v24  ;;  %v1581_v7 = vsel %vm1580_vm0, %v1578_v20, %v1575_v58  ;;  %v1281_v0 = vmul.f32 1.442695, %v1191_v54 }
 0x211   : > { %v1957_v5 = vadd.f32 %v1581_v7, %v1061_v44  ;;  %2854 = vlog2.f32 %v1861_v46  ;;  %v1345_v21 = vmul.f32 1.442695, %v1223_v42  ;;  %v1283_v41 = vmul.f32 1.442695, %v1192_v9  ;;  %v4573_v7 = vld [vmem:[#allocation4_spill] sm:$0xff] }
 0x212   : > { %2856 = vlog2.f32 %v1582_v23  ;;  %v1864_v1 = vmul.f32 -0.5, %v4245_v8  ;;  %v1160_v37 = vand.u32 2147483647, %v4263_v3  ;;  %v4271_v51 = vadd.f32 %v4110_v27, %v3730_v26 }
 0x213   : > { %2858 = vtanh.f32 %v1957_v5  ;;  %v1093_v29 = vmax.f32 %v4136_v31, 0.0  ;;  %v1062_v32 = vmax.f32 %v4143_v47, 0.0  ;;  %v4279_v44 = vadd.f32 %v4110_v27, %v3732_v16 }
 0x214   : > { %v4273_v45 = vpop.eup %2844  ;;  %2860 = vpow2.f32 %v1281_v0  ;;  %v1585_v55 = vmul.f32 -0.5, %v4256_v48  ;;  %v4285_v26 = vadd.f32 %v4110_v27, %v4568_v19  ;;  %v1867_v17 = vand.u32 2147483647, %v4245_v8 }
 0x215   : > { %v1870_v15 = vadd.f32 1.0, %v4273_v45  ;;  %2862 = vpow2.f32 %v1345_v21  ;;  %v1224_v14 = vsub.f32 0.0, %v1160_v37  ;;  %v1129_v56 = vand.u32 2147483647, %v4271_v51 }
 0x216   : > { %v2847_v2 = vpop.eup %2846  ;;  %2864 = vpow2.f32 %v1283_v41  ;;  %v1865_v34 = vadd.f32 1.0, %v1864_v1  ;;  %v1588_v61 = vand.u32 2147483647, %v4256_v48  ;;  %v1094_v39 = vmax.f32 %v4182_v38, 0.0 }
 0x217   : > { %v2083_v16 = vmul.f32 %v2847_v2, %v4046_v35  ;;  %2866 = vlog2.f32 %v1870_v15  ;;  %v1347_v28 = vmul.f32 1.442695, %v1224_v14  ;;  %v1193_v59 = vsub.f32 0.0, %v1129_v56 }
 0x218   : > { %v2849_v22 = vpop.eup %2848  ;;  %v1161_v18 = vand.u32 2147483647, %v4279_v44  ;;  %v1586_v12 = vadd.f32 1.0, %v1585_v55  ;;  %v1873_v35 = vmul.f32 -0.5, %v4273_v45  ;;  %v1130_v4 = vand.u32 2147483647, %v4285_v26 }
 0x219   : > { %v2851_v25 = vpop.eup %2850  ;;  %2147 = vst [vmem:[%s3341_s8 + $0xb0] sm:$0xff] %v2083_v16  ;;  %v2115_v60 = vmul.f32 %v2849_v22, %v4054_v30  ;;  %2868 = vpow2.f32 %v1347_v28  ;;  %v1285_v43 = vmul.f32 1.442695, %v1193_v59  ;;  %v1866_v36 = vmul.f32 %v4245_v8, %v1865_v34 }
 0x21a   : > { %v2853_v20 = vpop.eup %2852  ;;  %v2084_v63 = vmul.f32 %v2851_v25, %v4062_v13  ;;  %v1225_v54 = vsub.f32 0.0, %v1161_v18  ;;  %vm4301_vm1 = vcmp.lt.f32.partialorder %v1867_v17, 0.0004427343  ;;  %v1063_v46 = vmax.f32 %v4209_v53, 0.0 }
 0x21b   : > { %v2855_v50 = vpop.eup %2854  ;;  %2179 = vst [vmem:[%s3341_s8 + $0x1b0] sm:$0xff] %v2115_v60  ;;  %v2116_v52 = vmul.f32 %v2853_v20, %v4094_v6  ;;  %vm4307_vm2 = vcmp.lt.f32.partialorder %v1588_v61, 0.0004427343  ;;  %2870 = vpow2.f32 %v1285_v43  ;;  %v1587_v8 = vmul.f32 %v4256_v48, %v1586_v12 }
 0x21c   : > { %v2857_v42 = vpop.eup %2856  ;;  %2148 = vst [vmem:[%s3341_s8 + $0xb8] sm:$0xff] %v2084_v63  ;;  %v1863_v24 = vmul.f32 0.6931472, %v2855_v50  ;;  %v1349_v58 = vmul.f32 1.442695, %v1225_v54  ;;  %v1874_v23 = vadd.f32 1.0, %v1873_v35  ;;  %v4315_v0 = vadd.f32 %v4110_v27, %v4573_v7 }
 0x21d   : > { %v2859_v9 = vpop.eup %2858  ;;  %2180 = vst [vmem:[%s3341_s8 + $0x1b8] sm:$0xff] %v2116_v52  ;;  %v1584_v6 = vmul.f32 0.6931472, %v2857_v42  ;;  %v1194_v1 = vsub.f32 0.0, %v1130_v4  ;;  %v1876_v48 = vand.u32 2147483647, %v4273_v45  ;;  %v4342_v50 = vadd.f32 %v4110_v27, %v3811_v33 }
 0x21e   : > { %v2861_v5 = vpop.eup %2860  ;;  %v2085_v21 = vmul.f32 %v2859_v9, %v4114_v10  ;;  %v1869_v41 = vsel %vm4301_vm1, %v1866_v36, %v1863_v24  ;;  %2872 = vpow2.f32 %v1349_v58  ;;  %v1095_v10 = vmax.f32 %v4213_v40, 0.0 }
 0x21f   : > { %v4320_v37 = vpop.eup %2862  ;;  %v1989_v55 = vadd.f32 %v1869_v41, %v1093_v29  ;;  %v1590_v15 = vsel %vm4307_vm2, %v1587_v8, %v1584_v6  ;;  %v1591_v19 = vadd.f32 1.0, %v2861_v5  ;;  %v1064_v56 = vmax.f32 %v4222_v57, 0.0 }
 0x220   : > { %v4325_v2 = vpop.eup %2864  ;;  %2149 = vst [vmem:[%s3341_s8 + $0xc0] sm:$0xff] %v2085_v21  ;;  %v1958_v17 = vadd.f32 %v1590_v15, %v1062_v32  ;;  %v1879_v14 = vadd.f32 1.0, %v4320_v37  ;;  %v1875_v29 = vmul.f32 %v4273_v45, %v1874_v23  ;;  %v1162_v61 = vand.u32 2147483647, %v4315_v0 }
 0x221   : > { %v2867_v16 = vpop.eup %2866  ;;  %2874 = vtanh.f32 %v1989_v55  ;;  %v1600_v34 = vadd.f32 1.0, %v4325_v2  ;;  %v1594_v28 = vmul.f32 -0.5, %v2861_v5  ;;  %v1287_v59 = vmul.f32 1.442695, %v1194_v1 }
 0x222   : > { %2876 = vtanh.f32 %v1958_v17  ;;  %v1872_v22 = vmul.f32 0.6931472, %v2867_v16  ;;  %vm1877_vm3 = vcmp.lt.f32.partialorder %v1876_v48, 0.0004427343  ;;  %v1096_v32 = vmax.f32 %v4263_v3, 0.0 }
 0x223   : > { %2878 = vlog2.f32 %v1591_v19  ;;  %v1065_v18 = vmax.f32 %v4271_v51, 0.0  ;;  %v2869_v25 = vpop.eup %2868  ;;  %v1597_v12 = vand.u32 2147483647, %v2861_v5  ;;  %v1882_v45 = vmul.f32 -0.5, %v4320_v37 }
 0x224   : > { %v1878_v60 = vsel %vm1877_vm3, %v1875_v29, %v1872_v22  ;;  %2880 = vlog2.f32 %v1879_v14  ;;  %v1603_v4 = vmul.f32 -0.5, %v4325_v2  ;;  %v1888_v20 = vadd.f32 1.0, %v2869_v25 }
 0x225   : > { %v1990_v35 = vadd.f32 %v1878_v60, %v1094_v39  ;;  %2882 = vlog2.f32 %v1600_v34  ;;  %v2871_v63 = vpop.eup %2870  ;;  %v1595_v43 = vadd.f32 1.0, %v1594_v28  ;;  %v1226_v54 = vsub.f32 0.0, %v1162_v61 }
 0x226   : > { %2884 = vpow2.f32 %v1287_v59  ;;  %v1885_v52 = vand.u32 2147483647, %v4320_v37  ;;  %v1891_v36 = vmul.f32 -0.5, %v2869_v25  ;;  %v1609_v30 = vadd.f32 1.0, %v2871_v63 }
 0x227   : > { %2886 = vtanh.f32 %v1990_v35  ;;  %vm4347_vm4 = vcmp.lt.f32.partialorder %v1597_v12, 0.0004427343  ;;  %v1883_v24 = vadd.f32 1.0, %v1882_v45  ;;  %v1612_v13 = vmul.f32 -0.5, %v2871_v63 }
 0x228   : > { %v4345_v42 = vpop.eup %2872  ;;  %2888 = vlog2.f32 %v1888_v20  ;;  %v1604_v58 = vadd.f32 1.0, %v1603_v4  ;;  %v1606_v9 = vand.u32 2147483647, %v4325_v2  ;;  %v1894_v6 = vand.u32 2147483647, %v2869_v25 }
 0x229   : > { %2890 = vlog2.f32 %v1609_v30  ;;  %v1897_v33 = vadd.f32 1.0, %v4345_v42  ;;  %v1615_v8 = vand.u32 2147483647, %v2871_v63  ;;  %v1351_v23 = vmul.f32 1.442695, %v1226_v54 }
 0x22a   : > { %v4355_v7 = vadd.f32 %v4110_v27, %v3853_v49  ;;  %v1596_v41 = vmul.f32 %v2861_v5, %v1595_v43  ;;  %v1892_v1 = vadd.f32 1.0, %v1891_v36  ;;  %v1900_v55 = vmul.f32 -0.5, %v4345_v42 }
 0x22b   : > { %v2875_v21 = vpop.eup %2874  ;;  %2892 = vlog2.f32 %v1897_v33  ;;  %vm4359_vm5 = vcmp.lt.f32.partialorder %v1885_v52, 0.0004427343  ;;  %v1613_v17 = vadd.f32 1.0, %v1612_v13  ;;  %v1884_v16 = vmul.f32 %v4320_v37, %v1883_v24 }
 0x22c   : > { %v2877_v15 = vpop.eup %2876  ;;  %v2117_v48 = vmul.f32 %v2875_v21, %v4136_v31  ;;  %2894 = vpow2.f32 %v1351_v23  ;;  %v1605_v5 = vmul.f32 %v4325_v2, %v1604_v58  ;;  %vm4366_vm6 = vcmp.lt.f32.partialorder %v1606_v9, 0.0004427343 }
 0x22d   : > { %v2879_v14 = vpop.eup %2878  ;;  %v2086_v49 = vmul.f32 %v2877_v15, %v4143_v47  ;;  %vm4371_vm7 = vcmp.lt.f32.partialorder %v1894_v6, 0.0004427343  ;;  %vm4375_vm8 = vcmp.lt.f32.partialorder %v1615_v8, 0.0004427343  ;;  %v4381_v47 = vadd.f32 %v4110_v27, %v3872_v62 }
 0x22e   : > { %v2881_v34 = vpop.eup %2880  ;;  %2181 = vst [vmem:[%s3341_s8 + $0x1c0] sm:$0xff] %v2117_v48  ;;  %v1593_v31 = vmul.f32 0.6931472, %v2879_v14  ;;  %v1893_v28 = vmul.f32 %v2869_v25, %v1892_v1  ;;  %v1901_v59 = vadd.f32 1.0, %v1900_v55  ;;  %v1903_v60 = vand.u32 2147483647, %v4345_v42 }
 0x22f   : > { %v2883_v37 = vpop.eup %2882  ;;  %2150 = vst [vmem:[%s3341_s8 + $0xc8] sm:$0xff] %v2086_v49  ;;  %v1881_v2 = vmul.f32 0.6931472, %v2881_v34  ;;  %v1614_v4 = vmul.f32 %v2871_v63, %v1613_v17  ;;  %v1131_v20 = vand.u32 2147483647, %v4342_v50 }
 0x230   : > { %v4385_v12 = vpop.eup %2884  ;;  %v1599_v45 = vsel %vm4347_vm4, %v1596_v41, %v1593_v31  ;;  %v1602_v35 = vmul.f32 0.6931472, %v2883_v37  ;;  %v1163_v54 = vand.u32 2147483647, %v4355_v7  ;;  %v1132_v52 = vand.u32 2147483647, %v4381_v47 }
 0x231   : > { %v2887_v43 = vpop.eup %2886  ;;  %v1959_v62 = vadd.f32 %v1599_v45, %v1063_v46  ;;  %v1887_v25 = vsel %vm4359_vm5, %v1884_v16, %v1881_v2  ;;  %v1618_v24 = vadd.f32 1.0, %v4385_v12  ;;  %v1902_v9 = vmul.f32 %v4345_v42, %v1901_v59 }
 0x232   : > { %v2889_v36 = vpop.eup %2888  ;;  %v2118_v30 = vmul.f32 %v2887_v43, %v4182_v38  ;;  %v1991_v63 = vadd.f32 %v1887_v25, %v1095_v10  ;;  %v1608_v39 = vsel %vm4366_vm6, %v1605_v5, %v1602_v35  ;;  %v1195_v38 = vsub.f32 0.0, %v1131_v20 }
 0x233   : > { %v2891_v13 = vpop.eup %2890  ;;  %2896 = vtanh.f32 %v1959_v62  ;;  %v1960_v46 = vadd.f32 %v1608_v39, %v1064_v56  ;;  %v1890_v58 = vmul.f32 0.6931472, %v2889_v36  ;;  %v4408_v10 = vadd.f32 %v4110_v27, %v3874_v11 }
 0x234   : > { %2182 = vst [vmem:[%s3341_s8 + $0x1c8] sm:$0xff] %v2118_v30  ;;  %2898 = vtanh.f32 %v1991_v63  ;;  %v1611_v33 = vmul.f32 0.6931472, %v2891_v13  ;;  %v1227_v23 = vsub.f32 0.0, %v1163_v54  ;;  %v1196_v21 = vsub.f32 0.0, %v1132_v52 }
 0x235   : > { %v2893_v6 = vpop.eup %2892  ;;  %2900 = vtanh.f32 %v1960_v46  ;;  %v1896_v8 = vsel %vm4371_vm7, %v1893_v28, %v1890_v58  ;;  %v1097_v27 = vmax.f32 %v4279_v44, 0.0  ;;  %vm1904_vm9 = vcmp.lt.f32.partialorder %v1903_v60, 0.0004427343 }
 0x236   : > { %v2895_v41 = vpop.eup %2894  ;;  %v1992_v56 = vadd.f32 %v1896_v8, %v1096_v32  ;;  %v1617_v42 = vsel %vm4375_vm8, %v1614_v4, %v1611_v33  ;;  %v1899_v1 = vmul.f32 0.6931472, %v2893_v6  ;;  %2902 = vlog2.f32 %v1618_v24 }
 0x237   : > { %v1961_v11 = vadd.f32 %v1617_v42, %v1065_v18  ;;  %v1906_v55 = vadd.f32 1.0, %v2895_v41  ;;  %v1289_v48 = vmul.f32 1.442695, %v1195_v38  ;;  %v1621_v17 = vmul.f32 -0.5, %v4385_v12 }
 0x238   : > { %2904 = vtanh.f32 %v1992_v56  ;;  %v1905_v15 = vsel %vm1904_vm9, %v1902_v9, %v1899_v1  ;;  %v1353_v32 = vmul.f32 1.442695, %v1227_v23  ;;  %v1291_v14 = vmul.f32 1.442695, %v1196_v21 }
 0x239   : > { %2906 = vtanh.f32 %v1961_v11  ;;  %v1993_v19 = vadd.f32 %v1905_v15, %v1097_v27  ;;  %v1164_v49 = vand.u32 2147483647, %v4408_v10  ;;  %v1622_v5 = vadd.f32 1.0, %v1621_v17 }
 0x23a   : > { %2908 = vlog2.f32 %v1906_v55  ;;  %v1909_v29 = vmul.f32 -0.5, %v2895_v41  ;;  %v1624_v61 = vand.u32 2147483647, %v4385_v12  ;;  %v1912_v20 = vand.u32 2147483647, %v2895_v41 }
 0x23b   : > { %2910 = vtanh.f32 %v1993_v19  ;;  %v1228_v18 = vsub.f32 0.0, %v1164_v49  ;;  %v1623_v45 = vmul.f32 %v4385_v12, %v1622_v5  ;;  %v1098_v39 = vmax.f32 %v4315_v0, 0.0 }
 0x23c   : > { %2912 = vpow2.f32 %v1289_v48  ;;  %v1910_v35 = vadd.f32 1.0, %v1909_v29  ;;  %vm1625_vm10 = vcmp.lt.f32.partialorder %v1624_v61, 0.0004427343  ;;  %vm1913_vm11 = vcmp.lt.f32.partialorder %v1912_v20, 0.0004427343 }
 0x23d   : > { %v2897_v16 = vpop.eup %2896  ;;  %2914 = vpow2.f32 %v1353_v32  ;;  %v1355_v22 = vmul.f32 1.442695, %v1228_v18  ;;  %v1067_v27 = vmax.f32 %v4342_v50, 0.0  ;;  %v1099_v55 = vmax.f32 %v4355_v7, 0.0 }
 0x23e   : > { %v2899_v34 = vpop.eup %2898  ;;  %v2087_v31 = vmul.f32 %v2897_v16, %v4209_v53  ;;  %2916 = vpow2.f32 %v1291_v14  ;;  %v1066_v53 = vmax.f32 %v4285_v26, 0.0  ;;  %v1911_v36 = vmul.f32 %v2895_v41, %v1910_v35 }
 0x23f   : > { %v2901_v37 = vpop.eup %2900  ;;  %v2119_v2 = vmul.f32 %v2899_v34, %v4213_v40  ;;  %2918 = vpow2.f32 %v1355_v22  ;;  %v1100_v22 = vmax.f32 %v4408_v10, 0.0 }
 0x240   : > { %v2903_v28 = vpop.eup %2902  ;;  %2151 = vst [vmem:[%s3341_s8 + $0xd0] sm:$0xff] %v2087_v31  ;;  %v2088_v59 = vmul.f32 %v2901_v37, %v4222_v57 }
 0x241   : > { %2183 = vst [vmem:[%s3341_s8 + $0x1d0] sm:$0xff] %v2119_v2  ;;  %v1620_v60 = vmul.f32 0.6931472, %v2903_v28 }
 0x242   : > { %v2905_v4 = vpop.eup %2904  ;;  %2152 = vst [vmem:[%s3341_s8 + $0xd8] sm:$0xff] %v2088_v59 }
 0x243   : > { %v2907_v43 = vpop.eup %2906  ;;  %v2120_v40 = vmul.f32 %v2905_v4, %v4263_v3  ;;  %v1626_v62 = vsel %vm1625_vm10, %v1623_v45, %v1620_v60 }
 0x244   : > { %v2909_v25 = vpop.eup %2908  ;;  %v2089_v57 = vmul.f32 %v2907_v43, %v4271_v51  ;;  %v1962_v54 = vadd.f32 %v1626_v62, %v1066_v53 }
 0x245   : > { %v2911_v52 = vpop.eup %2910  ;;  %2184 = vst [vmem:[%s3341_s8 + $0x1d8] sm:$0xff] %v2120_v40  ;;  %v1908_v12 = vmul.f32 0.6931472, %v2909_v25 }
 0x246   : > { %v2913_v30 = vpop.eup %2912  ;;  %2153 = vst [vmem:[%s3341_s8 + $0xe0] sm:$0xff] %v2089_v57  ;;  %v2121_v63 = vmul.f32 %v2911_v52, %v4279_v44  ;;  %2920 = vtanh.f32 %v1962_v54 }
 0x247   : > { %v2915_v24 = vpop.eup %2914  ;;  %v1914_v3 = vsel %vm1913_vm11, %v1911_v36, %v1908_v12  ;;  %v1627_v13 = vadd.f32 1.0, %v2913_v30  ;;  %v1630_v6 = vmul.f32 -0.5, %v2913_v30  ;;  %v1633_v42 = vand.u32 2147483647, %v2913_v30 }
 0x248   : > { %v2917_v46 = vpop.eup %2916  ;;  %2185 = vst [vmem:[%s3341_s8 + $0x1e0] sm:$0xff] %v2121_v63  ;;  %v1994_v51 = vadd.f32 %v1914_v3, %v1098_v39  ;;  %v1915_v58 = vadd.f32 1.0, %v2915_v24  ;;  %v1918_v44 = vmul.f32 -0.5, %v2915_v24  ;;  %v1921_v15 = vand.u32 2147483647, %v2915_v24 }
 0x249   : > { %2922 = vlog2.f32 %v1627_v13  ;;  %v1636_v9 = vadd.f32 1.0, %v2917_v46  ;;  %v2919_v33 = vpop.eup %2918  ;;  %v1639_v8 = vmul.f32 -0.5, %v2917_v46  ;;  %v1631_v21 = vadd.f32 1.0, %v1630_v6 }
 0x24a   : > { %2924 = vtanh.f32 %v1994_v51  ;;  %v1924_v38 = vadd.f32 1.0, %v2919_v33  ;;  %v1927_v41 = vmul.f32 -0.5, %v2919_v33  ;;  %v1919_v1 = vadd.f32 1.0, %v1918_v44 }
 0x24b   : > { %2926 = vlog2.f32 %v1915_v58  ;;  %v1640_v48 = vadd.f32 1.0, %v1639_v8  ;;  %v1632_v32 = vmul.f32 %v2913_v30, %v1631_v21  ;;  %v1642_v14 = vand.u32 2147483647, %v2917_v46 }
 0x24c   : > { %2928 = vlog2.f32 %v1636_v9  ;;  %v1928_v49 = vadd.f32 1.0, %v1927_v41  ;;  %vm1634_vm12 = vcmp.lt.f32.partialorder %v1633_v42, 0.0004427343  ;;  %v1930_v5 = vand.u32 2147483647, %v2919_v33 }
 0x24d   : > { %2930 = vlog2.f32 %v1924_v38  ;;  %v1920_v61 = vmul.f32 %v2915_v24, %v1919_v1  ;;  %vm1922_vm13 = vcmp.lt.f32.partialorder %v1921_v15, 0.0004427343  ;;  %v1641_v59 = vmul.f32 %v2917_v46, %v1640_v48 }
 0x24e   : > { %vm1643_vm14 = vcmp.lt.f32.partialorder %v1642_v14, 0.0004427343  ;;  %vm1931_vm15 = vcmp.lt.f32.partialorder %v1930_v5, 0.0004427343 }
 0x250   : > { %v2921_v23 = vpop.eup %2920 }
 0x251   : > { %v2090_v56 = vmul.f32 %v2921_v23, %v4285_v26  ;;  %v1068_v26 = vmax.f32 %v4381_v47, 0.0 }
 0x253   : > { %v2923_v11 = vpop.eup %2922  ;;  %2154 = vst [vmem:[%s3341_s8 + $0xe8] sm:$0xff] %v2090_v56 }
 0x254   : > { %v2925_v19 = vpop.eup %2924  ;;  %v1629_v17 = vmul.f32 0.6931472, %v2923_v11 }
 0x255   : > { %v2927_v18 = vpop.eup %2926  ;;  %v2122_v16 = vmul.f32 %v2925_v19, %v4315_v0  ;;  %v1929_v0 = vmul.f32 %v2919_v33, %v1928_v49 }
 0x256   : > { %v2929_v29 = vpop.eup %2928  ;;  %v1635_v34 = vsel %vm1634_vm12, %v1632_v32, %v1629_v17  ;;  %v1917_v31 = vmul.f32 0.6931472, %v2927_v18 }
 0x257   : > { %v2931_v37 = vpop.eup %2930  ;;  %2186 = vst [vmem:[%s3341_s8 + $0x1e8] sm:$0xff] %v2122_v16  ;;  %v1963_v2 = vadd.f32 %v1635_v34, %v1067_v27  ;;  %v1638_v28 = vmul.f32 0.6931472, %v2929_v29 }
 0x258   : > { %v1923_v60 = vsel %vm1922_vm13, %v1920_v61, %v1917_v31  ;;  %v1926_v45 = vmul.f32 0.6931472, %v2931_v37 }
 0x259   : > { %2932 = vtanh.f32 %v1963_v2  ;;  %v1995_v35 = vadd.f32 %v1923_v60, %v1099_v55  ;;  %v1644_v4 = vsel %vm1643_vm14, %v1641_v59, %v1638_v28 }
 0x25a   : > { %v1964_v53 = vadd.f32 %v1644_v4, %v1068_v26  ;;  %v1932_v20 = vsel %vm1931_vm15, %v1929_v0, %v1926_v45 }
 0x25b   : > { %2934 = vtanh.f32 %v1995_v35  ;;  %v1996_v43 = vadd.f32 %v1932_v20, %v1100_v22 }
 0x25c   : > { %2936 = vtanh.f32 %v1964_v53 }
 0x25d   : > { %2938 = vtanh.f32 %v1996_v43 }
 0x263   : > { %v2933_v40 = vpop.eup %2932 }
 0x264   : > { %v2091_v62 = vmul.f32 %v2933_v40, %v4342_v50 }
 0x265   : > { %v2935_v25 = vpop.eup %2934 }
 0x266   : > { %v2937_v57 = vpop.eup %2936  ;;  %2155 = vst [vmem:[%s3341_s8 + $0xf0] sm:$0xff] %v2091_v62  ;;  %v2123_v54 = vmul.f32 %v2935_v25, %v4355_v7 }
 0x267   : > { %v2939_v52 = vpop.eup %2938  ;;  %v2092_v12 = vmul.f32 %v2937_v57, %v4381_v47 }
 0x268   : > { %2187 = vst [vmem:[%s3341_s8 + $0x1f0] sm:$0xff] %v2123_v54  ;;  %v2124_v36 = vmul.f32 %v2939_v52, %v4408_v10 }
 0x269   : > { %2156 = vst [vmem:[%s3341_s8 + $0xf8] sm:$0xff] %v2092_v12 }
 0x26a   : > { %2188 = vst [vmem:[%s3341_s8 + $0x1f8] sm:$0xff] %v2124_v36 }
 0x26b PF: > { %s13_s14 = sadd.s32 1, %s2964_s14   ;;  %s4584_s12 = smov %s2960_s13 }
 0x26c   : > { %p10_p5 = scmp.ge.s32.totalorder %s13_s14, 4   ;;  %s4585_s13 = smov %s4587_s15 }
 0x26e   :  { %12 = sbr.rel (!%p10_p5) target bundleno = 2 (0x2), region = 68 }

// kernel: forward.12
= control target key start
LH: loop header
LB: loop body
LE: loop exit
PB: predicated region body
PF: predicated region fallthrough
CT: control target
= control target key end

     0   :  { %s2780_s12 = smov 0   ;;  %s2782_s13 = smov 0   ;;  %s4140_s0 = inlined_call_operand.vmem [shape: bf16[1024,128], index: 0, kind: input, shape index: {}]   ;;  %s4141_s1 = inlined_call_operand.vmem [shape: bf16[128,128], index: 1, kind: input, shape index: {}]   ;;  %s4142_s2 = inlined_call_operand.vmem [shape: f32[1,128], index: 2, kind: input, shape index: {}]   ;;  %s4143_s3 = inlined_call_operand.vmem [shape: f32[1024,128], index: 3, kind: output, shape index: {}]  }
   0x1   :  { %s2784_s14 = smov 0  }
   0x2 LB: > { %s25_s15 = sadd.s32 1, %s2754_s13  ;;  %p2102_p0 = scmp.ge.s32.totalorder %s2758_s14, 1  ;;  %s2758_s14 = sphi %s2784_s14, %s13_s14   ;;  %s2754_s13 = sphi %s2782_s13, %s4270_s13   ;;  %s2750_s12 = sphi %s2780_s12, %s4269_s12  }
   0x3   : > { %p27_p1 = scmp.ge.s32.totalorder %s25_s15, 2  ;;  %p169_p2 = scmp.lt.s32.totalorder %s2758_s14, 3 }
   0x5   : > { %s4272_s15 = smov (%p27_p1, %s25_s15), 0  ;;  %p170_p3 = pnand %p2102_p0, %p169_p2 }
   0x7   : > { %173 = sbr.rel (%p170_p3) target bundleno = 589 (0x24d), region = 32 }
   0xe   : > { %v2310_v0 = vld [vmem:[%s4141_s1] sm:$0xff]   ;;  %s2103_s18 = sshll.u32 %s2750_s12, 6  ;;  %v2311_v1 = vld [vmem:[%s4141_s1 + $0x8] sm:$0xff]   ;;  %v2312_v2 = vld [vmem:[%s4141_s1 + $0x10] sm:$0xff]  }
   0xf   : > { %p204_p4 = scmp.lt.s32.totalorder %s2103_s18, 127  ;;  %2190 = vmatprep.subr.bf16.mxu0 %v2310_v0  ;;  %2270 = vmatprep.subr.bf16.mxu1 %v2310_v0  ;;  %v2313_v3 = vld [vmem:[%s4141_s1 + $0x18] sm:$0xff]   ;;  %v2314_v6 = vld [vmem:[%s4141_s1 + $0x20] sm:$0xff]   ;;  %v2315_v7 = vld [vmem:[%s4141_s1 + $0x28] sm:$0xff]  }
  0x10   : > { %2191 = vmatpush3.bf16.msra.mxu0 %v2310_v0  ;;  %2278 = vmatpush3.bf16.msra.mxu1 %v2310_v0  ;;  %v2316_v8 = vld [vmem:[%s4141_s1 + $0x30] sm:$0xff]   ;;  %v2317_v9 = vld [vmem:[%s4141_s1 + $0x38] sm:$0xff]   ;;  %v2865_v40 = vld [vmem:[%s4142_s2] ss:$0 sm:$0xff] }
  0x11   : > { %s4274_s18 = smov (!%p204_p4, %s2103_s18), 127  ;;  %2192 = vmatprep.subr.bf16.mxu0 %v2311_v1  ;;  %2271 = vmatprep.subr.bf16.mxu1 %v2311_v1 }
  0x12   : > { %s2104_s23 = sshll.u32 %s4274_s18, 2  ;;  %s2106_s12 = sshll.u32 %s4274_s18, 3 }
  0x13   : > { %s2813_s26 = scalar_lea.vmem %s4140_s0, %s2104_s23  ;;  %s3101_s18 = scalar_lea.vmem %s4143_s3, %s2106_s12 }
  0x14   : > { %2193 = vmatpush3.bf16.msra.mxu0 %v2311_v1  ;;  %2279 = vmatpush3.bf16.msra.mxu1 %v2311_v1  ;;  %v2318_v4 = vld [vmem:[%s2813_s26] sm:$0xff]   ;;  %v2320_v10 = vld [vmem:[%s2813_s26 + $0x8] sm:$0xff]   ;;  %v2322_v12 = vld [vmem:[%s2813_s26 + $0x10] sm:$0xff]  }
  0x15   : > { %2194 = vmatprep.subr.bf16.mxu0 %v2312_v2  ;;  %2272 = vmatprep.subr.bf16.mxu1 %v2312_v2  ;;  %v2319_v5 = vld [vmem:[%s2813_s26 + $0x80] sm:$0xff]   ;;  %v2321_v11 = vld [vmem:[%s2813_s26 + $0x88] sm:$0xff]   ;;  %v2323_v13 = vld [vmem:[%s2813_s26 + $0x90] sm:$0xff]  }
  0x16   : > { %2206 = vmatprep.mubr.bf16.mxu0 %v2318_v4  ;;  %2238 = vmatprep.mubr.bf16.mxu1 %v2319_v5  ;;  %v2324_v14 = vld [vmem:[%s2813_s26 + $0x18] sm:$0xff]   ;;  %v2326_v16 = vld [vmem:[%s2813_s26 + $0x20] sm:$0xff]   ;;  %v2328_v18 = vld [vmem:[%s2813_s26 + $0x28] sm:$0xff]  }
  0x17   : > { %v2325_v15 = vld [vmem:[%s2813_s26 + $0x98] sm:$0xff]   ;;  %v2327_v17 = vld [vmem:[%s2813_s26 + $0xa0] sm:$0xff]   ;;  %v2329_v19 = vld [vmem:[%s2813_s26 + $0xa8] sm:$0xff]  }
  0x18   : > { %2195 = vmatpush3.bf16.msra.mxu0 %v2312_v2  ;;  %2280 = vmatpush3.bf16.msra.mxu1 %v2312_v2  ;;  %v2330_v20 = vld [vmem:[%s2813_s26 + $0x30] sm:$0xff]   ;;  %v2332_v22 = vld [vmem:[%s2813_s26 + $0x38] sm:$0xff]   ;;  %v2334_v24 = vld [vmem:[%s2813_s26 + $0x40] sm:$0xff]  }
  0x19   : > { %2196 = vmatprep.subr.bf16.mxu0 %v2313_v3  ;;  %2273 = vmatprep.subr.bf16.mxu1 %v2313_v3  ;;  %v2331_v21 = vld [vmem:[%s2813_s26 + $0xb0] sm:$0xff]   ;;  %v2333_v23 = vld [vmem:[%s2813_s26 + $0xb8] sm:$0xff]   ;;  %v2335_v25 = vld [vmem:[%s2813_s26 + $0xc0] sm:$0xff]  }
  0x1a   : > { %v2336_v26 = vld [vmem:[%s2813_s26 + $0x48] sm:$0xff]   ;;  %v2338_v28 = vld [vmem:[%s2813_s26 + $0x50] sm:$0xff]   ;;  %v2340_v30 = vld [vmem:[%s2813_s26 + $0x58] sm:$0xff]  }
  0x1b   : > { %v2337_v27 = vld [vmem:[%s2813_s26 + $0xc8] sm:$0xff]   ;;  %v2339_v29 = vld [vmem:[%s2813_s26 + $0xd0] sm:$0xff]   ;;  %v2341_v31 = vld [vmem:[%s2813_s26 + $0xd8] sm:$0xff]  }
  0x1c   : > { %2197 = vmatpush3.bf16.msra.mxu0 %v2313_v3  ;;  %2281 = vmatpush3.bf16.msra.mxu1 %v2313_v3  ;;  %v2342_v32 = vld [vmem:[%s2813_s26 + $0x60] sm:$0xff]   ;;  %v2344_v34 = vld [vmem:[%s2813_s26 + $0x68] sm:$0xff]   ;;  %v2346_v36 = vld [vmem:[%s2813_s26 + $0x70] sm:$0xff]  }
  0x1d   : > { %2198 = vmatprep.subr.bf16.mxu0 %v2314_v6  ;;  %2274 = vmatprep.subr.bf16.mxu1 %v2314_v6  ;;  %v2343_v33 = vld [vmem:[%s2813_s26 + $0xe0] sm:$0xff]   ;;  %v2345_v35 = vld [vmem:[%s2813_s26 + $0xe8] sm:$0xff]   ;;  %v2347_v37 = vld [vmem:[%s2813_s26 + $0xf0] sm:$0xff]  }
  0x1e   : > { %v2348_v38 = vld [vmem:[%s2813_s26 + $0x78] sm:$0xff]  }
  0x1f   : > { %v2349_v39 = vld [vmem:[%s2813_s26 + $0xf8] sm:$0xff]  }
  0x20   : > { %2199 = vmatpush3.bf16.msra.mxu0 %v2314_v6  ;;  %2282 = vmatpush3.bf16.msra.mxu1 %v2314_v6 }
  0x21   : > { %2200 = vmatprep.subr.bf16.mxu0 %v2315_v7  ;;  %2275 = vmatprep.subr.bf16.mxu1 %v2315_v7 }
  0x24   : > { %2201 = vmatpush3.bf16.msra.mxu0 %v2315_v7  ;;  %2283 = vmatpush3.bf16.msra.mxu1 %v2315_v7 }
  0x25   : > { %2202 = vmatprep.subr.bf16.mxu0 %v2316_v8  ;;  %2276 = vmatprep.subr.bf16.mxu1 %v2316_v8 }
  0x28   : > { %2203 = vmatpush3.bf16.msra.mxu0 %v2316_v8  ;;  %2284 = vmatpush3.bf16.msra.mxu1 %v2316_v8 }
  0x29   : > { %2204 = vmatprep.subr.bf16.mxu0 %v2317_v9  ;;  %2277 = vmatprep.subr.bf16.mxu1 %v2317_v9 }
  0x2c   : > { %2205 = vmatpush3.bf16.msra.mxu0 %v2317_v9  ;;  %2285 = vmatpush3.bf16.msra.mxu1 %v2317_v9 }
  0x2f   : > { %2207 = vmatmul.mubr.bf16.vlgmr.msra.gmra.mrb[0].mxu0 %v2320_v10  ;;  %2239 = vmatmul.mubr.bf16.vlgmr.msra.gmra.mrb[0].mxu1 %v2321_v11 }
  0x30   : > { %2210 = vmatprep.mubr.bf16.mxu0 %v2322_v12  ;;  %2242 = vmatprep.mubr.bf16.mxu1 %v2323_v13 }
  0x37   : > { %2211 = vmatmul.mubr.bf16.gmra.mrb[4].mxu0 %v2324_v14  ;;  %2243 = vmatmul.mubr.bf16.gmra.mrb[4].mxu1 %v2325_v15 }
  0x38   : > { %2214 = vmatprep.mubr.bf16.mxu0 %v2326_v16  ;;  %2246 = vmatprep.mubr.bf16.mxu1 %v2327_v17 }
  0x3f   : > { %2215 = vmatmul.mubr.bf16.gmra.mrb[8].mxu0 %v2328_v18  ;;  %2247 = vmatmul.mubr.bf16.gmra.mrb[8].mxu1 %v2329_v19 }
  0x40   : > { %2218 = vmatprep.mubr.bf16.mxu0 %v2330_v20  ;;  %2250 = vmatprep.mubr.bf16.mxu1 %v2331_v21 }
  0x47   : > { %2219 = vmatmul.mubr.bf16.gmra.mrb[12].mxu0 %v2332_v22  ;;  %2251 = vmatmul.mubr.bf16.gmra.mrb[12].mxu1 %v2333_v23 }
  0x48   : > { %2222 = vmatprep.mubr.bf16.mxu0 %v2334_v24  ;;  %2254 = vmatprep.mubr.bf16.mxu1 %v2335_v25 }
  0x4f   : > { %2223 = vmatmul.mubr.bf16.gmra.mrb[16].mxu0 %v2336_v26  ;;  %2255 = vmatmul.mubr.bf16.gmra.mrb[16].mxu1 %v2337_v27 }
  0x50   : > { %2226 = vmatprep.mubr.bf16.mxu0 %v2338_v28  ;;  %2258 = vmatprep.mubr.bf16.mxu1 %v2339_v29 }
  0x57   : > { %2227 = vmatmul.mubr.bf16.gmra.mrb[20].mxu0 %v2340_v30  ;;  %2259 = vmatmul.mubr.bf16.gmra.mrb[20].mxu1 %v2341_v31 }
  0x58   : > { %2230 = vmatprep.mubr.bf16.mxu0 %v2342_v32  ;;  %2262 = vmatprep.mubr.bf16.mxu1 %v2343_v33 }
  0x5f   : > { %2231 = vmatmul.mubr.bf16.gmra.mrb[24].mxu0 %v2344_v34  ;;  %2263 = vmatmul.mubr.bf16.gmra.mrb[24].mxu1 %v2345_v35 }
  0x60   : > { %2234 = vmatprep.mubr.bf16.mxu0 %v2346_v36  ;;  %2266 = vmatprep.mubr.bf16.mxu1 %v2347_v37 }
  0x67   : > { %2235 = vmatmul.mubr.bf16.gmra.mrb[28].mxu0 %v2348_v38  ;;  %2267 = vmatmul.mubr.bf16.gmra.mrb[28].mxu1 %v2349_v39 }
 0x102   : > { %v2208_v41 = vpop.f32.mrb[0].mxu0  ;;  %v2240_v42 = vpop.f32.mrb[0].mxu1 }
 0x103   : > { %v2868_v43 = vadd.f32 %v2208_v41, %v2865_v40  ;;  %v2871_v44 = vadd.f32 %v2240_v42, %v2865_v40  ;;  %v587_v45 = vpop.f32.mrb[1].mxu0  ;;  %v715_v46 = vpop.f32.mrb[1].mxu1 }
 0x104   : > { %v2874_v47 = vadd.f32 %v2865_v40, %v587_v45  ;;  %v2877_v48 = vadd.f32 %v2865_v40, %v715_v46  ;;  %v2209_v49 = vpop.f32.mrb[2].mxu0  ;;  %v2241_v50 = vpop.f32.mrb[2].mxu1 }
 0x105   : > { %v908_v51 = vand.u32 2147483647, %v2868_v43  ;;  %v940_v52 = vand.u32 2147483647, %v2871_v44  ;;  %v2884_v57 = vadd.f32 %v2209_v49, %v2865_v40  ;;  %v2887_v58 = vadd.f32 %v2241_v50, %v2865_v40  ;;  %v590_v59 = vpop.f32.mrb[3].mxu0  ;;  %v718_v60 = vpop.f32.mrb[3].mxu1 }
 0x106   : > { %v906_v53 = vand.u32 2147483647, %v2874_v47  ;;  %v938_v54 = vand.u32 2147483647, %v2877_v48  ;;  %v2890_v63 = vadd.f32 %v2865_v40, %v590_v59  ;;  %v2893_v0 = vadd.f32 %v2865_v40, %v718_v60 }
 0x107   : > { %v972_v55 = vsub.f32 0.0, %v908_v51  ;;  %v1004_v56 = vsub.f32 0.0, %v940_v52  ;;  %v909_v5 = vand.u32 2147483647, %v2884_v57  ;;  %v941_v6 = vand.u32 2147483647, %v2887_v58 }
 0x108   : > { %v970_v61 = vsub.f32 0.0, %v906_v53  ;;  %v1002_v62 = vsub.f32 0.0, %v938_v54  ;;  %v907_v7 = vand.u32 2147483647, %v2890_v63  ;;  %v939_v10 = vand.u32 2147483647, %v2893_v0 }
 0x109   : > { %v1038_v1 = vmul.f32 1.442695, %v972_v55  ;;  %v1102_v2 = vmul.f32 1.442695, %v1004_v56  ;;  %v973_v9 = vsub.f32 0.0, %v909_v5  ;;  %v1005_v13 = vsub.f32 0.0, %v941_v6 }
 0x10a   : > { %v1034_v3 = vmul.f32 1.442695, %v970_v61  ;;  %v1098_v4 = vmul.f32 1.442695, %v1002_v62  ;;  %v2212_v8 = vpop.f32.mrb[4].mxu0  ;;  %v2244_v11 = vpop.f32.mrb[4].mxu1 }
 0x10b   : > { %2350 = vpow2.f32 %v1038_v1  ;;  %v603_v12 = vpop.f32.mrb[5].mxu0  ;;  %v971_v14 = vsub.f32 0.0, %v907_v7  ;;  %v2900_v15 = vadd.f32 %v2212_v8, %v2865_v40  ;;  %v731_v16 = vpop.f32.mrb[5].mxu1  ;;  %v1040_v18 = vmul.f32 1.442695, %v973_v9 }
 0x10c   : > { %2352 = vpow2.f32 %v1102_v2  ;;  %v2213_v17 = vpop.f32.mrb[6].mxu0  ;;  %v1003_v19 = vsub.f32 0.0, %v939_v10  ;;  %v2903_v20 = vadd.f32 %v2244_v11, %v2865_v40  ;;  %v2245_v21 = vpop.f32.mrb[6].mxu1  ;;  %v1104_v23 = vmul.f32 1.442695, %v1005_v13 }
 0x10d   : > { %2354 = vpow2.f32 %v1034_v3  ;;  %v606_v22 = vpop.f32.mrb[7].mxu0  ;;  %v1036_v24 = vmul.f32 1.442695, %v971_v14  ;;  %v2906_v25 = vadd.f32 %v2865_v40, %v603_v12  ;;  %v2908_v26 = vpop.f32.mrb[7].mxu1  ;;  %v912_v28 = vand.u32 2147483647, %v2900_v15 }
 0x10e   : > { %2356 = vpow2.f32 %v1098_v4  ;;  %v1100_v27 = vmul.f32 1.442695, %v1003_v19  ;;  %v944_v30 = vand.u32 2147483647, %v2903_v20  ;;  %v2916_v34 = vadd.f32 %v2865_v40, %v731_v16 }
 0x10f   : > { %2358 = vpow2.f32 %v1040_v18  ;;  %v910_v31 = vand.u32 2147483647, %v2906_v25  ;;  %v976_v33 = vsub.f32 0.0, %v912_v28  ;;  %v2934_v55 = vadd.f32 %v2213_v17, %v2865_v40 }
 0x110   : > { %2360 = vpow2.f32 %v1104_v23  ;;  %v1008_v41 = vsub.f32 0.0, %v944_v30  ;;  %v2944_v6 = vadd.f32 %v2245_v21, %v2865_v40  ;;  %v2956_v21 = vadd.f32 %v2865_v40, %v606_v22 }
 0x111   : > { %2362 = vpow2.f32 %v1036_v24  ;;  %v1046_v49 = vmul.f32 1.442695, %v976_v33  ;;  %v974_v50 = vsub.f32 0.0, %v910_v31 }
 0x112   : > { %v2918_v35 = vpop.f32.mrb[8].mxu0  ;;  %v2920_v36 = vpop.f32.mrb[8].mxu1  ;;  %2364 = vpow2.f32 %v1100_v27  ;;  %v1110_v5 = vmul.f32 1.442695, %v1008_v41 }
 0x113   : > { %v2925_v42 = vpop.f32.mrb[9].mxu0  ;;  %v2927_v45 = vpop.f32.mrb[9].mxu1  ;;  %2366 = vpow2.f32 %v1046_v49  ;;  %v2951_v12 = vmul.f32 1.442695, %v974_v50 }
 0x114   : > { %v2937_v62 = vpop.f32.mrb[10].mxu0  ;;  %v2939_v1 = vpop.f32.mrb[10].mxu1 }
 0x115   : > { %v2351_v51 = vpop.eup %2350  ;;  %v2946_v7 = vpop.f32.mrb[11].mxu0 }
 0x116   : > { %v2353_v56 = vpop.eup %2352  ;;  %v1180_v59 = vadd.f32 1.0, %v2351_v51  ;;  %v1183_v60 = vmul.f32 -0.5, %v2351_v51  ;;  %v2948_v8 = vpop.f32.mrb[11].mxu1  ;;  %v1186_v10 = vand.u32 2147483647, %v2351_v51 }
 0x117   : > { %v2941_v2 = vpop.eup %2354  ;;  %v1468_v3 = vadd.f32 1.0, %v2353_v56  ;;  %v1471_v4 = vmul.f32 -0.5, %v2353_v56  ;;  %v1474_v14 = vand.u32 2147483647, %v2353_v56 }
 0x118   : > { %v2357_v9 = vpop.eup %2356  ;;  %2368 = vlog2.f32 %v1180_v59  ;;  %v1162_v11 = vadd.f32 1.0, %v2941_v2  ;;  %v1184_v13 = vadd.f32 1.0, %v1183_v60  ;;  %v1165_v16 = vmul.f32 -0.5, %v2941_v2 }
 0x119   : > { %2370 = vlog2.f32 %v1468_v3  ;;  %v2359_v17 = vpop.eup %2358  ;;  %v1450_v18 = vadd.f32 1.0, %v2357_v9  ;;  %v1472_v28 = vadd.f32 1.0, %v1471_v4  ;;  %v1168_v30 = vand.u32 2147483647, %v2941_v2 }
 0x11a   : > { %2372 = vlog2.f32 %v1162_v11  ;;  %v2958_v23 = vpop.f32.mrb[12].mxu0  ;;  %v2960_v24 = vpop.f32.mrb[12].mxu1  ;;  %v1453_v31 = vmul.f32 -0.5, %v2357_v9  ;;  %vm2969_vm0 = vcmp.lt.f32.partialorder %v1186_v10, 0.0004427343  ;;  %v1189_v22 = vadd.f32 1.0, %v2359_v17 }
 0x11b   : > { %v2361_v27 = vpop.eup %2360  ;;  %2374 = vpow2.f32 %v1110_v5  ;;  %v2963_v33 = vpop.f32.mrb[13].mxu0  ;;  %v1192_v59 = vmul.f32 -0.5, %v2359_v17  ;;  %v1185_v4 = vmul.f32 %v2351_v51, %v1184_v13  ;;  %vm2977_vm1 = vcmp.lt.f32.partialorder %v1474_v14, 0.0004427343 }
 0x11c   : > { %v2965_v41 = vpop.f32.mrb[13].mxu1  ;;  %v2967_v49 = vpop.eup %2362  ;;  %2376 = vlog2.f32 %v1450_v18  ;;  %v1166_v11 = vadd.f32 1.0, %v1165_v16  ;;  %v1454_v54 = vadd.f32 1.0, %v1453_v31  ;;  %v1456_v53 = vand.u32 2147483647, %v2357_v9 }
 0x11d   : > { %4144 = vst [vmem:[#allocation2_spill] sm:$0xff] %v2965_v41  ;;  %v2973_v60 = vpop.f32.mrb[14].mxu0  ;;  %v2975_v3 = vpop.f32.mrb[14].mxu1  ;;  %2378 = vlog2.f32 %v1189_v22  ;;  %v1195_v18 = vand.u32 2147483647, %v2359_v17  ;;  %v1477_v52 = vadd.f32 1.0, %v2361_v27  ;;  %v1473_v61 = vmul.f32 %v2353_v56, %v1472_v28 }
 0x11e   : > { %4147 = vst [vmem:[#allocation3_spill] sm:$0xff] %v2973_v60  ;;  %4148 = vst [vmem:[#allocation4_spill] sm:$0xff] %v2975_v3  ;;  %v2981_v19 = vpop.f32.mrb[15].mxu0  ;;  %v2983_v10 = vpop.eup %2364  ;;  %v1480_v46 = vmul.f32 -0.5, %v2361_v27  ;;  %vm2987_vm2 = vcmp.lt.f32.partialorder %v1168_v30, 0.0004427343  ;;  %v1455_v32 = vmul.f32 %v2357_v9, %v1454_v54 }
 0x11f   : > { %4151 = vst [vmem:[#allocation5_spill] sm:$0xff] %v2981_v19  ;;  %v2985_v39 = vpop.f32.mrb[15].mxu1  ;;  %v1193_v13 = vadd.f32 1.0, %v1192_v59  ;;  %v1171_v14 = vadd.f32 1.0, %v2967_v49  ;;  %v2992_v16 = vpop.eup %2366  ;;  %2380 = vlog2.f32 %v1477_v52  ;;  %v1483_v38 = vand.u32 2147483647, %v2361_v27 }
 0x120   : > { %4152 = vst [vmem:[#allocation6_spill] sm:$0xff] %v2985_v39  ;;  %v1481_v31 = vadd.f32 1.0, %v1480_v46  ;;  %v1174_v22 = vmul.f32 -0.5, %v2967_v49  ;;  %vm2995_vm3 = vcmp.lt.f32.partialorder %v1456_v53, 0.0004427343  ;;  %v1459_v28 = vadd.f32 1.0, %v2983_v10 }
 0x121   : > { %2382 = vlog2.f32 %v1171_v14  ;;  %v1177_v56 = vand.u32 2147483647, %v2967_v49  ;;  %v1167_v59 = vmul.f32 %v2941_v2, %v1166_v11  ;;  %vm3002_vm4 = vcmp.lt.f32.partialorder %v1195_v18, 0.0004427343 }
 0x122   : > { %v2369_v30 = vpop.eup %2368  ;;  %v1462_v46 = vmul.f32 -0.5, %v2983_v10  ;;  %v3007_v52 = vpop.f32.mrb[16].mxu0  ;;  %v1175_v19 = vadd.f32 1.0, %v1174_v22  ;;  %2384 = vlog2.f32 %v1459_v28  ;;  %v1216_v3 = vadd.f32 1.0, %v2992_v16 }
 0x123   : > { %4159 = vst [vmem:[#allocation7_spill] sm:$0xff] %v3007_v52  ;;  %v3009_v53 = vpop.f32.mrb[16].mxu1  ;;  %v2371_v39 = vpop.eup %2370  ;;  %v1182_v14 = vmul.f32 0.6931472, %v2369_v30  ;;  %v1194_v9 = vmul.f32 %v2359_v17, %v1193_v13  ;;  %v1482_v11 = vmul.f32 %v2361_v27, %v1481_v31  ;;  %vm3014_vm5 = vcmp.lt.f32.partialorder %v1483_v38, 0.0004427343 }
 0x124   : > { %4160 = vst [vmem:[#allocation8_spill] sm:$0xff] %v3009_v53  ;;  %v3012_v60 = vpop.f32.mrb[17].mxu0  ;;  %v2373_v2 = vpop.eup %2372  ;;  %v1470_v54 = vmul.f32 0.6931472, %v2371_v39  ;;  %v1465_v52 = vand.u32 2147483647, %v2983_v10  ;;  %2386 = vlog2.f32 %v1216_v3 }
 0x125   : > { %v3019_v41 = vpop.f32.mrb[17].mxu1  ;;  %v3021_v53 = vpop.eup %2374  ;;  %v1188_v22 = vsel %vm2969_vm0, %v1185_v4, %v1182_v14  ;;  %v1164_v28 = vmul.f32 0.6931472, %v2373_v2  ;;  %vm3025_vm6 = vcmp.lt.f32.partialorder %v1177_v56, 0.0004427343  ;;  %v4168_v27 = vmax.f32 %v2868_v43, 0.0 }
 0x126   : > { %4163 = vst [vmem:[#allocation9_spill] sm:$0xff] %v3019_v41  ;;  %v3029_v39 = vpop.f32.mrb[18].mxu0  ;;  %v3031_v38 = vpop.f32.mrb[18].mxu1  ;;  %v1476_v31 = vsel %vm2977_vm1, %v1473_v61, %v1470_v54  ;;  %v1463_v41 = vadd.f32 1.0, %v1462_v46  ;;  %v1219_v50 = vmul.f32 -0.5, %v2992_v16  ;;  %v4169_v3 = vmax.f32 %v2871_v44, 0.0 }
 0x127   : > { %4166 = vst [vmem:[#allocation10_spill] sm:$0xff] %v3029_v39  ;;  %4167 = vst [vmem:[#allocation11_spill] sm:$0xff] %v3031_v38  ;;  %v2377_v17 = vpop.eup %2376  ;;  %v1740_v13 = vadd.f32 %v1188_v22, %v4168_v27  ;;  %v3038_v4 = vpop.f32.mrb[19].mxu0  ;;  %v1170_v2 = vsel %vm2987_vm2, %v1167_v59, %v1164_v28  ;;  %v1176_v39 = vmul.f32 %v2967_v49, %v1175_v19  ;;  %v4170_v61 = vmax.f32 %v2874_v47, 0.0 }
 0x128   : > { %v3040_v56 = vpop.f32.mrb[19].mxu1  ;;  %v1772_v14 = vadd.f32 %v1476_v31, %v4169_v3  ;;  %v1452_v38 = vmul.f32 0.6931472, %v2377_v17  ;;  %v2379_v22 = vpop.eup %2378  ;;  %v1222_v46 = vand.u32 2147483647, %v2992_v16  ;;  %v1504_v54 = vadd.f32 1.0, %v3021_v53 }
 0x129   : > { %2388 = vtanh.f32 %v1740_v13  ;;  %v1738_v5 = vadd.f32 %v1170_v2, %v4170_v61  ;;  %v1191_v31 = vmul.f32 0.6931472, %v2379_v22  ;;  %vm3053_vm7 = vcmp.lt.f32.partialorder %v1465_v52, 0.0004427343  ;;  %v2381_v59 = vpop.eup %2380 }
 0x12a   : > { %2390 = vtanh.f32 %v1772_v14  ;;  %v1458_v27 = vsel %vm2995_vm3, %v1455_v32, %v1452_v38  ;;  %v4173_v19 = vmax.f32 %v2877_v48, 0.0  ;;  %v1464_v28 = vmul.f32 %v2983_v10, %v1463_v41  ;;  %v3060_v13 = vpop.f32.mrb[20].mxu0  ;;  %v3062_v3 = vpop.f32.mrb[20].mxu1 }
 0x12b   : > { %2392 = vtanh.f32 %v1738_v5  ;;  %v1220_v17 = vadd.f32 1.0, %v1219_v50  ;;  %v2383_v14 = vpop.eup %2382  ;;  %v1197_v32 = vsel %vm3002_vm4, %v1194_v9, %v1191_v31  ;;  %v1479_v37 = vmul.f32 0.6931472, %v2381_v59  ;;  %v3068_v2 = vpop.f32.mrb[21].mxu0 }
 0x12c   : > { %v1770_v49 = vadd.f32 %v1458_v27, %v4173_v19  ;;  %2394 = vlog2.f32 %v1504_v54  ;;  %v4174_v52 = vand.u32 2147483647, %v2916_v34  ;;  %v4175_v41 = vmax.f32 %v2884_v57, 0.0  ;;  %v2385_v61 = vpop.eup %2384 }
 0x12d   : > { %v1173_v50 = vmul.f32 0.6931472, %v2383_v14  ;;  %vm3072_vm8 = vcmp.lt.f32.partialorder %v1222_v46, 0.0004427343  ;;  %v1485_v29 = vsel %vm3014_vm5, %v1482_v11, %v1479_v37  ;;  %v1507_v9 = vmul.f32 -0.5, %v3021_v53  ;;  %v3090_v14 = vpop.f32.mrb[21].mxu1 }
 0x12e   : > { %v1006_v38 = vsub.f32 0.0, %v4174_v52  ;;  %2396 = vtanh.f32 %v1770_v49  ;;  %v1741_v10 = vadd.f32 %v1197_v32, %v4175_v41  ;;  %v4178_v54 = vmax.f32 %v2887_v58, 0.0  ;;  %v2387_v59 = vpop.eup %2386 }
 0x12f   : > { %2398 = vpow2.f32 %v2951_v12  ;;  %v1179_v31 = vsel %vm3025_vm6, %v1176_v39, %v1173_v50  ;;  %v1461_v46 = vmul.f32 0.6931472, %v2385_v61  ;;  %v4179_v19 = vmax.f32 %v2890_v63, 0.0 }
 0x130   : > { %v1106_v5 = vmul.f32 1.442695, %v1006_v38  ;;  %2400 = vtanh.f32 %v1741_v10  ;;  %v1773_v27 = vadd.f32 %v1485_v29, %v4178_v54  ;;  %v1221_v11 = vmul.f32 %v2992_v16, %v1220_v17 }
 0x131   : > { %v1739_v49 = vadd.f32 %v1179_v31, %v4179_v19  ;;  %v4180_v18 = vand.u32 2147483647, %v2934_v55  ;;  %v1467_v32 = vsel %vm3053_vm7, %v1464_v28, %v1461_v46  ;;  %v1218_v30 = vmul.f32 0.6931472, %v2387_v59 }
 0x132   : > { %2402 = vpow2.f32 %v1106_v5  ;;  %v1510_v39 = vand.u32 2147483647, %v3021_v53  ;;  %v4181_v37 = vmax.f32 %v2893_v0, 0.0  ;;  %v945_v16 = vand.u32 2147483647, %v2944_v6 }
 0x133   : > { %v977_v12 = vsub.f32 0.0, %v4180_v18  ;;  %2404 = vtanh.f32 %v1773_v27  ;;  %v2389_v17 = vpop.eup %2388  ;;  %v1224_v51 = vsel %vm3072_vm8, %v1221_v11, %v1218_v30  ;;  %v1508_v28 = vadd.f32 1.0, %v1507_v9 }
 0x134   : > { %2406 = vtanh.f32 %v1739_v49  ;;  %v1771_v52 = vadd.f32 %v1467_v32, %v4181_v37  ;;  %v911_v41 = vand.u32 2147483647, %v2956_v21  ;;  %v3108_v10 = vadd.f32 %v2865_v40, %v2908_v26  ;;  %v2391_v50 = vpop.eup %2390 }
 0x135   : > { %v1048_v38 = vmul.f32 1.442695, %v977_v12  ;;  %v1868_v61 = vmul.f32 %v2389_v17, %v2868_v43  ;;  %v4182_v29 = vmax.f32 %v2900_v15, 0.0  ;;  %v1009_v54 = vsub.f32 0.0, %v945_v16  ;;  %v2393_v27 = vpop.eup %2392 }
 0x136   : > { %2408 = vtanh.f32 %v1771_v52  ;;  %v1900_v22 = vmul.f32 %v2391_v50, %v2871_v44  ;;  %v975_v9 = vsub.f32 0.0, %v911_v41  ;;  %v2395_v31 = vpop.eup %2394  ;;  %v1866_v26 = vmul.f32 %v2393_v27, %v2874_v47  ;;  %v3137_v41 = vpop.f32.mrb[22].mxu1 }
 0x137   : > { %v1744_v5 = vadd.f32 %v1224_v51, %v4182_v29  ;;  %2410 = vpow2.f32 %v1048_v38  ;;  %1932 = vst [vmem:[%s3101_s18 + $0x10] sm:$0xff] %v1868_v61  ;;  %v1112_v46 = vmul.f32 1.442695, %v1009_v54  ;;  %v943_v59 = vand.u32 2147483647, %v3108_v10  ;;  %v3129_v38 = vpop.f32.mrb[22].mxu0 }
 0x138   : > { %v2397_v43 = vpop.eup %2396  ;;  %1964 = vst [vmem:[%s3101_s18 + $0x110] sm:$0xff] %v1900_v22  ;;  %v880_v19 = vmax.f32 %v2903_v20, 0.0  ;;  %v1506_v49 = vmul.f32 0.6931472, %v2395_v31  ;;  %v1509_v11 = vmul.f32 %v3021_v53, %v1508_v28  ;;  %v1044_v44 = vmul.f32 1.442695, %v975_v9  ;;  %1930 = vst [vmem:[%s3101_s18] sm:$0xff] %v1866_v26 }
 0x139   : > { %2412 = vtanh.f32 %v1744_v5  ;;  %v3120_v18 = vpop.eup %2398  ;;  %v1898_v12 = vmul.f32 %v2397_v43, %v2877_v48  ;;  %vm1511_vm9 = vcmp.lt.f32.partialorder %v1510_v39, 0.0004427343  ;;  %v1007_v47 = vsub.f32 0.0, %v943_v59 }
 0x13a   : > { %2414 = vpow2.f32 %v1112_v46  ;;  %v2401_v32 = vpop.eup %2400  ;;  %v1512_v30 = vsel %vm1511_vm9, %v1509_v11, %v1506_v49  ;;  %v1198_v37 = vadd.f32 1.0, %v3120_v18  ;;  %v3127_v52 = vadd.f32 %v2918_v35, %v2865_v40 }
 0x13b   : > { %1962 = vst [vmem:[%s3101_s18 + $0x100] sm:$0xff] %v1898_v12  ;;  %v1869_v16 = vmul.f32 %v2401_v32, %v2884_v57  ;;  %v1776_v17 = vadd.f32 %v1512_v30, %v880_v19  ;;  %2416 = vpow2.f32 %v1044_v44  ;;  %v1108_v48 = vmul.f32 1.442695, %v1007_v47 }
 0x13c   : > { %v2403_v53 = vpop.eup %2402  ;;  %2418 = vlog2.f32 %v1198_v37  ;;  %v3135_v28 = vadd.f32 %v2920_v36, %v2865_v40  ;;  %v1201_v57 = vmul.f32 -0.5, %v3120_v18  ;;  %v846_v29 = vmax.f32 %v2906_v25, 0.0  ;;  %v3165_v37 = vpop.f32.mrb[23].mxu0 }
 0x13d   : > { %v2405_v39 = vpop.eup %2404  ;;  %v1486_v51 = vadd.f32 1.0, %v2403_v53  ;;  %1933 = vst [vmem:[%s3101_s18 + $0x18] sm:$0xff] %v1869_v16  ;;  %2420 = vtanh.f32 %v1776_v17  ;;  %v1489_v5 = vmul.f32 -0.5, %v2403_v53  ;;  %v878_v36 = vmax.f32 %v2916_v34, 0.0  ;;  %v3167_v16 = vpop.f32.mrb[23].mxu1 }
 0x13e   : > { %v2407_v35 = vpop.eup %2406  ;;  %v1901_v50 = vmul.f32 %v2405_v39, %v2887_v58  ;;  %v916_v27 = vand.u32 2147483647, %v3127_v52  ;;  %v3149_v58 = vadd.f32 %v2865_v40, %v2925_v42  ;;  %v1204_v9 = vand.u32 2147483647, %v3120_v18 }
 0x13f   : > { %v1867_v61 = vmul.f32 %v2407_v35, %v2890_v63  ;;  %2422 = vlog2.f32 %v1486_v51  ;;  %v849_v31 = vmax.f32 %v2934_v55, 0.0  ;;  %v948_v26 = vand.u32 2147483647, %v3135_v28 }
 0x140   : > { %v2409_v54 = vpop.eup %2408  ;;  %1965 = vst [vmem:[%s3101_s18 + $0x118] sm:$0xff] %v1901_v50  ;;  %2424 = vpow2.f32 %v1108_v48  ;;  %v1202_v59 = vadd.f32 1.0, %v1201_v57  ;;  %v1492_v43 = vand.u32 2147483647, %v2403_v53  ;;  %v881_v42 = vmax.f32 %v2944_v6, 0.0 }
 0x141   : > { %v3151_v22 = vpop.eup %2410  ;;  %1931 = vst [vmem:[%s3101_s18 + $0x8] sm:$0xff] %v1867_v61  ;;  %v1899_v63 = vmul.f32 %v2409_v54, %v2893_v0  ;;  %v1490_v11 = vadd.f32 1.0, %v1489_v5  ;;  %v847_v0 = vmax.f32 %v2956_v21, 0.0  ;;  %v980_v44 = vsub.f32 0.0, %v916_v27 }
 0x142   : > { %v1225_v19 = vadd.f32 1.0, %v3151_v22  ;;  %v879_v47 = vmax.f32 %v3108_v10, 0.0  ;;  %v1012_v32 = vsub.f32 0.0, %v948_v26  ;;  %v914_v30 = vand.u32 2147483647, %v3149_v58 }
 0x143   : > { %v2413_v46 = vpop.eup %2412  ;;  %1963 = vst [vmem:[%s3101_s18 + $0x108] sm:$0xff] %v1899_v63  ;;  %vm3170_vm10 = vcmp.lt.f32.partialorder %v1204_v9, 0.0004427343  ;;  %v1054_v39 = vmul.f32 1.442695, %v980_v44  ;;  %v1203_v35 = vmul.f32 %v3120_v18, %v1202_v59  ;;  %v1491_v54 = vmul.f32 %v2403_v53, %v1490_v11 }
 0x144   : > { %v1872_v49 = vmul.f32 %v2413_v46, %v2900_v15  ;;  %v2415_v12 = vpop.eup %2414  ;;  %2426 = vlog2.f32 %v1225_v19  ;;  %v1228_v15 = vmul.f32 -0.5, %v3151_v22  ;;  %vm3178_vm11 = vcmp.lt.f32.partialorder %v1492_v43, 0.0004427343 }
 0x145   : > { %v1513_v48 = vadd.f32 1.0, %v2415_v12  ;;  %v3175_v51 = vpop.eup %2416  ;;  %v1231_v57 = vand.u32 2147483647, %v3151_v22  ;;  %v1516_v61 = vmul.f32 -0.5, %v2415_v12  ;;  %v3186_v63 = vadd.f32 %v2865_v40, %v2927_v45 }
 0x146   : > { %1936 = vst [vmem:[%s3101_s18 + $0x30] sm:$0xff] %v1872_v49  ;;  %v2419_v5 = vpop.eup %2418  ;;  %v1207_v27 = vadd.f32 1.0, %v3175_v51  ;;  %v1118_v18 = vmul.f32 1.442695, %v1012_v32  ;;  %v978_v46 = vsub.f32 0.0, %v914_v30  ;;  %v1229_v19 = vadd.f32 1.0, %v1228_v15 }
 0x147   : > { %2428 = vlog2.f32 %v1513_v48  ;;  %v2421_v9 = vpop.eup %2420  ;;  %v1200_v26 = vmul.f32 0.6931472, %v2419_v5  ;;  %v1519_v49 = vand.u32 2147483647, %v2415_v12  ;;  %vm3193_vm12 = vcmp.lt.f32.partialorder %v1231_v57, 0.0004427343 }
 0x148   : > { %2430 = vpow2.f32 %v1054_v39  ;;  %v1904_v43 = vmul.f32 %v2421_v9, %v2903_v20  ;;  %v1517_v48 = vadd.f32 1.0, %v1516_v61  ;;  %v1210_v20 = vmul.f32 -0.5, %v3175_v51 }
 0x149   : > { %v2423_v59 = vpop.eup %2422  ;;  %2432 = vlog2.f32 %v1207_v27  ;;  %v1206_v11 = vsel %vm3170_vm10, %v1203_v35, %v1200_v26  ;;  %v1213_v30 = vand.u32 2147483647, %v3175_v51  ;;  %v1050_v39 = vmul.f32 1.442695, %v978_v46 }
 0x14a   : > { %v3189_v53 = vpop.eup %2424  ;;  %v1488_v44 = vmul.f32 0.6931472, %v2423_v59  ;;  %1968 = vst [vmem:[%s3101_s18 + $0x130] sm:$0xff] %v1904_v43  ;;  %v1742_v32 = vadd.f32 %v1206_v11, %v846_v29  ;;  %2434 = vpow2.f32 %v1118_v18  ;;  %v946_v35 = vand.u32 2147483647, %v3186_v63 }
 0x14b   : > { %v1495_v15 = vadd.f32 1.0, %v3189_v53  ;;  %v1230_v61 = vmul.f32 %v3151_v22, %v1229_v19  ;;  %vm3209_vm13 = vcmp.lt.f32.partialorder %v1519_v49, 0.0004427343  ;;  %v3215_v50 = vadd.f32 %v2937_v62, %v2865_v40  ;;  %v3234_v19 = vpop.f32.mrb[24].mxu0  ;;  %v3236_v49 = vpop.f32.mrb[24].mxu1 }
 0x14c   : > { %v1494_v17 = vsel %vm3178_vm11, %v1491_v54, %v1488_v44  ;;  %2436 = vtanh.f32 %v1742_v32  ;;  %v1010_v27 = vsub.f32 0.0, %v946_v35  ;;  %v3219_v54 = vadd.f32 %v2939_v1, %v2865_v40 }
 0x14d   : > { %v1774_v57 = vadd.f32 %v1494_v17, %v878_v36  ;;  %2438 = vlog2.f32 %v1495_v15  ;;  %v1518_v36 = vmul.f32 %v2415_v12, %v1517_v48  ;;  %v1211_v26 = vadd.f32 1.0, %v1210_v20  ;;  %v3245_v17 = vpop.f32.mrb[25].mxu0 }
 0x14e   : > { %v2427_v5 = vpop.eup %2426  ;;  %vm3221_vm14 = vcmp.lt.f32.partialorder %v1213_v30, 0.0004427343  ;;  %v1114_v18 = vmul.f32 1.442695, %v1010_v27  ;;  %v917_v46 = vand.u32 2147483647, %v3215_v50  ;;  %v3232_v12 = vadd.f32 %v2865_v40, %v2946_v7 }
 0x14f   : > { %2440 = vtanh.f32 %v1774_v57  ;;  %v1227_v9 = vmul.f32 0.6931472, %v2427_v5  ;;  %v1498_v43 = vmul.f32 -0.5, %v3189_v53  ;;  %v949_v1 = vand.u32 2147483647, %v3219_v54 }
 0x150   : > { %2442 = vpow2.f32 %v1050_v39  ;;  %v981_v45 = vsub.f32 0.0, %v917_v46  ;;  %v1212_v20 = vmul.f32 %v3175_v51, %v1211_v26  ;;  %v1501_v30 = vand.u32 2147483647, %v3189_v53 }
 0x151   : > { %v2429_v59 = vpop.eup %2428  ;;  %v1233_v62 = vsel %vm3193_vm12, %v1230_v61, %v1227_v9  ;;  %2444 = vpow2.f32 %v1114_v18  ;;  %v1013_v15 = vsub.f32 0.0, %v949_v1  ;;  %v1499_v61 = vadd.f32 1.0, %v1498_v43 }
 0x152   : > { %v3238_v11 = vpop.eup %2430  ;;  %v1745_v44 = vadd.f32 %v1233_v62, %v849_v31  ;;  %v1515_v48 = vmul.f32 0.6931472, %v2429_v59  ;;  %v1056_v57 = vmul.f32 1.442695, %v981_v45  ;;  %v915_v26 = vand.u32 2147483647, %v3232_v12 }
 0x153   : > { %v2433_v32 = vpop.eup %2432  ;;  %v1252_v7 = vadd.f32 1.0, %v3238_v11  ;;  %v1255_v51 = vmul.f32 -0.5, %v3238_v11  ;;  %v1120_v9 = vmul.f32 1.442695, %v1013_v15  ;;  %vm3262_vm15 = vcmp.lt.f32.partialorder %v1501_v30, 0.0004427343 }
 0x154   : > { %2446 = vtanh.f32 %v1745_v44  ;;  %v1521_v39 = vsel %vm3209_vm13, %v1518_v36, %v1515_v48  ;;  %v1209_v35 = vmul.f32 0.6931472, %v2433_v32  ;;  %v3252_v5 = vpop.eup %2434  ;;  %v884_v62 = vmax.f32 %v3135_v28, 0.0 }
 0x155   : > { %v1777_v31 = vadd.f32 %v1521_v39, %v881_v42  ;;  %2448 = vlog2.f32 %v1252_v7  ;;  %v852_v42 = vmax.f32 %v3127_v52, 0.0  ;;  %v1540_v18 = vadd.f32 1.0, %v3252_v5 }
 0x156   : > { %v1215_v27 = vsel %vm3221_vm14, %v1212_v20, %v1209_v35  ;;  %2450 = vpow2.f32 %v1056_v57  ;;  %v2437_v29 = vpop.eup %2436  ;;  %v979_v44 = vsub.f32 0.0, %v915_v26  ;;  %v1256_v32 = vadd.f32 1.0, %v1255_v51 }
 0x157   : > { %2452 = vtanh.f32 %v1777_v31  ;;  %v1743_v36 = vadd.f32 %v1215_v27, %v847_v0  ;;  %v2439_v46 = vpop.eup %2438  ;;  %v1870_v59 = vmul.f32 %v2437_v29, %v2906_v25  ;;  %v1500_v0 = vmul.f32 %v3189_v53, %v1499_v61  ;;  %v3278_v53 = vpop.f32.mrb[25].mxu1 }
 0x158   : > { %2454 = vpow2.f32 %v1120_v9  ;;  %v1497_v1 = vmul.f32 0.6931472, %v2439_v46  ;;  %v3272_v25 = vadd.f32 %v2865_v40, %v2948_v8  ;;  %v1543_v30 = vmul.f32 -0.5, %v3252_v5 }
 0x159   : > { %v2441_v43 = vpop.eup %2440  ;;  %2456 = vtanh.f32 %v1743_v36  ;;  %1934 = vst [vmem:[%s3101_s18 + $0x20] sm:$0xff] %v1870_v59  ;;  %v850_v7 = vmax.f32 %v3149_v58, 0.0  ;;  %v882_v8 = vmax.f32 %v3186_v63, 0.0  ;;  %v1052_v57 = vmul.f32 1.442695, %v979_v44  ;;  %v3293_v59 = vpop.f32.mrb[26].mxu0 }
 0x15a   : > { %v2443_v48 = vpop.eup %2442  ;;  %v1902_v45 = vmul.f32 %v2441_v43, %v2916_v34  ;;  %2458 = vlog2.f32 %v1540_v18  ;;  %v1503_v20 = vsel %vm3262_vm15, %v1500_v0, %v1497_v1  ;;  %v1258_v31 = vand.u32 2147483647, %v3238_v11 }
 0x15b   : > { %v1234_v15 = vadd.f32 1.0, %v2443_v48  ;;  %v3280_v39 = vpop.eup %2444  ;;  %v1775_v34 = vadd.f32 %v1503_v20, %v879_v47  ;;  %v1237_v35 = vmul.f32 -0.5, %v2443_v48  ;;  %v1546_v61 = vand.u32 2147483647, %v3252_v5 }
 0x15c   : > { %1966 = vst [vmem:[%s3101_s18 + $0x120] sm:$0xff] %v1902_v45  ;;  %v1522_v51 = vadd.f32 1.0, %v3280_v39  ;;  %v1257_v9 = vmul.f32 %v3238_v11, %v1256_v32  ;;  %v853_v26 = vmax.f32 %v3215_v50, 0.0  ;;  %v947_v47 = vand.u32 2147483647, %v3272_v25 }
 0x15d   : > { %2460 = vlog2.f32 %v1234_v15  ;;  %v1544_v18 = vadd.f32 1.0, %v1543_v30  ;;  %v1240_v46 = vand.u32 2147483647, %v2443_v48  ;;  %v1238_v1 = vadd.f32 1.0, %v1237_v35  ;;  %v3312_v35 = vpop.f32.mrb[26].mxu1 }
 0x15e   : > { %v2447_v27 = vpop.eup %2446  ;;  %2462 = vtanh.f32 %v1775_v34  ;;  %v1525_v0 = vmul.f32 -0.5, %v3280_v39  ;;  %vm1259_vm0 = vcmp.lt.f32.partialorder %v1258_v31, 0.0004427343  ;;  %vm3299_vm1 = vcmp.lt.f32.partialorder %v1546_v61, 0.0004427343 }
 0x15f   : > { %v2449_v29 = vpop.eup %2448  ;;  %v1873_v36 = vmul.f32 %v2447_v27, %v2934_v55  ;;  %2464 = vlog2.f32 %v1522_v51  ;;  %v1011_v45 = vsub.f32 0.0, %v947_v47  ;;  %v1528_v15 = vand.u32 2147483647, %v3280_v39 }
 0x160   : > { %v3295_v22 = vpop.eup %2450  ;;  %v1254_v43 = vmul.f32 0.6931472, %v2449_v29  ;;  %2466 = vpow2.f32 %v1052_v57  ;;  %v3310_v34 = vadd.f32 %v2958_v23, %v2865_v40  ;;  %v1545_v61 = vmul.f32 %v3252_v5, %v1544_v18  ;;  %v3322_v29 = vpop.f32.mrb[27].mxu0 }
 0x161   : > { %v2453_v11 = vpop.eup %2452  ;;  %1937 = vst [vmem:[%s3101_s18 + $0x38] sm:$0xff] %v1873_v36  ;;  %v1261_v55 = vadd.f32 1.0, %v3295_v22  ;;  %vm3315_vm2 = vcmp.lt.f32.partialorder %v1240_v46, 0.0004427343  ;;  %v1526_v47 = vadd.f32 1.0, %v1525_v0  ;;  %v1264_v36 = vmul.f32 -0.5, %v3295_v22 }
 0x162   : > { %v3304_v32 = vpop.eup %2454  ;;  %v1905_v20 = vmul.f32 %v2453_v11, %v2944_v6  ;;  %v1260_v30 = vsel %vm1259_vm0, %v1257_v9, %v1254_v43  ;;  %v1239_v9 = vmul.f32 %v2443_v48, %v1238_v1  ;;  %v1116_v5 = vmul.f32 1.442695, %v1011_v45  ;;  %v3325_v18 = vpop.f32.mrb[27].mxu1 }
 0x163   : > { %v2457_v57 = vpop.eup %2456  ;;  %v1748_v31 = vadd.f32 %v1260_v30, %v852_v42  ;;  %2468 = vlog2.f32 %v1261_v55  ;;  %v1549_v23 = vadd.f32 1.0, %v3304_v32  ;;  %vm3328_vm3 = vcmp.lt.f32.partialorder %v1528_v15, 0.0004427343 }
 0x164   : > { %v2459_v6 = vpop.eup %2458  ;;  %1969 = vst [vmem:[%s3101_s18 + $0x138] sm:$0xff] %v1905_v20  ;;  %v1871_v27 = vmul.f32 %v2457_v57, %v2956_v21  ;;  %v1267_v21 = vand.u32 2147483647, %v3295_v22  ;;  %v920_v48 = vand.u32 2147483647, %v3310_v34  ;;  %v1552_v0 = vmul.f32 -0.5, %v3304_v32 }
 0x165   : > { %2470 = vtanh.f32 %v1748_v31  ;;  %v1542_v42 = vmul.f32 0.6931472, %v2459_v6  ;;  %v3339_v11 = vadd.f32 %v2960_v24, %v2865_v40  ;;  %v3345_v15 = vadd.f32 %v2865_v40, %v2963_v33 }
 0x166   : > { %1935 = vst [vmem:[%s3101_s18 + $0x28] sm:$0xff] %v1871_v27  ;;  %2472 = vlog2.f32 %v1549_v23  ;;  %v984_v30 = vsub.f32 0.0, %v920_v48  ;;  %v1527_v31 = vmul.f32 %v3280_v39, %v1526_v47  ;;  %vm3357_vm4 = vcmp.lt.f32.partialorder %v1267_v21, 0.0004427343 }
 0x167   : > { %v2461_v43 = vpop.eup %2460  ;;  %v1548_v1 = vsel %vm3299_vm1, %v1545_v61, %v1542_v42  ;;  %2474 = vpow2.f32 %v1116_v5  ;;  %v1265_v61 = vadd.f32 1.0, %v1264_v36  ;;  %v952_v24 = vand.u32 2147483647, %v3339_v11 }
 0x168   : > { %v2463_v55 = vpop.eup %2462  ;;  %v1780_v45 = vadd.f32 %v1548_v1, %v884_v62  ;;  %v1236_v20 = vmul.f32 0.6931472, %v2461_v43  ;;  %v1062_v23 = vmul.f32 1.442695, %v984_v30  ;;  %v918_v51 = vand.u32 2147483647, %v3345_v15 }
 0x169   : > { %v2465_v44 = vpop.eup %2464  ;;  %v1903_v57 = vmul.f32 %v2463_v55, %v3108_v10  ;;  %v1553_v10 = vadd.f32 1.0, %v1552_v0  ;;  %v1016_v42 = vsub.f32 0.0, %v952_v24  ;;  %v1555_v5 = vand.u32 2147483647, %v3304_v32  ;;  %v3374_v55 = vld [vmem:[%s4142_s2] ss:$0 sm:$0xff] }
 0x16a   : > { %v3350_v6 = vpop.eup %2466  ;;  %2476 = vtanh.f32 %v1780_v45  ;;  %v1242_v62 = vsel %vm3315_vm2, %v1239_v9, %v1236_v20  ;;  %v1524_v27 = vmul.f32 0.6931472, %v2465_v44  ;;  %v982_v43 = vsub.f32 0.0, %v918_v51  ;;  %v4204_v24 = vld [vmem:[#allocation3_spill] sm:$0xff] }
 0x16b   : > { %1967 = vst [vmem:[%s3101_s18 + $0x128] sm:$0xff] %v1903_v57  ;;  %v1746_v40 = vadd.f32 %v1242_v62, %v850_v7  ;;  %v1243_v39 = vadd.f32 1.0, %v3350_v6  ;;  %2478 = vpow2.f32 %v1062_v23  ;;  %v1266_v7 = vmul.f32 %v3295_v22, %v1265_v61 }
 0x16c   : > { %v1530_v47 = vsel %vm3328_vm3, %v1527_v31, %v1524_v27  ;;  %v1126_v48 = vmul.f32 1.442695, %v1016_v42  ;;  %v1554_v46 = vmul.f32 %v3304_v32, %v1553_v10  ;;  %v1246_v0 = vmul.f32 -0.5, %v3350_v6 }
 0x16d   : > { %v2469_v9 = vpop.eup %2468  ;;  %2480 = vtanh.f32 %v1746_v40  ;;  %v1778_v36 = vadd.f32 %v1530_v47, %v882_v8  ;;  %v4203_v8 = vld [vmem:[#allocation2_spill] sm:$0xff]  ;;  %v1058_v44 = vmul.f32 1.442695, %v982_v43  ;;  %v3390_v62 = vadd.f32 %v3374_v55, %v4204_v24 }
 0x16e   : > { %v1263_v21 = vmul.f32 0.6931472, %v2469_v9  ;;  %2482 = vlog2.f32 %v1243_v39  ;;  %v3378_v22 = vadd.f32 %v3374_v55, %v4203_v8  ;;  %vm1556_vm5 = vcmp.lt.f32.partialorder %v1555_v5, 0.0004427343  ;;  %v4205_v9 = vld [vmem:[#allocation4_spill] sm:$0xff] }
 0x16f   : > { %v2471_v1 = vpop.eup %2470  ;;  %2484 = vtanh.f32 %v1778_v36  ;;  %v1247_v10 = vadd.f32 1.0, %v1246_v0  ;;  %v1249_v39 = vand.u32 2147483647, %v3350_v6  ;;  %v921_v51 = vand.u32 2147483647, %v3390_v62  ;;  %v3412_v0 = vpop.f32.mrb[28].mxu1 }
 0x170   : > { %v2473_v45 = vpop.eup %2472  ;;  %v1876_v20 = vmul.f32 %v2471_v1, %v3127_v52  ;;  %v1269_v30 = vsel %vm3357_vm4, %v1266_v7, %v1263_v21  ;;  %2486 = vpow2.f32 %v1126_v48  ;;  %v950_v61 = vand.u32 2147483647, %v3378_v22 }
 0x171   : > { %v3383_v32 = vpop.eup %2474  ;;  %v1749_v57 = vadd.f32 %v1269_v30, %v853_v26  ;;  %v1551_v31 = vmul.f32 0.6931472, %v2473_v45  ;;  %v885_v52 = vmax.f32 %v3219_v54, 0.0  ;;  %2488 = vpow2.f32 %v1058_v44 }
 0x172   : > { %1940 = vst [vmem:[%s3101_s18 + $0x50] sm:$0xff] %v1876_v20  ;;  %v1531_v27 = vadd.f32 1.0, %v3383_v32  ;;  %v1014_v40 = vsub.f32 0.0, %v950_v61  ;;  %v3400_v36 = vadd.f32 %v3374_v55, %v4205_v9  ;;  %v851_v5 = vmax.f32 %v3232_v12, 0.0 }
 0x173   : > { %2490 = vtanh.f32 %v1749_v57  ;;  %v1557_v23 = vsel %vm1556_vm5, %v1554_v46, %v1551_v31  ;;  %v883_v21 = vmax.f32 %v3272_v25, 0.0  ;;  %v1534_v43 = vmul.f32 -0.5, %v3383_v32  ;;  %v3410_v46 = vpop.f32.mrb[28].mxu0 }
 0x174   : > { %v2477_v33 = vpop.eup %2476  ;;  %v1781_v26 = vadd.f32 %v1557_v23, %v885_v52  ;;  %2492 = vlog2.f32 %v1531_v27  ;;  %v1122_v42 = vmul.f32 1.442695, %v1014_v40  ;;  %v888_v20 = vmax.f32 %v3339_v11, 0.0  ;;  %v3417_v57 = vpop.f32.mrb[29].mxu0 }
 0x175   : > { %v1908_v47 = vmul.f32 %v2477_v33, %v3135_v28  ;;  %v3402_v7 = vpop.eup %2478  ;;  %v856_v28 = vmax.f32 %v3310_v34, 0.0  ;;  %v985_v30 = vsub.f32 0.0, %v921_v51  ;;  %v953_v44 = vand.u32 2147483647, %v3400_v36  ;;  %v3420_v52 = vpop.f32.mrb[29].mxu1  ;;  %v4206_v51 = vld [vmem:[#allocation5_spill] sm:$0xff] }
 0x176   : > { %2494 = vtanh.f32 %v1781_v26  ;;  %v1288_v1 = vadd.f32 1.0, %v3402_v7  ;;  %v1248_v24 = vmul.f32 %v3350_v6, %v1247_v10  ;;  %vm1250_vm6 = vcmp.lt.f32.partialorder %v1249_v39, 0.0004427343 }
 0x177   : > { %v2481_v48 = vpop.eup %2480  ;;  %1972 = vst [vmem:[%s3101_s18 + $0x150] sm:$0xff] %v1908_v47  ;;  %2496 = vpow2.f32 %v1122_v42  ;;  %v1537_v23 = vand.u32 2147483647, %v3383_v32  ;;  %v1064_v40 = vmul.f32 1.442695, %v985_v30  ;;  %v1017_v33 = vsub.f32 0.0, %v953_v44 }
 0x178   : > { %v2483_v8 = vpop.eup %2482  ;;  %v1874_v45 = vmul.f32 %v2481_v48, %v3149_v58  ;;  %2498 = vlog2.f32 %v1288_v1  ;;  %v1535_v47 = vadd.f32 1.0, %v1534_v43  ;;  %v3430_v6 = vadd.f32 %v3374_v55, %v4206_v51 }
 0x179   : > { %v2485_v31 = vpop.eup %2484  ;;  %v1245_v61 = vmul.f32 0.6931472, %v2483_v8  ;;  %v1291_v9 = vmul.f32 -0.5, %v3402_v7  ;;  %2500 = vpow2.f32 %v1064_v40  ;;  %v4207_v8 = vld [vmem:[#allocation6_spill] sm:$0xff]  ;;  %vm1538_vm7 = vcmp.lt.f32.partialorder %v1537_v23, 0.0004427343 }
 0x17a   : > { %v3422_v27 = vpop.eup %2486  ;;  %1938 = vst [vmem:[%s3101_s18 + $0x40] sm:$0xff] %v1874_v45  ;;  %v1906_v58 = vmul.f32 %v2485_v31, %v3186_v63  ;;  %v1128_v63 = vmul.f32 1.442695, %v1017_v33  ;;  %v3440_v45 = vadd.f32 %v3374_v55, %v4207_v8 }
 0x17b   : > { %v1251_v26 = vsel %vm1250_vm6, %v1248_v24, %v1245_v61  ;;  %v1576_v42 = vadd.f32 1.0, %v3422_v27  ;;  %v3432_v10 = vpop.eup %2488  ;;  %v1536_v24 = vmul.f32 %v3383_v32, %v1535_v47  ;;  %v1292_v33 = vadd.f32 1.0, %v1291_v9 }
 0x17c   : > { %1970 = vst [vmem:[%s3101_s18 + $0x140] sm:$0xff] %v1906_v58  ;;  %v1747_v39 = vadd.f32 %v1251_v26, %v851_v5  ;;  %v1270_v43 = vadd.f32 1.0, %v3432_v10  ;;  %v1579_v5 = vmul.f32 -0.5, %v3422_v27  ;;  %v1294_v58 = vand.u32 2147483647, %v3402_v7 }
 0x17d   : > { %v2491_v48 = vpop.eup %2490  ;;  %2502 = vlog2.f32 %v1576_v42  ;;  %v919_v26 = vand.u32 2147483647, %v3430_v6  ;;  %v951_v32 = vand.u32 2147483647, %v3440_v45 }
 0x17e   : > { %v2493_v30 = vpop.eup %2492  ;;  %v1877_v44 = vmul.f32 %v2491_v48, %v3215_v50  ;;  %2504 = vtanh.f32 %v1747_v39  ;;  %v1580_v48 = vadd.f32 1.0, %v1579_v5  ;;  %vm3457_vm8 = vcmp.lt.f32.partialorder %v1294_v58, 0.0004427343  ;;  %v4211_v5 = vld [vmem:[#allocation8_spill] sm:$0xff]  ;;  %v3484_v39 = vpop.f32.mrb[30].mxu1 }
 0x17f   : > { %v1533_v61 = vmul.f32 0.6931472, %v2493_v30  ;;  %2506 = vlog2.f32 %v1270_v43  ;;  %v1273_v43 = vmul.f32 -0.5, %v3432_v10  ;;  %v1015_v30 = vsub.f32 0.0, %v951_v32 }
 0x180   : > { %v2495_v40 = vpop.eup %2494  ;;  %1941 = vst [vmem:[%s3101_s18 + $0x58] sm:$0xff] %v1877_v44  ;;  %2508 = vpow2.f32 %v1128_v63  ;;  %v983_v63 = vsub.f32 0.0, %v919_v26  ;;  %v1276_v58 = vand.u32 2147483647, %v3432_v10  ;;  %v1581_v32 = vmul.f32 %v3422_v27, %v1580_v48 }
 0x181   : > { %v3449_v50 = vpop.eup %2496  ;;  %v1909_v42 = vmul.f32 %v2495_v40, %v3219_v54  ;;  %v1539_v51 = vsel %vm1538_vm7, %v1536_v24, %v1533_v61  ;;  %v4210_v54 = vld [vmem:[#allocation7_spill] sm:$0xff]  ;;  %v3468_v24 = vadd.f32 %v3374_v55, %v4211_v5  ;;  %v1582_v40 = vand.u32 2147483647, %v3422_v27 }
 0x182   : > { %v1779_v47 = vadd.f32 %v1539_v51, %v883_v21  ;;  %v1558_v8 = vadd.f32 1.0, %v3449_v50  ;;  %v2499_v23 = vpop.eup %2498  ;;  %v3463_v44 = vadd.f32 %v3374_v55, %v4210_v54  ;;  %v1293_v21 = vmul.f32 %v3402_v7, %v1292_v33  ;;  %v3478_v33 = vpop.f32.mrb[30].mxu0 }
 0x183   : > { %1973 = vst [vmem:[%s3101_s18 + $0x158] sm:$0xff] %v1909_v42  ;;  %v1290_v61 = vmul.f32 0.6931472, %v2499_v23  ;;  %v1060_v42 = vmul.f32 1.442695, %v983_v63  ;;  %v3472_v26 = vpop.eup %2500  ;;  %v1561_v5 = vmul.f32 -0.5, %v3449_v50 }
 0x184   : > { %2510 = vtanh.f32 %v1779_v47  ;;  %v1274_v47 = vadd.f32 1.0, %v1273_v43  ;;  %v924_v7 = vand.u32 2147483647, %v3463_v44  ;;  %v1124_v63 = vmul.f32 1.442695, %v1015_v30 }
 0x185   : > { %2512 = vlog2.f32 %v1558_v8  ;;  %v1296_v51 = vsel %vm3457_vm8, %v1293_v21, %v1290_v61  ;;  %v1297_v8 = vadd.f32 1.0, %v3472_v26  ;;  %v956_v48 = vand.u32 2147483647, %v3468_v24 }
 0x186   : > { %v1752_v54 = vadd.f32 %v1296_v51, %v856_v28  ;;  %2514 = vpow2.f32 %v1060_v42  ;;  %v988_v27 = vsub.f32 0.0, %v924_v7  ;;  %vm1583_vm9 = vcmp.lt.f32.partialorder %v1582_v40, 0.0004427343 }
 0x187   : > { %v2503_v23 = vpop.eup %2502  ;;  %vm3488_vm10 = vcmp.lt.f32.partialorder %v1276_v58, 0.0004427343  ;;  %v1275_v1 = vmul.f32 %v3432_v10, %v1274_v47  ;;  %v1562_v7 = vadd.f32 1.0, %v1561_v5  ;;  %v3500_v58 = vpop.f32.mrb[31].mxu0  ;;  %v1020_v10 = vsub.f32 0.0, %v956_v48 }
 0x188   : > { %v2505_v9 = vpop.eup %2504  ;;  %v1578_v61 = vmul.f32 0.6931472, %v2503_v23  ;;  %2516 = vtanh.f32 %v1752_v54  ;;  %v3502_v23 = vpop.f32.mrb[31].mxu1  ;;  %v1070_v54 = vmul.f32 1.442695, %v988_v27  ;;  %v4214_v47 = vmax.f32 %v3345_v15, 0.0 }
 0x189   : > { %v2507_v43 = vpop.eup %2506  ;;  %v1875_v21 = vmul.f32 %v2505_v9, %v3232_v12  ;;  %2518 = vlog2.f32 %v1297_v8  ;;  %v1564_v12 = vand.u32 2147483647, %v3449_v50  ;;  %v3511_v5 = vadd.f32 %v3374_v55, %v3012_v60 }
 0x18a   : > { %v3492_v51 = vpop.eup %2508  ;;  %v1584_v30 = vsel %vm1583_vm9, %v1581_v32, %v1578_v61  ;;  %v1272_v31 = vmul.f32 0.6931472, %v2507_v43  ;;  %2520 = vpow2.f32 %v1124_v63  ;;  %v1563_v48 = vmul.f32 %v3449_v50, %v1562_v7  ;;  %v4215_v43 = vld [vmem:[#allocation9_spill] sm:$0xff] }
 0x18b   : > { %1939 = vst [vmem:[%s3101_s18 + $0x48] sm:$0xff] %v1875_v21  ;;  %v1784_v42 = vadd.f32 %v1584_v30, %v888_v20  ;;  %v1585_v40 = vadd.f32 1.0, %v3492_v51  ;;  %v1300_v20 = vmul.f32 -0.5, %v3472_v26  ;;  %v3519_v21 = vadd.f32 %v3374_v55, %v4215_v43 }
 0x18c   : > { %v1278_v32 = vsel %vm3488_vm10, %v1275_v1, %v1272_v31  ;;  %v1134_v31 = vmul.f32 1.442695, %v1020_v10  ;;  %v1303_v60 = vand.u32 2147483647, %v3472_v26  ;;  %v922_v30 = vand.u32 2147483647, %v3511_v5 }
 0x18d   : > { %2522 = vtanh.f32 %v1784_v42  ;;  %v1750_v8 = vadd.f32 %v1278_v32, %v4214_v47  ;;  %vm1565_vm11 = vcmp.lt.f32.partialorder %v1564_v12, 0.0004427343  ;;  %v1301_v42 = vadd.f32 1.0, %v1300_v20  ;;  %v4216_v10 = vld [vmem:[#allocation10_spill] sm:$0xff] }
 0x18e   : > { %v2511_v9 = vpop.eup %2510  ;;  %2524 = vlog2.f32 %v1585_v40  ;;  %v1588_v40 = vmul.f32 -0.5, %v3492_v51  ;;  %v1591_v50 = vand.u32 2147483647, %v3492_v51  ;;  %v986_v7 = vsub.f32 0.0, %v922_v30 }
 0x18f   : > { %v2513_v63 = vpop.eup %2512  ;;  %v1907_v27 = vmul.f32 %v2511_v9, %v3272_v25  ;;  %2526 = vtanh.f32 %v1750_v8  ;;  %v3530_v47 = vadd.f32 %v3374_v55, %v4216_v10  ;;  %v4217_v8 = vmax.f32 %v3378_v22, 0.0 }
 0x190   : > { %v1560_v28 = vmul.f32 0.6931472, %v2513_v63  ;;  %2528 = vpow2.f32 %v1070_v54  ;;  %v3525_v25 = vpop.eup %2514  ;;  %vm3538_vm12 = vcmp.lt.f32.partialorder %v1303_v60, 0.0004427343  ;;  %v1589_v10 = vadd.f32 1.0, %v1588_v40  ;;  %v4222_v60 = vld [vmem:[#allocation11_spill] sm:$0xff] }
 0x191   : > { %1971 = vst [vmem:[%s3101_s18 + $0x148] sm:$0xff] %v1907_v27  ;;  %2530 = vpow2.f32 %v1134_v31  ;;  %v1279_v12 = vadd.f32 1.0, %v3525_v25  ;;  %v954_v31 = vand.u32 2147483647, %v3519_v21  ;;  %vm3545_vm13 = vcmp.lt.f32.partialorder %v1591_v50, 0.0004427343 }
 0x192   : > { %v1566_v32 = vsel %vm1565_vm11, %v1563_v48, %v1560_v28  ;;  %v2517_v54 = vpop.eup %2516  ;;  %v1066_v28 = vmul.f32 1.442695, %v986_v7  ;;  %v1590_v61 = vmul.f32 %v3492_v51, %v1589_v10  ;;  %v4224_v10 = vmax.f32 %v3400_v36, 0.0 }
 0x193   : > { %v1782_v9 = vadd.f32 %v1566_v32, %v4217_v8  ;;  %v2519_v63 = vpop.eup %2518  ;;  %v1880_v27 = vmul.f32 %v2517_v54, %v3310_v34  ;;  %v1302_v32 = vmul.f32 %v3472_v26, %v1301_v42  ;;  %v925_v34 = vand.u32 2147483647, %v3530_v47 }
 0x194   : > { %v1299_v30 = vmul.f32 0.6931472, %v2519_v63  ;;  %v2521_v8 = vpop.eup %2520  ;;  %v3552_v54 = vadd.f32 %v3374_v55, %v4222_v60  ;;  %v1282_v26 = vmul.f32 -0.5, %v3525_v25  ;;  %v1018_v40 = vsub.f32 0.0, %v954_v31 }
 0x195   : > { %2532 = vtanh.f32 %v1782_v9  ;;  %1944 = vst [vmem:[%s3101_s18 + $0x70] sm:$0xff] %v1880_v27  ;;  %v1567_v42 = vadd.f32 1.0, %v2521_v8  ;;  %v1570_v27 = vmul.f32 -0.5, %v2521_v8  ;;  %v989_v48 = vsub.f32 0.0, %v925_v34 }
 0x196   : > { %2534 = vlog2.f32 %v1279_v12  ;;  %v1305_v7 = vsel %vm3538_vm12, %v1302_v32, %v1299_v30  ;;  %v4223_v12 = vmax.f32 %v3390_v62, 0.0  ;;  %v3579_v20 = vadd.f32 %v3374_v55, %v3038_v4 }
 0x197   : > { %v2523_v43 = vpop.eup %2522  ;;  %2536 = vpow2.f32 %v1066_v28 }
 0x198   : > { %v2525_v50 = vpop.eup %2524  ;;  %v1912_v9 = vmul.f32 %v2523_v43, %v3339_v11  ;;  %v1753_v63 = vadd.f32 %v1305_v7, %v4223_v12  ;;  %2538 = vlog2.f32 %v1567_v42  ;;  %v1285_v11 = vand.u32 2147483647, %v3525_v25 }
 0x199   : > { %v2527_v1 = vpop.eup %2526  ;;  %v1587_v60 = vmul.f32 0.6931472, %v2525_v50  ;;  %v957_v43 = vand.u32 2147483647, %v3552_v54  ;;  %v1283_v7 = vadd.f32 1.0, %v1282_v26  ;;  %v1571_v42 = vadd.f32 1.0, %v1570_v27 }
 0x19a   : > { %v3561_v30 = vpop.eup %2528  ;;  %1976 = vst [vmem:[%s3101_s18 + $0x170] sm:$0xff] %v1912_v9  ;;  %v1878_v31 = vmul.f32 %v2527_v1, %v3345_v15  ;;  %2540 = vtanh.f32 %v1753_v63  ;;  %v1573_v50 = vand.u32 2147483647, %v2521_v8  ;;  %v1130_v1 = vmul.f32 1.442695, %v1018_v40 }
 0x19b   : > { %v3567_v32 = vpop.eup %2530  ;;  %v1593_v28 = vsel %vm3545_vm13, %v1590_v61, %v1587_v60  ;;  %v1324_v51 = vadd.f32 1.0, %v3561_v30  ;;  %v1072_v12 = vmul.f32 1.442695, %v989_v48  ;;  %v1327_v61 = vmul.f32 -0.5, %v3561_v30 }
 0x19c   : > { %1942 = vst [vmem:[%s3101_s18 + $0x60] sm:$0xff] %v1878_v31  ;;  %v1785_v34 = vadd.f32 %v1593_v28, %v4224_v10  ;;  %v1612_v15 = vadd.f32 1.0, %v3567_v32  ;;  %v1021_v26 = vsub.f32 0.0, %v957_v43  ;;  %v3584_v63 = vadd.f32 %v3374_v55, %v3040_v56 }
 0x19d   : > { %2542 = vlog2.f32 %v1324_v51  ;;  %v1284_v40 = vmul.f32 %v3525_v25, %v1283_v7  ;;  %vm3587_vm14 = vcmp.lt.f32.partialorder %v1285_v11, 0.0004427343  ;;  %vm3591_vm15 = vcmp.lt.f32.partialorder %v1573_v50, 0.0004427343 }
 0x19e   : > { %2544 = vtanh.f32 %v1785_v34  ;;  %v1572_v43 = vmul.f32 %v2521_v8, %v1571_v42  ;;  %v1136_v56 = vmul.f32 1.442695, %v1021_v26  ;;  %v1615_v51 = vmul.f32 -0.5, %v3567_v32 }
 0x19f   : > { %v2533_v27 = vpop.eup %2532  ;;  %2546 = vlog2.f32 %v1612_v15  ;;  %v923_v25 = vand.u32 2147483647, %v3579_v20  ;;  %v1328_v7 = vadd.f32 1.0, %v1327_v61  ;;  %v1330_v50 = vand.u32 2147483647, %v3561_v30 }
 0x1a0   : > { %v2535_v4 = vpop.eup %2534  ;;  %v1910_v31 = vmul.f32 %v2533_v27, %v3378_v22  ;;  %2548 = vpow2.f32 %v1130_v1  ;;  %v955_v10 = vand.u32 2147483647, %v3584_v63  ;;  %v1618_v8 = vand.u32 2147483647, %v3567_v32 }
 0x1a1   : > { %v1281_v28 = vmul.f32 0.6931472, %v2535_v4  ;;  %2550 = vpow2.f32 %v1072_v12  ;;  %v3598_v11 = vpop.eup %2536  ;;  %v3609_v15 = vadd.f32 %v3374_v55, %v3060_v13  ;;  %v4229_v12 = vmax.f32 %v3430_v6, 0.0 }
 0x1a2   : > { %1974 = vst [vmem:[%s3101_s18 + $0x160] sm:$0xff] %v1910_v31  ;;  %2552 = vpow2.f32 %v1136_v56  ;;  %v2539_v34 = vpop.eup %2538  ;;  %v1306_v42 = vadd.f32 1.0, %v3598_v11  ;;  %v987_v27 = vsub.f32 0.0, %v923_v25  ;;  %v1019_v4 = vsub.f32 0.0, %v955_v10 }
 0x1a3   : > { %v1287_v22 = vsel %vm3587_vm14, %v1284_v40, %v1281_v28  ;;  %v1569_v26 = vmul.f32 0.6931472, %v2539_v34  ;;  %v1616_v60 = vadd.f32 1.0, %v1615_v51  ;;  %v3616_v40 = vadd.f32 %v3374_v55, %v3062_v3 }
 0x1a4   : > { %v2541_v1 = vpop.eup %2540  ;;  %v1751_v61 = vadd.f32 %v1287_v22, %v4229_v12  ;;  %2554 = vlog2.f32 %v1306_v42  ;;  %v1068_v56 = vmul.f32 1.442695, %v987_v27  ;;  %v1132_v28 = vmul.f32 1.442695, %v1019_v4 }
 0x1a5   : > { %v1881_v31 = vmul.f32 %v2541_v1, %v3390_v62  ;;  %v1575_v13 = vsel %vm3591_vm15, %v1572_v43, %v1569_v26  ;;  %v4230_v34 = vmax.f32 %v3440_v45, 0.0  ;;  %vm3623_vm0 = vcmp.lt.f32.partialorder %v1330_v50, 0.0004427343 }
 0x1a6   : > { %2556 = vtanh.f32 %v1751_v61  ;;  %v858_v62 = vmax.f32 %v3511_v5, 0.0  ;;  %v1309_v3 = vmul.f32 -0.5, %v3598_v11  ;;  %v1329_v48 = vmul.f32 %v3561_v30, %v1328_v7 }
 0x1a7   : > { %v2543_v9 = vpop.eup %2542  ;;  %1945 = vst [vmem:[%s3101_s18 + $0x78] sm:$0xff] %v1881_v31  ;;  %v1783_v25 = vadd.f32 %v1575_v13, %v4230_v34  ;;  %2558 = vpow2.f32 %v1068_v56  ;;  %v928_v43 = vand.u32 2147483647, %v3609_v15  ;;  %v1617_v50 = vmul.f32 %v3567_v32, %v1616_v60 }
 0x1a8   : > { %v2545_v51 = vpop.eup %2544  ;;  %v1326_v22 = vmul.f32 0.6931472, %v2543_v9  ;;  %vm3633_vm1 = vcmp.lt.f32.partialorder %v1618_v8, 0.0004427343  ;;  %v960_v30 = vand.u32 2147483647, %v3616_v40 }
 0x1a9   : > { %v2547_v42 = vpop.eup %2546  ;;  %v1913_v1 = vmul.f32 %v2545_v51, %v3400_v36  ;;  %2560 = vtanh.f32 %v1783_v25  ;;  %v4235_v36 = vmax.f32 %v3463_v44, 0.0  ;;  %v1310_v4 = vadd.f32 1.0, %v1309_v3 }
 0x1aa   : > { %v2549_v61 = vpop.eup %2548  ;;  %v1332_v26 = vsel %vm3623_vm0, %v1329_v48, %v1326_v22  ;;  %v1614_v9 = vmul.f32 0.6931472, %v2547_v42  ;;  %2562 = vpow2.f32 %v1132_v28  ;;  %v1312_v32 = vand.u32 2147483647, %v3598_v11 }
 0x1ab   : > { %v3640_v7 = vpop.eup %2550  ;;  %1977 = vst [vmem:[%s3101_s18 + $0x178] sm:$0xff] %v1913_v1  ;;  %v1756_v27 = vadd.f32 %v1332_v26, %v4235_v36  ;;  %v1594_v8 = vadd.f32 1.0, %v2549_v61  ;;  %v890_v13 = vmax.f32 %v3519_v21, 0.0  ;;  %v992_v28 = vsub.f32 0.0, %v928_v43 }
 0x1ac   : > { %v3646_v31 = vpop.eup %2552  ;;  %v1620_v60 = vsel %vm3633_vm1, %v1617_v50, %v1614_v9  ;;  %v1333_v56 = vadd.f32 1.0, %v3640_v7  ;;  %v4236_v34 = vmax.f32 %v3468_v24, 0.0  ;;  %v861_v10 = vmax.f32 %v3530_v47, 0.0 }
 0x1ad   : > { %2564 = vtanh.f32 %v1756_v27  ;;  %v893_v3 = vmax.f32 %v3552_v54, 0.0  ;;  %v1597_v51 = vmul.f32 -0.5, %v2549_v61  ;;  %v1621_v22 = vadd.f32 1.0, %v3646_v31 }
 0x1ae   : > { %v1788_v25 = vadd.f32 %v1620_v60, %v4236_v34  ;;  %2566 = vlog2.f32 %v1594_v8  ;;  %v1024_v48 = vsub.f32 0.0, %v960_v30  ;;  %v2555_v42 = vpop.eup %2554  ;;  %v1311_v1 = vmul.f32 %v3598_v11, %v1310_v4 }
 0x1af   : > { %vm3658_vm2 = vcmp.lt.f32.partialorder %v1312_v32, 0.0004427343  ;;  %v3664_v43 = vadd.f32 %v3374_v55, %v3068_v2  ;;  %v1308_v26 = vmul.f32 0.6931472, %v2555_v42  ;;  %v1600_v9 = vand.u32 2147483647, %v2549_v61 }
 0x1b0   : > { %2568 = vtanh.f32 %v1788_v25  ;;  %v2557_v12 = vpop.eup %2556  ;;  %v1078_v36 = vmul.f32 1.442695, %v992_v28  ;;  %v1336_v27 = vmul.f32 -0.5, %v3640_v7  ;;  %v1339_v11 = vand.u32 2147483647, %v3640_v7 }
 0x1b1   : > { %2570 = vlog2.f32 %v1333_v56  ;;  %v1879_v30 = vmul.f32 %v2557_v12, %v3430_v6  ;;  %v3669_v4 = vpop.eup %2558  ;;  %v1314_v32 = vsel %vm3658_vm2, %v1311_v1, %v1308_v26  ;;  %v1598_v2 = vadd.f32 1.0, %v1597_v51 }
 0x1b2   : > { %2572 = vlog2.f32 %v1621_v22  ;;  %v1142_v8 = vmul.f32 1.442695, %v1024_v48  ;;  %v1754_v56 = vadd.f32 %v1314_v32, %v858_v62  ;;  %v1624_v28 = vmul.f32 -0.5, %v3646_v31 }
 0x1b3   : > { %2574 = vpow2.f32 %v1078_v36  ;;  %v2561_v60 = vpop.eup %2560  ;;  %1943 = vst [vmem:[%s3101_s18 + $0x68] sm:$0xff] %v1879_v30  ;;  %v859_v6 = vmax.f32 %v3579_v20, 0.0  ;;  %v1315_v34 = vadd.f32 1.0, %v3669_v4  ;;  %vm3680_vm3 = vcmp.lt.f32.partialorder %v1600_v9, 0.0004427343 }
 0x1b4   : > { %v3677_v25 = vpop.eup %2562  ;;  %v1911_v22 = vmul.f32 %v2561_v60, %v3440_v45  ;;  %2576 = vpow2.f32 %v1142_v8  ;;  %v926_v51 = vand.u32 2147483647, %v3664_v43  ;;  %v1337_v48 = vadd.f32 1.0, %v1336_v27 }
 0x1b5   : > { %2578 = vtanh.f32 %v1754_v56  ;;  %vm3685_vm4 = vcmp.lt.f32.partialorder %v1339_v11, 0.0004427343  ;;  %v1603_v1 = vadd.f32 1.0, %v3677_v25  ;;  %v1599_v50 = vmul.f32 %v2549_v61, %v1598_v2 }
 0x1b6   : > { %1975 = vst [vmem:[%s3101_s18 + $0x168] sm:$0xff] %v1911_v22  ;;  %v1627_v12 = vand.u32 2147483647, %v3646_v31  ;;  %2580 = vlog2.f32 %v1315_v34  ;;  %v990_v45 = vsub.f32 0.0, %v926_v51  ;;  %v1625_v9 = vadd.f32 1.0, %v1624_v28 }
 0x1b7   : > { %v2565_v26 = vpop.eup %2564  ;;  %v1318_v36 = vmul.f32 -0.5, %v3669_v4  ;;  %2582 = vlog2.f32 %v1603_v1  ;;  %v3695_v30 = vadd.f32 %v3374_v55, %v3090_v14  ;;  %v1606_v32 = vmul.f32 -0.5, %v3677_v25 }
 0x1b8   : > { %v2567_v27 = vpop.eup %2566  ;;  %v1884_v11 = vmul.f32 %v2565_v26, %v3463_v44  ;;  %v1074_v61 = vmul.f32 1.442695, %v990_v45  ;;  %v3701_v2 = vadd.f32 %v3374_v55, %v3129_v38  ;;  %v1338_v56 = vmul.f32 %v3640_v7, %v1337_v48 }
 0x1b9   : > { %v1596_v60 = vmul.f32 0.6931472, %v2567_v27  ;;  %v1321_v28 = vand.u32 2147483647, %v3669_v4  ;;  %v958_v14 = vand.u32 2147483647, %v3695_v30  ;;  %v1626_v27 = vmul.f32 %v3646_v31, %v1625_v9 }
 0x1ba   : > { %v2569_v8 = vpop.eup %2568  ;;  %1948 = vst [vmem:[%s3101_s18 + $0x90] sm:$0xff] %v1884_v11  ;;  %vm3708_vm5 = vcmp.lt.f32.partialorder %v1627_v12, 0.0004427343  ;;  %2584 = vpow2.f32 %v1074_v61  ;;  %v929_v38 = vand.u32 2147483647, %v3701_v2  ;;  %v1319_v48 = vadd.f32 1.0, %v1318_v36 }
 0x1bb   : > { %v2571_v34 = vpop.eup %2570  ;;  %v1916_v44 = vmul.f32 %v2569_v8, %v3468_v24  ;;  %v1602_v1 = vsel %vm3680_vm3, %v1599_v50, %v1596_v60  ;;  %v1022_v45 = vsub.f32 0.0, %v958_v14  ;;  %v1607_v11 = vadd.f32 1.0, %v1606_v32 }
 0x1bc   : > { %v2573_v51 = vpop.eup %2572  ;;  %v1335_v7 = vmul.f32 0.6931472, %v2571_v34  ;;  %v1786_v24 = vadd.f32 %v1602_v1, %v890_v13  ;;  %vm3723_vm6 = vcmp.lt.f32.partialorder %v1321_v28, 0.0004427343  ;;  %v1609_v42 = vand.u32 2147483647, %v3677_v25 }
 0x1bd   : > { %v3715_v26 = vpop.eup %2574  ;;  %1980 = vst [vmem:[%s3101_s18 + $0x190] sm:$0xff] %v1916_v44  ;;  %v1623_v12 = vmul.f32 0.6931472, %v2573_v51  ;;  %v993_v9 = vsub.f32 0.0, %v929_v38  ;;  %v1320_v60 = vmul.f32 %v3669_v4, %v1319_v48  ;;  %v1608_v34 = vmul.f32 %v3677_v25, %v1607_v11 }
 0x1be   : > { %v1341_v61 = vsel %vm3685_vm4, %v1338_v56, %v1335_v7  ;;  %v1360_v50 = vadd.f32 1.0, %v3715_v26  ;;  %v3729_v36 = vpop.eup %2576  ;;  %2586 = vtanh.f32 %v1786_v24  ;;  %v1138_v56 = vmul.f32 1.442695, %v1022_v45 }
 0x1bf   : > { %v1757_v13 = vadd.f32 %v1341_v61, %v861_v10  ;;  %v1629_v31 = vsel %vm3708_vm5, %v1626_v27, %v1623_v12  ;;  %v2579_v62 = vpop.eup %2578  ;;  %v1648_v10 = vadd.f32 1.0, %v3729_v36  ;;  %v3743_v38 = vadd.f32 %v3374_v55, %v3137_v41 }
 0x1c0   : > { %v1789_v32 = vadd.f32 %v1629_v31, %v893_v3  ;;  %2588 = vlog2.f32 %v1360_v50  ;;  %v2581_v28 = vpop.eup %2580  ;;  %v1882_v14 = vmul.f32 %v2579_v62, %v3511_v5  ;;  %v3747_v3 = vadd.f32 %v3374_v55, %v3165_v37 }
 0x1c1   : > { %2590 = vtanh.f32 %v1757_v13  ;;  %v2583_v44 = vpop.eup %2582  ;;  %v1317_v22 = vmul.f32 0.6931472, %v2581_v28  ;;  %v1363_v5 = vmul.f32 -0.5, %v3715_v26  ;;  %v1080_v51 = vmul.f32 1.442695, %v993_v9 }
 0x1c2   : > { %2592 = vtanh.f32 %v1789_v32  ;;  %1946 = vst [vmem:[%s3101_s18 + $0x80] sm:$0xff] %v1882_v14  ;;  %v1605_v4 = vmul.f32 0.6931472, %v2583_v44  ;;  %v891_v1 = vmax.f32 %v3584_v63, 0.0  ;;  %vm1610_vm7 = vcmp.lt.f32.partialorder %v1609_v42, 0.0004427343 }
 0x1c3   : > { %2594 = vlog2.f32 %v1648_v10  ;;  %v1323_v25 = vsel %vm3723_vm6, %v1320_v60, %v1317_v22  ;;  %v864_v48 = vmax.f32 %v3609_v15, 0.0  ;;  %v896_v24 = vmax.f32 %v3616_v40, 0.0 }
 0x1c4   : > { %2596 = vpow2.f32 %v1138_v56  ;;  %v3754_v7 = vpop.eup %2584  ;;  %v1755_v41 = vadd.f32 %v1323_v25, %v859_v6  ;;  %v1611_v37 = vsel %vm1610_vm7, %v1608_v34, %v1605_v4  ;;  %v1651_v12 = vmul.f32 -0.5, %v3729_v36 }
 0x1c5   : > { %2598 = vpow2.f32 %v1080_v51  ;;  %v1787_v45 = vadd.f32 %v1611_v37, %v891_v1  ;;  %v1342_v27 = vadd.f32 1.0, %v3754_v7  ;;  %v1364_v11 = vadd.f32 1.0, %v1363_v5 }
 0x1c6   : > { %2600 = vtanh.f32 %v1755_v41  ;;  %v961_v61 = vand.u32 2147483647, %v3743_v38  ;;  %v927_v8 = vand.u32 2147483647, %v3747_v3  ;;  %v1366_v6 = vand.u32 2147483647, %v3715_v26 }
 0x1c7   : > { %2602 = vtanh.f32 %v1787_v45  ;;  %v1654_v42 = vand.u32 2147483647, %v3729_v36  ;;  %v3768_v50 = vadd.f32 %v3374_v55, %v3167_v16  ;;  %v3772_v62 = vadd.f32 %v3374_v55, %v3234_v19 }
 0x1c8   : > { %v2587_v13 = vpop.eup %2586  ;;  %2604 = vlog2.f32 %v1342_v27  ;;  %v1025_v31 = vsub.f32 0.0, %v961_v61  ;;  %v991_v9 = vsub.f32 0.0, %v927_v8  ;;  %v1652_v56 = vadd.f32 1.0, %v1651_v12 }
 0x1c9   : > { %v1914_v60 = vmul.f32 %v2587_v13, %v3519_v21  ;;  %v1345_v28 = vmul.f32 -0.5, %v3754_v7  ;;  %v959_v14 = vand.u32 2147483647, %v3768_v50  ;;  %v1365_v10 = vmul.f32 %v3715_v26, %v1364_v11 }
 0x1ca   : > { %v2589_v32 = vpop.eup %2588  ;;  %v1144_v44 = vmul.f32 1.442695, %v1025_v31  ;;  %v1076_v22 = vmul.f32 1.442695, %v991_v9  ;;  %vm1367_vm8 = vcmp.lt.f32.partialorder %v1366_v6, 0.0004427343  ;;  %v1653_v12 = vmul.f32 %v3729_v36, %v1652_v56 }
 0x1cb   : > { %v2591_v34 = vpop.eup %2590  ;;  %v1362_v16 = vmul.f32 0.6931472, %v2589_v32  ;;  %1978 = vst [vmem:[%s3101_s18 + $0x180] sm:$0xff] %v1914_v60  ;;  %v1023_v5 = vsub.f32 0.0, %v959_v14  ;;  %v932_v21 = vand.u32 2147483647, %v3772_v62  ;;  %v3795_v36 = vadd.f32 %v3374_v55, %v3236_v49 }
 0x1cc   : > { %v2593_v4 = vpop.eup %2592  ;;  %v1885_v19 = vmul.f32 %v2591_v34, %v3530_v47  ;;  %v862_v41 = vmax.f32 %v3664_v43, 0.0  ;;  %2606 = vpow2.f32 %v1144_v44  ;;  %vm1655_vm9 = vcmp.lt.f32.partialorder %v1654_v42, 0.0004427343 }
 0x1cd   : > { %v2595_v51 = vpop.eup %2594  ;;  %v1917_v25 = vmul.f32 %v2593_v4, %v3552_v54  ;;  %v1368_v1 = vsel %vm1367_vm8, %v1365_v10, %v1362_v16  ;;  %2608 = vpow2.f32 %v1076_v22  ;;  %v1346_v27 = vadd.f32 1.0, %v1345_v28 }
 0x1ce   : > { %v3783_v37 = vpop.eup %2596  ;;  %1949 = vst [vmem:[%s3101_s18 + $0x98] sm:$0xff] %v1885_v19  ;;  %v1760_v26 = vadd.f32 %v1368_v1, %v864_v48  ;;  %v1650_v45 = vmul.f32 0.6931472, %v2595_v51  ;;  %v996_v54 = vsub.f32 0.0, %v932_v21  ;;  %v1140_v6 = vmul.f32 1.442695, %v1023_v5 }
 0x1cf   : > { %v3787_v47 = vpop.eup %2598  ;;  %1981 = vst [vmem:[%s3101_s18 + $0x198] sm:$0xff] %v1917_v25  ;;  %v1630_v11 = vadd.f32 1.0, %v3783_v37  ;;  %v1348_v31 = vand.u32 2147483647, %v3754_v7  ;;  %v894_v32 = vmax.f32 %v3695_v30, 0.0  ;;  %v865_v60 = vmax.f32 %v3701_v2, 0.0 }
 0x1d0   : > { %2610 = vtanh.f32 %v1760_v26  ;;  %v1656_v61 = vsel %vm1655_vm9, %v1653_v12, %v1650_v45  ;;  %v1369_v8 = vadd.f32 1.0, %v3787_v47  ;;  %v2601_v13 = vpop.eup %2600  ;;  %v1086_v14 = vmul.f32 1.442695, %v996_v54 }
 0x1d1   : > { %v1792_v48 = vadd.f32 %v1656_v61, %v896_v24  ;;  %2612 = vlog2.f32 %v1630_v11  ;;  %v2603_v42 = vpop.eup %2602  ;;  %v1883_v9 = vmul.f32 %v2601_v13, %v3579_v20  ;;  %v1633_v24 = vmul.f32 -0.5, %v3783_v37 }
 0x1d2   : > { %2614 = vlog2.f32 %v1369_v8  ;;  %v2605_v56 = vpop.eup %2604  ;;  %v1915_v28 = vmul.f32 %v2603_v42, %v3584_v63  ;;  %v1347_v49 = vmul.f32 %v3754_v7, %v1346_v27  ;;  %v1372_v16 = vmul.f32 -0.5, %v3787_v47 }
 0x1d3   : > { %2616 = vtanh.f32 %v1792_v48  ;;  %1947 = vst [vmem:[%s3101_s18 + $0x88] sm:$0xff] %v1883_v9  ;;  %v1344_v34 = vmul.f32 0.6931472, %v2605_v56  ;;  %vm1349_vm10 = vcmp.lt.f32.partialorder %v1348_v31, 0.0004427343  ;;  %v3809_v10 = vadd.f32 %v3374_v55, %v3245_v17 }
 0x1d4   : > { %2618 = vpow2.f32 %v1140_v6  ;;  %1979 = vst [vmem:[%s3101_s18 + $0x188] sm:$0xff] %v1915_v28  ;;  %v964_v20 = vand.u32 2147483647, %v3795_v36  ;;  %v897_v44 = vmax.f32 %v3743_v38, 0.0  ;;  %v863_v22 = vmax.f32 %v3747_v3, 0.0 }
 0x1d5   : > { %2620 = vpow2.f32 %v1086_v14  ;;  %v1350_v63 = vsel %vm1349_vm10, %v1347_v49, %v1344_v34  ;;  %v895_v4 = vmax.f32 %v3768_v50, 0.0  ;;  %v1634_v5 = vadd.f32 1.0, %v1633_v24 }
 0x1d6   : > { %v3814_v7 = vpop.eup %2606  ;;  %v1758_v19 = vadd.f32 %v1350_v63, %v862_v41  ;;  %v1636_v21 = vand.u32 2147483647, %v3783_v37  ;;  %v1028_v51 = vsub.f32 0.0, %v964_v20  ;;  %v1373_v1 = vadd.f32 1.0, %v1372_v16  ;;  %v3827_v41 = vld [vmem:[%s4142_s2] ss:$0 sm:$0xff] }
 0x1d7   : > { %v3817_v25 = vpop.eup %2608  ;;  %v1375_v17 = vand.u32 2147483647, %v3787_v47  ;;  %v1657_v55 = vadd.f32 1.0, %v3814_v7  ;;  %v868_v26 = vmax.f32 %v3772_v62, 0.0  ;;  %v930_v12 = vand.u32 2147483647, %v3809_v10 }
 0x1d8   : > { %2622 = vtanh.f32 %v1758_v19  ;;  %v1351_v45 = vadd.f32 1.0, %v3817_v25  ;;  %v3831_v27 = vadd.f32 %v3827_v41, %v3278_v53  ;;  %v900_v54 = vmax.f32 %v3795_v36, 0.0 }
 0x1d9   : > { %2624 = vlog2.f32 %v1657_v55  ;;  %v1150_v61 = vmul.f32 1.442695, %v1028_v51  ;;  %v3836_v8 = vadd.f32 %v3827_v41, %v3293_v59  ;;  %v1635_v48 = vmul.f32 %v3783_v37, %v1634_v5 }
 0x1da   : > { %v2611_v11 = vpop.eup %2610  ;;  %vm3840_vm11 = vcmp.lt.f32.partialorder %v1636_v21, 0.0004427343  ;;  %2626 = vlog2.f32 %v1351_v45  ;;  %vm3844_vm12 = vcmp.lt.f32.partialorder %v1375_v17, 0.0004427343  ;;  %v1660_v56 = vmul.f32 -0.5, %v3814_v7 }
 0x1db   : > { %v2613_v6 = vpop.eup %2612  ;;  %v1888_v13 = vmul.f32 %v2611_v11, %v3609_v15  ;;  %2628 = vpow2.f32 %v1150_v61  ;;  %v1374_v37 = vmul.f32 %v3787_v47, %v1373_v1  ;;  %v994_v28 = vsub.f32 0.0, %v930_v12 }
 0x1dc   : > { %v2615_v53 = vpop.eup %2614  ;;  %v1632_v42 = vmul.f32 0.6931472, %v2613_v6  ;;  %v962_v24 = vand.u32 2147483647, %v3831_v27  ;;  %v1354_v16 = vmul.f32 -0.5, %v3817_v25  ;;  %v1661_v51 = vadd.f32 1.0, %v1660_v56 }
 0x1dd   : > { %v2617_v59 = vpop.eup %2616  ;;  %1952 = vst [vmem:[%s3101_s18 + $0xb0] sm:$0xff] %v1888_v13  ;;  %v1371_v15 = vmul.f32 0.6931472, %v2615_v53  ;;  %v933_v20 = vand.u32 2147483647, %v3836_v8  ;;  %v3873_v17 = vadd.f32 %v3827_v41, %v3312_v35  ;;  %v3877_v45 = vadd.f32 %v3827_v41, %v3322_v29 }
 0x1de   : > { %v3852_v14 = vpop.eup %2618  ;;  %v1920_v34 = vmul.f32 %v2617_v59, %v3616_v40  ;;  %v1638_v49 = vsel %vm3840_vm11, %v1635_v48, %v1632_v42  ;;  %v1663_v5 = vand.u32 2147483647, %v3814_v7  ;;  %v1026_v55 = vsub.f32 0.0, %v962_v24 }
 0x1df   : > { %v3859_v63 = vpop.eup %2620  ;;  %v1790_v19 = vadd.f32 %v1638_v49, %v894_v32  ;;  %v1377_v47 = vsel %vm3844_vm12, %v1374_v37, %v1371_v15  ;;  %v1639_v21 = vadd.f32 1.0, %v3852_v14  ;;  %v1082_v32 = vmul.f32 1.442695, %v994_v28 }
 0x1e0   : > { %1984 = vst [vmem:[%s3101_s18 + $0x1b0] sm:$0xff] %v1920_v34  ;;  %v1761_v40 = vadd.f32 %v1377_v47, %v865_v60  ;;  %v1396_v1 = vadd.f32 1.0, %v3859_v63  ;;  %v1355_v12 = vadd.f32 1.0, %v1354_v16  ;;  %v866_v11 = vmax.f32 %v3809_v10, 0.0 }
 0x1e1   : > { %2630 = vtanh.f32 %v1790_v19  ;;  %v997_v61 = vsub.f32 0.0, %v933_v20  ;;  %vm3880_vm13 = vcmp.lt.f32.partialorder %v1663_v5, 0.0004427343  ;;  %v1357_v35 = vand.u32 2147483647, %v3817_v25 }
 0x1e2   : > { %2632 = vtanh.f32 %v1761_v40  ;;  %v2623_v60 = vpop.eup %2622  ;;  %v1146_v13 = vmul.f32 1.442695, %v1026_v55  ;;  %v1662_v29 = vmul.f32 %v3814_v7, %v1661_v51  ;;  %v1642_v56 = vmul.f32 -0.5, %v3852_v14 }
 0x1e3   : > { %2634 = vlog2.f32 %v1639_v21  ;;  %v2625_v48 = vpop.eup %2624  ;;  %v1886_v31 = vmul.f32 %v2623_v60, %v3664_v43  ;;  %v1088_v53 = vmul.f32 1.442695, %v997_v61  ;;  %v965_v59 = vand.u32 2147483647, %v3873_v17 }
 0x1e4   : > { %2636 = vlog2.f32 %v1396_v1  ;;  %v2627_v42 = vpop.eup %2626  ;;  %v1659_v9 = vmul.f32 0.6931472, %v2625_v48  ;;  %v1356_v28 = vmul.f32 %v3817_v25, %v1355_v12  ;;  %v931_v43 = vand.u32 2147483647, %v3877_v45 }
 0x1e5   : > { %2638 = vpow2.f32 %v1082_v32  ;;  %v3889_v15 = vpop.eup %2628  ;;  %1950 = vst [vmem:[%s3101_s18 + $0xa0] sm:$0xff] %v1886_v31  ;;  %v1353_v37 = vmul.f32 0.6931472, %v2627_v42  ;;  %vm1358_vm14 = vcmp.lt.f32.partialorder %v1357_v35, 0.0004427343  ;;  %v1399_v24 = vmul.f32 -0.5, %v3859_v63 }
 0x1e6   : > { %2640 = vpow2.f32 %v1146_v13  ;;  %v1665_v7 = vsel %vm3880_vm13, %v1662_v29, %v1659_v9  ;;  %v1684_v34 = vadd.f32 1.0, %v3889_v15  ;;  %v1029_v20 = vsub.f32 0.0, %v965_v59 }
 0x1e7   : > { %v1793_v49 = vadd.f32 %v1665_v7, %v897_v44  ;;  %v1359_v16 = vsel %vm1358_vm14, %v1356_v28, %v1353_v37  ;;  %2642 = vpow2.f32 %v1088_v53  ;;  %v1643_v19 = vadd.f32 1.0, %v1642_v56 }
 0x1e8   : > { %v1759_v25 = vadd.f32 %v1359_v16, %v863_v22  ;;  %v1645_v47 = vand.u32 2147483647, %v3852_v14  ;;  %2644 = vlog2.f32 %v1684_v34  ;;  %v1402_v5 = vand.u32 2147483647, %v3859_v63 }
 0x1e9   : > { %2646 = vtanh.f32 %v1793_v49  ;;  %v1152_v21 = vmul.f32 1.442695, %v1029_v20  ;;  %v995_v40 = vsub.f32 0.0, %v931_v43  ;;  %v1400_v1 = vadd.f32 1.0, %v1399_v24 }
 0x1ea   : > { %2648 = vtanh.f32 %v1759_v25  ;;  %v1687_v44 = vmul.f32 -0.5, %v3889_v15  ;;  %v3907_v32 = vadd.f32 %v3827_v41, %v3325_v18  ;;  %v3912_v61 = vadd.f32 %v3827_v41, %v3410_v46 }
 0x1eb   : > { %v2631_v51 = vpop.eup %2630  ;;  %2650 = vpow2.f32 %v1152_v21  ;;  %v1084_v12 = vmul.f32 1.442695, %v995_v40  ;;  %v1644_v35 = vmul.f32 %v3852_v14, %v1643_v19  ;;  %vm3916_vm15 = vcmp.lt.f32.partialorder %v1645_v47, 0.0004427343 }
 0x1ec   : > { %v2633_v22 = vpop.eup %2632  ;;  %v1918_v55 = vmul.f32 %v2631_v51, %v3695_v30  ;;  %v898_v18 = vmax.f32 %v3831_v27, 0.0  ;;  %vm3922_vm0 = vcmp.lt.f32.partialorder %v1402_v5, 0.0004427343  ;;  %v1690_v46 = vand.u32 2147483647, %v3889_v15 }
 0x1ed   : > { %v2635_v60 = vpop.eup %2634  ;;  %v1889_v6 = vmul.f32 %v2633_v22, %v3701_v2  ;;  %2652 = vpow2.f32 %v1084_v12  ;;  %v1401_v14 = vmul.f32 %v3859_v63, %v1400_v1  ;;  %v1688_v53 = vadd.f32 1.0, %v1687_v44 }
 0x1ee   : > { %v2637_v48 = vpop.eup %2636  ;;  %1982 = vst [vmem:[%s3101_s18 + $0x1a0] sm:$0xff] %v1918_v55  ;;  %v1641_v30 = vmul.f32 0.6931472, %v2635_v60  ;;  %v3931_v42 = vadd.f32 %v3827_v41, %v3412_v0  ;;  %v963_v37 = vand.u32 2147483647, %v3907_v32  ;;  %v3970_v31 = vadd.f32 %v3827_v41, %v3417_v57 }
 0x1ef   : > { %v2639_v29 = vpop.eup %2638  ;;  %1953 = vst [vmem:[%s3101_s18 + $0xb8] sm:$0xff] %v1889_v6  ;;  %v1398_v2 = vmul.f32 0.6931472, %v2637_v48  ;;  %v936_v28 = vand.u32 2147483647, %v3912_v61  ;;  %v869_v48 = vmax.f32 %v3836_v8, 0.0 }
 0x1f0   : > { %v2641_v9 = vpop.eup %2640  ;;  %v1647_v56 = vsel %vm3916_vm15, %v1644_v35, %v1641_v30  ;;  %v1378_v59 = vadd.f32 1.0, %v2639_v29  ;;  %v1381_v7 = vmul.f32 -0.5, %v2639_v29  ;;  %vm3945_vm1 = vcmp.lt.f32.partialorder %v1690_v46, 0.0004427343 }
 0x1f1   : > { %v1791_v43 = vadd.f32 %v1647_v56, %v895_v4  ;;  %v1404_v63 = vsel %vm3922_vm0, %v1401_v14, %v1398_v2  ;;  %v1666_v24 = vadd.f32 1.0, %v2641_v9  ;;  %v3941_v34 = vpop.eup %2642  ;;  %v1669_v16 = vmul.f32 -0.5, %v2641_v9 }
 0x1f2   : > { %v1764_v0 = vadd.f32 %v1404_v63, %v868_v26  ;;  %2654 = vlog2.f32 %v1378_v59  ;;  %v2645_v20 = vpop.eup %2644  ;;  %v1689_v4 = vmul.f32 %v3889_v15, %v1688_v53  ;;  %v1405_v25 = vadd.f32 1.0, %v3941_v34 }
 0x1f3   : > { %2656 = vtanh.f32 %v1791_v43  ;;  %v968_v19 = vand.u32 2147483647, %v3931_v42  ;;  %v2647_v47 = vpop.eup %2646  ;;  %v1686_v5 = vmul.f32 0.6931472, %v2645_v20  ;;  %v1027_v21 = vsub.f32 0.0, %v963_v37 }
 0x1f4   : > { %2658 = vtanh.f32 %v1764_v0  ;;  %v1000_v26 = vsub.f32 0.0, %v936_v28  ;;  %v2649_v40 = vpop.eup %2648  ;;  %v1921_v51 = vmul.f32 %v2647_v47, %v3743_v38  ;;  %v1382_v1 = vadd.f32 1.0, %v1381_v7 }
 0x1f5   : > { %v1384_v44 = vand.u32 2147483647, %v2639_v29  ;;  %2660 = vlog2.f32 %v1666_v24  ;;  %v3953_v22 = vpop.eup %2650  ;;  %v1887_v15 = vmul.f32 %v2649_v40, %v3747_v3  ;;  %v1692_v55 = vsel %vm3945_vm1, %v1689_v4, %v1686_v5 }
 0x1f6   : > { %v1670_v12 = vadd.f32 1.0, %v1669_v16  ;;  %2662 = vlog2.f32 %v1405_v25  ;;  %1985 = vst [vmem:[%s3101_s18 + $0x1b8] sm:$0xff] %v1921_v51  ;;  %v1796_v60 = vadd.f32 %v1692_v55, %v900_v54  ;;  %v1672_v6 = vand.u32 2147483647, %v2641_v9 }
 0x1f7   : > { %v1408_v35 = vmul.f32 -0.5, %v3941_v34  ;;  %v1693_v38 = vadd.f32 1.0, %v3953_v22  ;;  %v3963_v13 = vpop.eup %2652  ;;  %1951 = vst [vmem:[%s3101_s18 + $0xa8] sm:$0xff] %v1887_v15  ;;  %v901_v3 = vmax.f32 %v3873_v17, 0.0  ;;  %v1148_v30 = vmul.f32 1.442695, %v1027_v21 }
 0x1f8   : > { %2664 = vtanh.f32 %v1796_v60  ;;  %v867_v54 = vmax.f32 %v3877_v45, 0.0  ;;  %v1387_v46 = vadd.f32 1.0, %v3963_v13  ;;  %v1094_v2 = vmul.f32 1.442695, %v1000_v26 }
 0x1f9   : > { %v1383_v14 = vmul.f32 %v2639_v29, %v1382_v1  ;;  %vm3974_vm2 = vcmp.lt.f32.partialorder %v1384_v44, 0.0004427343  ;;  %v1671_v56 = vmul.f32 %v2641_v9, %v1670_v12  ;;  %2666 = vlog2.f32 %v1693_v38 }
 0x1fa   : > { %vm3978_vm3 = vcmp.lt.f32.partialorder %v1672_v6, 0.0004427343  ;;  %v1409_v37 = vadd.f32 1.0, %v1408_v35  ;;  %2668 = vlog2.f32 %v1387_v46  ;;  %v1032_v57 = vsub.f32 0.0, %v968_v19 }
 0x1fb   : > { %v1411_v43 = vand.u32 2147483647, %v3941_v34  ;;  %v1696_v63 = vmul.f32 -0.5, %v3953_v22  ;;  %2670 = vpow2.f32 %v1148_v30  ;;  %v934_v29 = vand.u32 2147483647, %v3970_v31 }
 0x1fc   : > { %v2655_v28 = vpop.eup %2654  ;;  %v1699_v9 = vand.u32 2147483647, %v3953_v22  ;;  %2672 = vpow2.f32 %v1094_v2  ;;  %v1158_v0 = vmul.f32 1.442695, %v1032_v57  ;;  %v1390_v20 = vmul.f32 -0.5, %v3963_v13 }
 0x1fd   : > { %v2657_v7 = vpop.eup %2656  ;;  %v1380_v24 = vmul.f32 0.6931472, %v2655_v28  ;;  %v998_v4 = vsub.f32 0.0, %v934_v29  ;;  %v3990_v25 = vadd.f32 %v3827_v41, %v3420_v52  ;;  %v3997_v21 = vadd.f32 %v3827_v41, %v3478_v33 }
 0x1fe   : > { %v2659_v49 = vpop.eup %2658  ;;  %v1919_v16 = vmul.f32 %v2657_v7, %v3768_v50  ;;  %2674 = vpow2.f32 %v1158_v0  ;;  %vm4002_vm4 = vcmp.lt.f32.partialorder %v1411_v43, 0.0004427343  ;;  %v1410_v1 = vmul.f32 %v3941_v34, %v1409_v37 }
 0x1ff   : > { %v2661_v19 = vpop.eup %2660  ;;  %v1892_v47 = vmul.f32 %v2659_v49, %v3772_v62  ;;  %v1386_v5 = vsel %vm3974_vm2, %v1383_v14, %v1380_v24  ;;  %v1090_v51 = vmul.f32 1.442695, %v998_v4  ;;  %v1697_v44 = vadd.f32 1.0, %v1696_v63 }
 0x200   : > { %v2663_v26 = vpop.eup %2662  ;;  %1983 = vst [vmem:[%s3101_s18 + $0x1a8] sm:$0xff] %v1919_v16  ;;  %v1762_v50 = vadd.f32 %v1386_v5, %v866_v11  ;;  %v1668_v40 = vmul.f32 0.6931472, %v2661_v19  ;;  %v1393_v15 = vand.u32 2147483647, %v3963_v13  ;;  %v1391_v55 = vadd.f32 1.0, %v1390_v20 }
 0x201   : > { %1956 = vst [vmem:[%s3101_s18 + $0xd0] sm:$0xff] %v1892_v47  ;;  %v1407_v62 = vmul.f32 0.6931472, %v2663_v26  ;;  %v966_v11 = vand.u32 2147483647, %v3990_v25  ;;  %v4024_v2 = vadd.f32 %v3827_v41, %v3484_v39  ;;  %v1698_v53 = vmul.f32 %v3953_v22, %v1697_v44 }
 0x202   : > { %2676 = vtanh.f32 %v1762_v50  ;;  %v1674_v33 = vsel %vm3978_vm3, %v1671_v56, %v1668_v40  ;;  %v2665_v12 = vpop.eup %2664  ;;  %v937_v34 = vand.u32 2147483647, %v3997_v21  ;;  %vm4018_vm5 = vcmp.lt.f32.partialorder %v1699_v9, 0.0004427343 }
 0x203   : > { %v1794_v60 = vadd.f32 %v1674_v33, %v898_v18  ;;  %v1413_v6 = vsel %vm4002_vm4, %v1410_v1, %v1407_v62  ;;  %2678 = vpow2.f32 %v1090_v51  ;;  %v2667_v35 = vpop.eup %2666  ;;  %v1924_v38 = vmul.f32 %v2665_v12, %v3795_v36 }
 0x204   : > { %v1765_v30 = vadd.f32 %v1413_v6, %v869_v48  ;;  %v2669_v14 = vpop.eup %2668  ;;  %v1695_v18 = vmul.f32 0.6931472, %v2667_v35  ;;  %vm4027_vm6 = vcmp.lt.f32.partialorder %v1393_v15, 0.0004427343  ;;  %v1392_v48 = vmul.f32 %v3963_v13, %v1391_v55 }
 0x205   : > { %2680 = vtanh.f32 %v1794_v60  ;;  %v4031_v59 = vpop.eup %2670  ;;  %1988 = vst [vmem:[%s3101_s18 + $0x1d0] sm:$0xff] %v1924_v38  ;;  %v1389_v36 = vmul.f32 0.6931472, %v2669_v14  ;;  %v1030_v37 = vsub.f32 0.0, %v966_v11  ;;  %v1001_v22 = vsub.f32 0.0, %v937_v34 }
 0x206   : > { %2682 = vtanh.f32 %v1765_v30  ;;  %v4035_v57 = vpop.eup %2672  ;;  %v1701_v39 = vsel %vm4018_vm5, %v1698_v53, %v1695_v18  ;;  %v1675_v28 = vadd.f32 1.0, %v4031_v59  ;;  %v4042_v43 = vadd.f32 %v3827_v41, %v3500_v58 }
 0x207   : > { %v1797_v63 = vadd.f32 %v1701_v39, %v901_v3  ;;  %v1395_v29 = vsel %vm4027_vm6, %v1392_v48, %v1389_v36  ;;  %v1432_v13 = vadd.f32 1.0, %v4035_v57  ;;  %v969_v7 = vand.u32 2147483647, %v4024_v2 }
 0x208   : > { %v4050_v24 = vpop.eup %2674  ;;  %v1763_v9 = vadd.f32 %v1395_v29, %v867_v54  ;;  %2684 = vlog2.f32 %v1675_v28  ;;  %v1154_v0 = vmul.f32 1.442695, %v1030_v37  ;;  %v1096_v3 = vmul.f32 1.442695, %v1001_v22 }
 0x209   : > { %2686 = vtanh.f32 %v1797_v63  ;;  %v1720_v58 = vadd.f32 1.0, %v4050_v24  ;;  %v935_v49 = vand.u32 2147483647, %v4042_v43  ;;  %v1678_v20 = vmul.f32 -0.5, %v4031_v59 }
 0x20a   : > { %2688 = vtanh.f32 %v1763_v9  ;;  %v1033_v4 = vsub.f32 0.0, %v969_v7  ;;  %v1435_v26 = vmul.f32 -0.5, %v4035_v57  ;;  %v1723_v1 = vmul.f32 -0.5, %v4050_v24 }
 0x20b   : > { %2690 = vlog2.f32 %v1432_v13  ;;  %v999_v40 = vsub.f32 0.0, %v935_v49  ;;  %v1679_v62 = vadd.f32 1.0, %v1678_v20  ;;  %v1681_v44 = vand.u32 2147483647, %v4031_v59 }
 0x20c   : > { %v2677_v16 = vpop.eup %2676  ;;  %2692 = vlog2.f32 %v1720_v58  ;;  %v1160_v50 = vmul.f32 1.442695, %v1033_v4  ;;  %v4070_v33 = vadd.f32 %v3827_v41, %v3502_v23  ;;  %v899_v11 = vmax.f32 %v3907_v32, 0.0 }
 0x20d   : > { %v4057_v19 = vpop.eup %2678  ;;  %v1890_v47 = vmul.f32 %v2677_v16, %v3809_v10  ;;  %2694 = vpow2.f32 %v1154_v0  ;;  %v1092_v15 = vmul.f32 1.442695, %v999_v40  ;;  %v1680_v6 = vmul.f32 %v4031_v59, %v1679_v62 }
 0x20e   : > { %v1414_v54 = vadd.f32 1.0, %v4057_v19  ;;  %2696 = vpow2.f32 %v1096_v3  ;;  %v1417_v12 = vmul.f32 -0.5, %v4057_v19  ;;  %v1438_v34 = vand.u32 2147483647, %v4035_v57 }
 0x20f   : > { %v2681_v5 = vpop.eup %2680  ;;  %1954 = vst [vmem:[%s3101_s18 + $0xc0] sm:$0xff] %v1890_v47  ;;  %v1724_v35 = vadd.f32 1.0, %v1723_v1  ;;  %vm1682_vm7 = vcmp.lt.f32.partialorder %v1681_v44, 0.0004427343  ;;  %v872_v41 = vmax.f32 %v3912_v61, 0.0  ;;  %v904_v53 = vmax.f32 %v3931_v42, 0.0 }
 0x210   : > { %v2683_v52 = vpop.eup %2682  ;;  %v1922_v51 = vmul.f32 %v2681_v5, %v3831_v27  ;;  %2698 = vlog2.f32 %v1414_v54  ;;  %v1436_v27 = vadd.f32 1.0, %v1435_v26  ;;  %v1726_v30 = vand.u32 2147483647, %v4050_v24 }
 0x211   : > { %v1893_v10 = vmul.f32 %v2683_v52, %v3836_v8  ;;  %2700 = vpow2.f32 %v1160_v50  ;;  %v967_v56 = vand.u32 2147483647, %v4070_v33  ;;  %v1418_v37 = vadd.f32 1.0, %v1417_v12 }
 0x212   : > { %1986 = vst [vmem:[%s3101_s18 + $0x1c0] sm:$0xff] %v1922_v51  ;;  %v2685_v55 = vpop.eup %2684  ;;  %2702 = vpow2.f32 %v1092_v15  ;;  %vm1439_vm8 = vcmp.lt.f32.partialorder %v1438_v34, 0.0004427343  ;;  %v1725_v22 = vmul.f32 %v4050_v24, %v1724_v35  ;;  %vm1727_vm9 = vcmp.lt.f32.partialorder %v1726_v30, 0.0004427343 }
 0x213   : > { %1957 = vst [vmem:[%s3101_s18 + $0xd8] sm:$0xff] %v1893_v10  ;;  %v2687_v60 = vpop.eup %2686  ;;  %v1677_v8 = vmul.f32 0.6931472, %v2685_v55  ;;  %v1031_v0 = vsub.f32 0.0, %v967_v56  ;;  %v1419_v24 = vmul.f32 %v4057_v19, %v1418_v37  ;;  %v870_v20 = vmax.f32 %v3970_v31, 0.0 }
 0x214   : > { %v2689_v38 = vpop.eup %2688  ;;  %v1925_v23 = vmul.f32 %v2687_v60, %v3873_v17  ;;  %v1437_v17 = vmul.f32 %v4035_v57, %v1436_v27  ;;  %v902_v35 = vmax.f32 %v3990_v25, 0.0  ;;  %v873_v30 = vmax.f32 %v3997_v21, 0.0 }
 0x215   : > { %v2691_v46 = vpop.eup %2690  ;;  %v1891_v14 = vmul.f32 %v2689_v38, %v3877_v45  ;;  %v1683_v18 = vsel %vm1682_vm7, %v1680_v6, %v1677_v8  ;;  %v1420_v45 = vand.u32 2147483647, %v4057_v19  ;;  %v1156_v50 = vmul.f32 1.442695, %v1031_v0 }
 0x216   : > { %v2693_v59 = vpop.eup %2692  ;;  %1989 = vst [vmem:[%s3101_s18 + $0x1d8] sm:$0xff] %v1925_v23  ;;  %v1795_v36 = vadd.f32 %v1683_v18, %v899_v11  ;;  %v1434_v48 = vmul.f32 0.6931472, %v2691_v46 }
 0x217   : > { %v2695_v39 = vpop.eup %2694  ;;  %1955 = vst [vmem:[%s3101_s18 + $0xc8] sm:$0xff] %v1891_v14  ;;  %v1722_v28 = vmul.f32 0.6931472, %v2693_v59  ;;  %vm1421_vm10 = vcmp.lt.f32.partialorder %v1420_v45, 0.0004427343 }
 0x218   : > { %v4088_v63 = vpop.eup %2696  ;;  %2704 = vtanh.f32 %v1795_v36  ;;  %v1440_v29 = vsel %vm1439_vm8, %v1437_v17, %v1434_v48  ;;  %v1702_v13 = vadd.f32 1.0, %v2695_v39  ;;  %v1705_v26 = vmul.f32 -0.5, %v2695_v39 }
 0x219   : > { %v1768_v9 = vadd.f32 %v1440_v29, %v872_v41  ;;  %v1728_v58 = vsel %vm1727_vm9, %v1725_v22, %v1722_v28  ;;  %v1441_v57 = vadd.f32 1.0, %v4088_v63  ;;  %v1444_v19 = vmul.f32 -0.5, %v4088_v63 }
 0x21a   : > { %v2699_v7 = vpop.eup %2698  ;;  %v1800_v49 = vadd.f32 %v1728_v58, %v904_v53  ;;  %2706 = vlog2.f32 %v1702_v13  ;;  %v1706_v52 = vadd.f32 1.0, %v1705_v26  ;;  %v1708_v1 = vand.u32 2147483647, %v2695_v39 }
 0x21b   : > { %v4091_v3 = vpop.eup %2700  ;;  %v1416_v16 = vmul.f32 0.6931472, %v2699_v7  ;;  %2708 = vtanh.f32 %v1768_v9  ;;  %v1445_v55 = vadd.f32 1.0, %v1444_v19  ;;  %v1447_v60 = vand.u32 2147483647, %v4088_v63 }
 0x21c   : > { %v4095_v4 = vpop.eup %2702  ;;  %2710 = vtanh.f32 %v1800_v49  ;;  %v1729_v54 = vadd.f32 1.0, %v4091_v3  ;;  %v1732_v51 = vmul.f32 -0.5, %v4091_v3  ;;  %v1707_v12 = vmul.f32 %v2695_v39, %v1706_v52 }
 0x21d   : > { %v1422_v47 = vsel %vm1421_vm10, %v1419_v24, %v1416_v16  ;;  %2712 = vlog2.f32 %v1441_v57  ;;  %v1423_v40 = vadd.f32 1.0, %v4095_v4  ;;  %v1426_v44 = vmul.f32 -0.5, %v4095_v4 }
 0x21e   : > { %v1766_v5 = vadd.f32 %v1422_v47, %v870_v20  ;;  %2714 = vlog2.f32 %v1729_v54  ;;  %v1733_v8 = vadd.f32 1.0, %v1732_v51  ;;  %vm1709_vm11 = vcmp.lt.f32.partialorder %v1708_v1, 0.0004427343 }
 0x21f   : > { %v1427_v46 = vadd.f32 1.0, %v1426_v44  ;;  %v1446_v56 = vmul.f32 %v4088_v63, %v1445_v55  ;;  %vm1448_vm12 = vcmp.lt.f32.partialorder %v1447_v60, 0.0004427343  ;;  %v905_v36 = vmax.f32 %v4024_v2, 0.0 }
 0x220   : > { %2716 = vtanh.f32 %v1766_v5  ;;  %v871_v7 = vmax.f32 %v4042_v43, 0.0 }
 0x221   : > { %2718 = vlog2.f32 %v1423_v40  ;;  %v1428_v29 = vmul.f32 %v4095_v4, %v1427_v46 }
 0x222   : > { %2720 = vpow2.f32 %v1156_v50  ;;  %v2705_v62 = vpop.eup %2704 }
 0x223   : > { %v1923_v10 = vmul.f32 %v2705_v62, %v3907_v32  ;;  %v1735_v32 = vand.u32 2147483647, %v4091_v3 }
 0x224   : > { %v2707_v15 = vpop.eup %2706 }
 0x225   : > { %v2709_v11 = vpop.eup %2708  ;;  %1987 = vst [vmem:[%s3101_s18 + $0x1c8] sm:$0xff] %v1923_v10  ;;  %v1704_v27 = vmul.f32 0.6931472, %v2707_v15  ;;  %vm1736_vm13 = vcmp.lt.f32.partialorder %v1735_v32, 0.0004427343 }
 0x226   : > { %v2711_v6 = vpop.eup %2710  ;;  %v1896_v34 = vmul.f32 %v2709_v11, %v3912_v61  ;;  %v1429_v61 = vand.u32 2147483647, %v4095_v4 }
 0x227   : > { %v2713_v38 = vpop.eup %2712  ;;  %v1928_v23 = vmul.f32 %v2711_v6, %v3931_v42  ;;  %v1710_v41 = vsel %vm1709_vm11, %v1707_v12, %v1704_v27  ;;  %v1734_v42 = vmul.f32 %v4091_v3, %v1733_v8 }
 0x228   : > { %v2715_v14 = vpop.eup %2714  ;;  %1960 = vst [vmem:[%s3101_s18 + $0xf0] sm:$0xff] %v1896_v34  ;;  %v1798_v18 = vadd.f32 %v1710_v41, %v902_v35  ;;  %v1443_v53 = vmul.f32 0.6931472, %v2713_v38  ;;  %vm1430_vm14 = vcmp.lt.f32.partialorder %v1429_v61, 0.0004427343 }
 0x229   : > { %1992 = vst [vmem:[%s3101_s18 + $0x1f0] sm:$0xff] %v1928_v23  ;;  %v1731_v48 = vmul.f32 0.6931472, %v2715_v14 }
 0x22a   : > { %v2717_v59 = vpop.eup %2716  ;;  %2722 = vtanh.f32 %v1798_v18  ;;  %v1449_v39 = vsel %vm1448_vm12, %v1446_v56, %v1443_v53 }
 0x22b   : > { %v2719_v17 = vpop.eup %2718  ;;  %v1894_v37 = vmul.f32 %v2717_v59, %v3970_v31  ;;  %v1769_v22 = vadd.f32 %v1449_v39, %v873_v30  ;;  %v1737_v45 = vsel %vm1736_vm13, %v1734_v42, %v1731_v48 }
 0x22c   : > { %v2721_v28 = vpop.eup %2720  ;;  %v1425_v63 = vmul.f32 0.6931472, %v2719_v17  ;;  %v1801_v13 = vadd.f32 %v1737_v45, %v905_v36 }
 0x22d   : > { %1958 = vst [vmem:[%s3101_s18 + $0xe0] sm:$0xff] %v1894_v37  ;;  %v1711_v9 = vadd.f32 1.0, %v2721_v28  ;;  %2724 = vtanh.f32 %v1769_v22  ;;  %v1714_v57 = vmul.f32 -0.5, %v2721_v28  ;;  %v1717_v24 = vand.u32 2147483647, %v2721_v28 }
 0x22e   : > { %v1431_v58 = vsel %vm1430_vm14, %v1428_v29, %v1425_v63  ;;  %2726 = vtanh.f32 %v1801_v13 }
 0x22f   : > { %v1767_v31 = vadd.f32 %v1431_v58, %v871_v7  ;;  %2728 = vlog2.f32 %v1711_v9  ;;  %v1715_v49 = vadd.f32 1.0, %v1714_v57  ;;  %vm1718_vm15 = vcmp.lt.f32.partialorder %v1717_v24, 0.0004427343 }
 0x231   : > { %2730 = vtanh.f32 %v1767_v31  ;;  %v1716_v50 = vmul.f32 %v2721_v28, %v1715_v49 }
 0x234   : > { %v2723_v0 = vpop.eup %2722 }
 0x235   : > { %v1926_v3 = vmul.f32 %v2723_v0, %v3990_v25  ;;  %v903_v25 = vmax.f32 %v4070_v33, 0.0 }
 0x237   : > { %v2725_v16 = vpop.eup %2724  ;;  %1990 = vst [vmem:[%s3101_s18 + $0x1e0] sm:$0xff] %v1926_v3 }
 0x238   : > { %v2727_v20 = vpop.eup %2726  ;;  %v1897_v4 = vmul.f32 %v2725_v16, %v3997_v21 }
 0x239   : > { %v2729_v47 = vpop.eup %2728  ;;  %v1929_v54 = vmul.f32 %v2727_v20, %v4024_v2 }
 0x23a   : > { %1961 = vst [vmem:[%s3101_s18 + $0xf8] sm:$0xff] %v1897_v4  ;;  %v1713_v26 = vmul.f32 0.6931472, %v2729_v47 }
 0x23b   : > { %v2731_v5 = vpop.eup %2730  ;;  %1993 = vst [vmem:[%s3101_s18 + $0x1f8] sm:$0xff] %v1929_v54 }
 0x23c   : > { %v1895_v40 = vmul.f32 %v2731_v5, %v4042_v43  ;;  %v1719_v19 = vsel %vm1718_vm15, %v1716_v50, %v1713_v26 }
 0x23d   : > { %v1799_v52 = vadd.f32 %v1719_v19, %v903_v25 }
 0x23e   : > { %1959 = vst [vmem:[%s3101_s18 + $0xe8] sm:$0xff] %v1895_v40 }
 0x23f   : > { %2732 = vtanh.f32 %v1799_v52 }
 0x249   : > { %v2733_v51 = vpop.eup %2732 }
 0x24a   : > { %v1927_v21 = vmul.f32 %v2733_v51, %v4070_v33 }
 0x24c   : > { %1991 = vst [vmem:[%s3101_s18 + $0x1e8] sm:$0xff] %v1927_v21 }
 0x24d PF: > { %s13_s14 = sadd.s32 1, %s2758_s14   ;;  %s4269_s12 = smov %s2754_s13 }
 0x24e   : > { %p10_p5 = scmp.ge.s32.totalorder %s13_s14, 4   ;;  %s4270_s13 = smov %s4272_s15 }
 0x250   :  { %12 = sbr.rel (!%p10_p5) target bundleno = 2 (0x2), region = 68 }

// kernel: forward.13
= control target key start
LH: loop header
LB: loop body
LE: loop exit
PB: predicated region body
PF: predicated region fallthrough
CT: control target
= control target key end

     0   :  { %s2321_s12 = smov 0   ;;  %s2323_s13 = smov 0   ;;  %s2809_s0 = inlined_call_operand.vmem [shape: bf16[3584,384], index: 0, kind: input, shape index: {}]   ;;  %s2810_s1 = inlined_call_operand.vmem [shape: bf16[384,128], index: 1, kind: input, shape index: {}]   ;;  %s2811_s2 = inlined_call_operand.vmem [shape: f32[1,128], index: 2, kind: input, shape index: {}]   ;;  %s2812_s3 = inlined_call_operand.vmem [shape: f32[3584,128], index: 3, kind: output, shape index: {}]  }
   0x1   :  { %s2325_s14 = smov 0  }
   0x2 LB: > { %s25_s15 = sadd.s32 1, %s2294_s13  ;;  %p1818_p0 = scmp.ge.s32.totalorder %s2298_s14, 1  ;;  %s2298_s14 = sphi %s2325_s14, %s13_s14   ;;  %s2294_s13 = sphi %s2323_s13, %s2814_s13   ;;  %s2290_s12 = sphi %s2321_s12, %s2813_s12  }
   0x3   : > { %p27_p1 = scmp.ge.s32.totalorder %s25_s15, 7  ;;  %p170_p2 = scmp.lt.s32.totalorder %s2298_s14, 8 }
   0x5   : > { %s2816_s15 = smov (%p27_p1, %s25_s15), 0  ;;  %p171_p3 = pnand %p1818_p0, %p170_p2 }
   0x6   : > { %v2124_v0 = vld [vmem:[%s2810_s1] sm:$0xff] (!%p171_p3)   ;;  %v2300_v1 = vmov (!%p171_p3), 0   ;;  %s1819_s18 = sshll.u32 (!%p171_p3), %s2290_s12, 6  ;;  %v2125_v2 = vld [vmem:[%s2810_s1 + $0x8] sm:$0xff] (!%p171_p3)   ;;  %v2126_v3 = vld [vmem:[%s2810_s1 + $0x10] sm:$0xff] (!%p171_p3)  }
   0x7   : > { %174 = sbr.rel (%p171_p3) target bundleno = 474 (0x1da), region = 32  ;;  %1068 = vmatprep.subr.bf16.mxu0 (!%p171_p3), %v2300_v1  ;;  %2066 = vmatprep.subr.bf16.mxu1 (!%p171_p3), %v2300_v1  ;;  %p206_p4 = scmp.lt.s32.totalorder (!%p171_p3), %s1819_s18, 447  ;;  %v2127_v4 = vld [vmem:[%s2810_s1 + $0x18] sm:$0xff] (!%p171_p3)   ;;  %v2128_v5 = vld [vmem:[%s2810_s1 + $0x20] sm:$0xff] (!%p171_p3)   ;;  %v2129_v7 = vld [vmem:[%s2810_s1 + $0x28] sm:$0xff] (!%p171_p3)  }
   0x8   : > { %1069 = vmatpush1.bf16.msra.mxu0 (!%p171_p3), %v2124_v0  ;;  %2082 = vmatpush1.bf16.msra.mxu1 (!%p171_p3), %v2124_v0  ;;  %v2130_v9 = vld [vmem:[%s2810_s1 + $0x30] sm:$0xff] (!%p171_p3)   ;;  %v2131_v10 = vld [vmem:[%s2810_s1 + $0x38] sm:$0xff] (!%p171_p3)   ;;  %v2132_v11 = vld [vmem:[%s2810_s1 + $0x40] sm:$0xff] (!%p171_p3)  }
   0x9   : > { %1070 = vmatprep.subr.bf16.mxu0 (!%p171_p3), %v2300_v1  ;;  %2067 = vmatprep.subr.bf16.mxu1 (!%p171_p3), %v2300_v1  ;;  %v2133_v12 = vld [vmem:[%s2810_s1 + $0x48] sm:$0xff] (!%p171_p3)   ;;  %v2134_v13 = vld [vmem:[%s2810_s1 + $0x50] sm:$0xff] (!%p171_p3)   ;;  %v2135_v14 = vld [vmem:[%s2810_s1 + $0x58] sm:$0xff] (!%p171_p3)  }
   0xa   : > { %v2136_v15 = vld [vmem:[%s2810_s1 + $0x60] sm:$0xff] (!%p171_p3)   ;;  %v2137_v16 = vld [vmem:[%s2810_s1 + $0x68] sm:$0xff] (!%p171_p3)   ;;  %v2138_v17 = vld [vmem:[%s2810_s1 + $0x70] sm:$0xff] (!%p171_p3)  }
   0xb   : > { %v2139_v18 = vld [vmem:[%s2810_s1 + $0x78] sm:$0xff] (!%p171_p3)   ;;  %v2146_v19 = vld [vmem:[%s2810_s1 + $0x80] sm:$0xff] (!%p171_p3)   ;;  %v2153_v24 = vld [vmem:[%s2810_s1 + $0x88] sm:$0xff] (!%p171_p3)  }
   0xc   : > { %1071 = vmatpush1.bf16.msra.mxu0 (!%p171_p3), %v2125_v2  ;;  %2083 = vmatpush1.bf16.msra.mxu1 (!%p171_p3), %v2125_v2  ;;  %v2160_v25 = vld [vmem:[%s2810_s1 + $0x90] sm:$0xff] (!%p171_p3)   ;;  %v2167_v30 = vld [vmem:[%s2810_s1 + $0x98] sm:$0xff] (!%p171_p3)   ;;  %v2174_v32 = vld [vmem:[%s2810_s1 + $0xa0] sm:$0xff] (!%p171_p3)  }
   0xd   : > { %1072 = vmatprep.subr.bf16.mxu0 (!%p171_p3), %v2300_v1  ;;  %2068 = vmatprep.subr.bf16.mxu1 (!%p171_p3), %v2300_v1  ;;  %v2181_v36 = vld [vmem:[%s2810_s1 + $0xa8] sm:$0xff] (!%p171_p3)   ;;  %v2188_v41 = vld [vmem:[%s2810_s1 + $0xb0] sm:$0xff] (!%p171_p3)   ;;  %v2195_v42 = vld [vmem:[%s2810_s1 + $0xb8] sm:$0xff] (!%p171_p3)  }
   0xe   : > { %s2818_s18 = smov (!%p206_p4, %s1819_s18), 447 }
   0xf   : > { %s2098_s25 = smul.u32 12, %s2818_s18 }
  0x10   : > { %1073 = vmatpush1.bf16.msra.mxu0 %v2126_v3  ;;  %2084 = vmatpush1.bf16.msra.mxu1 %v2126_v3 }
  0x11   : > { %1074 = vmatprep.subr.bf16.mxu0 %v2300_v1  ;;  %2069 = vmatprep.subr.bf16.mxu1 %v2300_v1  ;;  %s2368_s30 = scalar_lea.vmem %s2809_s0, %s2098_s25  ;;  %s1822_s25 = sshll.u32 %s2818_s18, 3 }
  0x12   : > { %v2142_v6 = vld [vmem:[%s2368_s30 + $0x4] ss:$12 sps:$4 sm:$0xff]   ;;  %v2140_v20 = vld [vmem:[%s2368_s30] ss:$12 sps:$4 sm:$0xff]   ;;  %v2147_v22 = vld [vmem:[%s2368_s30 + $0x1c] ss:$12 sps:$4 sm:$0xff]   ;;  %s2621_s28 = scalar_lea.vmem %s2812_s3, %s1822_s25 }
  0x13   : > { %v2145_v8 = vld [vmem:[%s2368_s30 + $0x244] ss:$12 sps:$4 sm:$0xff]   ;;  %1100 = vmatprep.mubr.bf16.mxu0 %v2142_v6  ;;  %v2143_v21 = vld [vmem:[%s2368_s30 + $0x240] ss:$12 sps:$4 sm:$0xff]   ;;  %v2149_v23 = vld [vmem:[%s2368_s30 + $0x25c] ss:$12 sps:$4 sm:$0xff]  }
  0x14   : > { %1075 = vmatpush1.bf16.msra.mxu0 %v2127_v4  ;;  %2085 = vmatpush1.bf16.msra.mxu1 %v2127_v4  ;;  %v2151_v26 = vld [vmem:[%s2368_s30 + $0x18] ss:$12 sps:$4 sm:$0xff]   ;;  %v2154_v28 = vld [vmem:[%s2368_s30 + $0x34] ss:$12 sps:$4 sm:$0xff]   ;;  %v2158_v31 = vld [vmem:[%s2368_s30 + $0x30] ss:$12 sps:$4 sm:$0xff]  }
  0x15   : > { %1076 = vmatprep.subr.bf16.mxu0 %v2300_v1  ;;  %2070 = vmatprep.subr.bf16.mxu1 %v2300_v1  ;;  %v2152_v27 = vld [vmem:[%s2368_s30 + $0x258] ss:$12 sps:$4 sm:$0xff]   ;;  %v2156_v29 = vld [vmem:[%s2368_s30 + $0x274] ss:$12 sps:$4 sm:$0xff]   ;;  %v2159_v33 = vld [vmem:[%s2368_s30 + $0x270] ss:$12 sps:$4 sm:$0xff]  }
  0x16   : > { %1292 = vmatprep.mubr.bf16.mxu1 %v2145_v8  ;;  %v2161_v34 = vld [vmem:[%s2368_s30 + $0x4c] ss:$12 sps:$4 sm:$0xff]   ;;  %v2165_v37 = vld [vmem:[%s2368_s30 + $0x48] ss:$12 sps:$4 sm:$0xff]   ;;  %v2168_v39 = vld [vmem:[%s2368_s30 + $0x64] ss:$12 sps:$4 sm:$0xff]  }
  0x17   : > { %v2163_v35 = vld [vmem:[%s2368_s30 + $0x28c] ss:$12 sps:$4 sm:$0xff]   ;;  %v2166_v38 = vld [vmem:[%s2368_s30 + $0x288] ss:$12 sps:$4 sm:$0xff]   ;;  %v2170_v40 = vld [vmem:[%s2368_s30 + $0x2a4] ss:$12 sps:$4 sm:$0xff]  }
  0x18   : > { %1077 = vmatpush1.bf16.msra.mxu0 %v2128_v5  ;;  %2086 = vmatpush1.bf16.msra.mxu1 %v2128_v5  ;;  %v2172_v43 = vld [vmem:[%s2368_s30 + $0x60] ss:$12 sps:$4 sm:$0xff]   ;;  %v2175_v45 = vld [vmem:[%s2368_s30 + $0x7c] ss:$12 sps:$4 sm:$0xff]   ;;  %v2179_v47 = vld [vmem:[%s2368_s30 + $0x78] ss:$12 sps:$4 sm:$0xff]  }
  0x19   : > { %1078 = vmatprep.subr.bf16.mxu0 %v2300_v1  ;;  %2071 = vmatprep.subr.bf16.mxu1 %v2300_v1  ;;  %v2173_v44 = vld [vmem:[%s2368_s30 + $0x2a0] ss:$12 sps:$4 sm:$0xff]   ;;  %v2177_v46 = vld [vmem:[%s2368_s30 + $0x2bc] ss:$12 sps:$4 sm:$0xff]   ;;  %v2180_v48 = vld [vmem:[%s2368_s30 + $0x2b8] ss:$12 sps:$4 sm:$0xff]  }
  0x1a   : > { %v2182_v49 = vld [vmem:[%s2368_s30 + $0x94] ss:$12 sps:$4 sm:$0xff]   ;;  %v2186_v51 = vld [vmem:[%s2368_s30 + $0x90] ss:$12 sps:$4 sm:$0xff]   ;;  %v2189_v53 = vld [vmem:[%s2368_s30 + $0xac] ss:$12 sps:$4 sm:$0xff]  }
  0x1b   : > { %v2184_v50 = vld [vmem:[%s2368_s30 + $0x2d4] ss:$12 sps:$4 sm:$0xff]   ;;  %v2187_v52 = vld [vmem:[%s2368_s30 + $0x2d0] ss:$12 sps:$4 sm:$0xff]   ;;  %v2191_v54 = vld [vmem:[%s2368_s30 + $0x2ec] ss:$12 sps:$4 sm:$0xff]  }
  0x1c   : > { %1079 = vmatpush1.bf16.msra.mxu0 %v2129_v7  ;;  %2087 = vmatpush1.bf16.msra.mxu1 %v2129_v7  ;;  %v2193_v55 = vld [vmem:[%s2368_s30 + $0xa8] ss:$12 sps:$4 sm:$0xff]   ;;  %v2196_v57 = vld [vmem:[%s2368_s30 + $0xc4] ss:$12 sps:$4 sm:$0xff]   ;;  %v2199_v59 = vld [vmem:[%s2368_s30 + $0xc0] ss:$12 sps:$4 sm:$0xff]  }
  0x1d   : > { %1080 = vmatprep.subr.bf16.mxu0 %v2300_v1  ;;  %2072 = vmatprep.subr.bf16.mxu1 %v2300_v1  ;;  %v2194_v56 = vld [vmem:[%s2368_s30 + $0x2e8] ss:$12 sps:$4 sm:$0xff]   ;;  %v2200_v60 = vld [vmem:[%s2368_s30 + $0x20] ss:$12 sps:$4 sm:$0xff]   ;;  %v2203_v62 = vld [vmem:[%s2368_s30 + $0x38] ss:$12 sps:$4 sm:$0xff]  }
  0x1e   : > { %v2198_v58 = vld [vmem:[%s2368_s30 + $0x8] ss:$12 sps:$4 sm:$0xff]   ;;  %v2204_v63 = vld [vmem:[%s2368_s30 + $0xd8] ss:$12 sps:$4 sm:$0xff]   ;;  %v2205_v0 = vld [vmem:[%s2368_s30 + $0x50] ss:$12 sps:$4 sm:$0xff]  }
  0x1f   : > { %v2201_v61 = vld [vmem:[%s2368_s30 + $0xdc] ss:$12 sps:$4 sm:$0xff]   ;;  %v2210_v4 = vld [vmem:[%s2368_s30 + $0x80] ss:$12 sps:$4 sm:$0xff]   ;;  %v2213_v6 = vld [vmem:[%s2368_s30 + $0x98] ss:$12 sps:$4 sm:$0xff]  }
  0x20   : > { %1081 = vmatpush1.bf16.msra.mxu0 %v2130_v9  ;;  %2088 = vmatpush1.bf16.msra.mxu1 %v2130_v9  ;;  %v2208_v2 = vld [vmem:[%s2368_s30 + $0x68] ss:$12 sps:$4 sm:$0xff]   ;;  %v2209_v3 = vld [vmem:[%s2368_s30 + $0xf0] ss:$12 sps:$4 sm:$0xff]   ;;  %v2211_v5 = vld [vmem:[%s2368_s30 + $0x10c] ss:$12 sps:$4 sm:$0xff]  }
  0x21   : > { %1082 = vmatprep.subr.bf16.mxu0 %v2300_v1  ;;  %2073 = vmatprep.subr.bf16.mxu1 %v2300_v1  ;;  %v2214_v7 = vld [vmem:[%s2368_s30 + $0x108] ss:$12 sps:$4 sm:$0xff]   ;;  %v2215_v8 = vld [vmem:[%s2368_s30 + $0xb0] ss:$12 sps:$4 sm:$0xff]  }
  0x22   : > { %v2216_v9 = vld [vmem:[%s2368_s30 + $0x124] ss:$12 sps:$4 sm:$0xff]  }
  0x24   : > { %1083 = vmatpush1.bf16.msra.mxu0 %v2131_v10  ;;  %2089 = vmatpush1.bf16.msra.mxu1 %v2131_v10  ;;  %v2218_v10 = vld [vmem:[%s2368_s30 + $0xc8] ss:$12 sps:$4 sm:$0xff]  }
  0x25   : > { %1084 = vmatprep.subr.bf16.mxu0 %v2300_v1  ;;  %2074 = vmatprep.subr.bf16.mxu1 %v2300_v1 }
  0x28   : > { %1085 = vmatpush1.bf16.msra.mxu0 %v2132_v11  ;;  %2090 = vmatpush1.bf16.msra.mxu1 %v2132_v11  ;;  %v2219_v11 = vld [vmem:[%s2368_s30 + $0x120] ss:$12 sps:$4 sm:$0xff]  }
  0x29   : > { %1086 = vmatprep.subr.bf16.mxu0 %v2300_v1  ;;  %2075 = vmatprep.subr.bf16.mxu1 %v2300_v1 }
  0x2c   : > { %1087 = vmatpush1.bf16.msra.mxu0 %v2133_v12  ;;  %2091 = vmatpush1.bf16.msra.mxu1 %v2133_v12  ;;  %v2220_v12 = vld [vmem:[%s2368_s30 + $0xe0] ss:$12 sps:$4 sm:$0xff]  }
  0x2d   : > { %1088 = vmatprep.subr.bf16.mxu0 %v2300_v1  ;;  %2076 = vmatprep.subr.bf16.mxu1 %v2300_v1 }
  0x30   : > { %1089 = vmatpush1.bf16.msra.mxu0 %v2134_v13  ;;  %2092 = vmatpush1.bf16.msra.mxu1 %v2134_v13  ;;  %v2221_v13 = vld [vmem:[%s2368_s30 + $0x13c] ss:$12 sps:$4 sm:$0xff]  }
  0x31   : > { %1090 = vmatprep.subr.bf16.mxu0 %v2300_v1  ;;  %2077 = vmatprep.subr.bf16.mxu1 %v2300_v1 }
  0x34   : > { %1091 = vmatpush1.bf16.msra.mxu0 %v2135_v14  ;;  %2093 = vmatpush1.bf16.msra.mxu1 %v2135_v14  ;;  %v2223_v14 = vld [vmem:[%s2368_s30 + $0xf8] ss:$12 sps:$4 sm:$0xff]  }
  0x35   : > { %1092 = vmatprep.subr.bf16.mxu0 %v2300_v1  ;;  %2078 = vmatprep.subr.bf16.mxu1 %v2300_v1 }
  0x38   : > { %1093 = vmatpush1.bf16.msra.mxu0 %v2136_v15  ;;  %2094 = vmatpush1.bf16.msra.mxu1 %v2136_v15  ;;  %v2224_v15 = vld [vmem:[%s2368_s30 + $0x138] ss:$12 sps:$4 sm:$0xff]  }
  0x39   : > { %1094 = vmatprep.subr.bf16.mxu0 %v2300_v1  ;;  %2079 = vmatprep.subr.bf16.mxu1 %v2300_v1 }
  0x3c   : > { %1095 = vmatpush1.bf16.msra.mxu0 %v2137_v16  ;;  %2095 = vmatpush1.bf16.msra.mxu1 %v2137_v16  ;;  %v2225_v16 = vld [vmem:[%s2368_s30 + $0x110] ss:$12 sps:$4 sm:$0xff]  }
  0x3d   : > { %1096 = vmatprep.subr.bf16.mxu0 %v2300_v1  ;;  %2080 = vmatprep.subr.bf16.mxu1 %v2300_v1 }
  0x40   : > { %1097 = vmatpush1.bf16.msra.mxu0 %v2138_v17  ;;  %2096 = vmatpush1.bf16.msra.mxu1 %v2138_v17  ;;  %v2226_v17 = vld [vmem:[%s2368_s30 + $0x154] ss:$12 sps:$4 sm:$0xff]  }
  0x41   : > { %1098 = vmatprep.subr.bf16.mxu0 %v2300_v1  ;;  %2081 = vmatprep.subr.bf16.mxu1 %v2300_v1  ;;  %v2206_v1 = vld [vmem:[%s2368_s30 + $0xf4] ss:$12 sps:$4 sm:$0xff]  }
  0x44   : > { %1099 = vmatpush1.bf16.msra.mxu0 %v2139_v18  ;;  %2097 = vmatpush1.bf16.msra.mxu1 %v2139_v18  ;;  %v2228_v18 = vld [vmem:[%s2368_s30 + $0x128] ss:$12 sps:$4 sm:$0xff]  }
  0x45   : > { %1986 = vmatprep.subr.bf16.mxu1 %v2146_v19 }
  0x47   : > { %1101 = vmatmul.mubr.bf16.vlgmr.msra.gmra.mrb[0].mxu0 %v2140_v20  ;;  %1293 = vmatmul.mubr.bf16.vlgmr.msra.gmra.mrb[0].mxu1 %v2143_v21  ;;  %v2230_v20 = vld [vmem:[%s2368_s30 + $0x140] ss:$12 sps:$4 sm:$0xff]  }
  0x48   : > { %1987 = vmatpush3.bf16.msra.mxu1 %v2146_v19  ;;  %1108 = vmatprep.mubr.bf16.mxu0 %v2147_v22  ;;  %v2229_v19 = vld [vmem:[%s2368_s30 + $0x150] ss:$12 sps:$4 sm:$0xff]   ;;  %v2231_v21 = vld [vmem:[%s2368_s30 + $0x16c] ss:$12 sps:$4 sm:$0xff]  }
  0x49   : > { %1300 = vmatprep.mubr.bf16.mxu1 %v2149_v23  ;;  %1988 = vmatprep.subr.bf16.mxu1 %v2153_v24  ;;  %v2233_v22 = vld [vmem:[%s2368_s30 + $0x158] ss:$12 sps:$4 sm:$0xff]   ;;  %v2234_v23 = vld [vmem:[%s2368_s30 + $0x168] ss:$12 sps:$4 sm:$0xff]  }
  0x4c   : > { %1989 = vmatpush3.bf16.msra.mxu1 %v2153_v24  ;;  %v2235_v24 = vld [vmem:[%s2368_s30 + $0x170] ss:$12 sps:$4 sm:$0xff]  }
  0x4d   : > { %1990 = vmatprep.subr.bf16.mxu1 %v2160_v25 }
  0x4f   : > { %1109 = vmatmul.mubr.bf16.gmra.mrb[4].mxu0 %v2151_v26  ;;  %1301 = vmatmul.mubr.bf16.gmra.mrb[4].mxu1 %v2152_v27  ;;  %v2238_v26 = vld [vmem:[%s2368_s30 + $0x188] ss:$12 sps:$4 sm:$0xff]   ;;  %v2239_v27 = vld [vmem:[%s2368_s30 + $0x180] ss:$12 sps:$4 sm:$0xff]  }
  0x50   : > { %1116 = vmatprep.mubr.bf16.mxu0 %v2154_v28  ;;  %1308 = vmatprep.mubr.bf16.mxu1 %v2156_v29  ;;  %v2240_v28 = vld [vmem:[%s2368_s30 + $0x1a0] ss:$12 sps:$4 sm:$0xff]   ;;  %v2241_v29 = vld [vmem:[%s2368_s30 + $0x19c] ss:$12 sps:$4 sm:$0xff]  }
  0x51   : > { %1991 = vmatpush3.bf16.msra.mxu1 %v2160_v25  ;;  %v2236_v25 = vld [vmem:[%s2368_s30 + $0x184] ss:$12 sps:$4 sm:$0xff]  }
  0x52   : > { %1992 = vmatprep.subr.bf16.mxu1 %v2167_v30 }
  0x55   : > { %1993 = vmatpush3.bf16.msra.mxu1 %v2167_v30  ;;  %v2243_v30 = vld [vmem:[%s2368_s30 + $0x1b8] ss:$12 sps:$4 sm:$0xff]  }
  0x56   : > { %1994 = vmatprep.subr.bf16.mxu1 %v2174_v32 }
  0x57   : > { %1117 = vmatmul.mubr.bf16.gmra.mrb[8].mxu0 %v2158_v31  ;;  %1309 = vmatmul.mubr.bf16.gmra.mrb[8].mxu1 %v2159_v33  ;;  %v2244_v31 = vld [vmem:[%s2368_s30 + $0x198] ss:$12 sps:$4 sm:$0xff]   ;;  %v2246_v33 = vld [vmem:[%s2368_s30 + $0x1b4] ss:$12 sps:$4 sm:$0xff]  }
  0x58   : > { %1124 = vmatprep.mubr.bf16.mxu0 %v2161_v34  ;;  %1316 = vmatprep.mubr.bf16.mxu1 %v2163_v35  ;;  %v2248_v34 = vld [vmem:[%s2368_s30 + $0x1e8] ss:$12 sps:$4 sm:$0xff]   ;;  %v2249_v35 = vld [vmem:[%s2368_s30 + $0x1b0] ss:$12 sps:$4 sm:$0xff]  }
  0x59   : > { %1995 = vmatpush3.bf16.msra.mxu1 %v2174_v32  ;;  %v2245_v32 = vld [vmem:[%s2368_s30 + $0x1d0] ss:$12 sps:$4 sm:$0xff]  }
  0x5a   : > { %1996 = vmatprep.subr.bf16.mxu1 %v2181_v36 }
  0x5d   : > { %1997 = vmatpush3.bf16.msra.mxu1 %v2181_v36  ;;  %v2250_v36 = vld [vmem:[%s2368_s30 + $0x200] ss:$12 sps:$4 sm:$0xff]  }
  0x5e   : > { %1998 = vmatprep.subr.bf16.mxu1 %v2188_v41 }
  0x5f   : > { %1125 = vmatmul.mubr.bf16.gmra.mrb[12].mxu0 %v2165_v37  ;;  %1317 = vmatmul.mubr.bf16.gmra.mrb[12].mxu1 %v2166_v38  ;;  %v2251_v37 = vld [vmem:[%s2368_s30 + $0x1cc] ss:$12 sps:$4 sm:$0xff]  }
  0x60   : > { %1132 = vmatprep.mubr.bf16.mxu0 %v2168_v39  ;;  %1324 = vmatprep.mubr.bf16.mxu1 %v2170_v40  ;;  %v2253_v38 = vld [vmem:[%s2368_s30 + $0x218] ss:$12 sps:$4 sm:$0xff]   ;;  %v2254_v39 = vld [vmem:[%s2368_s30 + $0x1c8] ss:$12 sps:$4 sm:$0xff]   ;;  %v2255_v40 = vld [vmem:[%s2368_s30 + $0x230] ss:$12 sps:$4 sm:$0xff]  }
  0x61   : > { %1999 = vmatpush3.bf16.msra.mxu1 %v2188_v41  ;;  %v2256_v41 = vld [vmem:[%s2368_s30 + $0x1e4] ss:$12 sps:$4 sm:$0xff]  }
  0x62   : > { %2000 = vmatprep.subr.bf16.mxu1 %v2195_v42 }
  0x65   : > { %2001 = vmatpush3.bf16.msra.mxu1 %v2195_v42  ;;  %v2258_v42 = vld [vmem:[%s2368_s30 + $0x248] ss:$12 sps:$4 sm:$0xff]  }
  0x67   : > { %1133 = vmatmul.mubr.bf16.gmra.mrb[16].mxu0 %v2172_v43  ;;  %1325 = vmatmul.mubr.bf16.gmra.mrb[16].mxu1 %v2173_v44  ;;  %v2259_v43 = vld [vmem:[%s2368_s30 + $0x1e0] ss:$12 sps:$4 sm:$0xff]  }
  0x68   : > { %1140 = vmatprep.mubr.bf16.mxu0 %v2175_v45  ;;  %1332 = vmatprep.mubr.bf16.mxu1 %v2177_v46  ;;  %v2260_v44 = vld [vmem:[%s2368_s30 + $0x260] ss:$12 sps:$4 sm:$0xff]   ;;  %v2261_v45 = vld [vmem:[%s2368_s30 + $0x1fc] ss:$12 sps:$4 sm:$0xff]   ;;  %v2263_v46 = vld [vmem:[%s2368_s30 + $0x278] ss:$12 sps:$4 sm:$0xff]  }
  0x6f   : > { %1141 = vmatmul.mubr.bf16.gmra.mrb[20].mxu0 %v2179_v47  ;;  %1333 = vmatmul.mubr.bf16.gmra.mrb[20].mxu1 %v2180_v48  ;;  %v2264_v47 = vld [vmem:[%s2368_s30 + $0x1f8] ss:$12 sps:$4 sm:$0xff]   ;;  %v2265_v48 = vld [vmem:[%s2368_s30 + $0x290] ss:$12 sps:$4 sm:$0xff]  }
  0x70   : > { %1148 = vmatprep.mubr.bf16.mxu0 %v2182_v49  ;;  %1340 = vmatprep.mubr.bf16.mxu1 %v2184_v50  ;;  %v2266_v49 = vld [vmem:[%s2368_s30 + $0x214] ss:$12 sps:$4 sm:$0xff]  }
  0x71   : > { %v2268_v50 = vld [vmem:[%s2368_s30 + $0x2a8] ss:$12 sps:$4 sm:$0xff]  }
  0x77   : > { %1149 = vmatmul.mubr.bf16.gmra.mrb[24].mxu0 %v2186_v51  ;;  %1341 = vmatmul.mubr.bf16.gmra.mrb[24].mxu1 %v2187_v52  ;;  %v2269_v51 = vld [vmem:[%s2368_s30 + $0x210] ss:$12 sps:$4 sm:$0xff]   ;;  %v2270_v52 = vld [vmem:[%s2368_s30 + $0x2c0] ss:$12 sps:$4 sm:$0xff]  }
  0x78   : > { %1156 = vmatprep.mubr.bf16.mxu0 %v2189_v53  ;;  %1348 = vmatprep.mubr.bf16.mxu1 %v2191_v54  ;;  %v2271_v53 = vld [vmem:[%s2368_s30 + $0x22c] ss:$12 sps:$4 sm:$0xff]  }
  0x79   : > { %v2273_v54 = vld [vmem:[%s2368_s30 + $0x2d8] ss:$12 sps:$4 sm:$0xff]  }
  0x7f   : > { %1157 = vmatmul.mubr.bf16.gmra.mrb[28].mxu0 %v2193_v55  ;;  %1349 = vmatmul.mubr.bf16.gmra.mrb[28].mxu1 %v2194_v56  ;;  %v2274_v55 = vld [vmem:[%s2368_s30 + $0x228] ss:$12 sps:$4 sm:$0xff]   ;;  %v2275_v56 = vld [vmem:[%s2368_s30 + $0x2f0] ss:$12 sps:$4 sm:$0xff]  }
  0x80   : > { %1164 = vmatprep.mubr.bf16.mxu0 %v2196_v57  ;;  %2002 = vmatprep.mubr.bf16.mxu1 %v2198_v58 }
  0x87   : > { %1165 = vmatmul.mubr.bf16.gmra.mrb[32].mxu0 %v2199_v59  ;;  %2003 = vmatmul.mubr.bf16.vlgmr.msra.gmra.mrb[32].mxu1 %v2200_v60 }
  0x88   : > { %1172 = vmatprep.mubr.bf16.mxu0 %v2201_v61  ;;  %2006 = vmatprep.mubr.bf16.mxu1 %v2203_v62 }
  0x8f   : > { %1173 = vmatmul.mubr.bf16.gmra.mrb[36].mxu0 %v2204_v63  ;;  %2007 = vmatmul.mubr.bf16.gmra.mrb[36].mxu1 %v2205_v0 }
  0x90   : > { %1180 = vmatprep.mubr.bf16.mxu0 %v2206_v1  ;;  %2010 = vmatprep.mubr.bf16.mxu1 %v2208_v2 }
  0x97   : > { %1181 = vmatmul.mubr.bf16.gmra.mrb[40].mxu0 %v2209_v3  ;;  %2011 = vmatmul.mubr.bf16.gmra.mrb[40].mxu1 %v2210_v4 }
  0x98   : > { %1188 = vmatprep.mubr.bf16.mxu0 %v2211_v5  ;;  %2014 = vmatprep.mubr.bf16.mxu1 %v2213_v6 }
  0x9f   : > { %1189 = vmatmul.mubr.bf16.gmra.mrb[44].mxu0 %v2214_v7  ;;  %2015 = vmatmul.mubr.bf16.gmra.mrb[44].mxu1 %v2215_v8 }
  0xa0   : > { %1196 = vmatprep.mubr.bf16.mxu0 %v2216_v9  ;;  %2018 = vmatprep.mubr.bf16.mxu1 %v2218_v10 }
  0xa7   : > { %1197 = vmatmul.mubr.bf16.gmra.mrb[48].mxu0 %v2219_v11  ;;  %2019 = vmatmul.mubr.bf16.gmra.mrb[48].mxu1 %v2220_v12 }
  0xa8   : > { %1204 = vmatprep.mubr.bf16.mxu0 %v2221_v13  ;;  %2022 = vmatprep.mubr.bf16.mxu1 %v2223_v14 }
  0xaf   : > { %1205 = vmatmul.mubr.bf16.gmra.mrb[52].mxu0 %v2224_v15  ;;  %2023 = vmatmul.mubr.bf16.gmra.mrb[52].mxu1 %v2225_v16 }
  0xb0   : > { %1212 = vmatprep.mubr.bf16.mxu0 %v2226_v17  ;;  %2026 = vmatprep.mubr.bf16.mxu1 %v2228_v18 }
  0xb7   : > { %1213 = vmatmul.mubr.bf16.gmra.mrb[56].mxu0 %v2229_v19  ;;  %2027 = vmatmul.mubr.bf16.gmra.mrb[56].mxu1 %v2230_v20 }
  0xb8   : > { %1220 = vmatprep.mubr.bf16.mxu0 %v2231_v21  ;;  %2030 = vmatprep.mubr.bf16.mxu1 %v2233_v22 }
  0xbf   : > { %1221 = vmatmul.mubr.bf16.gmra.mrb[60].mxu0 %v2234_v23  ;;  %2031 = vmatmul.mubr.bf16.gmra.mrb[60].mxu1 %v2235_v24 }
  0xc0   : > { %1228 = vmatprep.mubr.bf16.mxu0 %v2236_v25  ;;  %2034 = vmatprep.mubr.bf16.mxu1 %v2238_v26 }
  0xc7   : > { %1229 = vmatmul.mubr.bf16.gmra.mrb[64].mxu0 %v2239_v27  ;;  %2035 = vmatmul.mubr.bf16.gmra.mrb[64].mxu1 %v2240_v28 }
  0xc8   : > { %1236 = vmatprep.mubr.bf16.mxu0 %v2241_v29  ;;  %2038 = vmatprep.mubr.bf16.mxu1 %v2243_v30 }
  0xcf   : > { %1237 = vmatmul.mubr.bf16.gmra.mrb[68].mxu0 %v2244_v31  ;;  %2039 = vmatmul.mubr.bf16.gmra.mrb[68].mxu1 %v2245_v32 }
  0xd0   : > { %1244 = vmatprep.mubr.bf16.mxu0 %v2246_v33  ;;  %2042 = vmatprep.mubr.bf16.mxu1 %v2248_v34 }
  0xd7   : > { %1245 = vmatmul.mubr.bf16.gmra.mrb[72].mxu0 %v2249_v35  ;;  %2043 = vmatmul.mubr.bf16.gmra.mrb[72].mxu1 %v2250_v36 }
  0xd8   : > { %1252 = vmatprep.mubr.bf16.mxu0 %v2251_v37  ;;  %2046 = vmatprep.mubr.bf16.mxu1 %v2253_v38 }
  0xdf   : > { %1253 = vmatmul.mubr.bf16.gmra.mrb[76].mxu0 %v2254_v39  ;;  %2047 = vmatmul.mubr.bf16.gmra.mrb[76].mxu1 %v2255_v40 }
  0xe0   : > { %1260 = vmatprep.mubr.bf16.mxu0 %v2256_v41  ;;  %2050 = vmatprep.mubr.bf16.mxu1 %v2258_v42 }
  0xe7   : > { %1261 = vmatmul.mubr.bf16.gmra.mrb[80].mxu0 %v2259_v43  ;;  %2051 = vmatmul.mubr.bf16.gmra.mrb[80].mxu1 %v2260_v44 }
  0xe8   : > { %1268 = vmatprep.mubr.bf16.mxu0 %v2261_v45  ;;  %2054 = vmatprep.mubr.bf16.mxu1 %v2263_v46 }
  0xef   : > { %1269 = vmatmul.mubr.bf16.gmra.mrb[84].mxu0 %v2264_v47  ;;  %2055 = vmatmul.mubr.bf16.gmra.mrb[84].mxu1 %v2265_v48 }
  0xf0   : > { %1276 = vmatprep.mubr.bf16.mxu0 %v2266_v49  ;;  %2058 = vmatprep.mubr.bf16.mxu1 %v2268_v50 }
  0xf7   : > { %1277 = vmatmul.mubr.bf16.gmra.mrb[88].mxu0 %v2269_v51  ;;  %2059 = vmatmul.mubr.bf16.gmra.mrb[88].mxu1 %v2270_v52 }
  0xf8   : > { %1284 = vmatprep.mubr.bf16.mxu0 %v2271_v53  ;;  %2062 = vmatprep.mubr.bf16.mxu1 %v2273_v54 }
  0xff   : > { %1285 = vmatmul.mubr.bf16.gmra.mrb[92].mxu0 %v2274_v55  ;;  %2063 = vmatmul.mubr.bf16.gmra.mrb[92].mxu1 %v2275_v56 }
 0x11a   : > { %v2547_v57 = vpop.f32.mrb[0].mxu0  ;;  %v2549_v58 = vpop.f32.mrb[0].mxu1 }
 0x11b   : > { %v1104_v59 = vpop.f32.mrb[1].mxu0  ;;  %v1296_v60 = vpop.f32.mrb[1].mxu1 }
 0x11c   : > { %v2551_v61 = vpop.f32.mrb[2].mxu0  ;;  %v2553_v62 = vpop.f32.mrb[2].mxu1  ;;  %v2610_v59 = vld [vmem:[%s2811_s2] ss:$0 sm:$0xff] }
 0x11d   : > { %v1107_v63 = vpop.f32.mrb[3].mxu0  ;;  %v1299_v0 = vpop.f32.mrb[3].mxu1 }
 0x11e   : > { %v1103_v63 = vadd.f32 %v2610_v59, %v2547_v57  ;;  %v1106_v57 = vadd.f32 %v2610_v59, %v2551_v61 }
 0x122   : > { %v1110_v1 = vpop.f32.mrb[4].mxu0  ;;  %v2555_v2 = vpop.f32.mrb[4].mxu1 }
 0x123   : > { %v1112_v3 = vpop.f32.mrb[5].mxu0  ;;  %v1304_v4 = vpop.f32.mrb[5].mxu1  ;;  %v1111_v60 = vadd.f32 %v2610_v59, %v1110_v1 }
 0x124   : > { %v1113_v5 = vpop.f32.mrb[6].mxu0  ;;  %v2557_v6 = vpop.f32.mrb[6].mxu1 }
 0x125   : > { %v1115_v7 = vpop.f32.mrb[7].mxu0  ;;  %v1307_v8 = vpop.f32.mrb[7].mxu1  ;;  %v1114_v4 = vadd.f32 %v2610_v59, %v1113_v5 }
 0x12a   : > { %v2559_v9 = vpop.f32.mrb[8].mxu0  ;;  %v2561_v10 = vpop.f32.mrb[8].mxu1 }
 0x12b   : > { %v1120_v11 = vpop.f32.mrb[9].mxu0  ;;  %v1312_v12 = vpop.f32.mrb[9].mxu1  ;;  %v1119_v61 = vadd.f32 %v2610_v59, %v2559_v9 }
 0x12c   : > { %v2563_v13 = vpop.f32.mrb[10].mxu0  ;;  %v2565_v14 = vpop.f32.mrb[10].mxu1 }
 0x12d   : > { %v1123_v15 = vpop.f32.mrb[11].mxu0  ;;  %v1315_v16 = vpop.f32.mrb[11].mxu1 }
 0x132   : > { %v2567_v17 = vpop.f32.mrb[12].mxu0  ;;  %v2569_v18 = vpop.f32.mrb[12].mxu1 }
 0x133   : > { %v1128_v19 = vpop.f32.mrb[13].mxu0  ;;  %v1320_v20 = vpop.f32.mrb[13].mxu1  ;;  %v1127_v5 = vadd.f32 %v2610_v59, %v2567_v17 }
 0x134   : > { %v2571_v21 = vpop.f32.mrb[14].mxu0  ;;  %v2573_v22 = vpop.f32.mrb[14].mxu1 }
 0x135   : > { %v1131_v23 = vpop.f32.mrb[15].mxu0  ;;  %v1323_v24 = vpop.f32.mrb[15].mxu1 }
 0x13a   : > { %v2575_v25 = vpop.f32.mrb[16].mxu0  ;;  %v2577_v26 = vpop.f32.mrb[16].mxu1 }
 0x13b   : > { %v1136_v27 = vpop.f32.mrb[17].mxu0  ;;  %v1328_v28 = vpop.f32.mrb[17].mxu1 }
 0x13c   : > { %v2579_v29 = vpop.f32.mrb[18].mxu0  ;;  %v2581_v30 = vpop.f32.mrb[18].mxu1  ;;  %v1130_v28 = vadd.f32 %v2610_v59, %v2571_v21 }
 0x13d   : > { %v1139_v31 = vpop.f32.mrb[19].mxu0  ;;  %v1331_v32 = vpop.f32.mrb[19].mxu1 }
 0x142   : > { %v2583_v33 = vpop.f32.mrb[20].mxu0  ;;  %v2585_v34 = vpop.f32.mrb[20].mxu1 }
 0x143   : > { %v1144_v35 = vpop.f32.mrb[21].mxu0  ;;  %v1336_v36 = vpop.f32.mrb[21].mxu1  ;;  %v1143_v21 = vadd.f32 %v2610_v59, %v2583_v33 }
 0x144   : > { %v2587_v37 = vpop.f32.mrb[22].mxu0  ;;  %v2589_v38 = vpop.f32.mrb[22].mxu1  ;;  %v1122_v36 = vadd.f32 %v2610_v59, %v2563_v13 }
 0x145   : > { %v1147_v39 = vpop.f32.mrb[23].mxu0  ;;  %v1339_v40 = vpop.f32.mrb[23].mxu1 }
 0x14a   : > { %v2591_v41 = vpop.f32.mrb[24].mxu0  ;;  %v2593_v42 = vpop.f32.mrb[24].mxu1 }
 0x14b   : > { %v1152_v43 = vpop.f32.mrb[25].mxu0  ;;  %v1344_v44 = vpop.f32.mrb[25].mxu1 }
 0x14c   : > { %v2595_v45 = vpop.f32.mrb[26].mxu0  ;;  %v2597_v46 = vpop.f32.mrb[26].mxu1 }
 0x14d   : > { %v1155_v47 = vpop.f32.mrb[27].mxu0  ;;  %v1347_v48 = vpop.f32.mrb[27].mxu1 }
 0x14e   : > { %v1135_v48 = vadd.f32 %v2610_v59, %v2575_v25 }
 0x152   : > { %v2599_v49 = vpop.f32.mrb[28].mxu0  ;;  %v2601_v50 = vpop.f32.mrb[28].mxu1 }
 0x153   : > { %v1160_v51 = vpop.f32.mrb[29].mxu0  ;;  %v1352_v52 = vpop.f32.mrb[29].mxu1 }
 0x154   : > { %v2603_v53 = vpop.f32.mrb[30].mxu0  ;;  %v2605_v54 = vpop.f32.mrb[30].mxu1  ;;  %v1146_v52 = vadd.f32 %v2610_v59, %v2587_v37  ;;  %v1159_v37 = vadd.f32 %v2610_v59, %v2599_v49 }
 0x155   : > { %v1163_v55 = vpop.f32.mrb[31].mxu0  ;;  %v1355_v56 = vpop.f32.mrb[31].mxu1 }
 0x15a   : > { %v2616_v0 = vpop.f32.mrb[32].mxu0  ;;  %v2004_v3 = vpop.f32.mrb[32].mxu1 }
 0x15b   : > { %v1400_v7 = vadd.f32 %v2004_v3, %v1111_v60  ;;  %v1168_v8 = vpop.f32.mrb[33].mxu0  ;;  %v1391_v1 = vpop.f32.mrb[33].mxu1 }
 0x15c   : > { %v1392_v11 = vadd.f32 %v1391_v1, %v1103_v63  ;;  %v2626_v12 = vpop.f32.mrb[34].mxu0  ;;  %v2005_v15 = vpop.f32.mrb[34].mxu1  ;;  %v1138_v63 = vadd.f32 %v2610_v59, %v2579_v29 }
 0x15d   : > { %1648 = vst [vmem:[%s2621_s28 + $0x10] sm:$0xff] %v1400_v7  ;;  %v1403_v16 = vadd.f32 %v2005_v15, %v1114_v4  ;;  %v1171_v19 = vpop.f32.mrb[35].mxu0  ;;  %v1394_v20 = vpop.f32.mrb[35].mxu1  ;;  %v1162_v15 = vadd.f32 %v2610_v59, %v2603_v53 }
 0x15e   : > { %1646 = vst [vmem:[%s2621_s28] sm:$0xff] %v1392_v11  ;;  %v1395_v23 = vadd.f32 %v1394_v20, %v1106_v57  ;;  %v1151_v57 = vadd.f32 %v2610_v59, %v2591_v41 }
 0x15f   : > { %1649 = vst [vmem:[%s2621_s28 + $0x18] sm:$0xff] %v1403_v16 }
 0x160   : > { %1647 = vst [vmem:[%s2621_s28 + $0x8] sm:$0xff] %v1395_v23  ;;  %v1154_v23 = vadd.f32 %v2610_v59, %v2595_v45 }
 0x162   : > { %v1174_v24 = vpop.f32.mrb[36].mxu0  ;;  %v2008_v27 = vpop.f32.mrb[36].mxu1 }
 0x163   : > { %v1416_v31 = vadd.f32 %v2008_v27, %v1127_v5  ;;  %v1176_v32 = vpop.f32.mrb[37].mxu0  ;;  %v1407_v35 = vpop.f32.mrb[37].mxu1  ;;  %v1175_v53 = vadd.f32 %v2610_v59, %v1174_v24 }
 0x164   : > { %v1408_v39 = vadd.f32 %v1407_v35, %v1119_v61  ;;  %v1177_v40 = vpop.f32.mrb[38].mxu0  ;;  %v2009_v17 = vpop.f32.mrb[38].mxu1  ;;  %v1167_v32 = vadd.f32 %v2610_v59, %v2616_v0 }
 0x165   : > { %1652 = vst [vmem:[%s2621_s28 + $0x30] sm:$0xff] %v1416_v31  ;;  %v1419_v43 = vadd.f32 %v2009_v17, %v1130_v28  ;;  %v1179_v44 = vpop.f32.mrb[39].mxu0  ;;  %v1410_v9 = vpop.f32.mrb[39].mxu1 }
 0x166   : > { %1650 = vst [vmem:[%s2621_s28 + $0x20] sm:$0xff] %v1408_v39  ;;  %v1411_v47 = vadd.f32 %v1410_v9, %v1122_v36  ;;  %v1178_v36 = vadd.f32 %v2610_v59, %v1177_v40  ;;  %v1170_v44 = vadd.f32 %v2610_v59, %v2626_v12 }
 0x167   : > { %1653 = vst [vmem:[%s2621_s28 + $0x38] sm:$0xff] %v1419_v43 }
 0x168   : > { %1651 = vst [vmem:[%s2621_s28 + $0x28] sm:$0xff] %v1411_v47 }
 0x16a   : > { %v1182_v13 = vpop.f32.mrb[40].mxu0  ;;  %v2012_v51 = vpop.f32.mrb[40].mxu1 }
 0x16b   : > { %v1432_v55 = vadd.f32 %v2012_v51, %v1143_v21  ;;  %v1184_v56 = vpop.f32.mrb[41].mxu0  ;;  %v1423_v60 = vpop.f32.mrb[41].mxu1 }
 0x16c   : > { %v1424_v3 = vadd.f32 %v1423_v60, %v1135_v48  ;;  %v1185_v4 = vpop.f32.mrb[42].mxu0  ;;  %v2013_v33 = vpop.f32.mrb[42].mxu1 }
 0x16d   : > { %1656 = vst [vmem:[%s2621_s28 + $0x50] sm:$0xff] %v1432_v55  ;;  %v1435_v7 = vadd.f32 %v2013_v33, %v1146_v52  ;;  %v1187_v8 = vpop.f32.mrb[43].mxu0  ;;  %v1426_v25 = vpop.f32.mrb[43].mxu1  ;;  %v1183_v52 = vadd.f32 %v2610_v59, %v1182_v13  ;;  %v1186_v33 = vadd.f32 %v2610_v59, %v1185_v4 }
 0x16e   : > { %1654 = vst [vmem:[%s2621_s28 + $0x40] sm:$0xff] %v1424_v3  ;;  %v1427_v1 = vadd.f32 %v1426_v25, %v1138_v63 }
 0x16f   : > { %1657 = vst [vmem:[%s2621_s28 + $0x58] sm:$0xff] %v1435_v7 }
 0x170   : > { %1655 = vst [vmem:[%s2621_s28 + $0x48] sm:$0xff] %v1427_v1 }
 0x172   : > { %v1190_v29 = vpop.f32.mrb[44].mxu0  ;;  %v2016_v11 = vpop.f32.mrb[44].mxu1 }
 0x173   : > { %v1448_v16 = vadd.f32 %v2016_v11, %v1159_v37  ;;  %v1192_v19 = vpop.f32.mrb[45].mxu0  ;;  %v1439_v20 = vpop.f32.mrb[45].mxu1  ;;  %v1191_v40 = vadd.f32 %v2610_v59, %v1190_v29 }
 0x174   : > { %v1440_v5 = vadd.f32 %v1439_v20, %v1151_v57  ;;  %v1193_v61 = vpop.f32.mrb[46].mxu0  ;;  %v2017_v49 = vpop.f32.mrb[46].mxu1 }
 0x175   : > { %1660 = vst [vmem:[%s2621_s28 + $0x70] sm:$0xff] %v1448_v16  ;;  %v1451_v27 = vadd.f32 %v2017_v49, %v1162_v15  ;;  %v1195_v28 = vpop.f32.mrb[47].mxu0  ;;  %v1442_v41 = vpop.f32.mrb[47].mxu1  ;;  %v1194_v56 = vadd.f32 %v2610_v59, %v1193_v61 }
 0x176   : > { %1658 = vst [vmem:[%s2621_s28 + $0x60] sm:$0xff] %v1440_v5  ;;  %v1443_v31 = vadd.f32 %v1442_v41, %v1154_v23 }
 0x177   : > { %1661 = vst [vmem:[%s2621_s28 + $0x78] sm:$0xff] %v1451_v27 }
 0x178   : > { %1659 = vst [vmem:[%s2621_s28 + $0x68] sm:$0xff] %v1443_v31 }
 0x17a   : > { %v1198_v35 = vpop.f32.mrb[48].mxu0  ;;  %v2020_v45 = vpop.f32.mrb[48].mxu1 }
 0x17b   : > { %v1464_v39 = vadd.f32 %v2020_v45, %v1175_v53  ;;  %v1200_v17 = vpop.f32.mrb[49].mxu0  ;;  %v1455_v43 = vpop.f32.mrb[49].mxu1  ;;  %v1199_v11 = vadd.f32 %v2610_v59, %v1198_v35 }
 0x17c   : > { %v1456_v9 = vadd.f32 %v1455_v43, %v1167_v32  ;;  %v1201_v47 = vpop.f32.mrb[50].mxu0  ;;  %v2021_v21 = vpop.f32.mrb[50].mxu1 }
 0x17d   : > { %1664 = vst [vmem:[%s2621_s28 + $0x90] sm:$0xff] %v1464_v39  ;;  %v1467_v24 = vadd.f32 %v2021_v21, %v1178_v36  ;;  %v1203_v48 = vpop.f32.mrb[51].mxu0  ;;  %v1458_v51 = vpop.f32.mrb[51].mxu1  ;;  %v1202_v5 = vadd.f32 %v2610_v59, %v1201_v47 }
 0x17e   : > { %1662 = vst [vmem:[%s2621_s28 + $0x80] sm:$0xff] %v1456_v9  ;;  %v1459_v0 = vadd.f32 %v1458_v51, %v1170_v44 }
 0x17f   : > { %1665 = vst [vmem:[%s2621_s28 + $0x98] sm:$0xff] %v1467_v24 }
 0x180   : > { %1663 = vst [vmem:[%s2621_s28 + $0x88] sm:$0xff] %v1459_v0 }
 0x182   : > { %v1206_v55 = vpop.f32.mrb[52].mxu0  ;;  %v2024_v12 = vpop.f32.mrb[52].mxu1 }
 0x183   : > { %v1480_v60 = vadd.f32 %v2024_v12, %v1191_v40  ;;  %v1208_v63 = vpop.f32.mrb[53].mxu0  ;;  %v1471_v3 = vpop.f32.mrb[53].mxu1  ;;  %v1207_v29 = vadd.f32 %v2610_v59, %v1206_v55 }
 0x184   : > { %v1472_v7 = vadd.f32 %v1471_v3, %v1183_v52  ;;  %v1209_v8 = vpop.f32.mrb[54].mxu0  ;;  %v2025_v25 = vpop.f32.mrb[54].mxu1 }
 0x185   : > { %1668 = vst [vmem:[%s2621_s28 + $0xb0] sm:$0xff] %v1480_v60  ;;  %v1483_v1 = vadd.f32 %v2025_v25, %v1194_v56  ;;  %v1211_v37 = vpop.f32.mrb[55].mxu0  ;;  %v1474_v57 = vpop.f32.mrb[55].mxu1  ;;  %v1210_v16 = vadd.f32 %v2610_v59, %v1209_v8 }
 0x186   : > { %1666 = vst [vmem:[%s2621_s28 + $0xa0] sm:$0xff] %v1472_v7  ;;  %v1475_v13 = vadd.f32 %v1474_v57, %v1186_v33 }
 0x187   : > { %1669 = vst [vmem:[%s2621_s28 + $0xb8] sm:$0xff] %v1483_v1 }
 0x188   : > { %1667 = vst [vmem:[%s2621_s28 + $0xa8] sm:$0xff] %v1475_v13 }
 0x18a   : > { %v1214_v15 = vpop.f32.mrb[56].mxu0  ;;  %v2028_v4 = vpop.f32.mrb[56].mxu1 }
 0x18b   : > { %v1496_v19 = vadd.f32 %v2028_v4, %v1207_v29  ;;  %v1216_v20 = vpop.f32.mrb[57].mxu0  ;;  %v1487_v23 = vpop.f32.mrb[57].mxu1  ;;  %v1215_v32 = vadd.f32 %v2610_v59, %v1214_v15 }
 0x18c   : > { %v1488_v61 = vadd.f32 %v1487_v23, %v1199_v11  ;;  %v1217_v49 = vpop.f32.mrb[58].mxu0  ;;  %v2029_v27 = vpop.f32.mrb[58].mxu1 }
 0x18d   : > { %1672 = vst [vmem:[%s2621_s28 + $0xd0] sm:$0xff] %v1496_v19  ;;  %v1499_v28 = vadd.f32 %v2029_v27, %v1210_v16  ;;  %v1219_v41 = vpop.f32.mrb[59].mxu0  ;;  %v1490_v31 = vpop.f32.mrb[59].mxu1  ;;  %v1218_v43 = vadd.f32 %v2610_v59, %v1217_v49 }
 0x18e   : > { %1670 = vst [vmem:[%s2621_s28 + $0xc0] sm:$0xff] %v1488_v61  ;;  %v1491_v53 = vadd.f32 %v1490_v31, %v1202_v5 }
 0x18f   : > { %1673 = vst [vmem:[%s2621_s28 + $0xd8] sm:$0xff] %v1499_v28 }
 0x190   : > { %1671 = vst [vmem:[%s2621_s28 + $0xc8] sm:$0xff] %v1491_v53 }
 0x192   : > { %v1222_v35 = vpop.f32.mrb[60].mxu0  ;;  %v2032_v45 = vpop.f32.mrb[60].mxu1 }
 0x193   : > { %v1223_v36 = vadd.f32 %v2610_v59, %v1222_v35  ;;  %v1224_v39 = vpop.f32.mrb[61].mxu0  ;;  %v1503_v17 = vpop.f32.mrb[61].mxu1 }
 0x194   : > { %v1504_v44 = vadd.f32 %v1503_v17, %v1215_v32  ;;  %v1225_v9 = vpop.f32.mrb[62].mxu0  ;;  %v2033_v47 = vpop.f32.mrb[62].mxu1 }
 0x195   : > { %v1512_v21 = vadd.f32 %v2032_v45, %v1223_v36  ;;  %v1226_v24 = vadd.f32 %v2610_v59, %v1225_v9  ;;  %v1227_v48 = vpop.f32.mrb[63].mxu0  ;;  %v1506_v51 = vpop.f32.mrb[63].mxu1 }
 0x196   : > { %1674 = vst [vmem:[%s2621_s28 + $0xe0] sm:$0xff] %v1504_v44  ;;  %v1507_v0 = vadd.f32 %v1506_v51, %v1218_v43 }
 0x197   : > { %1676 = vst [vmem:[%s2621_s28 + $0xf0] sm:$0xff] %v1512_v21  ;;  %v1515_v40 = vadd.f32 %v2033_v47, %v1226_v24 }
 0x198   : > { %1675 = vst [vmem:[%s2621_s28 + $0xe8] sm:$0xff] %v1507_v0 }
 0x199   : > { %1677 = vst [vmem:[%s2621_s28 + $0xf8] sm:$0xff] %v1515_v40 }
 0x19a   : > { %v1230_v52 = vpop.f32.mrb[64].mxu0  ;;  %v2036_v55 = vpop.f32.mrb[64].mxu1 }
 0x19b   : > { %v1231_v12 = vadd.f32 %v2610_v59, %v1230_v52  ;;  %v1232_v56 = vpop.f32.mrb[65].mxu0  ;;  %v1519_v60 = vpop.f32.mrb[65].mxu1 }
 0x19c   : > { %v1233_v63 = vpop.f32.mrb[66].mxu0  ;;  %v2037_v3 = vpop.f32.mrb[66].mxu1 }
 0x19d   : > { %v1520_v33 = vadd.f32 %v1519_v60, %v1231_v12  ;;  %v1234_v7 = vadd.f32 %v2610_v59, %v1233_v63  ;;  %v1235_v8 = vpop.f32.mrb[67].mxu0  ;;  %v1522_v25 = vpop.f32.mrb[67].mxu1  ;;  %v1295_v12 = vadd.f32 %v2610_v59, %v2549_v58  ;;  %v1306_v63 = vadd.f32 %v2610_v59, %v2557_v6 }
 0x19f   : > { %1678 = vst [vmem:[%s2621_s28 + $0x100] sm:$0xff] %v1520_v33  ;;  %v1523_v1 = vadd.f32 %v1522_v25, %v1234_v7 }
 0x1a1   : > { %1679 = vst [vmem:[%s2621_s28 + $0x108] sm:$0xff] %v1523_v1 }
 0x1a2   : > { %v1238_v37 = vpop.f32.mrb[68].mxu0  ;;  %v2040_v57 = vpop.f32.mrb[68].mxu1 }
 0x1a3   : > { %v1239_v13 = vadd.f32 %v2610_v59, %v1238_v37  ;;  %v1240_v29 = vpop.f32.mrb[69].mxu0  ;;  %v1535_v11 = vpop.f32.mrb[69].mxu1 }
 0x1a4   : > { %v1241_v15 = vpop.f32.mrb[70].mxu0  ;;  %v2041_v4 = vpop.f32.mrb[70].mxu1 }
 0x1a5   : > { %v1528_v16 = vadd.f32 %v2036_v55, %v1239_v13  ;;  %v1242_v19 = vadd.f32 %v2610_v59, %v1241_v15  ;;  %v1243_v20 = vpop.f32.mrb[71].mxu0  ;;  %v1538_v23 = vpop.f32.mrb[71].mxu1  ;;  %v1303_v55 = vadd.f32 %v2610_v59, %v2555_v2  ;;  %v1298_v2 = vadd.f32 %v2610_v59, %v2553_v62 }
 0x1a6   : > { %v1319_v62 = vadd.f32 %v2610_v59, %v2569_v18  ;;  %v1322_v20 = vadd.f32 %v2610_v59, %v2573_v22  ;;  %v1314_v18 = vadd.f32 %v2610_v59, %v2565_v14  ;;  %v1335_v14 = vadd.f32 %v2610_v59, %v2585_v34 }
 0x1a7   : > { %1680 = vst [vmem:[%s2621_s28 + $0x110] sm:$0xff] %v1528_v16  ;;  %v1531_v5 = vadd.f32 %v2037_v3, %v1242_v19  ;;  %v1330_v34 = vadd.f32 %v2610_v59, %v2581_v30  ;;  %v1351_v30 = vadd.f32 %v2610_v59, %v2601_v50  ;;  %v1346_v50 = vadd.f32 %v2610_v59, %v2597_v46 }
 0x1a9   : > { %1681 = vst [vmem:[%s2621_s28 + $0x118] sm:$0xff] %v1531_v5 }
 0x1aa   : > { %v1246_v61 = vpop.f32.mrb[72].mxu0  ;;  %v2710_v49 = vpop.f32.mrb[72].mxu1 }
 0x1ab   : > { %v1247_v27 = vadd.f32 %v2610_v59, %v1246_v61  ;;  %v1248_v28 = vpop.f32.mrb[73].mxu0  ;;  %v1551_v41 = vpop.f32.mrb[73].mxu1 }
 0x1ac   : > { %v1249_v31 = vpop.f32.mrb[74].mxu0  ;;  %v2713_v53 = vpop.f32.mrb[74].mxu1 }
 0x1ad   : > { %v1536_v32 = vadd.f32 %v1535_v11, %v1247_v27  ;;  %v1250_v35 = vadd.f32 %v2610_v59, %v1249_v31  ;;  %v1251_v45 = vpop.f32.mrb[75].mxu0  ;;  %v1554_v36 = vpop.f32.mrb[75].mxu1 }
 0x1af   : > { %1682 = vst [vmem:[%s2621_s28 + $0x120] sm:$0xff] %v1536_v32  ;;  %v1539_v39 = vadd.f32 %v1538_v23, %v1250_v35 }
 0x1b1   : > { %1683 = vst [vmem:[%s2621_s28 + $0x128] sm:$0xff] %v1539_v39 }
 0x1b2   : > { %v1254_v17 = vpop.f32.mrb[76].mxu0  ;;  %v2718_v43 = vpop.f32.mrb[76].mxu1 }
 0x1b3   : > { %v1255_v44 = vadd.f32 %v2610_v59, %v1254_v17  ;;  %v1256_v9 = vpop.f32.mrb[77].mxu0  ;;  %v2721_v47 = vpop.f32.mrb[77].mxu1 }
 0x1b4   : > { %v1257_v21 = vpop.f32.mrb[78].mxu0  ;;  %v2723_v24 = vpop.f32.mrb[78].mxu1  ;;  %v1338_v9 = vadd.f32 %v2610_v59, %v2589_v38 }
 0x1b5   : > { %v1544_v48 = vadd.f32 %v2040_v57, %v1255_v44  ;;  %v1258_v51 = vadd.f32 %v2610_v59, %v1257_v21  ;;  %v1259_v0 = vpop.f32.mrb[79].mxu0  ;;  %v2726_v40 = vpop.f32.mrb[79].mxu1 }
 0x1b7   : > { %1684 = vst [vmem:[%s2621_s28 + $0x130] sm:$0xff] %v1544_v48  ;;  %v1547_v52 = vadd.f32 %v2041_v4, %v1258_v51  ;;  %v1311_v4 = vadd.f32 %v2610_v59, %v2561_v10 }
 0x1b9   : > { %1685 = vst [vmem:[%s2621_s28 + $0x138] sm:$0xff] %v1547_v52 }
 0x1ba   : > { %v1262_v56 = vpop.f32.mrb[80].mxu0  ;;  %v2052_v60 = vpop.f32.mrb[80].mxu1 }
 0x1bb   : > { %v1263_v3 = vadd.f32 %v2610_v59, %v1262_v56  ;;  %v1592_v33 = vadd.f32 %v2052_v60, %v1303_v55  ;;  %v1264_v7 = vpop.f32.mrb[81].mxu0  ;;  %v1583_v8 = vpop.f32.mrb[81].mxu1 }
 0x1bc   : > { %v1584_v25 = vadd.f32 %v1583_v8, %v1295_v12  ;;  %v1265_v58 = vpop.f32.mrb[82].mxu0  ;;  %v2053_v1 = vpop.f32.mrb[82].mxu1  ;;  %v1354_v8 = vadd.f32 %v2610_v59, %v2605_v54 }
 0x1bd   : > { %v1552_v37 = vadd.f32 %v1551_v41, %v1263_v3  ;;  %1696 = vst [vmem:[%s2621_s28 + $0x190] sm:$0xff] %v1592_v33  ;;  %v1266_v57 = vadd.f32 %v2610_v59, %v1265_v58  ;;  %v1595_v6 = vadd.f32 %v2053_v1, %v1306_v63  ;;  %v1267_v13 = vpop.f32.mrb[83].mxu0  ;;  %v1586_v29 = vpop.f32.mrb[83].mxu1 }
 0x1be   : > { %1694 = vst [vmem:[%s2621_s28 + $0x180] sm:$0xff] %v1584_v25  ;;  %v1587_v11 = vadd.f32 %v1586_v29, %v1298_v2 }
 0x1bf   : > { %1686 = vst [vmem:[%s2621_s28 + $0x140] sm:$0xff] %v1552_v37  ;;  %v1555_v15 = vadd.f32 %v1554_v36, %v1266_v57  ;;  %1697 = vst [vmem:[%s2621_s28 + $0x198] sm:$0xff] %v1595_v6 }
 0x1c0   : > { %1695 = vst [vmem:[%s2621_s28 + $0x188] sm:$0xff] %v1587_v11 }
 0x1c1   : > { %1687 = vst [vmem:[%s2621_s28 + $0x148] sm:$0xff] %v1555_v15 }
 0x1c2   : > { %v1270_v16 = vpop.f32.mrb[84].mxu0  ;;  %v2056_v19 = vpop.f32.mrb[84].mxu1 }
 0x1c3   : > { %v1271_v23 = vadd.f32 %v2610_v59, %v1270_v16  ;;  %v1608_v5 = vadd.f32 %v2056_v19, %v1319_v62  ;;  %v1272_v61 = vpop.f32.mrb[85].mxu0  ;;  %v1599_v27 = vpop.f32.mrb[85].mxu1 }
 0x1c4   : > { %v1600_v28 = vadd.f32 %v1599_v27, %v1311_v4  ;;  %v1273_v10 = vpop.f32.mrb[86].mxu0  ;;  %v2057_v41 = vpop.f32.mrb[86].mxu1 }
 0x1c5   : > { %v1560_v31 = vadd.f32 %v2710_v49, %v1271_v23  ;;  %1700 = vst [vmem:[%s2621_s28 + $0x1b0] sm:$0xff] %v1608_v5  ;;  %v1274_v22 = vadd.f32 %v2610_v59, %v1273_v10  ;;  %v1611_v32 = vadd.f32 %v2057_v41, %v1322_v20  ;;  %v1275_v35 = vpop.f32.mrb[87].mxu0  ;;  %v1602_v45 = vpop.f32.mrb[87].mxu1  ;;  %v1327_v49 = vadd.f32 %v2610_v59, %v2577_v26 }
 0x1c6   : > { %1698 = vst [vmem:[%s2621_s28 + $0x1a0] sm:$0xff] %v1600_v28  ;;  %v1603_v36 = vadd.f32 %v1602_v45, %v1314_v18 }
 0x1c7   : > { %1688 = vst [vmem:[%s2621_s28 + $0x150] sm:$0xff] %v1560_v31  ;;  %v1563_v39 = vadd.f32 %v2713_v53, %v1274_v22  ;;  %1701 = vst [vmem:[%s2621_s28 + $0x1b8] sm:$0xff] %v1611_v32 }
 0x1c8   : > { %1699 = vst [vmem:[%s2621_s28 + $0x1a8] sm:$0xff] %v1603_v36 }
 0x1c9   : > { %1689 = vst [vmem:[%s2621_s28 + $0x158] sm:$0xff] %v1563_v39 }
 0x1ca   : > { %v1278_v17 = vpop.f32.mrb[88].mxu0  ;;  %v2060_v44 = vpop.f32.mrb[88].mxu1 }
 0x1cb   : > { %v1279_v21 = vadd.f32 %v2610_v59, %v1278_v17  ;;  %v1624_v53 = vadd.f32 %v2060_v44, %v1335_v14  ;;  %v1280_v48 = vpop.f32.mrb[89].mxu0  ;;  %v1615_v51 = vpop.f32.mrb[89].mxu1 }
 0x1cc   : > { %v1616_v0 = vadd.f32 %v1615_v51, %v1327_v49  ;;  %v1281_v26 = vpop.f32.mrb[90].mxu0  ;;  %v2061_v52 = vpop.f32.mrb[90].mxu1 }
 0x1cd   : > { %v1568_v55 = vadd.f32 %v2721_v47, %v1279_v21  ;;  %1704 = vst [vmem:[%s2621_s28 + $0x1d0] sm:$0xff] %v1624_v53  ;;  %v1282_v38 = vadd.f32 %v2610_v59, %v1281_v26  ;;  %v1627_v12 = vadd.f32 %v2061_v52, %v1338_v9  ;;  %v1283_v56 = vpop.f32.mrb[91].mxu0  ;;  %v1618_v60 = vpop.f32.mrb[91].mxu1  ;;  %v1343_v47 = vadd.f32 %v2610_v59, %v2593_v42 }
 0x1ce   : > { %1702 = vst [vmem:[%s2621_s28 + $0x1c0] sm:$0xff] %v1616_v0  ;;  %v1619_v63 = vadd.f32 %v1618_v60, %v1330_v34 }
 0x1cf   : > { %1690 = vst [vmem:[%s2621_s28 + $0x160] sm:$0xff] %v1568_v55  ;;  %v1571_v3 = vadd.f32 %v2726_v40, %v1282_v38  ;;  %1705 = vst [vmem:[%s2621_s28 + $0x1d8] sm:$0xff] %v1627_v12 }
 0x1d0   : > { %1703 = vst [vmem:[%s2621_s28 + $0x1c8] sm:$0xff] %v1619_v63 }
 0x1d1   : > { %1691 = vst [vmem:[%s2621_s28 + $0x168] sm:$0xff] %v1571_v3 }
 0x1d2   : > { %v1286_v33 = vpop.f32.mrb[92].mxu0  ;;  %v2064_v7 = vpop.f32.mrb[92].mxu1 }
 0x1d3   : > { %v1287_v2 = vadd.f32 %v2610_v59, %v1286_v33  ;;  %v1640_v40 = vadd.f32 %v2064_v7, %v1351_v30  ;;  %v1288_v25 = vpop.f32.mrb[93].mxu0  ;;  %v1631_v58 = vpop.f32.mrb[93].mxu1 }
 0x1d4   : > { %v1632_v1 = vadd.f32 %v1631_v58, %v1343_v47  ;;  %v1289_v42 = vpop.f32.mrb[94].mxu0  ;;  %v2065_v37 = vpop.f32.mrb[94].mxu1 }
 0x1d5   : > { %v1576_v57 = vadd.f32 %v2718_v43, %v1287_v2  ;;  %1708 = vst [vmem:[%s2621_s28 + $0x1f0] sm:$0xff] %v1640_v40  ;;  %v1290_v54 = vadd.f32 %v2610_v59, %v1289_v42  ;;  %v1643_v6 = vadd.f32 %v2065_v37, %v1354_v8  ;;  %v1291_v13 = vpop.f32.mrb[95].mxu0  ;;  %v1634_v29 = vpop.f32.mrb[95].mxu1 }
 0x1d6   : > { %1706 = vst [vmem:[%s2621_s28 + $0x1e0] sm:$0xff] %v1632_v1  ;;  %v1635_v11 = vadd.f32 %v1634_v29, %v1346_v50 }
 0x1d7   : > { %1692 = vst [vmem:[%s2621_s28 + $0x170] sm:$0xff] %v1576_v57  ;;  %v1579_v15 = vadd.f32 %v2723_v24, %v1290_v54  ;;  %1709 = vst [vmem:[%s2621_s28 + $0x1f8] sm:$0xff] %v1643_v6 }
 0x1d8   : > { %1707 = vst [vmem:[%s2621_s28 + $0x1e8] sm:$0xff] %v1635_v11 }
 0x1d9   : > { %1693 = vst [vmem:[%s2621_s28 + $0x178] sm:$0xff] %v1579_v15 }
 0x1da PF: > { %s13_s14 = sadd.s32 1, %s2298_s14   ;;  %s2813_s12 = smov %s2294_s13 }
 0x1db   : > { %p10_p5 = scmp.ge.s32.totalorder %s13_s14, 9   ;;  %s2814_s13 = smov %s2816_s15 }
 0x1dd   :  { %12 = sbr.rel (!%p10_p5) target bundleno = 2 (0x2), region = 68 }

</bundles_post_ra>
